<compile_context>
chip_gen: v7x
topology: tpu7x:2x2x1
jax: 0.10.0
libtpu: 0.0.40
codegen_flags: <defaults>
</compile_context>

<pallas_src>
import functools

import jax
import jax.numpy as jnp
from jax.experimental import pallas as pl
from jax.experimental.pallas import tpu as pltpu


C_BUF = 16        # channel width of the VMEM activation slab (== filters[i])
K31 = 31          # big conv kernel size
K31_PAD = 32      # taps zero-padded to 32 -> uniform 8/16-tap chunks
K3 = 3            # ResBlock second conv kernel size
K3_PAD = 8        # padded to 8 taps -> one 128-deep contraction
OFF = 128         # lane offset of the slab interior (aligned stores)
R_HALO = 128      # right halo (>= K31_PAD-1-15); keeps slab lane dim 128-mult


# ---------------------------------------------------------------------------
# Single fused kernel: the whole network for one batch element.
#   x_ref  : (1, 16, L)          input, channels zero-padded to 16
#   w31_ref: (9, 16, 512)  bf16  lane-dense im2col weights, K=31 layers
#   b31_ref: (9, 16, 1)    f32
#   w3_ref : (4, 16, 128)  bf16  K=3 ResBlock convs (taps padded to 8)
#   b3_ref : (4, 16, 1)    f32
#   wf_ref : (16, C_out)   f32   final 1x1 weights (transposed)
#   bf_ref : (C_out, 1)    f32
#   out_ref: (1, C_out, L)
#   pad_ref: (16, OFF + L + R_HALO)  VMEM scratch (zero halo + interior)
# ---------------------------------------------------------------------------
def _impedance_fused_kernel(x_ref, w31_ref, b31_ref, w3_ref, b3_ref,
                            wf_ref, bf_ref, out_ref, pad_ref,
                            *, L, off, chunk_taps):
    n_chunks = K31_PAD // chunk_taps

    def set_act(h):
        # Aligned, unmasked store of the (16, L) activation into the slab
        # interior at lane offset `off` (a multiple of 128).
        pad_ref[:, off:off + L] = h

    def im2col_chunk(base, k0, n_taps):
        # (n_taps*16, L) bf16 window stack read from the padded slab.
        # Cast per-slice so the f32 live set stays tiny.
        return jnp.concatenate(
            [pad_ref[:, base + k0 + k: base + k0 + k + L].astype(jnp.bfloat16)
             for k in range(n_taps)], axis=0)

    def conv31_relu(i):
        # K=31 conv (taps padded to 32) as n_chunks partial MXU matmuls of
        # contraction depth chunk_taps*16, accumulated in f32.
        base = off - (K31 - 1) // 2
        w_l = w31_ref[i]                                    # (16, 512) bf16
        y = None
        for c in range(n_chunks):
            k0 = c * chunk_taps
            cols = im2col_chunk(base, k0, chunk_taps)       # (ct*16, L) bf16
            w_c = w_l[:, k0 * C_BUF:(k0 + chunk_taps) * C_BUF]
            part = jnp.dot(w_c, cols, preferred_element_type=jnp.float32)
            y = part if y is None else y + part
        return jnp.maximum(y + b31_ref[i], 0.0)

    def conv3_relu(i):
        # K=3 conv (taps padded to 8): a single 128-deep matmul.
        base = off - (K3 - 1) // 2
        cols = im2col_chunk(base, 0, K3_PAD)                # (128, L) bf16
        y = jnp.dot(w3_ref[i], cols, preferred_element_type=jnp.float32)
        return jnp.maximum(y + b3_ref[i], 0.0)

    # Zero the whole slab once per batch element (halo columns must be zero
    # for every layer; do NOT guard this with program_id under ("parallel",)
    # semantics), then place the network input in the interior.
    pad_ref[...] = jnp.zeros_like(pad_ref)
    set_act(x_ref[0])

    h = conv31_relu(0)                                      # layer1
    for g in range(4):                                      # group1 .. group4
        set_act(h)
        h = conv31_relu(1 + 2 * g)                          # modelConv1
        res = h                                             # ResBlock skip
        set_act(h)
        h2 = conv31_relu(2 + 2 * g)                         # ResBlock conv1
        set_act(h2)
        h = conv3_relu(g) + res                             # ResBlock conv2 + skip

    # final: 1x1 conv + ReLU on the VPU/XLU (C_out=2 -> an MXU matmul would
    # be ~1% utilized and sit on the serialized tail of the kernel).
    wf_t = wf_ref[...]                                      # (16, C_out) f32
    c_out = wf_t.shape[1]
    rows = [jnp.sum(h * wf_t[:, o:o + 1], axis=0, keepdims=True)
            for o in range(c_out)]                          # each (1, L)
    out_ref[0] = jnp.maximum(jnp.concatenate(rows, axis=0) + bf_ref[...], 0.0)


# ---------------------------------------------------------------------------
# Parameters: PyTorch-default-style uniform init, raw Conv1d layout.
# ---------------------------------------------------------------------------
def _init_conv(key, c_out, c_in, k):
    kw, kb = jax.random.split(key)
    bound = 1.0 / jnp.sqrt(float(c_in * k))
    w = jax.random.uniform(kw, (c_out, c_in, k), jnp.float32, -bound, bound)
    b = jax.random.uniform(kb, (c_out,), jnp.float32, -bound, bound)
    return {"w": w, "b": b}


def init_impedance_model(key, in_channels, out_channels):
    filters = [16, 16, 16, 16, 16]
    keys = jax.random.split(key, 14)
    layers = [_init_conv(keys[0], filters[0], in_channels, 31)]       # layer1
    ki = 1
    for g in range(4):
        layers.append(_init_conv(keys[ki], filters[g + 1], filters[g], 31))
        ki += 1                                                       # conv_a
        layers.append(_init_conv(keys[ki], filters[g + 1], filters[g + 1], 31))
        ki += 1                                                       # res conv1
        layers.append(_init_conv(keys[ki], filters[g + 1], filters[g + 1], 3))
        ki += 1                                                       # res conv2
    layers.append(_init_conv(keys[ki], out_channels, filters[4], 1))  # final
    return layers   # ordered list of 14 layers (forward order)


def pack_params(layers):
    """Consolidate + re-lay weights.

    K=31 layers -> stacked (9, 16, 512) bf16 im2col weights (32 taps x 16 ch,
    zero-padded); K=3 layers -> (4, 16, 128) bf16 (8 taps); final 1x1 kept f32
    transposed as (16, C_out).  Biases stay f32.
    Im2col column ordering: W2[co, k*16 + ci] = w[co, ci, k].
    """
    w31, b31, w3, b3 = [], [], [], []
    for p in layers[:-1]:
        w, b = p["w"], p["b"]
        c_out, c_in, k = w.shape
        if c_in < C_BUF:
            w = jnp.pad(w, ((0, 0), (0, C_BUF - c_in), (0, 0)))
        k_pad = K31_PAD if k == K31 else K3_PAD
        w = jnp.pad(w, ((0, 0), (0, 0), (0, k_pad - k)))     # zero extra taps
        w2 = jnp.transpose(w, (0, 2, 1)).reshape(c_out, k_pad * C_BUF)
        if k == K31:
            w31.append(w2), b31.append(b.reshape(c_out, 1))
        else:
            w3.append(w2), b3.append(b.reshape(c_out, 1))
    wf = layers[-1]["w"][:, :, 0]                            # (C_out, 16)
    bf = layers[-1]["b"].reshape(-1, 1)                      # (C_out, 1)
    return {
        "w31": jnp.stack(w31).astype(jnp.bfloat16),          # (9, 16, 512)
        "b31": jnp.stack(b31),                               # (9, 16, 1)
        "w3": jnp.stack(w3).astype(jnp.bfloat16),            # (4, 16, 128)
        "b3": jnp.stack(b3),                                 # (4, 16, 1)
        "wf_t": jnp.transpose(wf),                           # (16, C_out) f32
        "bf": bf,                                            # (C_out, 1) f32
    }


# ---------------------------------------------------------------------------
# Forward: one pallas_call for the whole network, grid over batch.
# ---------------------------------------------------------------------------
def impedance_forward(packed, x, *, chunk_taps=8):
    N, c_in, L = x.shape
    assert K31_PAD % chunk_taps == 0
    if c_in < C_BUF:   # one tiny, one-time channel pad of the network input
        x = jnp.pad(x, ((0, 0), (0, C_BUF - c_in), (0, 0)))
    c_out_final = packed["bf"].shape[0]

    kernel = functools.partial(_impedance_fused_kernel,
                               L=L, off=OFF, chunk_taps=chunk_taps)
    c3 = lambda n: (0, 0, 0)   # constant index map: weights stay VMEM-resident
    c2 = lambda n: (0, 0)
    return pl.pallas_call(
        kernel,
        out_shape=jax.ShapeDtypeStruct((N, c_out_final, L), jnp.float32),
        grid=(N,),
        in_specs=[
            pl.BlockSpec((1, C_BUF, L), lambda n: (n, 0, 0)),
            pl.BlockSpec(packed["w31"].shape, c3),
            pl.BlockSpec(packed["b31"].shape, c3),
            pl.BlockSpec(packed["w3"].shape, c3),
            pl.BlockSpec(packed["b3"].shape, c3),
            pl.BlockSpec(packed["wf_t"].shape, c2),
            pl.BlockSpec(packed["bf"].shape, c2),
        ],
        out_specs=pl.BlockSpec((1, c_out_final, L), lambda n: (n, 0, 0)),
        scratch_shapes=[pltpu.VMEM((C_BUF, OFF + L + R_HALO), jnp.float32)],
        # TODO(synk): if L grows beyond ~1-2k samples, tile L across the grid
        # with halo'd windows and set vmem_limit_bytes explicitly (v7x 64 MiB);
        # for v6e with N>=4, pack 2 batch elements per step for 256-lane RHS.
        compiler_params=pltpu.CompilerParams(
            dimension_semantics=("parallel",)),
    )(x, packed["w31"], packed["b31"], packed["w3"], packed["b3"],
      packed["wf_t"], packed["bf"])


def _default_chunk_taps():
    """128-deep contraction chunks on v5e and older, 256-deep on v6e/v7x."""
    try:
        kind = jax.devices()[0].device_kind.lower()
    except Exception:
        return 8
    for old in ("v2", "v3", "v4", "v5"):
        if old in kind:
            return 8
    return 16


# ---------------------------------------------------------------------------
# Pure-JAX reference (lax.conv) for correctness verification.
# matmul_dtype=bfloat16 mirrors the kernel's numerics (bf16 operands,
# f32 accumulation / bias / ReLU / residual).
# ---------------------------------------------------------------------------
def impedance_reference(layers, x, matmul_dtype=jnp.float32):
    def conv_relu(h, p, pad):
        y = jax.lax.conv_general_dilated(
            h.astype(matmul_dtype), p["w"].astype(matmul_dtype),
            window_strides=(1,), padding=[(pad, pad)],
            dimension_numbers=("NCH", "OIH", "NCH"),
            preferred_element_type=jnp.float32,
            precision=jax.lax.Precision.HIGHEST)
        return jnp.maximum(y + p["b"][None, :, None], 0.0)

    h = conv_relu(x, layers[0], 15)                        # layer1
    li = 1
    for _ in range(4):
        h = conv_relu(h, layers[li], 15); li += 1          # modelConv1
        res = h
        h2 = conv_relu(h, layers[li], 15); li += 1         # ResBlock conv1
        h = conv_relu(h2, layers[li], 1) + res; li += 1    # ResBlock conv2 + skip
    return conv_relu(h, layers[li], 0)                     # final 1x1


# ---------------------------------------------------------------------------
if __name__ == "__main__":
    key = jax.random.PRNGKey(0)
    k_params, k_x = jax.random.split(key)

    in_channels, out_channels = 4, 2
    N, L = 2, 128

    layers = init_impedance_model(k_params, in_channels, out_channels)
    packed = pack_params(layers)
    x = jax.random.normal(k_x, (N, in_channels, L), jnp.float32)

    chunk_taps = _default_chunk_taps()
    fwd = jax.jit(impedance_forward, static_argnames=("chunk_taps",))
    out = jax.block_until_ready(fwd(packed, x, chunk_taps=chunk_taps))

    assert out.shape == (N, out_channels, L), out.shape
    assert bool(jnp.all(out >= 0.0))                       # final ReLU

    # Tight check vs a reference that mirrors the kernel numerics exactly
    # (bf16 matmul operands, f32 accumulation / elementwise math).
    ref_bf16 = jax.block_until_ready(
        impedance_reference(layers, x, matmul_dtype=jnp.bfloat16))
    err_bf16 = float(jnp.max(jnp.abs(out - ref_bf16)))
    assert bool(jnp.allclose(out, ref_bf16, rtol=1e-3, atol=1e-3)), err_bf16

    # Loose check vs the full-f32 PyTorch-equivalent forward.
    ref_f32 = jax.block_until_ready(impedance_reference(layers, x))
    err_f32 = float(jnp.max(jnp.abs(out - ref_f32)))
    assert bool(jnp.allclose(out, ref_f32, rtol=3e-2, atol=3e-2)), err_f32

    print("KERNEL_OK")
</pallas_src>

<mosaic_0001>
module attributes {stable_mosaic.version = 11 : i64} {
  func.func @_impedance_fused_kernel(%arg0: i32, %arg1: memref<1x16x128xf32, #tpu.memory_space<vmem>>, %arg2: memref<9x16x512xbf16, #tpu.memory_space<vmem>>, %arg3: memref<9x16x1xf32, #tpu.memory_space<vmem>>, %arg4: memref<4x16x128xbf16, #tpu.memory_space<vmem>>, %arg5: memref<4x16x1xf32, #tpu.memory_space<vmem>>, %arg6: memref<16x2xf32, #tpu.memory_space<vmem>>, %arg7: memref<2x1xf32, #tpu.memory_space<vmem>>, %arg8: memref<1x2x128xf32, #tpu.memory_space<vmem>>, %arg9: memref<16x384xf32, #tpu.memory_space<vmem>>) attributes {dimension_semantics = [#tpu.dimension_semantics<parallel>], iteration_bounds = array<i64: 2>, scalar_prefetch = 0 : i64, scratch_operands = 1 : i64, tpu.core_type = #tpu.core_type<tc>, window_params = [{transform_indices = @transform_0, window_bounds = array<i64: 1, 16, 128>}, {pipeline_mode = #tpu.pipeline_mode<synchronous>, transform_indices = @transform_1, window_bounds = array<i64: 9, 16, 512>}, {pipeline_mode = #tpu.pipeline_mode<synchronous>, transform_indices = @transform_2, window_bounds = array<i64: 9, 16, 1>}, {pipeline_mode = #tpu.pipeline_mode<synchronous>, transform_indices = @transform_3, window_bounds = array<i64: 4, 16, 128>}, {pipeline_mode = #tpu.pipeline_mode<synchronous>, transform_indices = @transform_4, window_bounds = array<i64: 4, 16, 1>}, {pipeline_mode = #tpu.pipeline_mode<synchronous>, transform_indices = @transform_5, window_bounds = array<i64: 16, 2>}, {pipeline_mode = #tpu.pipeline_mode<synchronous>, transform_indices = @transform_6, window_bounds = array<i64: 2, 1>}, {transform_indices = @transform_7, window_bounds = array<i64: 1, 2, 128>}]} {
    %cst = arith.constant 0.000000e+00 : f32
    %0 = vector.broadcast %cst : f32 to vector<16x384xf32>
    %c0 = arith.constant 0 : index
    %c0_0 = arith.constant 0 : index
    %1 = vector.load %arg9[%c0, %c0_0] : memref<16x384xf32, #tpu.memory_space<vmem>>, vector<16x384xf32>
    tpu.vector_store %arg9[%c0, %c0_0], %0 {strides = array<i32>} : memref<16x384xf32, #tpu.memory_space<vmem>>, vector<16x384xf32>,
    %c0_1 = arith.constant 0 : index
    %c0_2 = arith.constant 0 : index
    %c0_3 = arith.constant 0 : index
    %2 = vector.load %arg1[%c0_1, %c0_2, %c0_3] : memref<1x16x128xf32, #tpu.memory_space<vmem>>, vector<1x16x128xf32>
    %3 = vector.shape_cast %2 : vector<1x16x128xf32> to vector<16x128xf32>
    %c0_4 = arith.constant 0 : index
    %c128 = arith.constant 128 : index
    %4 = vector.load %arg9[%c0_4, %c128] : memref<16x384xf32, #tpu.memory_space<vmem>>, vector<16x128xf32>
    tpu.vector_store %arg9[%c0_4, %c128], %3 {strides = array<i32>} : memref<16x384xf32, #tpu.memory_space<vmem>>, vector<16x128xf32>,
    %c0_5 = arith.constant 0 : index
    %c0_6 = arith.constant 0 : index
    %c0_7 = arith.constant 0 : index
    %5 = vector.load %arg2[%c0_5, %c0_6, %c0_7] : memref<9x16x512xbf16, #tpu.memory_space<vmem>>, vector<1x16x512xbf16>
    %6 = vector.shape_cast %5 : vector<1x16x512xbf16> to vector<16x512xbf16>
    %c0_8 = arith.constant 0 : index
    %c113 = arith.constant 113 : index
    %7 = vector.load %arg9[%c0_8, %c113] : memref<16x384xf32, #tpu.memory_space<vmem>>, vector<16x128xf32>
    %8 = arith.truncf %7 : vector<16x128xf32> to vector<16x128xbf16>
    %c0_9 = arith.constant 0 : index
    %c114 = arith.constant 114 : index
    %9 = vector.load %arg9[%c0_9, %c114] : memref<16x384xf32, #tpu.memory_space<vmem>>, vector<16x128xf32>
    %10 = arith.truncf %9 : vector<16x128xf32> to vector<16x128xbf16>
    %c0_10 = arith.constant 0 : index
    %c115 = arith.constant 115 : index
    %11 = vector.load %arg9[%c0_10, %c115] : memref<16x384xf32, #tpu.memory_space<vmem>>, vector<16x128xf32>
    %12 = arith.truncf %11 : vector<16x128xf32> to vector<16x128xbf16>
    %c0_11 = arith.constant 0 : index
    %c116 = arith.constant 116 : index
    %13 = vector.load %arg9[%c0_11, %c116] : memref<16x384xf32, #tpu.memory_space<vmem>>, vector<16x128xf32>
    %14 = arith.truncf %13 : vector<16x128xf32> to vector<16x128xbf16>
    %c0_12 = arith.constant 0 : index
    %c117 = arith.constant 117 : index
    %15 = vector.load %arg9[%c0_12, %c117] : memref<16x384xf32, #tpu.memory_space<vmem>>, vector<16x128xf32>
    %16 = arith.truncf %15 : vector<16x128xf32> to vector<16x128xbf16>
    %c0_13 = arith.constant 0 : index
    %c118 = arith.constant 118 : index
    %17 = vector.load %arg9[%c0_13, %c118] : memref<16x384xf32, #tpu.memory_space<vmem>>, vector<16x128xf32>
    %18 = arith.truncf %17 : vector<16x128xf32> to vector<16x128xbf16>
    %c0_14 = arith.constant 0 : index
    %c119 = arith.constant 119 : index
    %19 = vector.load %arg9[%c0_14, %c119] : memref<16x384xf32, #tpu.memory_space<vmem>>, vector<16x128xf32>
    %20 = arith.truncf %19 : vector<16x128xf32> to vector<16x128xbf16>
    %c0_15 = arith.constant 0 : index
    %c120 = arith.constant 120 : index
    %21 = vector.load %arg9[%c0_15, %c120] : memref<16x384xf32, #tpu.memory_space<vmem>>, vector<16x128xf32>
    %22 = arith.truncf %21 : vector<16x128xf32> to vector<16x128xbf16>
    %c0_16 = arith.constant 0 : index
    %c121 = arith.constant 121 : index
    %23 = vector.load %arg9[%c0_16, %c121] : memref<16x384xf32, #tpu.memory_space<vmem>>, vector<16x128xf32>
    %24 = arith.truncf %23 : vector<16x128xf32> to vector<16x128xbf16>
    %c0_17 = arith.constant 0 : index
    %c122 = arith.constant 122 : index
    %25 = vector.load %arg9[%c0_17, %c122] : memref<16x384xf32, #tpu.memory_space<vmem>>, vector<16x128xf32>
    %26 = arith.truncf %25 : vector<16x128xf32> to vector<16x128xbf16>
    %c0_18 = arith.constant 0 : index
    %c123 = arith.constant 123 : index
    %27 = vector.load %arg9[%c0_18, %c123] : memref<16x384xf32, #tpu.memory_space<vmem>>, vector<16x128xf32>
    %28 = arith.truncf %27 : vector<16x128xf32> to vector<16x128xbf16>
    %c0_19 = arith.constant 0 : index
    %c124 = arith.constant 124 : index
    %29 = vector.load %arg9[%c0_19, %c124] : memref<16x384xf32, #tpu.memory_space<vmem>>, vector<16x128xf32>
    %30 = arith.truncf %29 : vector<16x128xf32> to vector<16x128xbf16>
    %c0_20 = arith.constant 0 : index
    %c125 = arith.constant 125 : index
    %31 = vector.load %arg9[%c0_20, %c125] : memref<16x384xf32, #tpu.memory_space<vmem>>, vector<16x128xf32>
    %32 = arith.truncf %31 : vector<16x128xf32> to vector<16x128xbf16>
    %c0_21 = arith.constant 0 : index
    %c126 = arith.constant 126 : index
    %33 = vector.load %arg9[%c0_21, %c126] : memref<16x384xf32, #tpu.memory_space<vmem>>, vector<16x128xf32>
    %34 = arith.truncf %33 : vector<16x128xf32> to vector<16x128xbf16>
    %c0_22 = arith.constant 0 : index
    %c127 = arith.constant 127 : index
    %35 = vector.load %arg9[%c0_22, %c127] : memref<16x384xf32, #tpu.memory_space<vmem>>, vector<16x128xf32>
    %36 = arith.truncf %35 : vector<16x128xf32> to vector<16x128xbf16>
    %c0_23 = arith.constant 0 : index
    %c128_24 = arith.constant 128 : index
    %37 = vector.load %arg9[%c0_23, %c128_24] : memref<16x384xf32, #tpu.memory_space<vmem>>, vector<16x128xf32>
    %38 = arith.truncf %37 : vector<16x128xf32> to vector<16x128xbf16>
    %39 = tpu.concatenate %8, %10, %12, %14, %16, %18, %20, %22, %24, %26, %28, %30, %32, %34, %36, %38 in 0 : vector<16x128xbf16>, vector<16x128xbf16>, vector<16x128xbf16>, vector<16x128xbf16>, vector<16x128xbf16>, vector<16x128xbf16>, vector<16x128xbf16>, vector<16x128xbf16>, vector<16x128xbf16>, vector<16x128xbf16>, vector<16x128xbf16>, vector<16x128xbf16>, vector<16x128xbf16>, vector<16x128xbf16>, vector<16x128xbf16>, vector<16x128xbf16> -> vector<256x128xbf16>
    %40 = vector.extract_strided_slice %6 {offsets = [0, 0], sizes = [16, 256], strides = [1, 1]} : vector<16x512xbf16> to vector<16x256xbf16>
    %cst_25 = arith.constant dense<0.000000e+00> : vector<16x128xf32>
    %41 = tpu.matmul %40, %39, %cst_25 {dimension_numbers = #tpu.dot_dimension_numbers<[1], [0], [0], [1], [0, 0, 1, 1], [], []>} : vector<16x256xbf16>, vector<256x128xbf16>, vector<16x128xf32> -> vector<16x128xf32>
    %c0_26 = arith.constant 0 : index
    %c129 = arith.constant 129 : index
    %42 = vector.load %arg9[%c0_26, %c129] : memref<16x384xf32, #tpu.memory_space<vmem>>, vector<16x128xf32>
    %43 = arith.truncf %42 : vector<16x128xf32> to vector<16x128xbf16>
    %c0_27 = arith.constant 0 : index
    %c130 = arith.constant 130 : index
    %44 = vector.load %arg9[%c0_27, %c130] : memref<16x384xf32, #tpu.memory_space<vmem>>, vector<16x128xf32>
    %45 = arith.truncf %44 : vector<16x128xf32> to vector<16x128xbf16>
    %c0_28 = arith.constant 0 : index
    %c131 = arith.constant 131 : index
    %46 = vector.load %arg9[%c0_28, %c131] : memref<16x384xf32, #tpu.memory_space<vmem>>, vector<16x128xf32>
    %47 = arith.truncf %46 : vector<16x128xf32> to vector<16x128xbf16>
    %c0_29 = arith.constant 0 : index
    %c132 = arith.constant 132 : index
    %48 = vector.load %arg9[%c0_29, %c132] : memref<16x384xf32, #tpu.memory_space<vmem>>, vector<16x128xf32>
    %49 = arith.truncf %48 : vector<16x128xf32> to vector<16x128xbf16>
    %c0_30 = arith.constant 0 : index
    %c133 = arith.constant 133 : index
    %50 = vector.load %arg9[%c0_30, %c133] : memref<16x384xf32, #tpu.memory_space<vmem>>, vector<16x128xf32>
    %51 = arith.truncf %50 : vector<16x128xf32> to vector<16x128xbf16>
    %c0_31 = arith.constant 0 : index
    %c134 = arith.constant 134 : index
    %52 = vector.load %arg9[%c0_31, %c134] : memref<16x384xf32, #tpu.memory_space<vmem>>, vector<16x128xf32>
    %53 = arith.truncf %52 : vector<16x128xf32> to vector<16x128xbf16>
    %c0_32 = arith.constant 0 : index
    %c135 = arith.constant 135 : index
    %54 = vector.load %arg9[%c0_32, %c135] : memref<16x384xf32, #tpu.memory_space<vmem>>, vector<16x128xf32>
    %55 = arith.truncf %54 : vector<16x128xf32> to vector<16x128xbf16>
    %c0_33 = arith.constant 0 : index
    %c136 = arith.constant 136 : index
    %56 = vector.load %arg9[%c0_33, %c136] : memref<16x384xf32, #tpu.memory_space<vmem>>, vector<16x128xf32>
    %57 = arith.truncf %56 : vector<16x128xf32> to vector<16x128xbf16>
    %c0_34 = arith.constant 0 : index
    %c137 = arith.constant 137 : index
    %58 = vector.load %arg9[%c0_34, %c137] : memref<16x384xf32, #tpu.memory_space<vmem>>, vector<16x128xf32>
    %59 = arith.truncf %58 : vector<16x128xf32> to vector<16x128xbf16>
    %c0_35 = arith.constant 0 : index
    %c138 = arith.constant 138 : index
    %60 = vector.load %arg9[%c0_35, %c138] : memref<16x384xf32, #tpu.memory_space<vmem>>, vector<16x128xf32>
    %61 = arith.truncf %60 : vector<16x128xf32> to vector<16x128xbf16>
    %c0_36 = arith.constant 0 : index
    %c139 = arith.constant 139 : index
    %62 = vector.load %arg9[%c0_36, %c139] : memref<16x384xf32, #tpu.memory_space<vmem>>, vector<16x128xf32>
    %63 = arith.truncf %62 : vector<16x128xf32> to vector<16x128xbf16>
    %c0_37 = arith.constant 0 : index
    %c140 = arith.constant 140 : index
    %64 = vector.load %arg9[%c0_37, %c140] : memref<16x384xf32, #tpu.memory_space<vmem>>, vector<16x128xf32>
    %65 = arith.truncf %64 : vector<16x128xf32> to vector<16x128xbf16>
    %c0_38 = arith.constant 0 : index
    %c141 = arith.constant 141 : index
    %66 = vector.load %arg9[%c0_38, %c141] : memref<16x384xf32, #tpu.memory_space<vmem>>, vector<16x128xf32>
    %67 = arith.truncf %66 : vector<16x128xf32> to vector<16x128xbf16>
    %c0_39 = arith.constant 0 : index
    %c142 = arith.constant 142 : index
    %68 = vector.load %arg9[%c0_39, %c142] : memref<16x384xf32, #tpu.memory_space<vmem>>, vector<16x128xf32>
    %69 = arith.truncf %68 : vector<16x128xf32> to vector<16x128xbf16>
    %c0_40 = arith.constant 0 : index
    %c143 = arith.constant 143 : index
    %70 = vector.load %arg9[%c0_40, %c143] : memref<16x384xf32, #tpu.memory_space<vmem>>, vector<16x128xf32>
    %71 = arith.truncf %70 : vector<16x128xf32> to vector<16x128xbf16>
    %c0_41 = arith.constant 0 : index
    %c144 = arith.constant 144 : index
    %72 = vector.load %arg9[%c0_41, %c144] : memref<16x384xf32, #tpu.memory_space<vmem>>, vector<16x128xf32>
    %73 = arith.truncf %72 : vector<16x128xf32> to vector<16x128xbf16>
    %74 = tpu.concatenate %43, %45, %47, %49, %51, %53, %55, %57, %59, %61, %63, %65, %67, %69, %71, %73 in 0 : vector<16x128xbf16>, vector<16x128xbf16>, vector<16x128xbf16>, vector<16x128xbf16>, vector<16x128xbf16>, vector<16x128xbf16>, vector<16x128xbf16>, vector<16x128xbf16>, vector<16x128xbf16>, vector<16x128xbf16>, vector<16x128xbf16>, vector<16x128xbf16>, vector<16x128xbf16>, vector<16x128xbf16>, vector<16x128xbf16>, vector<16x128xbf16> -> vector<256x128xbf16>
    %75 = vector.extract_strided_slice %6 {offsets = [0, 256], sizes = [16, 256], strides = [1, 1]} : vector<16x512xbf16> to vector<16x256xbf16>
    %cst_42 = arith.constant dense<0.000000e+00> : vector<16x128xf32>
    %76 = tpu.matmul %75, %74, %cst_42 {dimension_numbers = #tpu.dot_dimension_numbers<[1], [0], [0], [1], [0, 0, 1, 1], [], []>} : vector<16x256xbf16>, vector<256x128xbf16>, vector<16x128xf32> -> vector<16x128xf32>
    %77 = arith.addf %41, %76 : vector<16x128xf32>
    %c0_43 = arith.constant 0 : index
    %c0_44 = arith.constant 0 : index
    %c0_45 = arith.constant 0 : index
    %78 = vector.load %arg3[%c0_43, %c0_44, %c0_45] : memref<9x16x1xf32, #tpu.memory_space<vmem>>, vector<1x16x1xf32>
    %79 = vector.shape_cast %78 : vector<1x16x1xf32> to vector<16x1xf32>
    %80 = vector.broadcast %79 : vector<16x1xf32> to vector<16x128xf32>
    %81 = arith.addf %77, %80 : vector<16x128xf32>
    %cst_46 = arith.constant 0.000000e+00 : f32
    %82 = vector.broadcast %cst_46 : f32 to vector<16x128xf32>
    %83 = arith.maximumf %81, %82 : vector<16x128xf32>
    %c0_47 = arith.constant 0 : index
    %c128_48 = arith.constant 128 : index
    %84 = vector.load %arg9[%c0_47, %c128_48] : memref<16x384xf32, #tpu.memory_space<vmem>>, vector<16x128xf32>
    tpu.vector_store %arg9[%c0_47, %c128_48], %83 {strides = array<i32>} : memref<16x384xf32, #tpu.memory_space<vmem>>, vector<16x128xf32>,
    %c1 = arith.constant 1 : index
    %c0_49 = arith.constant 0 : index
    %c0_50 = arith.constant 0 : index
    %85 = vector.load %arg2[%c1, %c0_49, %c0_50] : memref<9x16x512xbf16, #tpu.memory_space<vmem>>, vector<1x16x512xbf16>
    %86 = vector.shape_cast %85 : vector<1x16x512xbf16> to vector<16x512xbf16>
    %c0_51 = arith.constant 0 : index
    %c113_52 = arith.constant 113 : index
    %87 = vector.load %arg9[%c0_51, %c113_52] : memref<16x384xf32, #tpu.memory_space<vmem>>, vector<16x128xf32>
    %88 = arith.truncf %87 : vector<16x128xf32> to vector<16x128xbf16>
    %c0_53 = arith.constant 0 : index
    %c114_54 = arith.constant 114 : index
    %89 = vector.load %arg9[%c0_53, %c114_54] : memref<16x384xf32, #tpu.memory_space<vmem>>, vector<16x128xf32>
    %90 = arith.truncf %89 : vector<16x128xf32> to vector<16x128xbf16>
    %c0_55 = arith.constant 0 : index
    %c115_56 = arith.constant 115 : index
    %91 = vector.load %arg9[%c0_55, %c115_56] : memref<16x384xf32, #tpu.memory_space<vmem>>, vector<16x128xf32>
    %92 = arith.truncf %91 : vector<16x128xf32> to vector<16x128xbf16>
    %c0_57 = arith.constant 0 : index
    %c116_58 = arith.constant 116 : index
    %93 = vector.load %arg9[%c0_57, %c116_58] : memref<16x384xf32, #tpu.memory_space<vmem>>, vector<16x128xf32>
    %94 = arith.truncf %93 : vector<16x128xf32> to vector<16x128xbf16>
    %c0_59 = arith.constant 0 : index
    %c117_60 = arith.constant 117 : index
    %95 = vector.load %arg9[%c0_59, %c117_60] : memref<16x384xf32, #tpu.memory_space<vmem>>, vector<16x128xf32>
    %96 = arith.truncf %95 : vector<16x128xf32> to vector<16x128xbf16>
    %c0_61 = arith.constant 0 : index
    %c118_62 = arith.constant 118 : index
    %97 = vector.load %arg9[%c0_61, %c118_62] : memref<16x384xf32, #tpu.memory_space<vmem>>, vector<16x128xf32>
    %98 = arith.truncf %97 : vector<16x128xf32> to vector<16x128xbf16>
    %c0_63 = arith.constant 0 : index
    %c119_64 = arith.constant 119 : index
    %99 = vector.load %arg9[%c0_63, %c119_64] : memref<16x384xf32, #tpu.memory_space<vmem>>, vector<16x128xf32>
    %100 = arith.truncf %99 : vector<16x128xf32> to vector<16x128xbf16>
    %c0_65 = arith.constant 0 : index
    %c120_66 = arith.constant 120 : index
    %101 = vector.load %arg9[%c0_65, %c120_66] : memref<16x384xf32, #tpu.memory_space<vmem>>, vector<16x128xf32>
    %102 = arith.truncf %101 : vector<16x128xf32> to vector<16x128xbf16>
    %c0_67 = arith.constant 0 : index
    %c121_68 = arith.constant 121 : index
    %103 = vector.load %arg9[%c0_67, %c121_68] : memref<16x384xf32, #tpu.memory_space<vmem>>, vector<16x128xf32>
    %104 = arith.truncf %103 : vector<16x128xf32> to vector<16x128xbf16>
    %c0_69 = arith.constant 0 : index
    %c122_70 = arith.constant 122 : index
    %105 = vector.load %arg9[%c0_69, %c122_70] : memref<16x384xf32, #tpu.memory_space<vmem>>, vector<16x128xf32>
    %106 = arith.truncf %105 : vector<16x128xf32> to vector<16x128xbf16>
    %c0_71 = arith.constant 0 : index
    %c123_72 = arith.constant 123 : index
    %107 = vector.load %arg9[%c0_71, %c123_72] : memref<16x384xf32, #tpu.memory_space<vmem>>, vector<16x128xf32>
    %108 = arith.truncf %107 : vector<16x128xf32> to vector<16x128xbf16>
    %c0_73 = arith.constant 0 : index
    %c124_74 = arith.constant 124 : index
    %109 = vector.load %arg9[%c0_73, %c124_74] : memref<16x384xf32, #tpu.memory_space<vmem>>, vector<16x128xf32>
    %110 = arith.truncf %109 : vector<16x128xf32> to vector<16x128xbf16>
    %c0_75 = arith.constant 0 : index
    %c125_76 = arith.constant 125 : index
    %111 = vector.load %arg9[%c0_75, %c125_76] : memref<16x384xf32, #tpu.memory_space<vmem>>, vector<16x128xf32>
    %112 = arith.truncf %111 : vector<16x128xf32> to vector<16x128xbf16>
    %c0_77 = arith.constant 0 : index
    %c126_78 = arith.constant 126 : index
    %113 = vector.load %arg9[%c0_77, %c126_78] : memref<16x384xf32, #tpu.memory_space<vmem>>, vector<16x128xf32>
    %114 = arith.truncf %113 : vector<16x128xf32> to vector<16x128xbf16>
    %c0_79 = arith.constant 0 : index
    %c127_80 = arith.constant 127 : index
    %115 = vector.load %arg9[%c0_79, %c127_80] : memref<16x384xf32, #tpu.memory_space<vmem>>, vector<16x128xf32>
    %116 = arith.truncf %115 : vector<16x128xf32> to vector<16x128xbf16>
    %c0_81 = arith.constant 0 : index
    %c128_82 = arith.constant 128 : index
    %117 = vector.load %arg9[%c0_81, %c128_82] : memref<16x384xf32, #tpu.memory_space<vmem>>, vector<16x128xf32>
    %118 = arith.truncf %117 : vector<16x128xf32> to vector<16x128xbf16>
    %119 = tpu.concatenate %88, %90, %92, %94, %96, %98, %100, %102, %104, %106, %108, %110, %112, %114, %116, %118 in 0 : vector<16x128xbf16>, vector<16x128xbf16>, vector<16x128xbf16>, vector<16x128xbf16>, vector<16x128xbf16>, vector<16x128xbf16>, vector<16x128xbf16>, vector<16x128xbf16>, vector<16x128xbf16>, vector<16x128xbf16>, vector<16x128xbf16>, vector<16x128xbf16>, vector<16x128xbf16>, vector<16x128xbf16>, vector<16x128xbf16>, vector<16x128xbf16> -> vector<256x128xbf16>
    %120 = vector.extract_strided_slice %86 {offsets = [0, 0], sizes = [16, 256], strides = [1, 1]} : vector<16x512xbf16> to vector<16x256xbf16>
    %cst_83 = arith.constant dense<0.000000e+00> : vector<16x128xf32>
    %121 = tpu.matmul %120, %119, %cst_83 {dimension_numbers = #tpu.dot_dimension_numbers<[1], [0], [0], [1], [0, 0, 1, 1], [], []>} : vector<16x256xbf16>, vector<256x128xbf16>, vector<16x128xf32> -> vector<16x128xf32>
    %c0_84 = arith.constant 0 : index
    %c129_85 = arith.constant 129 : index
    %122 = vector.load %arg9[%c0_84, %c129_85] : memref<16x384xf32, #tpu.memory_space<vmem>>, vector<16x128xf32>
    %123 = arith.truncf %122 : vector<16x128xf32> to vector<16x128xbf16>
    %c0_86 = arith.constant 0 : index
    %c130_87 = arith.constant 130 : index
    %124 = vector.load %arg9[%c0_86, %c130_87] : memref<16x384xf32, #tpu.memory_space<vmem>>, vector<16x128xf32>
    %125 = arith.truncf %124 : vector<16x128xf32> to vector<16x128xbf16>
    %c0_88 = arith.constant 0 : index
    %c131_89 = arith.constant 131 : index
    %126 = vector.load %arg9[%c0_88, %c131_89] : memref<16x384xf32, #tpu.memory_space<vmem>>, vector<16x128xf32>
    %127 = arith.truncf %126 : vector<16x128xf32> to vector<16x128xbf16>
    %c0_90 = arith.constant 0 : index
    %c132_91 = arith.constant 132 : index
    %128 = vector.load %arg9[%c0_90, %c132_91] : memref<16x384xf32, #tpu.memory_space<vmem>>, vector<16x128xf32>
    %129 = arith.truncf %128 : vector<16x128xf32> to vector<16x128xbf16>
    %c0_92 = arith.constant 0 : index
    %c133_93 = arith.constant 133 : index
    %130 = vector.load %arg9[%c0_92, %c133_93] : memref<16x384xf32, #tpu.memory_space<vmem>>, vector<16x128xf32>
    %131 = arith.truncf %130 : vector<16x128xf32> to vector<16x128xbf16>
    %c0_94 = arith.constant 0 : index
    %c134_95 = arith.constant 134 : index
    %132 = vector.load %arg9[%c0_94, %c134_95] : memref<16x384xf32, #tpu.memory_space<vmem>>, vector<16x128xf32>
    %133 = arith.truncf %132 : vector<16x128xf32> to vector<16x128xbf16>
    %c0_96 = arith.constant 0 : index
    %c135_97 = arith.constant 135 : index
    %134 = vector.load %arg9[%c0_96, %c135_97] : memref<16x384xf32, #tpu.memory_space<vmem>>, vector<16x128xf32>
    %135 = arith.truncf %134 : vector<16x128xf32> to vector<16x128xbf16>
    %c0_98 = arith.constant 0 : index
    %c136_99 = arith.constant 136 : index
    %136 = vector.load %arg9[%c0_98, %c136_99] : memref<16x384xf32, #tpu.memory_space<vmem>>, vector<16x128xf32>
    %137 = arith.truncf %136 : vector<16x128xf32> to vector<16x128xbf16>
    %c0_100 = arith.constant 0 : index
    %c137_101 = arith.constant 137 : index
    %138 = vector.load %arg9[%c0_100, %c137_101] : memref<16x384xf32, #tpu.memory_space<vmem>>, vector<16x128xf32>
    %139 = arith.truncf %138 : vector<16x128xf32> to vector<16x128xbf16>
    %c0_102 = arith.constant 0 : index
    %c138_103 = arith.constant 138 : index
    %140 = vector.load %arg9[%c0_102, %c138_103] : memref<16x384xf32, #tpu.memory_space<vmem>>, vector<16x128xf32>
    %141 = arith.truncf %140 : vector<16x128xf32> to vector<16x128xbf16>
    %c0_104 = arith.constant 0 : index
    %c139_105 = arith.constant 139 : index
    %142 = vector.load %arg9[%c0_104, %c139_105] : memref<16x384xf32, #tpu.memory_space<vmem>>, vector<16x128xf32>
    %143 = arith.truncf %142 : vector<16x128xf32> to vector<16x128xbf16>
    %c0_106 = arith.constant 0 : index
    %c140_107 = arith.constant 140 : index
    %144 = vector.load %arg9[%c0_106, %c140_107] : memref<16x384xf32, #tpu.memory_space<vmem>>, vector<16x128xf32>
    %145 = arith.truncf %144 : vector<16x128xf32> to vector<16x128xbf16>
    %c0_108 = arith.constant 0 : index
    %c141_109 = arith.constant 141 : index
    %146 = vector.load %arg9[%c0_108, %c141_109] : memref<16x384xf32, #tpu.memory_space<vmem>>, vector<16x128xf32>
    %147 = arith.truncf %146 : vector<16x128xf32> to vector<16x128xbf16>
    %c0_110 = arith.constant 0 : index
    %c142_111 = arith.constant 142 : index
    %148 = vector.load %arg9[%c0_110, %c142_111] : memref<16x384xf32, #tpu.memory_space<vmem>>, vector<16x128xf32>
    %149 = arith.truncf %148 : vector<16x128xf32> to vector<16x128xbf16>
    %c0_112 = arith.constant 0 : index
    %c143_113 = arith.constant 143 : index
    %150 = vector.load %arg9[%c0_112, %c143_113] : memref<16x384xf32, #tpu.memory_space<vmem>>, vector<16x128xf32>
    %151 = arith.truncf %150 : vector<16x128xf32> to vector<16x128xbf16>
    %c0_114 = arith.constant 0 : index
    %c144_115 = arith.constant 144 : index
    %152 = vector.load %arg9[%c0_114, %c144_115] : memref<16x384xf32, #tpu.memory_space<vmem>>, vector<16x128xf32>
    %153 = arith.truncf %152 : vector<16x128xf32> to vector<16x128xbf16>
    %154 = tpu.concatenate %123, %125, %127, %129, %131, %133, %135, %137, %139, %141, %143, %145, %147, %149, %151, %153 in 0 : vector<16x128xbf16>, vector<16x128xbf16>, vector<16x128xbf16>, vector<16x128xbf16>, vector<16x128xbf16>, vector<16x128xbf16>, vector<16x128xbf16>, vector<16x128xbf16>, vector<16x128xbf16>, vector<16x128xbf16>, vector<16x128xbf16>, vector<16x128xbf16>, vector<16x128xbf16>, vector<16x128xbf16>, vector<16x128xbf16>, vector<16x128xbf16> -> vector<256x128xbf16>
    %155 = vector.extract_strided_slice %86 {offsets = [0, 256], sizes = [16, 256], strides = [1, 1]} : vector<16x512xbf16> to vector<16x256xbf16>
    %cst_116 = arith.constant dense<0.000000e+00> : vector<16x128xf32>
    %156 = tpu.matmul %155, %154, %cst_116 {dimension_numbers = #tpu.dot_dimension_numbers<[1], [0], [0], [1], [0, 0, 1, 1], [], []>} : vector<16x256xbf16>, vector<256x128xbf16>, vector<16x128xf32> -> vector<16x128xf32>
    %157 = arith.addf %121, %156 : vector<16x128xf32>
    %c1_117 = arith.constant 1 : index
    %c0_118 = arith.constant 0 : index
    %c0_119 = arith.constant 0 : index
    %158 = vector.load %arg3[%c1_117, %c0_118, %c0_119] : memref<9x16x1xf32, #tpu.memory_space<vmem>>, vector<1x16x1xf32>
    %159 = vector.shape_cast %158 : vector<1x16x1xf32> to vector<16x1xf32>
    %160 = vector.broadcast %159 : vector<16x1xf32> to vector<16x128xf32>
    %161 = arith.addf %157, %160 : vector<16x128xf32>
    %cst_120 = arith.constant 0.000000e+00 : f32
    %162 = vector.broadcast %cst_120 : f32 to vector<16x128xf32>
    %163 = arith.maximumf %161, %162 : vector<16x128xf32>
    %c0_121 = arith.constant 0 : index
    %c128_122 = arith.constant 128 : index
    %164 = vector.load %arg9[%c0_121, %c128_122] : memref<16x384xf32, #tpu.memory_space<vmem>>, vector<16x128xf32>
    tpu.vector_store %arg9[%c0_121, %c128_122], %163 {strides = array<i32>} : memref<16x384xf32, #tpu.memory_space<vmem>>, vector<16x128xf32>,
    %c2 = arith.constant 2 : index
    %c0_123 = arith.constant 0 : index
    %c0_124 = arith.constant 0 : index
    %165 = vector.load %arg2[%c2, %c0_123, %c0_124] : memref<9x16x512xbf16, #tpu.memory_space<vmem>>, vector<1x16x512xbf16>
    %166 = vector.shape_cast %165 : vector<1x16x512xbf16> to vector<16x512xbf16>
    %c0_125 = arith.constant 0 : index
    %c113_126 = arith.constant 113 : index
    %167 = vector.load %arg9[%c0_125, %c113_126] : memref<16x384xf32, #tpu.memory_space<vmem>>, vector<16x128xf32>
    %168 = arith.truncf %167 : vector<16x128xf32> to vector<16x128xbf16>
    %c0_127 = arith.constant 0 : index
    %c114_128 = arith.constant 114 : index
    %169 = vector.load %arg9[%c0_127, %c114_128] : memref<16x384xf32, #tpu.memory_space<vmem>>, vector<16x128xf32>
    %170 = arith.truncf %169 : vector<16x128xf32> to vector<16x128xbf16>
    %c0_129 = arith.constant 0 : index
    %c115_130 = arith.constant 115 : index
    %171 = vector.load %arg9[%c0_129, %c115_130] : memref<16x384xf32, #tpu.memory_space<vmem>>, vector<16x128xf32>
    %172 = arith.truncf %171 : vector<16x128xf32> to vector<16x128xbf16>
    %c0_131 = arith.constant 0 : index
    %c116_132 = arith.constant 116 : index
    %173 = vector.load %arg9[%c0_131, %c116_132] : memref<16x384xf32, #tpu.memory_space<vmem>>, vector<16x128xf32>
    %174 = arith.truncf %173 : vector<16x128xf32> to vector<16x128xbf16>
    %c0_133 = arith.constant 0 : index
    %c117_134 = arith.constant 117 : index
    %175 = vector.load %arg9[%c0_133, %c117_134] : memref<16x384xf32, #tpu.memory_space<vmem>>, vector<16x128xf32>
    %176 = arith.truncf %175 : vector<16x128xf32> to vector<16x128xbf16>
    %c0_135 = arith.constant 0 : index
    %c118_136 = arith.constant 118 : index
    %177 = vector.load %arg9[%c0_135, %c118_136] : memref<16x384xf32, #tpu.memory_space<vmem>>, vector<16x128xf32>
    %178 = arith.truncf %177 : vector<16x128xf32> to vector<16x128xbf16>
    %c0_137 = arith.constant 0 : index
    %c119_138 = arith.constant 119 : index
    %179 = vector.load %arg9[%c0_137, %c119_138] : memref<16x384xf32, #tpu.memory_space<vmem>>, vector<16x128xf32>
    %180 = arith.truncf %179 : vector<16x128xf32> to vector<16x128xbf16>
    %c0_139 = arith.constant 0 : index
    %c120_140 = arith.constant 120 : index
    %181 = vector.load %arg9[%c0_139, %c120_140] : memref<16x384xf32, #tpu.memory_space<vmem>>, vector<16x128xf32>
    %182 = arith.truncf %181 : vector<16x128xf32> to vector<16x128xbf16>
    %c0_141 = arith.constant 0 : index
    %c121_142 = arith.constant 121 : index
    %183 = vector.load %arg9[%c0_141, %c121_142] : memref<16x384xf32, #tpu.memory_space<vmem>>, vector<16x128xf32>
    %184 = arith.truncf %183 : vector<16x128xf32> to vector<16x128xbf16>
    %c0_143 = arith.constant 0 : index
    %c122_144 = arith.constant 122 : index
    %185 = vector.load %arg9[%c0_143, %c122_144] : memref<16x384xf32, #tpu.memory_space<vmem>>, vector<16x128xf32>
    %186 = arith.truncf %185 : vector<16x128xf32> to vector<16x128xbf16>
    %c0_145 = arith.constant 0 : index
    %c123_146 = arith.constant 123 : index
    %187 = vector.load %arg9[%c0_145, %c123_146] : memref<16x384xf32, #tpu.memory_space<vmem>>, vector<16x128xf32>
    %188 = arith.truncf %187 : vector<16x128xf32> to vector<16x128xbf16>
    %c0_147 = arith.constant 0 : index
    %c124_148 = arith.constant 124 : index
    %189 = vector.load %arg9[%c0_147, %c124_148] : memref<16x384xf32, #tpu.memory_space<vmem>>, vector<16x128xf32>
    %190 = arith.truncf %189 : vector<16x128xf32> to vector<16x128xbf16>
    %c0_149 = arith.constant 0 : index
    %c125_150 = arith.constant 125 : index
    %191 = vector.load %arg9[%c0_149, %c125_150] : memref<16x384xf32, #tpu.memory_space<vmem>>, vector<16x128xf32>
    %192 = arith.truncf %191 : vector<16x128xf32> to vector<16x128xbf16>
    %c0_151 = arith.constant 0 : index
    %c126_152 = arith.constant 126 : index
    %193 = vector.load %arg9[%c0_151, %c126_152] : memref<16x384xf32, #tpu.memory_space<vmem>>, vector<16x128xf32>
    %194 = arith.truncf %193 : vector<16x128xf32> to vector<16x128xbf16>
    %c0_153 = arith.constant 0 : index
    %c127_154 = arith.constant 127 : index
    %195 = vector.load %arg9[%c0_153, %c127_154] : memref<16x384xf32, #tpu.memory_space<vmem>>, vector<16x128xf32>
    %196 = arith.truncf %195 : vector<16x128xf32> to vector<16x128xbf16>
    %c0_155 = arith.constant 0 : index
    %c128_156 = arith.constant 128 : index
    %197 = vector.load %arg9[%c0_155, %c128_156] : memref<16x384xf32, #tpu.memory_space<vmem>>, vector<16x128xf32>
    %198 = arith.truncf %197 : vector<16x128xf32> to vector<16x128xbf16>
    %199 = tpu.concatenate %168, %170, %172, %174, %176, %178, %180, %182, %184, %186, %188, %190, %192, %194, %196, %198 in 0 : vector<16x128xbf16>, vector<16x128xbf16>, vector<16x128xbf16>, vector<16x128xbf16>, vector<16x128xbf16>, vector<16x128xbf16>, vector<16x128xbf16>, vector<16x128xbf16>, vector<16x128xbf16>, vector<16x128xbf16>, vector<16x128xbf16>, vector<16x128xbf16>, vector<16x128xbf16>, vector<16x128xbf16>, vector<16x128xbf16>, vector<16x128xbf16> -> vector<256x128xbf16>
    %200 = vector.extract_strided_slice %166 {offsets = [0, 0], sizes = [16, 256], strides = [1, 1]} : vector<16x512xbf16> to vector<16x256xbf16>
    %cst_157 = arith.constant dense<0.000000e+00> : vector<16x128xf32>
    %201 = tpu.matmul %200, %199, %cst_157 {dimension_numbers = #tpu.dot_dimension_numbers<[1], [0], [0], [1], [0, 0, 1, 1], [], []>} : vector<16x256xbf16>, vector<256x128xbf16>, vector<16x128xf32> -> vector<16x128xf32>
    %c0_158 = arith.constant 0 : index
    %c129_159 = arith.constant 129 : index
    %202 = vector.load %arg9[%c0_158, %c129_159] : memref<16x384xf32, #tpu.memory_space<vmem>>, vector<16x128xf32>
    %203 = arith.truncf %202 : vector<16x128xf32> to vector<16x128xbf16>
    %c0_160 = arith.constant 0 : index
    %c130_161 = arith.constant 130 : index
    %204 = vector.load %arg9[%c0_160, %c130_161] : memref<16x384xf32, #tpu.memory_space<vmem>>, vector<16x128xf32>
    %205 = arith.truncf %204 : vector<16x128xf32> to vector<16x128xbf16>
    %c0_162 = arith.constant 0 : index
    %c131_163 = arith.constant 131 : index
    %206 = vector.load %arg9[%c0_162, %c131_163] : memref<16x384xf32, #tpu.memory_space<vmem>>, vector<16x128xf32>
    %207 = arith.truncf %206 : vector<16x128xf32> to vector<16x128xbf16>
    %c0_164 = arith.constant 0 : index
    %c132_165 = arith.constant 132 : index
    %208 = vector.load %arg9[%c0_164, %c132_165] : memref<16x384xf32, #tpu.memory_space<vmem>>, vector<16x128xf32>
    %209 = arith.truncf %208 : vector<16x128xf32> to vector<16x128xbf16>
    %c0_166 = arith.constant 0 : index
    %c133_167 = arith.constant 133 : index
    %210 = vector.load %arg9[%c0_166, %c133_167] : memref<16x384xf32, #tpu.memory_space<vmem>>, vector<16x128xf32>
    %211 = arith.truncf %210 : vector<16x128xf32> to vector<16x128xbf16>
    %c0_168 = arith.constant 0 : index
    %c134_169 = arith.constant 134 : index
    %212 = vector.load %arg9[%c0_168, %c134_169] : memref<16x384xf32, #tpu.memory_space<vmem>>, vector<16x128xf32>
    %213 = arith.truncf %212 : vector<16x128xf32> to vector<16x128xbf16>
    %c0_170 = arith.constant 0 : index
    %c135_171 = arith.constant 135 : index
    %214 = vector.load %arg9[%c0_170, %c135_171] : memref<16x384xf32, #tpu.memory_space<vmem>>, vector<16x128xf32>
    %215 = arith.truncf %214 : vector<16x128xf32> to vector<16x128xbf16>
    %c0_172 = arith.constant 0 : index
    %c136_173 = arith.constant 136 : index
    %216 = vector.load %arg9[%c0_172, %c136_173] : memref<16x384xf32, #tpu.memory_space<vmem>>, vector<16x128xf32>
    %217 = arith.truncf %216 : vector<16x128xf32> to vector<16x128xbf16>
    %c0_174 = arith.constant 0 : index
    %c137_175 = arith.constant 137 : index
    %218 = vector.load %arg9[%c0_174, %c137_175] : memref<16x384xf32, #tpu.memory_space<vmem>>, vector<16x128xf32>
    %219 = arith.truncf %218 : vector<16x128xf32> to vector<16x128xbf16>
    %c0_176 = arith.constant 0 : index
    %c138_177 = arith.constant 138 : index
    %220 = vector.load %arg9[%c0_176, %c138_177] : memref<16x384xf32, #tpu.memory_space<vmem>>, vector<16x128xf32>
    %221 = arith.truncf %220 : vector<16x128xf32> to vector<16x128xbf16>
    %c0_178 = arith.constant 0 : index
    %c139_179 = arith.constant 139 : index
    %222 = vector.load %arg9[%c0_178, %c139_179] : memref<16x384xf32, #tpu.memory_space<vmem>>, vector<16x128xf32>
    %223 = arith.truncf %222 : vector<16x128xf32> to vector<16x128xbf16>
    %c0_180 = arith.constant 0 : index
    %c140_181 = arith.constant 140 : index
    %224 = vector.load %arg9[%c0_180, %c140_181] : memref<16x384xf32, #tpu.memory_space<vmem>>, vector<16x128xf32>
    %225 = arith.truncf %224 : vector<16x128xf32> to vector<16x128xbf16>
    %c0_182 = arith.constant 0 : index
    %c141_183 = arith.constant 141 : index
    %226 = vector.load %arg9[%c0_182, %c141_183] : memref<16x384xf32, #tpu.memory_space<vmem>>, vector<16x128xf32>
    %227 = arith.truncf %226 : vector<16x128xf32> to vector<16x128xbf16>
    %c0_184 = arith.constant 0 : index
    %c142_185 = arith.constant 142 : index
    %228 = vector.load %arg9[%c0_184, %c142_185] : memref<16x384xf32, #tpu.memory_space<vmem>>, vector<16x128xf32>
    %229 = arith.truncf %228 : vector<16x128xf32> to vector<16x128xbf16>
    %c0_186 = arith.constant 0 : index
    %c143_187 = arith.constant 143 : index
    %230 = vector.load %arg9[%c0_186, %c143_187] : memref<16x384xf32, #tpu.memory_space<vmem>>, vector<16x128xf32>
    %231 = arith.truncf %230 : vector<16x128xf32> to vector<16x128xbf16>
    %c0_188 = arith.constant 0 : index
    %c144_189 = arith.constant 144 : index
    %232 = vector.load %arg9[%c0_188, %c144_189] : memref<16x384xf32, #tpu.memory_space<vmem>>, vector<16x128xf32>
    %233 = arith.truncf %232 : vector<16x128xf32> to vector<16x128xbf16>
    %234 = tpu.concatenate %203, %205, %207, %209, %211, %213, %215, %217, %219, %221, %223, %225, %227, %229, %231, %233 in 0 : vector<16x128xbf16>, vector<16x128xbf16>, vector<16x128xbf16>, vector<16x128xbf16>, vector<16x128xbf16>, vector<16x128xbf16>, vector<16x128xbf16>, vector<16x128xbf16>, vector<16x128xbf16>, vector<16x128xbf16>, vector<16x128xbf16>, vector<16x128xbf16>, vector<16x128xbf16>, vector<16x128xbf16>, vector<16x128xbf16>, vector<16x128xbf16> -> vector<256x128xbf16>
    %235 = vector.extract_strided_slice %166 {offsets = [0, 256], sizes = [16, 256], strides = [1, 1]} : vector<16x512xbf16> to vector<16x256xbf16>
    %cst_190 = arith.constant dense<0.000000e+00> : vector<16x128xf32>
    %236 = tpu.matmul %235, %234, %cst_190 {dimension_numbers = #tpu.dot_dimension_numbers<[1], [0], [0], [1], [0, 0, 1, 1], [], []>} : vector<16x256xbf16>, vector<256x128xbf16>, vector<16x128xf32> -> vector<16x128xf32>
    %237 = arith.addf %201, %236 : vector<16x128xf32>
    %c2_191 = arith.constant 2 : index
    %c0_192 = arith.constant 0 : index
    %c0_193 = arith.constant 0 : index
    %238 = vector.load %arg3[%c2_191, %c0_192, %c0_193] : memref<9x16x1xf32, #tpu.memory_space<vmem>>, vector<1x16x1xf32>
    %239 = vector.shape_cast %238 : vector<1x16x1xf32> to vector<16x1xf32>
    %240 = vector.broadcast %239 : vector<16x1xf32> to vector<16x128xf32>
    %241 = arith.addf %237, %240 : vector<16x128xf32>
    %cst_194 = arith.constant 0.000000e+00 : f32
    %242 = vector.broadcast %cst_194 : f32 to vector<16x128xf32>
    %243 = arith.maximumf %241, %242 : vector<16x128xf32>
    %c0_195 = arith.constant 0 : index
    %c128_196 = arith.constant 128 : index
    %244 = vector.load %arg9[%c0_195, %c128_196] : memref<16x384xf32, #tpu.memory_space<vmem>>, vector<16x128xf32>
    tpu.vector_store %arg9[%c0_195, %c128_196], %243 {strides = array<i32>} : memref<16x384xf32, #tpu.memory_space<vmem>>, vector<16x128xf32>,
    %c0_197 = arith.constant 0 : index
    %c127_198 = arith.constant 127 : index
    %245 = vector.load %arg9[%c0_197, %c127_198] : memref<16x384xf32, #tpu.memory_space<vmem>>, vector<16x128xf32>
    %246 = arith.truncf %245 : vector<16x128xf32> to vector<16x128xbf16>
    %c0_199 = arith.constant 0 : index
    %c128_200 = arith.constant 128 : index
    %247 = vector.load %arg9[%c0_199, %c128_200] : memref<16x384xf32, #tpu.memory_space<vmem>>, vector<16x128xf32>
    %248 = arith.truncf %247 : vector<16x128xf32> to vector<16x128xbf16>
    %c0_201 = arith.constant 0 : index
    %c129_202 = arith.constant 129 : index
    %249 = vector.load %arg9[%c0_201, %c129_202] : memref<16x384xf32, #tpu.memory_space<vmem>>, vector<16x128xf32>
    %250 = arith.truncf %249 : vector<16x128xf32> to vector<16x128xbf16>
    %c0_203 = arith.constant 0 : index
    %c130_204 = arith.constant 130 : index
    %251 = vector.load %arg9[%c0_203, %c130_204] : memref<16x384xf32, #tpu.memory_space<vmem>>, vector<16x128xf32>
    %252 = arith.truncf %251 : vector<16x128xf32> to vector<16x128xbf16>
    %c0_205 = arith.constant 0 : index
    %c131_206 = arith.constant 131 : index
    %253 = vector.load %arg9[%c0_205, %c131_206] : memref<16x384xf32, #tpu.memory_space<vmem>>, vector<16x128xf32>
    %254 = arith.truncf %253 : vector<16x128xf32> to vector<16x128xbf16>
    %c0_207 = arith.constant 0 : index
    %c132_208 = arith.constant 132 : index
    %255 = vector.load %arg9[%c0_207, %c132_208] : memref<16x384xf32, #tpu.memory_space<vmem>>, vector<16x128xf32>
    %256 = arith.truncf %255 : vector<16x128xf32> to vector<16x128xbf16>
    %c0_209 = arith.constant 0 : index
    %c133_210 = arith.constant 133 : index
    %257 = vector.load %arg9[%c0_209, %c133_210] : memref<16x384xf32, #tpu.memory_space<vmem>>, vector<16x128xf32>
    %258 = arith.truncf %257 : vector<16x128xf32> to vector<16x128xbf16>
    %c0_211 = arith.constant 0 : index
    %c134_212 = arith.constant 134 : index
    %259 = vector.load %arg9[%c0_211, %c134_212] : memref<16x384xf32, #tpu.memory_space<vmem>>, vector<16x128xf32>
    %260 = arith.truncf %259 : vector<16x128xf32> to vector<16x128xbf16>
    %261 = tpu.concatenate %246, %248, %250, %252, %254, %256, %258, %260 in 0 : vector<16x128xbf16>, vector<16x128xbf16>, vector<16x128xbf16>, vector<16x128xbf16>, vector<16x128xbf16>, vector<16x128xbf16>, vector<16x128xbf16>, vector<16x128xbf16> -> vector<128x128xbf16>
    %c0_213 = arith.constant 0 : index
    %c0_214 = arith.constant 0 : index
    %c0_215 = arith.constant 0 : index
    %262 = vector.load %arg4[%c0_213, %c0_214, %c0_215] : memref<4x16x128xbf16, #tpu.memory_space<vmem>>, vector<1x16x128xbf16>
    %263 = vector.shape_cast %262 : vector<1x16x128xbf16> to vector<16x128xbf16>
    %cst_216 = arith.constant dense<0.000000e+00> : vector<16x128xf32>
    %264 = tpu.matmul %263, %261, %cst_216 {dimension_numbers = #tpu.dot_dimension_numbers<[1], [0], [0], [1], [0, 0, 1, 1], [], []>} : vector<16x128xbf16>, vector<128x128xbf16>, vector<16x128xf32> -> vector<16x128xf32>
    %c0_217 = arith.constant 0 : index
    %c0_218 = arith.constant 0 : index
    %c0_219 = arith.constant 0 : index
    %265 = vector.load %arg5[%c0_217, %c0_218, %c0_219] : memref<4x16x1xf32, #tpu.memory_space<vmem>>, vector<1x16x1xf32>
    %266 = vector.shape_cast %265 : vector<1x16x1xf32> to vector<16x1xf32>
    %267 = vector.broadcast %266 : vector<16x1xf32> to vector<16x128xf32>
    %268 = arith.addf %264, %267 : vector<16x128xf32>
    %cst_220 = arith.constant 0.000000e+00 : f32
    %269 = vector.broadcast %cst_220 : f32 to vector<16x128xf32>
    %270 = arith.maximumf %268, %269 : vector<16x128xf32>
    %271 = arith.addf %270, %163 : vector<16x128xf32>
    %c0_221 = arith.constant 0 : index
    %c128_222 = arith.constant 128 : index
    %272 = vector.load %arg9[%c0_221, %c128_222] : memref<16x384xf32, #tpu.memory_space<vmem>>, vector<16x128xf32>
    tpu.vector_store %arg9[%c0_221, %c128_222], %271 {strides = array<i32>} : memref<16x384xf32, #tpu.memory_space<vmem>>, vector<16x128xf32>,
    %c3 = arith.constant 3 : index
    %c0_223 = arith.constant 0 : index
    %c0_224 = arith.constant 0 : index
    %273 = vector.load %arg2[%c3, %c0_223, %c0_224] : memref<9x16x512xbf16, #tpu.memory_space<vmem>>, vector<1x16x512xbf16>
    %274 = vector.shape_cast %273 : vector<1x16x512xbf16> to vector<16x512xbf16>
    %c0_225 = arith.constant 0 : index
    %c113_226 = arith.constant 113 : index
    %275 = vector.load %arg9[%c0_225, %c113_226] : memref<16x384xf32, #tpu.memory_space<vmem>>, vector<16x128xf32>
    %276 = arith.truncf %275 : vector<16x128xf32> to vector<16x128xbf16>
    %c0_227 = arith.constant 0 : index
    %c114_228 = arith.constant 114 : index
    %277 = vector.load %arg9[%c0_227, %c114_228] : memref<16x384xf32, #tpu.memory_space<vmem>>, vector<16x128xf32>
    %278 = arith.truncf %277 : vector<16x128xf32> to vector<16x128xbf16>
    %c0_229 = arith.constant 0 : index
    %c115_230 = arith.constant 115 : index
    %279 = vector.load %arg9[%c0_229, %c115_230] : memref<16x384xf32, #tpu.memory_space<vmem>>, vector<16x128xf32>
    %280 = arith.truncf %279 : vector<16x128xf32> to vector<16x128xbf16>
    %c0_231 = arith.constant 0 : index
    %c116_232 = arith.constant 116 : index
    %281 = vector.load %arg9[%c0_231, %c116_232] : memref<16x384xf32, #tpu.memory_space<vmem>>, vector<16x128xf32>
    %282 = arith.truncf %281 : vector<16x128xf32> to vector<16x128xbf16>
    %c0_233 = arith.constant 0 : index
    %c117_234 = arith.constant 117 : index
    %283 = vector.load %arg9[%c0_233, %c117_234] : memref<16x384xf32, #tpu.memory_space<vmem>>, vector<16x128xf32>
    %284 = arith.truncf %283 : vector<16x128xf32> to vector<16x128xbf16>
    %c0_235 = arith.constant 0 : index
    %c118_236 = arith.constant 118 : index
    %285 = vector.load %arg9[%c0_235, %c118_236] : memref<16x384xf32, #tpu.memory_space<vmem>>, vector<16x128xf32>
    %286 = arith.truncf %285 : vector<16x128xf32> to vector<16x128xbf16>
    %c0_237 = arith.constant 0 : index
    %c119_238 = arith.constant 119 : index
    %287 = vector.load %arg9[%c0_237, %c119_238] : memref<16x384xf32, #tpu.memory_space<vmem>>, vector<16x128xf32>
    %288 = arith.truncf %287 : vector<16x128xf32> to vector<16x128xbf16>
    %c0_239 = arith.constant 0 : index
    %c120_240 = arith.constant 120 : index
    %289 = vector.load %arg9[%c0_239, %c120_240] : memref<16x384xf32, #tpu.memory_space<vmem>>, vector<16x128xf32>
    %290 = arith.truncf %289 : vector<16x128xf32> to vector<16x128xbf16>
    %c0_241 = arith.constant 0 : index
    %c121_242 = arith.constant 121 : index
    %291 = vector.load %arg9[%c0_241, %c121_242] : memref<16x384xf32, #tpu.memory_space<vmem>>, vector<16x128xf32>
    %292 = arith.truncf %291 : vector<16x128xf32> to vector<16x128xbf16>
    %c0_243 = arith.constant 0 : index
    %c122_244 = arith.constant 122 : index
    %293 = vector.load %arg9[%c0_243, %c122_244] : memref<16x384xf32, #tpu.memory_space<vmem>>, vector<16x128xf32>
    %294 = arith.truncf %293 : vector<16x128xf32> to vector<16x128xbf16>
    %c0_245 = arith.constant 0 : index
    %c123_246 = arith.constant 123 : index
    %295 = vector.load %arg9[%c0_245, %c123_246] : memref<16x384xf32, #tpu.memory_space<vmem>>, vector<16x128xf32>
    %296 = arith.truncf %295 : vector<16x128xf32> to vector<16x128xbf16>
    %c0_247 = arith.constant 0 : index
    %c124_248 = arith.constant 124 : index
    %297 = vector.load %arg9[%c0_247, %c124_248] : memref<16x384xf32, #tpu.memory_space<vmem>>, vector<16x128xf32>
    %298 = arith.truncf %297 : vector<16x128xf32> to vector<16x128xbf16>
    %c0_249 = arith.constant 0 : index
    %c125_250 = arith.constant 125 : index
    %299 = vector.load %arg9[%c0_249, %c125_250] : memref<16x384xf32, #tpu.memory_space<vmem>>, vector<16x128xf32>
    %300 = arith.truncf %299 : vector<16x128xf32> to vector<16x128xbf16>
    %c0_251 = arith.constant 0 : index
    %c126_252 = arith.constant 126 : index
    %301 = vector.load %arg9[%c0_251, %c126_252] : memref<16x384xf32, #tpu.memory_space<vmem>>, vector<16x128xf32>
    %302 = arith.truncf %301 : vector<16x128xf32> to vector<16x128xbf16>
    %c0_253 = arith.constant 0 : index
    %c127_254 = arith.constant 127 : index
    %303 = vector.load %arg9[%c0_253, %c127_254] : memref<16x384xf32, #tpu.memory_space<vmem>>, vector<16x128xf32>
    %304 = arith.truncf %303 : vector<16x128xf32> to vector<16x128xbf16>
    %c0_255 = arith.constant 0 : index
    %c128_256 = arith.constant 128 : index
    %305 = vector.load %arg9[%c0_255, %c128_256] : memref<16x384xf32, #tpu.memory_space<vmem>>, vector<16x128xf32>
    %306 = arith.truncf %305 : vector<16x128xf32> to vector<16x128xbf16>
    %307 = tpu.concatenate %276, %278, %280, %282, %284, %286, %288, %290, %292, %294, %296, %298, %300, %302, %304, %306 in 0 : vector<16x128xbf16>, vector<16x128xbf16>, vector<16x128xbf16>, vector<16x128xbf16>, vector<16x128xbf16>, vector<16x128xbf16>, vector<16x128xbf16>, vector<16x128xbf16>, vector<16x128xbf16>, vector<16x128xbf16>, vector<16x128xbf16>, vector<16x128xbf16>, vector<16x128xbf16>, vector<16x128xbf16>, vector<16x128xbf16>, vector<16x128xbf16> -> vector<256x128xbf16>
    %308 = vector.extract_strided_slice %274 {offsets = [0, 0], sizes = [16, 256], strides = [1, 1]} : vector<16x512xbf16> to vector<16x256xbf16>
    %cst_257 = arith.constant dense<0.000000e+00> : vector<16x128xf32>
    %309 = tpu.matmul %308, %307, %cst_257 {dimension_numbers = #tpu.dot_dimension_numbers<[1], [0], [0], [1], [0, 0, 1, 1], [], []>} : vector<16x256xbf16>, vector<256x128xbf16>, vector<16x128xf32> -> vector<16x128xf32>
    %c0_258 = arith.constant 0 : index
    %c129_259 = arith.constant 129 : index
    %310 = vector.load %arg9[%c0_258, %c129_259] : memref<16x384xf32, #tpu.memory_space<vmem>>, vector<16x128xf32>
    %311 = arith.truncf %310 : vector<16x128xf32> to vector<16x128xbf16>
    %c0_260 = arith.constant 0 : index
    %c130_261 = arith.constant 130 : index
    %312 = vector.load %arg9[%c0_260, %c130_261] : memref<16x384xf32, #tpu.memory_space<vmem>>, vector<16x128xf32>
    %313 = arith.truncf %312 : vector<16x128xf32> to vector<16x128xbf16>
    %c0_262 = arith.constant 0 : index
    %c131_263 = arith.constant 131 : index
    %314 = vector.load %arg9[%c0_262, %c131_263] : memref<16x384xf32, #tpu.memory_space<vmem>>, vector<16x128xf32>
    %315 = arith.truncf %314 : vector<16x128xf32> to vector<16x128xbf16>
    %c0_264 = arith.constant 0 : index
    %c132_265 = arith.constant 132 : index
    %316 = vector.load %arg9[%c0_264, %c132_265] : memref<16x384xf32, #tpu.memory_space<vmem>>, vector<16x128xf32>
    %317 = arith.truncf %316 : vector<16x128xf32> to vector<16x128xbf16>
    %c0_266 = arith.constant 0 : index
    %c133_267 = arith.constant 133 : index
    %318 = vector.load %arg9[%c0_266, %c133_267] : memref<16x384xf32, #tpu.memory_space<vmem>>, vector<16x128xf32>
    %319 = arith.truncf %318 : vector<16x128xf32> to vector<16x128xbf16>
    %c0_268 = arith.constant 0 : index
    %c134_269 = arith.constant 134 : index
    %320 = vector.load %arg9[%c0_268, %c134_269] : memref<16x384xf32, #tpu.memory_space<vmem>>, vector<16x128xf32>
    %321 = arith.truncf %320 : vector<16x128xf32> to vector<16x128xbf16>
    %c0_270 = arith.constant 0 : index
    %c135_271 = arith.constant 135 : index
    %322 = vector.load %arg9[%c0_270, %c135_271] : memref<16x384xf32, #tpu.memory_space<vmem>>, vector<16x128xf32>
    %323 = arith.truncf %322 : vector<16x128xf32> to vector<16x128xbf16>
    %c0_272 = arith.constant 0 : index
    %c136_273 = arith.constant 136 : index
    %324 = vector.load %arg9[%c0_272, %c136_273] : memref<16x384xf32, #tpu.memory_space<vmem>>, vector<16x128xf32>
    %325 = arith.truncf %324 : vector<16x128xf32> to vector<16x128xbf16>
    %c0_274 = arith.constant 0 : index
    %c137_275 = arith.constant 137 : index
    %326 = vector.load %arg9[%c0_274, %c137_275] : memref<16x384xf32, #tpu.memory_space<vmem>>, vector<16x128xf32>
    %327 = arith.truncf %326 : vector<16x128xf32> to vector<16x128xbf16>
    %c0_276 = arith.constant 0 : index
    %c138_277 = arith.constant 138 : index
    %328 = vector.load %arg9[%c0_276, %c138_277] : memref<16x384xf32, #tpu.memory_space<vmem>>, vector<16x128xf32>
    %329 = arith.truncf %328 : vector<16x128xf32> to vector<16x128xbf16>
    %c0_278 = arith.constant 0 : index
    %c139_279 = arith.constant 139 : index
    %330 = vector.load %arg9[%c0_278, %c139_279] : memref<16x384xf32, #tpu.memory_space<vmem>>, vector<16x128xf32>
    %331 = arith.truncf %330 : vector<16x128xf32> to vector<16x128xbf16>
    %c0_280 = arith.constant 0 : index
    %c140_281 = arith.constant 140 : index
    %332 = vector.load %arg9[%c0_280, %c140_281] : memref<16x384xf32, #tpu.memory_space<vmem>>, vector<16x128xf32>
    %333 = arith.truncf %332 : vector<16x128xf32> to vector<16x128xbf16>
    %c0_282 = arith.constant 0 : index
    %c141_283 = arith.constant 141 : index
    %334 = vector.load %arg9[%c0_282, %c141_283] : memref<16x384xf32, #tpu.memory_space<vmem>>, vector<16x128xf32>
    %335 = arith.truncf %334 : vector<16x128xf32> to vector<16x128xbf16>
    %c0_284 = arith.constant 0 : index
    %c142_285 = arith.constant 142 : index
    %336 = vector.load %arg9[%c0_284, %c142_285] : memref<16x384xf32, #tpu.memory_space<vmem>>, vector<16x128xf32>
    %337 = arith.truncf %336 : vector<16x128xf32> to vector<16x128xbf16>
    %c0_286 = arith.constant 0 : index
    %c143_287 = arith.constant 143 : index
    %338 = vector.load %arg9[%c0_286, %c143_287] : memref<16x384xf32, #tpu.memory_space<vmem>>, vector<16x128xf32>
    %339 = arith.truncf %338 : vector<16x128xf32> to vector<16x128xbf16>
    %c0_288 = arith.constant 0 : index
    %c144_289 = arith.constant 144 : index
    %340 = vector.load %arg9[%c0_288, %c144_289] : memref<16x384xf32, #tpu.memory_space<vmem>>, vector<16x128xf32>
    %341 = arith.truncf %340 : vector<16x128xf32> to vector<16x128xbf16>
    %342 = tpu.concatenate %311, %313, %315, %317, %319, %321, %323, %325, %327, %329, %331, %333, %335, %337, %339, %341 in 0 : vector<16x128xbf16>, vector<16x128xbf16>, vector<16x128xbf16>, vector<16x128xbf16>, vector<16x128xbf16>, vector<16x128xbf16>, vector<16x128xbf16>, vector<16x128xbf16>, vector<16x128xbf16>, vector<16x128xbf16>, vector<16x128xbf16>, vector<16x128xbf16>, vector<16x128xbf16>, vector<16x128xbf16>, vector<16x128xbf16>, vector<16x128xbf16> -> vector<256x128xbf16>
    %343 = vector.extract_strided_slice %274 {offsets = [0, 256], sizes = [16, 256], strides = [1, 1]} : vector<16x512xbf16> to vector<16x256xbf16>
    %cst_290 = arith.constant dense<0.000000e+00> : vector<16x128xf32>
    %344 = tpu.matmul %343, %342, %cst_290 {dimension_numbers = #tpu.dot_dimension_numbers<[1], [0], [0], [1], [0, 0, 1, 1], [], []>} : vector<16x256xbf16>, vector<256x128xbf16>, vector<16x128xf32> -> vector<16x128xf32>
    %345 = arith.addf %309, %344 : vector<16x128xf32>
    %c3_291 = arith.constant 3 : index
    %c0_292 = arith.constant 0 : index
    %c0_293 = arith.constant 0 : index
    %346 = vector.load %arg3[%c3_291, %c0_292, %c0_293] : memref<9x16x1xf32, #tpu.memory_space<vmem>>, vector<1x16x1xf32>
    %347 = vector.shape_cast %346 : vector<1x16x1xf32> to vector<16x1xf32>
    %348 = vector.broadcast %347 : vector<16x1xf32> to vector<16x128xf32>
    %349 = arith.addf %345, %348 : vector<16x128xf32>
    %cst_294 = arith.constant 0.000000e+00 : f32
    %350 = vector.broadcast %cst_294 : f32 to vector<16x128xf32>
    %351 = arith.maximumf %349, %350 : vector<16x128xf32>
    %c0_295 = arith.constant 0 : index
    %c128_296 = arith.constant 128 : index
    %352 = vector.load %arg9[%c0_295, %c128_296] : memref<16x384xf32, #tpu.memory_space<vmem>>, vector<16x128xf32>
    tpu.vector_store %arg9[%c0_295, %c128_296], %351 {strides = array<i32>} : memref<16x384xf32, #tpu.memory_space<vmem>>, vector<16x128xf32>,
    %c4 = arith.constant 4 : index
    %c0_297 = arith.constant 0 : index
    %c0_298 = arith.constant 0 : index
    %353 = vector.load %arg2[%c4, %c0_297, %c0_298] : memref<9x16x512xbf16, #tpu.memory_space<vmem>>, vector<1x16x512xbf16>
    %354 = vector.shape_cast %353 : vector<1x16x512xbf16> to vector<16x512xbf16>
    %c0_299 = arith.constant 0 : index
    %c113_300 = arith.constant 113 : index
    %355 = vector.load %arg9[%c0_299, %c113_300] : memref<16x384xf32, #tpu.memory_space<vmem>>, vector<16x128xf32>
    %356 = arith.truncf %355 : vector<16x128xf32> to vector<16x128xbf16>
    %c0_301 = arith.constant 0 : index
    %c114_302 = arith.constant 114 : index
    %357 = vector.load %arg9[%c0_301, %c114_302] : memref<16x384xf32, #tpu.memory_space<vmem>>, vector<16x128xf32>
    %358 = arith.truncf %357 : vector<16x128xf32> to vector<16x128xbf16>
    %c0_303 = arith.constant 0 : index
    %c115_304 = arith.constant 115 : index
    %359 = vector.load %arg9[%c0_303, %c115_304] : memref<16x384xf32, #tpu.memory_space<vmem>>, vector<16x128xf32>
    %360 = arith.truncf %359 : vector<16x128xf32> to vector<16x128xbf16>
    %c0_305 = arith.constant 0 : index
    %c116_306 = arith.constant 116 : index
    %361 = vector.load %arg9[%c0_305, %c116_306] : memref<16x384xf32, #tpu.memory_space<vmem>>, vector<16x128xf32>
    %362 = arith.truncf %361 : vector<16x128xf32> to vector<16x128xbf16>
    %c0_307 = arith.constant 0 : index
    %c117_308 = arith.constant 117 : index
    %363 = vector.load %arg9[%c0_307, %c117_308] : memref<16x384xf32, #tpu.memory_space<vmem>>, vector<16x128xf32>
    %364 = arith.truncf %363 : vector<16x128xf32> to vector<16x128xbf16>
    %c0_309 = arith.constant 0 : index
    %c118_310 = arith.constant 118 : index
    %365 = vector.load %arg9[%c0_309, %c118_310] : memref<16x384xf32, #tpu.memory_space<vmem>>, vector<16x128xf32>
    %366 = arith.truncf %365 : vector<16x128xf32> to vector<16x128xbf16>
    %c0_311 = arith.constant 0 : index
    %c119_312 = arith.constant 119 : index
    %367 = vector.load %arg9[%c0_311, %c119_312] : memref<16x384xf32, #tpu.memory_space<vmem>>, vector<16x128xf32>
    %368 = arith.truncf %367 : vector<16x128xf32> to vector<16x128xbf16>
    %c0_313 = arith.constant 0 : index
    %c120_314 = arith.constant 120 : index
    %369 = vector.load %arg9[%c0_313, %c120_314] : memref<16x384xf32, #tpu.memory_space<vmem>>, vector<16x128xf32>
    %370 = arith.truncf %369 : vector<16x128xf32> to vector<16x128xbf16>
    %c0_315 = arith.constant 0 : index
    %c121_316 = arith.constant 121 : index
    %371 = vector.load %arg9[%c0_315, %c121_316] : memref<16x384xf32, #tpu.memory_space<vmem>>, vector<16x128xf32>
    %372 = arith.truncf %371 : vector<16x128xf32> to vector<16x128xbf16>
    %c0_317 = arith.constant 0 : index
    %c122_318 = arith.constant 122 : index
    %373 = vector.load %arg9[%c0_317, %c122_318] : memref<16x384xf32, #tpu.memory_space<vmem>>, vector<16x128xf32>
    %374 = arith.truncf %373 : vector<16x128xf32> to vector<16x128xbf16>
    %c0_319 = arith.constant 0 : index
    %c123_320 = arith.constant 123 : index
    %375 = vector.load %arg9[%c0_319, %c123_320] : memref<16x384xf32, #tpu.memory_space<vmem>>, vector<16x128xf32>
    %376 = arith.truncf %375 : vector<16x128xf32> to vector<16x128xbf16>
    %c0_321 = arith.constant 0 : index
    %c124_322 = arith.constant 124 : index
    %377 = vector.load %arg9[%c0_321, %c124_322] : memref<16x384xf32, #tpu.memory_space<vmem>>, vector<16x128xf32>
    %378 = arith.truncf %377 : vector<16x128xf32> to vector<16x128xbf16>
    %c0_323 = arith.constant 0 : index
    %c125_324 = arith.constant 125 : index
    %379 = vector.load %arg9[%c0_323, %c125_324] : memref<16x384xf32, #tpu.memory_space<vmem>>, vector<16x128xf32>
    %380 = arith.truncf %379 : vector<16x128xf32> to vector<16x128xbf16>
    %c0_325 = arith.constant 0 : index
    %c126_326 = arith.constant 126 : index
    %381 = vector.load %arg9[%c0_325, %c126_326] : memref<16x384xf32, #tpu.memory_space<vmem>>, vector<16x128xf32>
    %382 = arith.truncf %381 : vector<16x128xf32> to vector<16x128xbf16>
    %c0_327 = arith.constant 0 : index
    %c127_328 = arith.constant 127 : index
    %383 = vector.load %arg9[%c0_327, %c127_328] : memref<16x384xf32, #tpu.memory_space<vmem>>, vector<16x128xf32>
    %384 = arith.truncf %383 : vector<16x128xf32> to vector<16x128xbf16>
    %c0_329 = arith.constant 0 : index
    %c128_330 = arith.constant 128 : index
    %385 = vector.load %arg9[%c0_329, %c128_330] : memref<16x384xf32, #tpu.memory_space<vmem>>, vector<16x128xf32>
    %386 = arith.truncf %385 : vector<16x128xf32> to vector<16x128xbf16>
    %387 = tpu.concatenate %356, %358, %360, %362, %364, %366, %368, %370, %372, %374, %376, %378, %380, %382, %384, %386 in 0 : vector<16x128xbf16>, vector<16x128xbf16>, vector<16x128xbf16>, vector<16x128xbf16>, vector<16x128xbf16>, vector<16x128xbf16>, vector<16x128xbf16>, vector<16x128xbf16>, vector<16x128xbf16>, vector<16x128xbf16>, vector<16x128xbf16>, vector<16x128xbf16>, vector<16x128xbf16>, vector<16x128xbf16>, vector<16x128xbf16>, vector<16x128xbf16> -> vector<256x128xbf16>
    %388 = vector.extract_strided_slice %354 {offsets = [0, 0], sizes = [16, 256], strides = [1, 1]} : vector<16x512xbf16> to vector<16x256xbf16>
    %cst_331 = arith.constant dense<0.000000e+00> : vector<16x128xf32>
    %389 = tpu.matmul %388, %387, %cst_331 {dimension_numbers = #tpu.dot_dimension_numbers<[1], [0], [0], [1], [0, 0, 1, 1], [], []>} : vector<16x256xbf16>, vector<256x128xbf16>, vector<16x128xf32> -> vector<16x128xf32>
    %c0_332 = arith.constant 0 : index
    %c129_333 = arith.constant 129 : index
    %390 = vector.load %arg9[%c0_332, %c129_333] : memref<16x384xf32, #tpu.memory_space<vmem>>, vector<16x128xf32>
    %391 = arith.truncf %390 : vector<16x128xf32> to vector<16x128xbf16>
    %c0_334 = arith.constant 0 : index
    %c130_335 = arith.constant 130 : index
    %392 = vector.load %arg9[%c0_334, %c130_335] : memref<16x384xf32, #tpu.memory_space<vmem>>, vector<16x128xf32>
    %393 = arith.truncf %392 : vector<16x128xf32> to vector<16x128xbf16>
    %c0_336 = arith.constant 0 : index
    %c131_337 = arith.constant 131 : index
    %394 = vector.load %arg9[%c0_336, %c131_337] : memref<16x384xf32, #tpu.memory_space<vmem>>, vector<16x128xf32>
    %395 = arith.truncf %394 : vector<16x128xf32> to vector<16x128xbf16>
    %c0_338 = arith.constant 0 : index
    %c132_339 = arith.constant 132 : index
    %396 = vector.load %arg9[%c0_338, %c132_339] : memref<16x384xf32, #tpu.memory_space<vmem>>, vector<16x128xf32>
    %397 = arith.truncf %396 : vector<16x128xf32> to vector<16x128xbf16>
    %c0_340 = arith.constant 0 : index
    %c133_341 = arith.constant 133 : index
    %398 = vector.load %arg9[%c0_340, %c133_341] : memref<16x384xf32, #tpu.memory_space<vmem>>, vector<16x128xf32>
    %399 = arith.truncf %398 : vector<16x128xf32> to vector<16x128xbf16>
    %c0_342 = arith.constant 0 : index
    %c134_343 = arith.constant 134 : index
    %400 = vector.load %arg9[%c0_342, %c134_343] : memref<16x384xf32, #tpu.memory_space<vmem>>, vector<16x128xf32>
    %401 = arith.truncf %400 : vector<16x128xf32> to vector<16x128xbf16>
    %c0_344 = arith.constant 0 : index
    %c135_345 = arith.constant 135 : index
    %402 = vector.load %arg9[%c0_344, %c135_345] : memref<16x384xf32, #tpu.memory_space<vmem>>, vector<16x128xf32>
    %403 = arith.truncf %402 : vector<16x128xf32> to vector<16x128xbf16>
    %c0_346 = arith.constant 0 : index
    %c136_347 = arith.constant 136 : index
    %404 = vector.load %arg9[%c0_346, %c136_347] : memref<16x384xf32, #tpu.memory_space<vmem>>, vector<16x128xf32>
    %405 = arith.truncf %404 : vector<16x128xf32> to vector<16x128xbf16>
    %c0_348 = arith.constant 0 : index
    %c137_349 = arith.constant 137 : index
    %406 = vector.load %arg9[%c0_348, %c137_349] : memref<16x384xf32, #tpu.memory_space<vmem>>, vector<16x128xf32>
    %407 = arith.truncf %406 : vector<16x128xf32> to vector<16x128xbf16>
    %c0_350 = arith.constant 0 : index
    %c138_351 = arith.constant 138 : index
    %408 = vector.load %arg9[%c0_350, %c138_351] : memref<16x384xf32, #tpu.memory_space<vmem>>, vector<16x128xf32>
    %409 = arith.truncf %408 : vector<16x128xf32> to vector<16x128xbf16>
    %c0_352 = arith.constant 0 : index
    %c139_353 = arith.constant 139 : index
    %410 = vector.load %arg9[%c0_352, %c139_353] : memref<16x384xf32, #tpu.memory_space<vmem>>, vector<16x128xf32>
    %411 = arith.truncf %410 : vector<16x128xf32> to vector<16x128xbf16>
    %c0_354 = arith.constant 0 : index
    %c140_355 = arith.constant 140 : index
    %412 = vector.load %arg9[%c0_354, %c140_355] : memref<16x384xf32, #tpu.memory_space<vmem>>, vector<16x128xf32>
    %413 = arith.truncf %412 : vector<16x128xf32> to vector<16x128xbf16>
    %c0_356 = arith.constant 0 : index
    %c141_357 = arith.constant 141 : index
    %414 = vector.load %arg9[%c0_356, %c141_357] : memref<16x384xf32, #tpu.memory_space<vmem>>, vector<16x128xf32>
    %415 = arith.truncf %414 : vector<16x128xf32> to vector<16x128xbf16>
    %c0_358 = arith.constant 0 : index
    %c142_359 = arith.constant 142 : index
    %416 = vector.load %arg9[%c0_358, %c142_359] : memref<16x384xf32, #tpu.memory_space<vmem>>, vector<16x128xf32>
    %417 = arith.truncf %416 : vector<16x128xf32> to vector<16x128xbf16>
    %c0_360 = arith.constant 0 : index
    %c143_361 = arith.constant 143 : index
    %418 = vector.load %arg9[%c0_360, %c143_361] : memref<16x384xf32, #tpu.memory_space<vmem>>, vector<16x128xf32>
    %419 = arith.truncf %418 : vector<16x128xf32> to vector<16x128xbf16>
    %c0_362 = arith.constant 0 : index
    %c144_363 = arith.constant 144 : index
    %420 = vector.load %arg9[%c0_362, %c144_363] : memref<16x384xf32, #tpu.memory_space<vmem>>, vector<16x128xf32>
    %421 = arith.truncf %420 : vector<16x128xf32> to vector<16x128xbf16>
    %422 = tpu.concatenate %391, %393, %395, %397, %399, %401, %403, %405, %407, %409, %411, %413, %415, %417, %419, %421 in 0 : vector<16x128xbf16>, vector<16x128xbf16>, vector<16x128xbf16>, vector<16x128xbf16>, vector<16x128xbf16>, vector<16x128xbf16>, vector<16x128xbf16>, vector<16x128xbf16>, vector<16x128xbf16>, vector<16x128xbf16>, vector<16x128xbf16>, vector<16x128xbf16>, vector<16x128xbf16>, vector<16x128xbf16>, vector<16x128xbf16>, vector<16x128xbf16> -> vector<256x128xbf16>
    %423 = vector.extract_strided_slice %354 {offsets = [0, 256], sizes = [16, 256], strides = [1, 1]} : vector<16x512xbf16> to vector<16x256xbf16>
    %cst_364 = arith.constant dense<0.000000e+00> : vector<16x128xf32>
    %424 = tpu.matmul %423, %422, %cst_364 {dimension_numbers = #tpu.dot_dimension_numbers<[1], [0], [0], [1], [0, 0, 1, 1], [], []>} : vector<16x256xbf16>, vector<256x128xbf16>, vector<16x128xf32> -> vector<16x128xf32>
    %425 = arith.addf %389, %424 : vector<16x128xf32>
    %c4_365 = arith.constant 4 : index
    %c0_366 = arith.constant 0 : index
    %c0_367 = arith.constant 0 : index
    %426 = vector.load %arg3[%c4_365, %c0_366, %c0_367] : memref<9x16x1xf32, #tpu.memory_space<vmem>>, vector<1x16x1xf32>
    %427 = vector.shape_cast %426 : vector<1x16x1xf32> to vector<16x1xf32>
    %428 = vector.broadcast %427 : vector<16x1xf32> to vector<16x128xf32>
    %429 = arith.addf %425, %428 : vector<16x128xf32>
    %cst_368 = arith.constant 0.000000e+00 : f32
    %430 = vector.broadcast %cst_368 : f32 to vector<16x128xf32>
    %431 = arith.maximumf %429, %430 : vector<16x128xf32>
    %c0_369 = arith.constant 0 : index
    %c128_370 = arith.constant 128 : index
    %432 = vector.load %arg9[%c0_369, %c128_370] : memref<16x384xf32, #tpu.memory_space<vmem>>, vector<16x128xf32>
    tpu.vector_store %arg9[%c0_369, %c128_370], %431 {strides = array<i32>} : memref<16x384xf32, #tpu.memory_space<vmem>>, vector<16x128xf32>,
    %c0_371 = arith.constant 0 : index
    %c127_372 = arith.constant 127 : index
    %433 = vector.load %arg9[%c0_371, %c127_372] : memref<16x384xf32, #tpu.memory_space<vmem>>, vector<16x128xf32>
    %434 = arith.truncf %433 : vector<16x128xf32> to vector<16x128xbf16>
    %c0_373 = arith.constant 0 : index
    %c128_374 = arith.constant 128 : index
    %435 = vector.load %arg9[%c0_373, %c128_374] : memref<16x384xf32, #tpu.memory_space<vmem>>, vector<16x128xf32>
    %436 = arith.truncf %435 : vector<16x128xf32> to vector<16x128xbf16>
    %c0_375 = arith.constant 0 : index
    %c129_376 = arith.constant 129 : index
    %437 = vector.load %arg9[%c0_375, %c129_376] : memref<16x384xf32, #tpu.memory_space<vmem>>, vector<16x128xf32>
    %438 = arith.truncf %437 : vector<16x128xf32> to vector<16x128xbf16>
    %c0_377 = arith.constant 0 : index
    %c130_378 = arith.constant 130 : index
    %439 = vector.load %arg9[%c0_377, %c130_378] : memref<16x384xf32, #tpu.memory_space<vmem>>, vector<16x128xf32>
    %440 = arith.truncf %439 : vector<16x128xf32> to vector<16x128xbf16>
    %c0_379 = arith.constant 0 : index
    %c131_380 = arith.constant 131 : index
    %441 = vector.load %arg9[%c0_379, %c131_380] : memref<16x384xf32, #tpu.memory_space<vmem>>, vector<16x128xf32>
    %442 = arith.truncf %441 : vector<16x128xf32> to vector<16x128xbf16>
    %c0_381 = arith.constant 0 : index
    %c132_382 = arith.constant 132 : index
    %443 = vector.load %arg9[%c0_381, %c132_382] : memref<16x384xf32, #tpu.memory_space<vmem>>, vector<16x128xf32>
    %444 = arith.truncf %443 : vector<16x128xf32> to vector<16x128xbf16>
    %c0_383 = arith.constant 0 : index
    %c133_384 = arith.constant 133 : index
    %445 = vector.load %arg9[%c0_383, %c133_384] : memref<16x384xf32, #tpu.memory_space<vmem>>, vector<16x128xf32>
    %446 = arith.truncf %445 : vector<16x128xf32> to vector<16x128xbf16>
    %c0_385 = arith.constant 0 : index
    %c134_386 = arith.constant 134 : index
    %447 = vector.load %arg9[%c0_385, %c134_386] : memref<16x384xf32, #tpu.memory_space<vmem>>, vector<16x128xf32>
    %448 = arith.truncf %447 : vector<16x128xf32> to vector<16x128xbf16>
    %449 = tpu.concatenate %434, %436, %438, %440, %442, %444, %446, %448 in 0 : vector<16x128xbf16>, vector<16x128xbf16>, vector<16x128xbf16>, vector<16x128xbf16>, vector<16x128xbf16>, vector<16x128xbf16>, vector<16x128xbf16>, vector<16x128xbf16> -> vector<128x128xbf16>
    %c1_387 = arith.constant 1 : index
    %c0_388 = arith.constant 0 : index
    %c0_389 = arith.constant 0 : index
    %450 = vector.load %arg4[%c1_387, %c0_388, %c0_389] : memref<4x16x128xbf16, #tpu.memory_space<vmem>>, vector<1x16x128xbf16>
    %451 = vector.shape_cast %450 : vector<1x16x128xbf16> to vector<16x128xbf16>
    %cst_390 = arith.constant dense<0.000000e+00> : vector<16x128xf32>
    %452 = tpu.matmul %451, %449, %cst_390 {dimension_numbers = #tpu.dot_dimension_numbers<[1], [0], [0], [1], [0, 0, 1, 1], [], []>} : vector<16x128xbf16>, vector<128x128xbf16>, vector<16x128xf32> -> vector<16x128xf32>
    %c1_391 = arith.constant 1 : index
    %c0_392 = arith.constant 0 : index
    %c0_393 = arith.constant 0 : index
    %453 = vector.load %arg5[%c1_391, %c0_392, %c0_393] : memref<4x16x1xf32, #tpu.memory_space<vmem>>, vector<1x16x1xf32>
    %454 = vector.shape_cast %453 : vector<1x16x1xf32> to vector<16x1xf32>
    %455 = vector.broadcast %454 : vector<16x1xf32> to vector<16x128xf32>
    %456 = arith.addf %452, %455 : vector<16x128xf32>
    %cst_394 = arith.constant 0.000000e+00 : f32
    %457 = vector.broadcast %cst_394 : f32 to vector<16x128xf32>
    %458 = arith.maximumf %456, %457 : vector<16x128xf32>
    %459 = arith.addf %458, %351 : vector<16x128xf32>
    %c0_395 = arith.constant 0 : index
    %c128_396 = arith.constant 128 : index
    %460 = vector.load %arg9[%c0_395, %c128_396] : memref<16x384xf32, #tpu.memory_space<vmem>>, vector<16x128xf32>
    tpu.vector_store %arg9[%c0_395, %c128_396], %459 {strides = array<i32>} : memref<16x384xf32, #tpu.memory_space<vmem>>, vector<16x128xf32>,
    %c5 = arith.constant 5 : index
    %c0_397 = arith.constant 0 : index
    %c0_398 = arith.constant 0 : index
    %461 = vector.load %arg2[%c5, %c0_397, %c0_398] : memref<9x16x512xbf16, #tpu.memory_space<vmem>>, vector<1x16x512xbf16>
    %462 = vector.shape_cast %461 : vector<1x16x512xbf16> to vector<16x512xbf16>
    %c0_399 = arith.constant 0 : index
    %c113_400 = arith.constant 113 : index
    %463 = vector.load %arg9[%c0_399, %c113_400] : memref<16x384xf32, #tpu.memory_space<vmem>>, vector<16x128xf32>
    %464 = arith.truncf %463 : vector<16x128xf32> to vector<16x128xbf16>
    %c0_401 = arith.constant 0 : index
    %c114_402 = arith.constant 114 : index
    %465 = vector.load %arg9[%c0_401, %c114_402] : memref<16x384xf32, #tpu.memory_space<vmem>>, vector<16x128xf32>
    %466 = arith.truncf %465 : vector<16x128xf32> to vector<16x128xbf16>
    %c0_403 = arith.constant 0 : index
    %c115_404 = arith.constant 115 : index
    %467 = vector.load %arg9[%c0_403, %c115_404] : memref<16x384xf32, #tpu.memory_space<vmem>>, vector<16x128xf32>
    %468 = arith.truncf %467 : vector<16x128xf32> to vector<16x128xbf16>
    %c0_405 = arith.constant 0 : index
    %c116_406 = arith.constant 116 : index
    %469 = vector.load %arg9[%c0_405, %c116_406] : memref<16x384xf32, #tpu.memory_space<vmem>>, vector<16x128xf32>
    %470 = arith.truncf %469 : vector<16x128xf32> to vector<16x128xbf16>
    %c0_407 = arith.constant 0 : index
    %c117_408 = arith.constant 117 : index
    %471 = vector.load %arg9[%c0_407, %c117_408] : memref<16x384xf32, #tpu.memory_space<vmem>>, vector<16x128xf32>
    %472 = arith.truncf %471 : vector<16x128xf32> to vector<16x128xbf16>
    %c0_409 = arith.constant 0 : index
    %c118_410 = arith.constant 118 : index
    %473 = vector.load %arg9[%c0_409, %c118_410] : memref<16x384xf32, #tpu.memory_space<vmem>>, vector<16x128xf32>
    %474 = arith.truncf %473 : vector<16x128xf32> to vector<16x128xbf16>
    %c0_411 = arith.constant 0 : index
    %c119_412 = arith.constant 119 : index
    %475 = vector.load %arg9[%c0_411, %c119_412] : memref<16x384xf32, #tpu.memory_space<vmem>>, vector<16x128xf32>
    %476 = arith.truncf %475 : vector<16x128xf32> to vector<16x128xbf16>
    %c0_413 = arith.constant 0 : index
    %c120_414 = arith.constant 120 : index
    %477 = vector.load %arg9[%c0_413, %c120_414] : memref<16x384xf32, #tpu.memory_space<vmem>>, vector<16x128xf32>
    %478 = arith.truncf %477 : vector<16x128xf32> to vector<16x128xbf16>
    %c0_415 = arith.constant 0 : index
    %c121_416 = arith.constant 121 : index
    %479 = vector.load %arg9[%c0_415, %c121_416] : memref<16x384xf32, #tpu.memory_space<vmem>>, vector<16x128xf32>
    %480 = arith.truncf %479 : vector<16x128xf32> to vector<16x128xbf16>
    %c0_417 = arith.constant 0 : index
    %c122_418 = arith.constant 122 : index
    %481 = vector.load %arg9[%c0_417, %c122_418] : memref<16x384xf32, #tpu.memory_space<vmem>>, vector<16x128xf32>
    %482 = arith.truncf %481 : vector<16x128xf32> to vector<16x128xbf16>
    %c0_419 = arith.constant 0 : index
    %c123_420 = arith.constant 123 : index
    %483 = vector.load %arg9[%c0_419, %c123_420] : memref<16x384xf32, #tpu.memory_space<vmem>>, vector<16x128xf32>
    %484 = arith.truncf %483 : vector<16x128xf32> to vector<16x128xbf16>
    %c0_421 = arith.constant 0 : index
    %c124_422 = arith.constant 124 : index
    %485 = vector.load %arg9[%c0_421, %c124_422] : memref<16x384xf32, #tpu.memory_space<vmem>>, vector<16x128xf32>
    %486 = arith.truncf %485 : vector<16x128xf32> to vector<16x128xbf16>
    %c0_423 = arith.constant 0 : index
    %c125_424 = arith.constant 125 : index
    %487 = vector.load %arg9[%c0_423, %c125_424] : memref<16x384xf32, #tpu.memory_space<vmem>>, vector<16x128xf32>
    %488 = arith.truncf %487 : vector<16x128xf32> to vector<16x128xbf16>
    %c0_425 = arith.constant 0 : index
    %c126_426 = arith.constant 126 : index
    %489 = vector.load %arg9[%c0_425, %c126_426] : memref<16x384xf32, #tpu.memory_space<vmem>>, vector<16x128xf32>
    %490 = arith.truncf %489 : vector<16x128xf32> to vector<16x128xbf16>
    %c0_427 = arith.constant 0 : index
    %c127_428 = arith.constant 127 : index
    %491 = vector.load %arg9[%c0_427, %c127_428] : memref<16x384xf32, #tpu.memory_space<vmem>>, vector<16x128xf32>
    %492 = arith.truncf %491 : vector<16x128xf32> to vector<16x128xbf16>
    %c0_429 = arith.constant 0 : index
    %c128_430 = arith.constant 128 : index
    %493 = vector.load %arg9[%c0_429, %c128_430] : memref<16x384xf32, #tpu.memory_space<vmem>>, vector<16x128xf32>
    %494 = arith.truncf %493 : vector<16x128xf32> to vector<16x128xbf16>
    %495 = tpu.concatenate %464, %466, %468, %470, %472, %474, %476, %478, %480, %482, %484, %486, %488, %490, %492, %494 in 0 : vector<16x128xbf16>, vector<16x128xbf16>, vector<16x128xbf16>, vector<16x128xbf16>, vector<16x128xbf16>, vector<16x128xbf16>, vector<16x128xbf16>, vector<16x128xbf16>, vector<16x128xbf16>, vector<16x128xbf16>, vector<16x128xbf16>, vector<16x128xbf16>, vector<16x128xbf16>, vector<16x128xbf16>, vector<16x128xbf16>, vector<16x128xbf16> -> vector<256x128xbf16>
    %496 = vector.extract_strided_slice %462 {offsets = [0, 0], sizes = [16, 256], strides = [1, 1]} : vector<16x512xbf16> to vector<16x256xbf16>
    %cst_431 = arith.constant dense<0.000000e+00> : vector<16x128xf32>
    %497 = tpu.matmul %496, %495, %cst_431 {dimension_numbers = #tpu.dot_dimension_numbers<[1], [0], [0], [1], [0, 0, 1, 1], [], []>} : vector<16x256xbf16>, vector<256x128xbf16>, vector<16x128xf32> -> vector<16x128xf32>
    %c0_432 = arith.constant 0 : index
    %c129_433 = arith.constant 129 : index
    %498 = vector.load %arg9[%c0_432, %c129_433] : memref<16x384xf32, #tpu.memory_space<vmem>>, vector<16x128xf32>
    %499 = arith.truncf %498 : vector<16x128xf32> to vector<16x128xbf16>
    %c0_434 = arith.constant 0 : index
    %c130_435 = arith.constant 130 : index
    %500 = vector.load %arg9[%c0_434, %c130_435] : memref<16x384xf32, #tpu.memory_space<vmem>>, vector<16x128xf32>
    %501 = arith.truncf %500 : vector<16x128xf32> to vector<16x128xbf16>
    %c0_436 = arith.constant 0 : index
    %c131_437 = arith.constant 131 : index
    %502 = vector.load %arg9[%c0_436, %c131_437] : memref<16x384xf32, #tpu.memory_space<vmem>>, vector<16x128xf32>
    %503 = arith.truncf %502 : vector<16x128xf32> to vector<16x128xbf16>
    %c0_438 = arith.constant 0 : index
    %c132_439 = arith.constant 132 : index
    %504 = vector.load %arg9[%c0_438, %c132_439] : memref<16x384xf32, #tpu.memory_space<vmem>>, vector<16x128xf32>
    %505 = arith.truncf %504 : vector<16x128xf32> to vector<16x128xbf16>
    %c0_440 = arith.constant 0 : index
    %c133_441 = arith.constant 133 : index
    %506 = vector.load %arg9[%c0_440, %c133_441] : memref<16x384xf32, #tpu.memory_space<vmem>>, vector<16x128xf32>
    %507 = arith.truncf %506 : vector<16x128xf32> to vector<16x128xbf16>
    %c0_442 = arith.constant 0 : index
    %c134_443 = arith.constant 134 : index
    %508 = vector.load %arg9[%c0_442, %c134_443] : memref<16x384xf32, #tpu.memory_space<vmem>>, vector<16x128xf32>
    %509 = arith.truncf %508 : vector<16x128xf32> to vector<16x128xbf16>
    %c0_444 = arith.constant 0 : index
    %c135_445 = arith.constant 135 : index
    %510 = vector.load %arg9[%c0_444, %c135_445] : memref<16x384xf32, #tpu.memory_space<vmem>>, vector<16x128xf32>
    %511 = arith.truncf %510 : vector<16x128xf32> to vector<16x128xbf16>
    %c0_446 = arith.constant 0 : index
    %c136_447 = arith.constant 136 : index
    %512 = vector.load %arg9[%c0_446, %c136_447] : memref<16x384xf32, #tpu.memory_space<vmem>>, vector<16x128xf32>
    %513 = arith.truncf %512 : vector<16x128xf32> to vector<16x128xbf16>
    %c0_448 = arith.constant 0 : index
    %c137_449 = arith.constant 137 : index
    %514 = vector.load %arg9[%c0_448, %c137_449] : memref<16x384xf32, #tpu.memory_space<vmem>>, vector<16x128xf32>
    %515 = arith.truncf %514 : vector<16x128xf32> to vector<16x128xbf16>
    %c0_450 = arith.constant 0 : index
    %c138_451 = arith.constant 138 : index
    %516 = vector.load %arg9[%c0_450, %c138_451] : memref<16x384xf32, #tpu.memory_space<vmem>>, vector<16x128xf32>
    %517 = arith.truncf %516 : vector<16x128xf32> to vector<16x128xbf16>
    %c0_452 = arith.constant 0 : index
    %c139_453 = arith.constant 139 : index
    %518 = vector.load %arg9[%c0_452, %c139_453] : memref<16x384xf32, #tpu.memory_space<vmem>>, vector<16x128xf32>
    %519 = arith.truncf %518 : vector<16x128xf32> to vector<16x128xbf16>
    %c0_454 = arith.constant 0 : index
    %c140_455 = arith.constant 140 : index
    %520 = vector.load %arg9[%c0_454, %c140_455] : memref<16x384xf32, #tpu.memory_space<vmem>>, vector<16x128xf32>
    %521 = arith.truncf %520 : vector<16x128xf32> to vector<16x128xbf16>
    %c0_456 = arith.constant 0 : index
    %c141_457 = arith.constant 141 : index
    %522 = vector.load %arg9[%c0_456, %c141_457] : memref<16x384xf32, #tpu.memory_space<vmem>>, vector<16x128xf32>
    %523 = arith.truncf %522 : vector<16x128xf32> to vector<16x128xbf16>
    %c0_458 = arith.constant 0 : index
    %c142_459 = arith.constant 142 : index
    %524 = vector.load %arg9[%c0_458, %c142_459] : memref<16x384xf32, #tpu.memory_space<vmem>>, vector<16x128xf32>
    %525 = arith.truncf %524 : vector<16x128xf32> to vector<16x128xbf16>
    %c0_460 = arith.constant 0 : index
    %c143_461 = arith.constant 143 : index
    %526 = vector.load %arg9[%c0_460, %c143_461] : memref<16x384xf32, #tpu.memory_space<vmem>>, vector<16x128xf32>
    %527 = arith.truncf %526 : vector<16x128xf32> to vector<16x128xbf16>
    %c0_462 = arith.constant 0 : index
    %c144_463 = arith.constant 144 : index
    %528 = vector.load %arg9[%c0_462, %c144_463] : memref<16x384xf32, #tpu.memory_space<vmem>>, vector<16x128xf32>
    %529 = arith.truncf %528 : vector<16x128xf32> to vector<16x128xbf16>
    %530 = tpu.concatenate %499, %501, %503, %505, %507, %509, %511, %513, %515, %517, %519, %521, %523, %525, %527, %529 in 0 : vector<16x128xbf16>, vector<16x128xbf16>, vector<16x128xbf16>, vector<16x128xbf16>, vector<16x128xbf16>, vector<16x128xbf16>, vector<16x128xbf16>, vector<16x128xbf16>, vector<16x128xbf16>, vector<16x128xbf16>, vector<16x128xbf16>, vector<16x128xbf16>, vector<16x128xbf16>, vector<16x128xbf16>, vector<16x128xbf16>, vector<16x128xbf16> -> vector<256x128xbf16>
    %531 = vector.extract_strided_slice %462 {offsets = [0, 256], sizes = [16, 256], strides = [1, 1]} : vector<16x512xbf16> to vector<16x256xbf16>
    %cst_464 = arith.constant dense<0.000000e+00> : vector<16x128xf32>
    %532 = tpu.matmul %531, %530, %cst_464 {dimension_numbers = #tpu.dot_dimension_numbers<[1], [0], [0], [1], [0, 0, 1, 1], [], []>} : vector<16x256xbf16>, vector<256x128xbf16>, vector<16x128xf32> -> vector<16x128xf32>
    %533 = arith.addf %497, %532 : vector<16x128xf32>
    %c5_465 = arith.constant 5 : index
    %c0_466 = arith.constant 0 : index
    %c0_467 = arith.constant 0 : index
    %534 = vector.load %arg3[%c5_465, %c0_466, %c0_467] : memref<9x16x1xf32, #tpu.memory_space<vmem>>, vector<1x16x1xf32>
    %535 = vector.shape_cast %534 : vector<1x16x1xf32> to vector<16x1xf32>
    %536 = vector.broadcast %535 : vector<16x1xf32> to vector<16x128xf32>
    %537 = arith.addf %533, %536 : vector<16x128xf32>
    %cst_468 = arith.constant 0.000000e+00 : f32
    %538 = vector.broadcast %cst_468 : f32 to vector<16x128xf32>
    %539 = arith.maximumf %537, %538 : vector<16x128xf32>
    %c0_469 = arith.constant 0 : index
    %c128_470 = arith.constant 128 : index
    %540 = vector.load %arg9[%c0_469, %c128_470] : memref<16x384xf32, #tpu.memory_space<vmem>>, vector<16x128xf32>
    tpu.vector_store %arg9[%c0_469, %c128_470], %539 {strides = array<i32>} : memref<16x384xf32, #tpu.memory_space<vmem>>, vector<16x128xf32>,
    %c6 = arith.constant 6 : index
    %c0_471 = arith.constant 0 : index
    %c0_472 = arith.constant 0 : index
    %541 = vector.load %arg2[%c6, %c0_471, %c0_472] : memref<9x16x512xbf16, #tpu.memory_space<vmem>>, vector<1x16x512xbf16>
    %542 = vector.shape_cast %541 : vector<1x16x512xbf16> to vector<16x512xbf16>
    %c0_473 = arith.constant 0 : index
    %c113_474 = arith.constant 113 : index
    %543 = vector.load %arg9[%c0_473, %c113_474] : memref<16x384xf32, #tpu.memory_space<vmem>>, vector<16x128xf32>
    %544 = arith.truncf %543 : vector<16x128xf32> to vector<16x128xbf16>
    %c0_475 = arith.constant 0 : index
    %c114_476 = arith.constant 114 : index
    %545 = vector.load %arg9[%c0_475, %c114_476] : memref<16x384xf32, #tpu.memory_space<vmem>>, vector<16x128xf32>
    %546 = arith.truncf %545 : vector<16x128xf32> to vector<16x128xbf16>
    %c0_477 = arith.constant 0 : index
    %c115_478 = arith.constant 115 : index
    %547 = vector.load %arg9[%c0_477, %c115_478] : memref<16x384xf32, #tpu.memory_space<vmem>>, vector<16x128xf32>
    %548 = arith.truncf %547 : vector<16x128xf32> to vector<16x128xbf16>
    %c0_479 = arith.constant 0 : index
    %c116_480 = arith.constant 116 : index
    %549 = vector.load %arg9[%c0_479, %c116_480] : memref<16x384xf32, #tpu.memory_space<vmem>>, vector<16x128xf32>
    %550 = arith.truncf %549 : vector<16x128xf32> to vector<16x128xbf16>
    %c0_481 = arith.constant 0 : index
    %c117_482 = arith.constant 117 : index
    %551 = vector.load %arg9[%c0_481, %c117_482] : memref<16x384xf32, #tpu.memory_space<vmem>>, vector<16x128xf32>
    %552 = arith.truncf %551 : vector<16x128xf32> to vector<16x128xbf16>
    %c0_483 = arith.constant 0 : index
    %c118_484 = arith.constant 118 : index
    %553 = vector.load %arg9[%c0_483, %c118_484] : memref<16x384xf32, #tpu.memory_space<vmem>>, vector<16x128xf32>
    %554 = arith.truncf %553 : vector<16x128xf32> to vector<16x128xbf16>
    %c0_485 = arith.constant 0 : index
    %c119_486 = arith.constant 119 : index
    %555 = vector.load %arg9[%c0_485, %c119_486] : memref<16x384xf32, #tpu.memory_space<vmem>>, vector<16x128xf32>
    %556 = arith.truncf %555 : vector<16x128xf32> to vector<16x128xbf16>
    %c0_487 = arith.constant 0 : index
    %c120_488 = arith.constant 120 : index
    %557 = vector.load %arg9[%c0_487, %c120_488] : memref<16x384xf32, #tpu.memory_space<vmem>>, vector<16x128xf32>
    %558 = arith.truncf %557 : vector<16x128xf32> to vector<16x128xbf16>
    %c0_489 = arith.constant 0 : index
    %c121_490 = arith.constant 121 : index
    %559 = vector.load %arg9[%c0_489, %c121_490] : memref<16x384xf32, #tpu.memory_space<vmem>>, vector<16x128xf32>
    %560 = arith.truncf %559 : vector<16x128xf32> to vector<16x128xbf16>
    %c0_491 = arith.constant 0 : index
    %c122_492 = arith.constant 122 : index
    %561 = vector.load %arg9[%c0_491, %c122_492] : memref<16x384xf32, #tpu.memory_space<vmem>>, vector<16x128xf32>
    %562 = arith.truncf %561 : vector<16x128xf32> to vector<16x128xbf16>
    %c0_493 = arith.constant 0 : index
    %c123_494 = arith.constant 123 : index
    %563 = vector.load %arg9[%c0_493, %c123_494] : memref<16x384xf32, #tpu.memory_space<vmem>>, vector<16x128xf32>
    %564 = arith.truncf %563 : vector<16x128xf32> to vector<16x128xbf16>
    %c0_495 = arith.constant 0 : index
    %c124_496 = arith.constant 124 : index
    %565 = vector.load %arg9[%c0_495, %c124_496] : memref<16x384xf32, #tpu.memory_space<vmem>>, vector<16x128xf32>
    %566 = arith.truncf %565 : vector<16x128xf32> to vector<16x128xbf16>
    %c0_497 = arith.constant 0 : index
    %c125_498 = arith.constant 125 : index
    %567 = vector.load %arg9[%c0_497, %c125_498] : memref<16x384xf32, #tpu.memory_space<vmem>>, vector<16x128xf32>
    %568 = arith.truncf %567 : vector<16x128xf32> to vector<16x128xbf16>
    %c0_499 = arith.constant 0 : index
    %c126_500 = arith.constant 126 : index
    %569 = vector.load %arg9[%c0_499, %c126_500] : memref<16x384xf32, #tpu.memory_space<vmem>>, vector<16x128xf32>
    %570 = arith.truncf %569 : vector<16x128xf32> to vector<16x128xbf16>
    %c0_501 = arith.constant 0 : index
    %c127_502 = arith.constant 127 : index
    %571 = vector.load %arg9[%c0_501, %c127_502] : memref<16x384xf32, #tpu.memory_space<vmem>>, vector<16x128xf32>
    %572 = arith.truncf %571 : vector<16x128xf32> to vector<16x128xbf16>
    %c0_503 = arith.constant 0 : index
    %c128_504 = arith.constant 128 : index
    %573 = vector.load %arg9[%c0_503, %c128_504] : memref<16x384xf32, #tpu.memory_space<vmem>>, vector<16x128xf32>
    %574 = arith.truncf %573 : vector<16x128xf32> to vector<16x128xbf16>
    %575 = tpu.concatenate %544, %546, %548, %550, %552, %554, %556, %558, %560, %562, %564, %566, %568, %570, %572, %574 in 0 : vector<16x128xbf16>, vector<16x128xbf16>, vector<16x128xbf16>, vector<16x128xbf16>, vector<16x128xbf16>, vector<16x128xbf16>, vector<16x128xbf16>, vector<16x128xbf16>, vector<16x128xbf16>, vector<16x128xbf16>, vector<16x128xbf16>, vector<16x128xbf16>, vector<16x128xbf16>, vector<16x128xbf16>, vector<16x128xbf16>, vector<16x128xbf16> -> vector<256x128xbf16>
    %576 = vector.extract_strided_slice %542 {offsets = [0, 0], sizes = [16, 256], strides = [1, 1]} : vector<16x512xbf16> to vector<16x256xbf16>
    %cst_505 = arith.constant dense<0.000000e+00> : vector<16x128xf32>
    %577 = tpu.matmul %576, %575, %cst_505 {dimension_numbers = #tpu.dot_dimension_numbers<[1], [0], [0], [1], [0, 0, 1, 1], [], []>} : vector<16x256xbf16>, vector<256x128xbf16>, vector<16x128xf32> -> vector<16x128xf32>
    %c0_506 = arith.constant 0 : index
    %c129_507 = arith.constant 129 : index
    %578 = vector.load %arg9[%c0_506, %c129_507] : memref<16x384xf32, #tpu.memory_space<vmem>>, vector<16x128xf32>
    %579 = arith.truncf %578 : vector<16x128xf32> to vector<16x128xbf16>
    %c0_508 = arith.constant 0 : index
    %c130_509 = arith.constant 130 : index
    %580 = vector.load %arg9[%c0_508, %c130_509] : memref<16x384xf32, #tpu.memory_space<vmem>>, vector<16x128xf32>
    %581 = arith.truncf %580 : vector<16x128xf32> to vector<16x128xbf16>
    %c0_510 = arith.constant 0 : index
    %c131_511 = arith.constant 131 : index
    %582 = vector.load %arg9[%c0_510, %c131_511] : memref<16x384xf32, #tpu.memory_space<vmem>>, vector<16x128xf32>
    %583 = arith.truncf %582 : vector<16x128xf32> to vector<16x128xbf16>
    %c0_512 = arith.constant 0 : index
    %c132_513 = arith.constant 132 : index
    %584 = vector.load %arg9[%c0_512, %c132_513] : memref<16x384xf32, #tpu.memory_space<vmem>>, vector<16x128xf32>
    %585 = arith.truncf %584 : vector<16x128xf32> to vector<16x128xbf16>
    %c0_514 = arith.constant 0 : index
    %c133_515 = arith.constant 133 : index
    %586 = vector.load %arg9[%c0_514, %c133_515] : memref<16x384xf32, #tpu.memory_space<vmem>>, vector<16x128xf32>
    %587 = arith.truncf %586 : vector<16x128xf32> to vector<16x128xbf16>
    %c0_516 = arith.constant 0 : index
    %c134_517 = arith.constant 134 : index
    %588 = vector.load %arg9[%c0_516, %c134_517] : memref<16x384xf32, #tpu.memory_space<vmem>>, vector<16x128xf32>
    %589 = arith.truncf %588 : vector<16x128xf32> to vector<16x128xbf16>
    %c0_518 = arith.constant 0 : index
    %c135_519 = arith.constant 135 : index
    %590 = vector.load %arg9[%c0_518, %c135_519] : memref<16x384xf32, #tpu.memory_space<vmem>>, vector<16x128xf32>
    %591 = arith.truncf %590 : vector<16x128xf32> to vector<16x128xbf16>
    %c0_520 = arith.constant 0 : index
    %c136_521 = arith.constant 136 : index
    %592 = vector.load %arg9[%c0_520, %c136_521] : memref<16x384xf32, #tpu.memory_space<vmem>>, vector<16x128xf32>
    %593 = arith.truncf %592 : vector<16x128xf32> to vector<16x128xbf16>
    %c0_522 = arith.constant 0 : index
    %c137_523 = arith.constant 137 : index
    %594 = vector.load %arg9[%c0_522, %c137_523] : memref<16x384xf32, #tpu.memory_space<vmem>>, vector<16x128xf32>
    %595 = arith.truncf %594 : vector<16x128xf32> to vector<16x128xbf16>
    %c0_524 = arith.constant 0 : index
    %c138_525 = arith.constant 138 : index
    %596 = vector.load %arg9[%c0_524, %c138_525] : memref<16x384xf32, #tpu.memory_space<vmem>>, vector<16x128xf32>
    %597 = arith.truncf %596 : vector<16x128xf32> to vector<16x128xbf16>
    %c0_526 = arith.constant 0 : index
    %c139_527 = arith.constant 139 : index
    %598 = vector.load %arg9[%c0_526, %c139_527] : memref<16x384xf32, #tpu.memory_space<vmem>>, vector<16x128xf32>
    %599 = arith.truncf %598 : vector<16x128xf32> to vector<16x128xbf16>
    %c0_528 = arith.constant 0 : index
    %c140_529 = arith.constant 140 : index
    %600 = vector.load %arg9[%c0_528, %c140_529] : memref<16x384xf32, #tpu.memory_space<vmem>>, vector<16x128xf32>
    %601 = arith.truncf %600 : vector<16x128xf32> to vector<16x128xbf16>
    %c0_530 = arith.constant 0 : index
    %c141_531 = arith.constant 141 : index
    %602 = vector.load %arg9[%c0_530, %c141_531] : memref<16x384xf32, #tpu.memory_space<vmem>>, vector<16x128xf32>
    %603 = arith.truncf %602 : vector<16x128xf32> to vector<16x128xbf16>
    %c0_532 = arith.constant 0 : index
    %c142_533 = arith.constant 142 : index
    %604 = vector.load %arg9[%c0_532, %c142_533] : memref<16x384xf32, #tpu.memory_space<vmem>>, vector<16x128xf32>
    %605 = arith.truncf %604 : vector<16x128xf32> to vector<16x128xbf16>
    %c0_534 = arith.constant 0 : index
    %c143_535 = arith.constant 143 : index
    %606 = vector.load %arg9[%c0_534, %c143_535] : memref<16x384xf32, #tpu.memory_space<vmem>>, vector<16x128xf32>
    %607 = arith.truncf %606 : vector<16x128xf32> to vector<16x128xbf16>
    %c0_536 = arith.constant 0 : index
    %c144_537 = arith.constant 144 : index
    %608 = vector.load %arg9[%c0_536, %c144_537] : memref<16x384xf32, #tpu.memory_space<vmem>>, vector<16x128xf32>
    %609 = arith.truncf %608 : vector<16x128xf32> to vector<16x128xbf16>
    %610 = tpu.concatenate %579, %581, %583, %585, %587, %589, %591, %593, %595, %597, %599, %601, %603, %605, %607, %609 in 0 : vector<16x128xbf16>, vector<16x128xbf16>, vector<16x128xbf16>, vector<16x128xbf16>, vector<16x128xbf16>, vector<16x128xbf16>, vector<16x128xbf16>, vector<16x128xbf16>, vector<16x128xbf16>, vector<16x128xbf16>, vector<16x128xbf16>, vector<16x128xbf16>, vector<16x128xbf16>, vector<16x128xbf16>, vector<16x128xbf16>, vector<16x128xbf16> -> vector<256x128xbf16>
    %611 = vector.extract_strided_slice %542 {offsets = [0, 256], sizes = [16, 256], strides = [1, 1]} : vector<16x512xbf16> to vector<16x256xbf16>
    %cst_538 = arith.constant dense<0.000000e+00> : vector<16x128xf32>
    %612 = tpu.matmul %611, %610, %cst_538 {dimension_numbers = #tpu.dot_dimension_numbers<[1], [0], [0], [1], [0, 0, 1, 1], [], []>} : vector<16x256xbf16>, vector<256x128xbf16>, vector<16x128xf32> -> vector<16x128xf32>
    %613 = arith.addf %577, %612 : vector<16x128xf32>
    %c6_539 = arith.constant 6 : index
    %c0_540 = arith.constant 0 : index
    %c0_541 = arith.constant 0 : index
    %614 = vector.load %arg3[%c6_539, %c0_540, %c0_541] : memref<9x16x1xf32, #tpu.memory_space<vmem>>, vector<1x16x1xf32>
    %615 = vector.shape_cast %614 : vector<1x16x1xf32> to vector<16x1xf32>
    %616 = vector.broadcast %615 : vector<16x1xf32> to vector<16x128xf32>
    %617 = arith.addf %613, %616 : vector<16x128xf32>
    %cst_542 = arith.constant 0.000000e+00 : f32
    %618 = vector.broadcast %cst_542 : f32 to vector<16x128xf32>
    %619 = arith.maximumf %617, %618 : vector<16x128xf32>
    %c0_543 = arith.constant 0 : index
    %c128_544 = arith.constant 128 : index
    %620 = vector.load %arg9[%c0_543, %c128_544] : memref<16x384xf32, #tpu.memory_space<vmem>>, vector<16x128xf32>
    tpu.vector_store %arg9[%c0_543, %c128_544], %619 {strides = array<i32>} : memref<16x384xf32, #tpu.memory_space<vmem>>, vector<16x128xf32>,
    %c0_545 = arith.constant 0 : index
    %c127_546 = arith.constant 127 : index
    %621 = vector.load %arg9[%c0_545, %c127_546] : memref<16x384xf32, #tpu.memory_space<vmem>>, vector<16x128xf32>
    %622 = arith.truncf %621 : vector<16x128xf32> to vector<16x128xbf16>
    %c0_547 = arith.constant 0 : index
    %c128_548 = arith.constant 128 : index
    %623 = vector.load %arg9[%c0_547, %c128_548] : memref<16x384xf32, #tpu.memory_space<vmem>>, vector<16x128xf32>
    %624 = arith.truncf %623 : vector<16x128xf32> to vector<16x128xbf16>
    %c0_549 = arith.constant 0 : index
    %c129_550 = arith.constant 129 : index
    %625 = vector.load %arg9[%c0_549, %c129_550] : memref<16x384xf32, #tpu.memory_space<vmem>>, vector<16x128xf32>
    %626 = arith.truncf %625 : vector<16x128xf32> to vector<16x128xbf16>
    %c0_551 = arith.constant 0 : index
    %c130_552 = arith.constant 130 : index
    %627 = vector.load %arg9[%c0_551, %c130_552] : memref<16x384xf32, #tpu.memory_space<vmem>>, vector<16x128xf32>
    %628 = arith.truncf %627 : vector<16x128xf32> to vector<16x128xbf16>
    %c0_553 = arith.constant 0 : index
    %c131_554 = arith.constant 131 : index
    %629 = vector.load %arg9[%c0_553, %c131_554] : memref<16x384xf32, #tpu.memory_space<vmem>>, vector<16x128xf32>
    %630 = arith.truncf %629 : vector<16x128xf32> to vector<16x128xbf16>
    %c0_555 = arith.constant 0 : index
    %c132_556 = arith.constant 132 : index
    %631 = vector.load %arg9[%c0_555, %c132_556] : memref<16x384xf32, #tpu.memory_space<vmem>>, vector<16x128xf32>
    %632 = arith.truncf %631 : vector<16x128xf32> to vector<16x128xbf16>
    %c0_557 = arith.constant 0 : index
    %c133_558 = arith.constant 133 : index
    %633 = vector.load %arg9[%c0_557, %c133_558] : memref<16x384xf32, #tpu.memory_space<vmem>>, vector<16x128xf32>
    %634 = arith.truncf %633 : vector<16x128xf32> to vector<16x128xbf16>
    %c0_559 = arith.constant 0 : index
    %c134_560 = arith.constant 134 : index
    %635 = vector.load %arg9[%c0_559, %c134_560] : memref<16x384xf32, #tpu.memory_space<vmem>>, vector<16x128xf32>
    %636 = arith.truncf %635 : vector<16x128xf32> to vector<16x128xbf16>
    %637 = tpu.concatenate %622, %624, %626, %628, %630, %632, %634, %636 in 0 : vector<16x128xbf16>, vector<16x128xbf16>, vector<16x128xbf16>, vector<16x128xbf16>, vector<16x128xbf16>, vector<16x128xbf16>, vector<16x128xbf16>, vector<16x128xbf16> -> vector<128x128xbf16>
    %c2_561 = arith.constant 2 : index
    %c0_562 = arith.constant 0 : index
    %c0_563 = arith.constant 0 : index
    %638 = vector.load %arg4[%c2_561, %c0_562, %c0_563] : memref<4x16x128xbf16, #tpu.memory_space<vmem>>, vector<1x16x128xbf16>
    %639 = vector.shape_cast %638 : vector<1x16x128xbf16> to vector<16x128xbf16>
    %cst_564 = arith.constant dense<0.000000e+00> : vector<16x128xf32>
    %640 = tpu.matmul %639, %637, %cst_564 {dimension_numbers = #tpu.dot_dimension_numbers<[1], [0], [0], [1], [0, 0, 1, 1], [], []>} : vector<16x128xbf16>, vector<128x128xbf16>, vector<16x128xf32> -> vector<16x128xf32>
    %c2_565 = arith.constant 2 : index
    %c0_566 = arith.constant 0 : index
    %c0_567 = arith.constant 0 : index
    %641 = vector.load %arg5[%c2_565, %c0_566, %c0_567] : memref<4x16x1xf32, #tpu.memory_space<vmem>>, vector<1x16x1xf32>
    %642 = vector.shape_cast %641 : vector<1x16x1xf32> to vector<16x1xf32>
    %643 = vector.broadcast %642 : vector<16x1xf32> to vector<16x128xf32>
    %644 = arith.addf %640, %643 : vector<16x128xf32>
    %cst_568 = arith.constant 0.000000e+00 : f32
    %645 = vector.broadcast %cst_568 : f32 to vector<16x128xf32>
    %646 = arith.maximumf %644, %645 : vector<16x128xf32>
    %647 = arith.addf %646, %539 : vector<16x128xf32>
    %c0_569 = arith.constant 0 : index
    %c128_570 = arith.constant 128 : index
    %648 = vector.load %arg9[%c0_569, %c128_570] : memref<16x384xf32, #tpu.memory_space<vmem>>, vector<16x128xf32>
    tpu.vector_store %arg9[%c0_569, %c128_570], %647 {strides = array<i32>} : memref<16x384xf32, #tpu.memory_space<vmem>>, vector<16x128xf32>,
    %c7 = arith.constant 7 : index
    %c0_571 = arith.constant 0 : index
    %c0_572 = arith.constant 0 : index
    %649 = vector.load %arg2[%c7, %c0_571, %c0_572] : memref<9x16x512xbf16, #tpu.memory_space<vmem>>, vector<1x16x512xbf16>
    %650 = vector.shape_cast %649 : vector<1x16x512xbf16> to vector<16x512xbf16>
    %c0_573 = arith.constant 0 : index
    %c113_574 = arith.constant 113 : index
    %651 = vector.load %arg9[%c0_573, %c113_574] : memref<16x384xf32, #tpu.memory_space<vmem>>, vector<16x128xf32>
    %652 = arith.truncf %651 : vector<16x128xf32> to vector<16x128xbf16>
    %c0_575 = arith.constant 0 : index
    %c114_576 = arith.constant 114 : index
    %653 = vector.load %arg9[%c0_575, %c114_576] : memref<16x384xf32, #tpu.memory_space<vmem>>, vector<16x128xf32>
    %654 = arith.truncf %653 : vector<16x128xf32> to vector<16x128xbf16>
    %c0_577 = arith.constant 0 : index
    %c115_578 = arith.constant 115 : index
    %655 = vector.load %arg9[%c0_577, %c115_578] : memref<16x384xf32, #tpu.memory_space<vmem>>, vector<16x128xf32>
    %656 = arith.truncf %655 : vector<16x128xf32> to vector<16x128xbf16>
    %c0_579 = arith.constant 0 : index
    %c116_580 = arith.constant 116 : index
    %657 = vector.load %arg9[%c0_579, %c116_580] : memref<16x384xf32, #tpu.memory_space<vmem>>, vector<16x128xf32>
    %658 = arith.truncf %657 : vector<16x128xf32> to vector<16x128xbf16>
    %c0_581 = arith.constant 0 : index
    %c117_582 = arith.constant 117 : index
    %659 = vector.load %arg9[%c0_581, %c117_582] : memref<16x384xf32, #tpu.memory_space<vmem>>, vector<16x128xf32>
    %660 = arith.truncf %659 : vector<16x128xf32> to vector<16x128xbf16>
    %c0_583 = arith.constant 0 : index
    %c118_584 = arith.constant 118 : index
    %661 = vector.load %arg9[%c0_583, %c118_584] : memref<16x384xf32, #tpu.memory_space<vmem>>, vector<16x128xf32>
    %662 = arith.truncf %661 : vector<16x128xf32> to vector<16x128xbf16>
    %c0_585 = arith.constant 0 : index
    %c119_586 = arith.constant 119 : index
    %663 = vector.load %arg9[%c0_585, %c119_586] : memref<16x384xf32, #tpu.memory_space<vmem>>, vector<16x128xf32>
    %664 = arith.truncf %663 : vector<16x128xf32> to vector<16x128xbf16>
    %c0_587 = arith.constant 0 : index
    %c120_588 = arith.constant 120 : index
    %665 = vector.load %arg9[%c0_587, %c120_588] : memref<16x384xf32, #tpu.memory_space<vmem>>, vector<16x128xf32>
    %666 = arith.truncf %665 : vector<16x128xf32> to vector<16x128xbf16>
    %c0_589 = arith.constant 0 : index
    %c121_590 = arith.constant 121 : index
    %667 = vector.load %arg9[%c0_589, %c121_590] : memref<16x384xf32, #tpu.memory_space<vmem>>, vector<16x128xf32>
    %668 = arith.truncf %667 : vector<16x128xf32> to vector<16x128xbf16>
    %c0_591 = arith.constant 0 : index
    %c122_592 = arith.constant 122 : index
    %669 = vector.load %arg9[%c0_591, %c122_592] : memref<16x384xf32, #tpu.memory_space<vmem>>, vector<16x128xf32>
    %670 = arith.truncf %669 : vector<16x128xf32> to vector<16x128xbf16>
    %c0_593 = arith.constant 0 : index
    %c123_594 = arith.constant 123 : index
    %671 = vector.load %arg9[%c0_593, %c123_594] : memref<16x384xf32, #tpu.memory_space<vmem>>, vector<16x128xf32>
    %672 = arith.truncf %671 : vector<16x128xf32> to vector<16x128xbf16>
    %c0_595 = arith.constant 0 : index
    %c124_596 = arith.constant 124 : index
    %673 = vector.load %arg9[%c0_595, %c124_596] : memref<16x384xf32, #tpu.memory_space<vmem>>, vector<16x128xf32>
    %674 = arith.truncf %673 : vector<16x128xf32> to vector<16x128xbf16>
    %c0_597 = arith.constant 0 : index
    %c125_598 = arith.constant 125 : index
    %675 = vector.load %arg9[%c0_597, %c125_598] : memref<16x384xf32, #tpu.memory_space<vmem>>, vector<16x128xf32>
    %676 = arith.truncf %675 : vector<16x128xf32> to vector<16x128xbf16>
    %c0_599 = arith.constant 0 : index
    %c126_600 = arith.constant 126 : index
    %677 = vector.load %arg9[%c0_599, %c126_600] : memref<16x384xf32, #tpu.memory_space<vmem>>, vector<16x128xf32>
    %678 = arith.truncf %677 : vector<16x128xf32> to vector<16x128xbf16>
    %c0_601 = arith.constant 0 : index
    %c127_602 = arith.constant 127 : index
    %679 = vector.load %arg9[%c0_601, %c127_602] : memref<16x384xf32, #tpu.memory_space<vmem>>, vector<16x128xf32>
    %680 = arith.truncf %679 : vector<16x128xf32> to vector<16x128xbf16>
    %c0_603 = arith.constant 0 : index
    %c128_604 = arith.constant 128 : index
    %681 = vector.load %arg9[%c0_603, %c128_604] : memref<16x384xf32, #tpu.memory_space<vmem>>, vector<16x128xf32>
    %682 = arith.truncf %681 : vector<16x128xf32> to vector<16x128xbf16>
    %683 = tpu.concatenate %652, %654, %656, %658, %660, %662, %664, %666, %668, %670, %672, %674, %676, %678, %680, %682 in 0 : vector<16x128xbf16>, vector<16x128xbf16>, vector<16x128xbf16>, vector<16x128xbf16>, vector<16x128xbf16>, vector<16x128xbf16>, vector<16x128xbf16>, vector<16x128xbf16>, vector<16x128xbf16>, vector<16x128xbf16>, vector<16x128xbf16>, vector<16x128xbf16>, vector<16x128xbf16>, vector<16x128xbf16>, vector<16x128xbf16>, vector<16x128xbf16> -> vector<256x128xbf16>
    %684 = vector.extract_strided_slice %650 {offsets = [0, 0], sizes = [16, 256], strides = [1, 1]} : vector<16x512xbf16> to vector<16x256xbf16>
    %cst_605 = arith.constant dense<0.000000e+00> : vector<16x128xf32>
    %685 = tpu.matmul %684, %683, %cst_605 {dimension_numbers = #tpu.dot_dimension_numbers<[1], [0], [0], [1], [0, 0, 1, 1], [], []>} : vector<16x256xbf16>, vector<256x128xbf16>, vector<16x128xf32> -> vector<16x128xf32>
    %c0_606 = arith.constant 0 : index
    %c129_607 = arith.constant 129 : index
    %686 = vector.load %arg9[%c0_606, %c129_607] : memref<16x384xf32, #tpu.memory_space<vmem>>, vector<16x128xf32>
    %687 = arith.truncf %686 : vector<16x128xf32> to vector<16x128xbf16>
    %c0_608 = arith.constant 0 : index
    %c130_609 = arith.constant 130 : index
    %688 = vector.load %arg9[%c0_608, %c130_609] : memref<16x384xf32, #tpu.memory_space<vmem>>, vector<16x128xf32>
    %689 = arith.truncf %688 : vector<16x128xf32> to vector<16x128xbf16>
    %c0_610 = arith.constant 0 : index
    %c131_611 = arith.constant 131 : index
    %690 = vector.load %arg9[%c0_610, %c131_611] : memref<16x384xf32, #tpu.memory_space<vmem>>, vector<16x128xf32>
    %691 = arith.truncf %690 : vector<16x128xf32> to vector<16x128xbf16>
    %c0_612 = arith.constant 0 : index
    %c132_613 = arith.constant 132 : index
    %692 = vector.load %arg9[%c0_612, %c132_613] : memref<16x384xf32, #tpu.memory_space<vmem>>, vector<16x128xf32>
    %693 = arith.truncf %692 : vector<16x128xf32> to vector<16x128xbf16>
    %c0_614 = arith.constant 0 : index
    %c133_615 = arith.constant 133 : index
    %694 = vector.load %arg9[%c0_614, %c133_615] : memref<16x384xf32, #tpu.memory_space<vmem>>, vector<16x128xf32>
    %695 = arith.truncf %694 : vector<16x128xf32> to vector<16x128xbf16>
    %c0_616 = arith.constant 0 : index
    %c134_617 = arith.constant 134 : index
    %696 = vector.load %arg9[%c0_616, %c134_617] : memref<16x384xf32, #tpu.memory_space<vmem>>, vector<16x128xf32>
    %697 = arith.truncf %696 : vector<16x128xf32> to vector<16x128xbf16>
    %c0_618 = arith.constant 0 : index
    %c135_619 = arith.constant 135 : index
    %698 = vector.load %arg9[%c0_618, %c135_619] : memref<16x384xf32, #tpu.memory_space<vmem>>, vector<16x128xf32>
    %699 = arith.truncf %698 : vector<16x128xf32> to vector<16x128xbf16>
    %c0_620 = arith.constant 0 : index
    %c136_621 = arith.constant 136 : index
    %700 = vector.load %arg9[%c0_620, %c136_621] : memref<16x384xf32, #tpu.memory_space<vmem>>, vector<16x128xf32>
    %701 = arith.truncf %700 : vector<16x128xf32> to vector<16x128xbf16>
    %c0_622 = arith.constant 0 : index
    %c137_623 = arith.constant 137 : index
    %702 = vector.load %arg9[%c0_622, %c137_623] : memref<16x384xf32, #tpu.memory_space<vmem>>, vector<16x128xf32>
    %703 = arith.truncf %702 : vector<16x128xf32> to vector<16x128xbf16>
    %c0_624 = arith.constant 0 : index
    %c138_625 = arith.constant 138 : index
    %704 = vector.load %arg9[%c0_624, %c138_625] : memref<16x384xf32, #tpu.memory_space<vmem>>, vector<16x128xf32>
    %705 = arith.truncf %704 : vector<16x128xf32> to vector<16x128xbf16>
    %c0_626 = arith.constant 0 : index
    %c139_627 = arith.constant 139 : index
    %706 = vector.load %arg9[%c0_626, %c139_627] : memref<16x384xf32, #tpu.memory_space<vmem>>, vector<16x128xf32>
    %707 = arith.truncf %706 : vector<16x128xf32> to vector<16x128xbf16>
    %c0_628 = arith.constant 0 : index
    %c140_629 = arith.constant 140 : index
    %708 = vector.load %arg9[%c0_628, %c140_629] : memref<16x384xf32, #tpu.memory_space<vmem>>, vector<16x128xf32>
    %709 = arith.truncf %708 : vector<16x128xf32> to vector<16x128xbf16>
    %c0_630 = arith.constant 0 : index
    %c141_631 = arith.constant 141 : index
    %710 = vector.load %arg9[%c0_630, %c141_631] : memref<16x384xf32, #tpu.memory_space<vmem>>, vector<16x128xf32>
    %711 = arith.truncf %710 : vector<16x128xf32> to vector<16x128xbf16>
    %c0_632 = arith.constant 0 : index
    %c142_633 = arith.constant 142 : index
    %712 = vector.load %arg9[%c0_632, %c142_633] : memref<16x384xf32, #tpu.memory_space<vmem>>, vector<16x128xf32>
    %713 = arith.truncf %712 : vector<16x128xf32> to vector<16x128xbf16>
    %c0_634 = arith.constant 0 : index
    %c143_635 = arith.constant 143 : index
    %714 = vector.load %arg9[%c0_634, %c143_635] : memref<16x384xf32, #tpu.memory_space<vmem>>, vector<16x128xf32>
    %715 = arith.truncf %714 : vector<16x128xf32> to vector<16x128xbf16>
    %c0_636 = arith.constant 0 : index
    %c144_637 = arith.constant 144 : index
    %716 = vector.load %arg9[%c0_636, %c144_637] : memref<16x384xf32, #tpu.memory_space<vmem>>, vector<16x128xf32>
    %717 = arith.truncf %716 : vector<16x128xf32> to vector<16x128xbf16>
    %718 = tpu.concatenate %687, %689, %691, %693, %695, %697, %699, %701, %703, %705, %707, %709, %711, %713, %715, %717 in 0 : vector<16x128xbf16>, vector<16x128xbf16>, vector<16x128xbf16>, vector<16x128xbf16>, vector<16x128xbf16>, vector<16x128xbf16>, vector<16x128xbf16>, vector<16x128xbf16>, vector<16x128xbf16>, vector<16x128xbf16>, vector<16x128xbf16>, vector<16x128xbf16>, vector<16x128xbf16>, vector<16x128xbf16>, vector<16x128xbf16>, vector<16x128xbf16> -> vector<256x128xbf16>
    %719 = vector.extract_strided_slice %650 {offsets = [0, 256], sizes = [16, 256], strides = [1, 1]} : vector<16x512xbf16> to vector<16x256xbf16>
    %cst_638 = arith.constant dense<0.000000e+00> : vector<16x128xf32>
    %720 = tpu.matmul %719, %718, %cst_638 {dimension_numbers = #tpu.dot_dimension_numbers<[1], [0], [0], [1], [0, 0, 1, 1], [], []>} : vector<16x256xbf16>, vector<256x128xbf16>, vector<16x128xf32> -> vector<16x128xf32>
    %721 = arith.addf %685, %720 : vector<16x128xf32>
    %c7_639 = arith.constant 7 : index
    %c0_640 = arith.constant 0 : index
    %c0_641 = arith.constant 0 : index
    %722 = vector.load %arg3[%c7_639, %c0_640, %c0_641] : memref<9x16x1xf32, #tpu.memory_space<vmem>>, vector<1x16x1xf32>
    %723 = vector.shape_cast %722 : vector<1x16x1xf32> to vector<16x1xf32>
    %724 = vector.broadcast %723 : vector<16x1xf32> to vector<16x128xf32>
    %725 = arith.addf %721, %724 : vector<16x128xf32>
    %cst_642 = arith.constant 0.000000e+00 : f32
    %726 = vector.broadcast %cst_642 : f32 to vector<16x128xf32>
    %727 = arith.maximumf %725, %726 : vector<16x128xf32>
    %c0_643 = arith.constant 0 : index
    %c128_644 = arith.constant 128 : index
    %728 = vector.load %arg9[%c0_643, %c128_644] : memref<16x384xf32, #tpu.memory_space<vmem>>, vector<16x128xf32>
    tpu.vector_store %arg9[%c0_643, %c128_644], %727 {strides = array<i32>} : memref<16x384xf32, #tpu.memory_space<vmem>>, vector<16x128xf32>,
    %c8 = arith.constant 8 : index
    %c0_645 = arith.constant 0 : index
    %c0_646 = arith.constant 0 : index
    %729 = vector.load %arg2[%c8, %c0_645, %c0_646] : memref<9x16x512xbf16, #tpu.memory_space<vmem>>, vector<1x16x512xbf16>
    %730 = vector.shape_cast %729 : vector<1x16x512xbf16> to vector<16x512xbf16>
    %c0_647 = arith.constant 0 : index
    %c113_648 = arith.constant 113 : index
    %731 = vector.load %arg9[%c0_647, %c113_648] : memref<16x384xf32, #tpu.memory_space<vmem>>, vector<16x128xf32>
    %732 = arith.truncf %731 : vector<16x128xf32> to vector<16x128xbf16>
    %c0_649 = arith.constant 0 : index
    %c114_650 = arith.constant 114 : index
    %733 = vector.load %arg9[%c0_649, %c114_650] : memref<16x384xf32, #tpu.memory_space<vmem>>, vector<16x128xf32>
    %734 = arith.truncf %733 : vector<16x128xf32> to vector<16x128xbf16>
    %c0_651 = arith.constant 0 : index
    %c115_652 = arith.constant 115 : index
    %735 = vector.load %arg9[%c0_651, %c115_652] : memref<16x384xf32, #tpu.memory_space<vmem>>, vector<16x128xf32>
    %736 = arith.truncf %735 : vector<16x128xf32> to vector<16x128xbf16>
    %c0_653 = arith.constant 0 : index
    %c116_654 = arith.constant 116 : index
    %737 = vector.load %arg9[%c0_653, %c116_654] : memref<16x384xf32, #tpu.memory_space<vmem>>, vector<16x128xf32>
    %738 = arith.truncf %737 : vector<16x128xf32> to vector<16x128xbf16>
    %c0_655 = arith.constant 0 : index
    %c117_656 = arith.constant 117 : index
    %739 = vector.load %arg9[%c0_655, %c117_656] : memref<16x384xf32, #tpu.memory_space<vmem>>, vector<16x128xf32>
    %740 = arith.truncf %739 : vector<16x128xf32> to vector<16x128xbf16>
    %c0_657 = arith.constant 0 : index
    %c118_658 = arith.constant 118 : index
    %741 = vector.load %arg9[%c0_657, %c118_658] : memref<16x384xf32, #tpu.memory_space<vmem>>, vector<16x128xf32>
    %742 = arith.truncf %741 : vector<16x128xf32> to vector<16x128xbf16>
    %c0_659 = arith.constant 0 : index
    %c119_660 = arith.constant 119 : index
    %743 = vector.load %arg9[%c0_659, %c119_660] : memref<16x384xf32, #tpu.memory_space<vmem>>, vector<16x128xf32>
    %744 = arith.truncf %743 : vector<16x128xf32> to vector<16x128xbf16>
    %c0_661 = arith.constant 0 : index
    %c120_662 = arith.constant 120 : index
    %745 = vector.load %arg9[%c0_661, %c120_662] : memref<16x384xf32, #tpu.memory_space<vmem>>, vector<16x128xf32>
    %746 = arith.truncf %745 : vector<16x128xf32> to vector<16x128xbf16>
    %c0_663 = arith.constant 0 : index
    %c121_664 = arith.constant 121 : index
    %747 = vector.load %arg9[%c0_663, %c121_664] : memref<16x384xf32, #tpu.memory_space<vmem>>, vector<16x128xf32>
    %748 = arith.truncf %747 : vector<16x128xf32> to vector<16x128xbf16>
    %c0_665 = arith.constant 0 : index
    %c122_666 = arith.constant 122 : index
    %749 = vector.load %arg9[%c0_665, %c122_666] : memref<16x384xf32, #tpu.memory_space<vmem>>, vector<16x128xf32>
    %750 = arith.truncf %749 : vector<16x128xf32> to vector<16x128xbf16>
    %c0_667 = arith.constant 0 : index
    %c123_668 = arith.constant 123 : index
    %751 = vector.load %arg9[%c0_667, %c123_668] : memref<16x384xf32, #tpu.memory_space<vmem>>, vector<16x128xf32>
    %752 = arith.truncf %751 : vector<16x128xf32> to vector<16x128xbf16>
    %c0_669 = arith.constant 0 : index
    %c124_670 = arith.constant 124 : index
    %753 = vector.load %arg9[%c0_669, %c124_670] : memref<16x384xf32, #tpu.memory_space<vmem>>, vector<16x128xf32>
    %754 = arith.truncf %753 : vector<16x128xf32> to vector<16x128xbf16>
    %c0_671 = arith.constant 0 : index
    %c125_672 = arith.constant 125 : index
    %755 = vector.load %arg9[%c0_671, %c125_672] : memref<16x384xf32, #tpu.memory_space<vmem>>, vector<16x128xf32>
    %756 = arith.truncf %755 : vector<16x128xf32> to vector<16x128xbf16>
    %c0_673 = arith.constant 0 : index
    %c126_674 = arith.constant 126 : index
    %757 = vector.load %arg9[%c0_673, %c126_674] : memref<16x384xf32, #tpu.memory_space<vmem>>, vector<16x128xf32>
    %758 = arith.truncf %757 : vector<16x128xf32> to vector<16x128xbf16>
    %c0_675 = arith.constant 0 : index
    %c127_676 = arith.constant 127 : index
    %759 = vector.load %arg9[%c0_675, %c127_676] : memref<16x384xf32, #tpu.memory_space<vmem>>, vector<16x128xf32>
    %760 = arith.truncf %759 : vector<16x128xf32> to vector<16x128xbf16>
    %c0_677 = arith.constant 0 : index
    %c128_678 = arith.constant 128 : index
    %761 = vector.load %arg9[%c0_677, %c128_678] : memref<16x384xf32, #tpu.memory_space<vmem>>, vector<16x128xf32>
    %762 = arith.truncf %761 : vector<16x128xf32> to vector<16x128xbf16>
    %763 = tpu.concatenate %732, %734, %736, %738, %740, %742, %744, %746, %748, %750, %752, %754, %756, %758, %760, %762 in 0 : vector<16x128xbf16>, vector<16x128xbf16>, vector<16x128xbf16>, vector<16x128xbf16>, vector<16x128xbf16>, vector<16x128xbf16>, vector<16x128xbf16>, vector<16x128xbf16>, vector<16x128xbf16>, vector<16x128xbf16>, vector<16x128xbf16>, vector<16x128xbf16>, vector<16x128xbf16>, vector<16x128xbf16>, vector<16x128xbf16>, vector<16x128xbf16> -> vector<256x128xbf16>
    %764 = vector.extract_strided_slice %730 {offsets = [0, 0], sizes = [16, 256], strides = [1, 1]} : vector<16x512xbf16> to vector<16x256xbf16>
    %cst_679 = arith.constant dense<0.000000e+00> : vector<16x128xf32>
    %765 = tpu.matmul %764, %763, %cst_679 {dimension_numbers = #tpu.dot_dimension_numbers<[1], [0], [0], [1], [0, 0, 1, 1], [], []>} : vector<16x256xbf16>, vector<256x128xbf16>, vector<16x128xf32> -> vector<16x128xf32>
    %c0_680 = arith.constant 0 : index
    %c129_681 = arith.constant 129 : index
    %766 = vector.load %arg9[%c0_680, %c129_681] : memref<16x384xf32, #tpu.memory_space<vmem>>, vector<16x128xf32>
    %767 = arith.truncf %766 : vector<16x128xf32> to vector<16x128xbf16>
    %c0_682 = arith.constant 0 : index
    %c130_683 = arith.constant 130 : index
    %768 = vector.load %arg9[%c0_682, %c130_683] : memref<16x384xf32, #tpu.memory_space<vmem>>, vector<16x128xf32>
    %769 = arith.truncf %768 : vector<16x128xf32> to vector<16x128xbf16>
    %c0_684 = arith.constant 0 : index
    %c131_685 = arith.constant 131 : index
    %770 = vector.load %arg9[%c0_684, %c131_685] : memref<16x384xf32, #tpu.memory_space<vmem>>, vector<16x128xf32>
    %771 = arith.truncf %770 : vector<16x128xf32> to vector<16x128xbf16>
    %c0_686 = arith.constant 0 : index
    %c132_687 = arith.constant 132 : index
    %772 = vector.load %arg9[%c0_686, %c132_687] : memref<16x384xf32, #tpu.memory_space<vmem>>, vector<16x128xf32>
    %773 = arith.truncf %772 : vector<16x128xf32> to vector<16x128xbf16>
    %c0_688 = arith.constant 0 : index
    %c133_689 = arith.constant 133 : index
    %774 = vector.load %arg9[%c0_688, %c133_689] : memref<16x384xf32, #tpu.memory_space<vmem>>, vector<16x128xf32>
    %775 = arith.truncf %774 : vector<16x128xf32> to vector<16x128xbf16>
    %c0_690 = arith.constant 0 : index
    %c134_691 = arith.constant 134 : index
    %776 = vector.load %arg9[%c0_690, %c134_691] : memref<16x384xf32, #tpu.memory_space<vmem>>, vector<16x128xf32>
    %777 = arith.truncf %776 : vector<16x128xf32> to vector<16x128xbf16>
    %c0_692 = arith.constant 0 : index
    %c135_693 = arith.constant 135 : index
    %778 = vector.load %arg9[%c0_692, %c135_693] : memref<16x384xf32, #tpu.memory_space<vmem>>, vector<16x128xf32>
    %779 = arith.truncf %778 : vector<16x128xf32> to vector<16x128xbf16>
    %c0_694 = arith.constant 0 : index
    %c136_695 = arith.constant 136 : index
    %780 = vector.load %arg9[%c0_694, %c136_695] : memref<16x384xf32, #tpu.memory_space<vmem>>, vector<16x128xf32>
    %781 = arith.truncf %780 : vector<16x128xf32> to vector<16x128xbf16>
    %c0_696 = arith.constant 0 : index
    %c137_697 = arith.constant 137 : index
    %782 = vector.load %arg9[%c0_696, %c137_697] : memref<16x384xf32, #tpu.memory_space<vmem>>, vector<16x128xf32>
    %783 = arith.truncf %782 : vector<16x128xf32> to vector<16x128xbf16>
    %c0_698 = arith.constant 0 : index
    %c138_699 = arith.constant 138 : index
    %784 = vector.load %arg9[%c0_698, %c138_699] : memref<16x384xf32, #tpu.memory_space<vmem>>, vector<16x128xf32>
    %785 = arith.truncf %784 : vector<16x128xf32> to vector<16x128xbf16>
    %c0_700 = arith.constant 0 : index
    %c139_701 = arith.constant 139 : index
    %786 = vector.load %arg9[%c0_700, %c139_701] : memref<16x384xf32, #tpu.memory_space<vmem>>, vector<16x128xf32>
    %787 = arith.truncf %786 : vector<16x128xf32> to vector<16x128xbf16>
    %c0_702 = arith.constant 0 : index
    %c140_703 = arith.constant 140 : index
    %788 = vector.load %arg9[%c0_702, %c140_703] : memref<16x384xf32, #tpu.memory_space<vmem>>, vector<16x128xf32>
    %789 = arith.truncf %788 : vector<16x128xf32> to vector<16x128xbf16>
    %c0_704 = arith.constant 0 : index
    %c141_705 = arith.constant 141 : index
    %790 = vector.load %arg9[%c0_704, %c141_705] : memref<16x384xf32, #tpu.memory_space<vmem>>, vector<16x128xf32>
    %791 = arith.truncf %790 : vector<16x128xf32> to vector<16x128xbf16>
    %c0_706 = arith.constant 0 : index
    %c142_707 = arith.constant 142 : index
    %792 = vector.load %arg9[%c0_706, %c142_707] : memref<16x384xf32, #tpu.memory_space<vmem>>, vector<16x128xf32>
    %793 = arith.truncf %792 : vector<16x128xf32> to vector<16x128xbf16>
    %c0_708 = arith.constant 0 : index
    %c143_709 = arith.constant 143 : index
    %794 = vector.load %arg9[%c0_708, %c143_709] : memref<16x384xf32, #tpu.memory_space<vmem>>, vector<16x128xf32>
    %795 = arith.truncf %794 : vector<16x128xf32> to vector<16x128xbf16>
    %c0_710 = arith.constant 0 : index
    %c144_711 = arith.constant 144 : index
    %796 = vector.load %arg9[%c0_710, %c144_711] : memref<16x384xf32, #tpu.memory_space<vmem>>, vector<16x128xf32>
    %797 = arith.truncf %796 : vector<16x128xf32> to vector<16x128xbf16>
    %798 = tpu.concatenate %767, %769, %771, %773, %775, %777, %779, %781, %783, %785, %787, %789, %791, %793, %795, %797 in 0 : vector<16x128xbf16>, vector<16x128xbf16>, vector<16x128xbf16>, vector<16x128xbf16>, vector<16x128xbf16>, vector<16x128xbf16>, vector<16x128xbf16>, vector<16x128xbf16>, vector<16x128xbf16>, vector<16x128xbf16>, vector<16x128xbf16>, vector<16x128xbf16>, vector<16x128xbf16>, vector<16x128xbf16>, vector<16x128xbf16>, vector<16x128xbf16> -> vector<256x128xbf16>
    %799 = vector.extract_strided_slice %730 {offsets = [0, 256], sizes = [16, 256], strides = [1, 1]} : vector<16x512xbf16> to vector<16x256xbf16>
    %cst_712 = arith.constant dense<0.000000e+00> : vector<16x128xf32>
    %800 = tpu.matmul %799, %798, %cst_712 {dimension_numbers = #tpu.dot_dimension_numbers<[1], [0], [0], [1], [0, 0, 1, 1], [], []>} : vector<16x256xbf16>, vector<256x128xbf16>, vector<16x128xf32> -> vector<16x128xf32>
    %801 = arith.addf %765, %800 : vector<16x128xf32>
    %c8_713 = arith.constant 8 : index
    %c0_714 = arith.constant 0 : index
    %c0_715 = arith.constant 0 : index
    %802 = vector.load %arg3[%c8_713, %c0_714, %c0_715] : memref<9x16x1xf32, #tpu.memory_space<vmem>>, vector<1x16x1xf32>
    %803 = vector.shape_cast %802 : vector<1x16x1xf32> to vector<16x1xf32>
    %804 = vector.broadcast %803 : vector<16x1xf32> to vector<16x128xf32>
    %805 = arith.addf %801, %804 : vector<16x128xf32>
    %cst_716 = arith.constant 0.000000e+00 : f32
    %806 = vector.broadcast %cst_716 : f32 to vector<16x128xf32>
    %807 = arith.maximumf %805, %806 : vector<16x128xf32>
    %c0_717 = arith.constant 0 : index
    %c128_718 = arith.constant 128 : index
    %808 = vector.load %arg9[%c0_717, %c128_718] : memref<16x384xf32, #tpu.memory_space<vmem>>, vector<16x128xf32>
    tpu.vector_store %arg9[%c0_717, %c128_718], %807 {strides = array<i32>} : memref<16x384xf32, #tpu.memory_space<vmem>>, vector<16x128xf32>,
    %c0_719 = arith.constant 0 : index
    %c127_720 = arith.constant 127 : index
    %809 = vector.load %arg9[%c0_719, %c127_720] : memref<16x384xf32, #tpu.memory_space<vmem>>, vector<16x128xf32>
    %810 = arith.truncf %809 : vector<16x128xf32> to vector<16x128xbf16>
    %c0_721 = arith.constant 0 : index
    %c128_722 = arith.constant 128 : index
    %811 = vector.load %arg9[%c0_721, %c128_722] : memref<16x384xf32, #tpu.memory_space<vmem>>, vector<16x128xf32>
    %812 = arith.truncf %811 : vector<16x128xf32> to vector<16x128xbf16>
    %c0_723 = arith.constant 0 : index
    %c129_724 = arith.constant 129 : index
    %813 = vector.load %arg9[%c0_723, %c129_724] : memref<16x384xf32, #tpu.memory_space<vmem>>, vector<16x128xf32>
    %814 = arith.truncf %813 : vector<16x128xf32> to vector<16x128xbf16>
    %c0_725 = arith.constant 0 : index
    %c130_726 = arith.constant 130 : index
    %815 = vector.load %arg9[%c0_725, %c130_726] : memref<16x384xf32, #tpu.memory_space<vmem>>, vector<16x128xf32>
    %816 = arith.truncf %815 : vector<16x128xf32> to vector<16x128xbf16>
    %c0_727 = arith.constant 0 : index
    %c131_728 = arith.constant 131 : index
    %817 = vector.load %arg9[%c0_727, %c131_728] : memref<16x384xf32, #tpu.memory_space<vmem>>, vector<16x128xf32>
    %818 = arith.truncf %817 : vector<16x128xf32> to vector<16x128xbf16>
    %c0_729 = arith.constant 0 : index
    %c132_730 = arith.constant 132 : index
    %819 = vector.load %arg9[%c0_729, %c132_730] : memref<16x384xf32, #tpu.memory_space<vmem>>, vector<16x128xf32>
    %820 = arith.truncf %819 : vector<16x128xf32> to vector<16x128xbf16>
    %c0_731 = arith.constant 0 : index
    %c133_732 = arith.constant 133 : index
    %821 = vector.load %arg9[%c0_731, %c133_732] : memref<16x384xf32, #tpu.memory_space<vmem>>, vector<16x128xf32>
    %822 = arith.truncf %821 : vector<16x128xf32> to vector<16x128xbf16>
    %c0_733 = arith.constant 0 : index
    %c134_734 = arith.constant 134 : index
    %823 = vector.load %arg9[%c0_733, %c134_734] : memref<16x384xf32, #tpu.memory_space<vmem>>, vector<16x128xf32>
    %824 = arith.truncf %823 : vector<16x128xf32> to vector<16x128xbf16>
    %825 = tpu.concatenate %810, %812, %814, %816, %818, %820, %822, %824 in 0 : vector<16x128xbf16>, vector<16x128xbf16>, vector<16x128xbf16>, vector<16x128xbf16>, vector<16x128xbf16>, vector<16x128xbf16>, vector<16x128xbf16>, vector<16x128xbf16> -> vector<128x128xbf16>
    %c3_735 = arith.constant 3 : index
    %c0_736 = arith.constant 0 : index
    %c0_737 = arith.constant 0 : index
    %826 = vector.load %arg4[%c3_735, %c0_736, %c0_737] : memref<4x16x128xbf16, #tpu.memory_space<vmem>>, vector<1x16x128xbf16>
    %827 = vector.shape_cast %826 : vector<1x16x128xbf16> to vector<16x128xbf16>
    %cst_738 = arith.constant dense<0.000000e+00> : vector<16x128xf32>
    %828 = tpu.matmul %827, %825, %cst_738 {dimension_numbers = #tpu.dot_dimension_numbers<[1], [0], [0], [1], [0, 0, 1, 1], [], []>} : vector<16x128xbf16>, vector<128x128xbf16>, vector<16x128xf32> -> vector<16x128xf32>
    %c3_739 = arith.constant 3 : index
    %c0_740 = arith.constant 0 : index
    %c0_741 = arith.constant 0 : index
    %829 = vector.load %arg5[%c3_739, %c0_740, %c0_741] : memref<4x16x1xf32, #tpu.memory_space<vmem>>, vector<1x16x1xf32>
    %830 = vector.shape_cast %829 : vector<1x16x1xf32> to vector<16x1xf32>
    %831 = vector.broadcast %830 : vector<16x1xf32> to vector<16x128xf32>
    %832 = arith.addf %828, %831 : vector<16x128xf32>
    %cst_742 = arith.constant 0.000000e+00 : f32
    %833 = vector.broadcast %cst_742 : f32 to vector<16x128xf32>
    %834 = arith.maximumf %832, %833 : vector<16x128xf32>
    %835 = arith.addf %834, %727 : vector<16x128xf32>
    %c0_743 = arith.constant 0 : index
    %c0_744 = arith.constant 0 : index
    %836 = vector.load %arg6[%c0_743, %c0_744] : memref<16x2xf32, #tpu.memory_space<vmem>>, vector<16x2xf32>
    %837 = vector.extract_strided_slice %836 {offsets = [0, 0], sizes = [16, 1], strides = [1, 1]} : vector<16x2xf32> to vector<16x1xf32>
    %838 = vector.broadcast %837 : vector<16x1xf32> to vector<16x128xf32>
    %839 = arith.mulf %835, %838 : vector<16x128xf32>
    %cst_745 = arith.constant dense<0.000000e+00> : vector<128xf32>
    %840 = vector.multi_reduction <add>, %839, %cst_745 [0] : vector<16x128xf32> to vector<128xf32>
    %841 = vector.shape_cast %840 : vector<128xf32> to vector<1x128xf32>
    %842 = vector.extract_strided_slice %836 {offsets = [0, 1], sizes = [16, 1], strides = [1, 1]} : vector<16x2xf32> to vector<16x1xf32>
    %843 = vector.broadcast %842 : vector<16x1xf32> to vector<16x128xf32>
    %844 = arith.mulf %835, %843 : vector<16x128xf32>
    %cst_746 = arith.constant dense<0.000000e+00> : vector<128xf32>
    %845 = vector.multi_reduction <add>, %844, %cst_746 [0] : vector<16x128xf32> to vector<128xf32>
    %846 = vector.shape_cast %845 : vector<128xf32> to vector<1x128xf32>
    %847 = tpu.concatenate %841, %846 in 0 : vector<1x128xf32>, vector<1x128xf32> -> vector<2x128xf32>
    %c0_747 = arith.constant 0 : index
    %c0_748 = arith.constant 0 : index
    %848 = vector.load %arg7[%c0_747, %c0_748] : memref<2x1xf32, #tpu.memory_space<vmem>>, vector<2x1xf32>
    %849 = vector.broadcast %848 : vector<2x1xf32> to vector<2x128xf32>
    %850 = arith.addf %847, %849 : vector<2x128xf32>
    %cst_749 = arith.constant 0.000000e+00 : f32
    %851 = vector.broadcast %cst_749 : f32 to vector<2x128xf32>
    %852 = arith.maximumf %850, %851 : vector<2x128xf32>
    %c0_750 = arith.constant 0 : index
    %c0_751 = arith.constant 0 : index
    %c0_752 = arith.constant 0 : index
    %853 = vector.load %arg8[%c0_750, %c0_751, %c0_752] : memref<1x2x128xf32, #tpu.memory_space<vmem>>, vector<1x2x128xf32>
    %854 = vector.shape_cast %853 : vector<1x2x128xf32> to vector<2x128xf32>
    %855 = vector.shape_cast %852 : vector<2x128xf32> to vector<1x2x128xf32>
    tpu.vector_store %arg8[%c0_750, %c0_751, %c0_752], %855 {strides = array<i32>} : memref<1x2x128xf32, #tpu.memory_space<vmem>>, vector<1x2x128xf32>,
    return
  }
  func.func @transform_0(%arg0: i32) -> (i32, i32, i32) {
    %c0_i32 = arith.constant 0 : i32
    %c0_i32_0 = arith.constant 0 : i32
    %c0_i32_1 = arith.constant 0 : i32
    return %arg0, %c0_i32, %c0_i32_0 : i32, i32, i32
  }
  func.func @transform_1(%arg0: i32) -> (i32, i32, i32) {
    %c0_i32 = arith.constant 0 : i32
    %c0_i32_0 = arith.constant 0 : i32
    %c0_i32_1 = arith.constant 0 : i32
    %c0_i32_2 = arith.constant 0 : i32
    return %c0_i32, %c0_i32_0, %c0_i32_1 : i32, i32, i32
  }
  func.func @transform_2(%arg0: i32) -> (i32, i32, i32) {
    %c0_i32 = arith.constant 0 : i32
    %c0_i32_0 = arith.constant 0 : i32
    %c0_i32_1 = arith.constant 0 : i32
    %c0_i32_2 = arith.constant 0 : i32
    return %c0_i32, %c0_i32_0, %c0_i32_1 : i32, i32, i32
  }
  func.func @transform_3(%arg0: i32) -> (i32, i32, i32) {
    %c0_i32 = arith.constant 0 : i32
    %c0_i32_0 = arith.constant 0 : i32
    %c0_i32_1 = arith.constant 0 : i32
    %c0_i32_2 = arith.constant 0 : i32
    return %c0_i32, %c0_i32_0, %c0_i32_1 : i32, i32, i32
  }
  func.func @transform_4(%arg0: i32) -> (i32, i32, i32) {
    %c0_i32 = arith.constant 0 : i32
    %c0_i32_0 = arith.constant 0 : i32
    %c0_i32_1 = arith.constant 0 : i32
    %c0_i32_2 = arith.constant 0 : i32
    return %c0_i32, %c0_i32_0, %c0_i32_1 : i32, i32, i32
  }
  func.func @transform_5(%arg0: i32) -> (i32, i32) {
    %c0_i32 = arith.constant 0 : i32
    %c0_i32_0 = arith.constant 0 : i32
    %c0_i32_1 = arith.constant 0 : i32
    return %c0_i32, %c0_i32_0 : i32, i32
  }
  func.func @transform_6(%arg0: i32) -> (i32, i32) {
    %c0_i32 = arith.constant 0 : i32
    %c0_i32_0 = arith.constant 0 : i32
    %c0_i32_1 = arith.constant 0 : i32
    return %c0_i32, %c0_i32_0 : i32, i32
  }
  func.func @transform_7(%arg0: i32) -> (i32, i32, i32) {
    %c0_i32 = arith.constant 0 : i32
    %c0_i32_0 = arith.constant 0 : i32
    %c0_i32_1 = arith.constant 0 : i32
    return %arg0, %c0_i32, %c0_i32_0 : i32, i32, i32
  }
}

</mosaic_0001>

<bundles_post_ra>
// kernel: impedance_forward.1
= control target key start
LH: loop header
LB: loop body
LE: loop exit
PB: predicated region body
PF: predicated region fallthrough
CT: control target
= control target key end

     0   :  { %s10045_s0 = inlined_call_operand.vmem [shape: f32[2,16,128], index: 0, kind: input, shape index: {}]   ;;  %s10046_s1 = inlined_call_operand.vmem [shape: bf16[9,16,512], index: 1, kind: input, shape index: {}]   ;;  %s10047_s2 = inlined_call_operand.vmem [shape: f32[9,16,1], index: 2, kind: input, shape index: {}]   ;;  %s10048_s3 = inlined_call_operand.hbm [shape: bf16[4,16,128], index: 3, kind: input, shape index: {}]   ;;  %s10049_s4 = inlined_call_operand.vmem [shape: f32[4,16,1], index: 4, kind: input, shape index: {}]   ;;  %s10050_s5 = inlined_call_operand.vmem [shape: f32[16,2], index: 5, kind: input, shape index: {}]   ;;  %s10051_s6 = inlined_call_operand.vmem [shape: f32[2,1], index: 6, kind: input, shape index: {}]   ;;  %s10052_s7 = inlined_call_operand.hbm [shape: f32[2,2,128], index: 7, kind: output, shape index: {}]  }
   0x1   :  { %10103 = sst [smem:[#allocation14_spill]] %s10045_s0 }
   0x2   :  { %10104 = sst [smem:[#allocation15_spill]] %s10048_s3 }
   0x3   :  { %12 = vsyncpa [#allocation4], 0 }
   0x4   :  { %13 = vsyncpa [#allocation5], 0 }
   0x5   :  { %15 = vsyncpa [#allocation5 + $0x1], 0  ;;  %s6273_s24 = smov 0   ;;  %s6275_s25 = smov 0  }
   0x6   :  { %s6277_s26 = smov 0   ;;  %s6279_s27 = smov 0  }
   0x7 LB: > { %10105 = sst [smem:[#allocation9_spill]] %s6193_s24  ;;  %s6294_s28 = sadd.s32 4294967295, %s6205_s27   ;;  %s6205_s27 = sphi %s6279_s27, %s10269_s27   ;;  %s6201_s26 = sphi %s6277_s26, %s10271_s26   ;;  %s6197_s25 = sphi %s6275_s25, %s10273_s25   ;;  %s6193_s24 = sphi %s6273_s24, %s10272_s24  }
   0x8   : > { %10106 = sst [smem:[#allocation10_spill]] %s6201_s26  ;;  %s5353_s29 = sadd.s32 4294967294, %s6205_s27  }
   0x9   : > { %s6298_s30 = sadd.s32 1, %s6205_s27   ;;  %s180_s8 = sadd.s32 1, %s6201_s26 }
   0xa   : > { %10107 = sst [smem:[#allocation11_spill]] %s6298_s30  ;;  %s177_s9 = ssub.s32 %s6205_s27, %s6298_s30 }
   0xb   : > { %p190_p0 = scmp.ne.s32.totalorder %s6201_s26, %s6197_s25  ;;  %p178_p1 = scmp.eq.s32.totalorder %s177_s9, 0 }
   0xc   : > { %p191_p2 = scmp.eq.s32.totalorder %s6294_s28, 1  ;;  %p196_p3 = scmp.ne.s32.totalorder %s6197_s25, %s6193_s24 }
   0xd   : > { %p197_p4 = scmp.eq.s32.totalorder %s5353_s29, 1  ;;  %p5354_p7 = scmp.ge.s32.totalorder %s6205_s27, 1 }
   0xe   : > { %s6309_s10 = scalar_select %p178_p1, %s6201_s26, %s180_s8  }
   0xf   : > { %p6311_p5 = por %p191_p2, %p190_p0  ;;  %p6315_p6 = por %p197_p4, %p196_p3 }
  0x10   : > { %10108 = sst [smem:[#allocation12_spill]] %s6309_s10  ;;  %p204_p8 = scmp.lt.s32.totalorder %s6205_s27, 3 }
  0x11   : > { %s10109_s11 = scalar_select %p6311_p5, 1, 0 }
  0x12   : > { %s10110_s12 = scalar_select %p6315_p6, 1, 0 }
  0x13   : > { %p10053_p9 = scmp.eq.s32.totalorder %s6294_s28, 0  ;;  %p6322_p10 = pnand %p5354_p7, %p204_p8 }
  0x14   : > { %10111 = sst [smem:[#allocation13_spill]] %s10110_s12  ;;  %s6207_s14 = smov [#allocation3]  }
  0x15   : > { %s10112_s13 = scalar_select %p6322_p10, 1, 0 }
  0x16   : > { %s222_s15 = sshll.u32 %s6207_s14, 4  ;;  %p5979_p11 = pneg %p6322_p10  ;;  %s223_s15 = int_to_ptr.vmem [resolvable:$true] %s222_s15 }
  0x17   : > { %s10114_s3 = sld [smem:[#allocation15_spill]] }
  0x18   : > { %p6330_p12 = pnand %p10053_p9, %p5979_p11 }
  0x1a   : > { %p6113_p0 = pneg %p6330_p12 }
  0x1d   : > { %s6111_s19 = scalar_lea.hbm %s10114_s3, 512 }
  0x1e   : > { %p6112_p13 = scmp.ne.s32.totalorder %s10114_s3, %s6111_s19  ;;  %p6118_p3 = scmp.lt.u32.totalorder %s6111_s19, %s10114_s3 }
  0x20   : > { %p6114_p1 = pnand %p6113_p0, %p6112_p13 }
  0x22   : > { %p6115_p2 = pneg %p6114_p1 }
  0x24   : > { %p6120_p4 = pnand %p6118_p3, %p6115_p2 }
  0x26   : > { %6123 = shalt.err (!%p6120_p4)
}
  0x27   : > { %s6124_s29 = scalar_lea.vmem %s223_s15, 512  ;;  %p6132_p9 = scmp.lt.s32.totalorder %s223_s15, %s223_s15 }
  0x28   : > { %p6125_p7 = scmp.ne.s32.totalorder %s223_s15, %s6124_s29  ;;  %p6133_p6 = scmp.lt.s32.totalorder %s6124_s29, %s6124_s29 }
  0x2a   : > { %p6127_p8 = pnand %p6125_p7, %p6113_p0  ;;  %p6134_p5 = por %p6133_p6, %p6132_p9 }
  0x2c   : > { %p6128_p11 = pneg %p6127_p8 }
  0x2e   : > { %p6135_p10 = pnand %p6134_p5, %p6128_p11 }
  0x30   : > { %6138 = shalt.err (!%p6135_p10)
}
  0x31   : > { %s6208_s8 = smov 64   ;;  %s6209_s9 = smov 4  }
  0x32   : > { %5982 = dma.hbm_to_vmem [thread:$0]  (!%p6330_p12), %s10114_s3, 512, %s223_s15, [#allocation4], %s6208_s8, %s6208_s8, %s6209_s9  }
  0x33   : > { %p10115_p13 = scmp.ne.s32.totalorder %s10112_s13, 0 }
  0x34   : > { %p10116_p1 = scmp.eq.s32.totalorder (!%p10115_p13), %s6294_s28, 0 }
  0x35   : > { %255 = sbr.rel (%p10115_p13) target bundleno = 7213 (0x1c2d), region = 48 }
  0x3c   : > { %6184 = dma.done.wait (%p10116_p1), [#allocation4], 512   ;;  %p10117_p0 = pmov %p10116_p1 }
  0x3d   : > { %v6210_v0 = vmov 0.0|0.0   ;;  %s10084_s18 = smov 120   ;;  %p287_p5 = scmp.lt.s32.totalorder %s6294_s28, 1  ;;  %vm361_vm0 = vcmask 982016   ;;  %vm367_vm1 = vcmask 973824   ;;  %vm319_vm2 = vcmask 1039360  }
  0x3e   : > { %6186 = vsyncadd (%p10117_p0), [#allocation4], 4294966784  ;;  %357 = vrot.lane.b32.xlu0 %v6210_v0, %s10084_s18  ;;  %446 = vrot.lane.b32.xlu1 %v6210_v0, %s10084_s18  ;;  %s10082_s13 = smov 119   ;;  %s10118_s0 = sld [smem:[#allocation14_spill]]  ;;  %vm373_vm3 = vcmask 965632   ;;  %vm325_vm4 = vcmask 1031168  }
  0x3f   : > { %s288_s15 = scalar_select %p287_p5, %s6294_s28, 1  ;;  %vm379_vm5 = vcmask 957440   ;;  %vm331_vm6 = vcmask 1022976   ;;  %vm385_vm7 = vcmask 949248   ;;  %vm337_vm8 = vcmask 1014784  }
  0x40   : > { %s10093_s22 = smov 127   ;;  %s10080_s23 = smov 118   ;;  %vm391_vm9 = vcmask 941056   ;;  %vm343_vm10 = vcmask 1006592   ;;  %vm10102_vm11 = vcmask 932864   ;;  %vm10101_vm12 = vcmask 998400  }
  0x41   : > { %s5460_s16 = sshll.u32 %s288_s15, 4  ;;  %s10078_s29 = smov 126   ;;  %vm10099_vm13 = vcmask 924672   ;;  %vm10098_vm14 = vcmask 990208   ;;  %vm10090_vm15 = vcmask 121856  }
  0x42   : > { %363 = vrot.lane.b32.xlu0 %v6210_v0, %s10082_s13  ;;  %s10076_s8 = smov 117   ;;  %s10074_s9 = smov 125  }
  0x43   : > { %s10070_s14 = smov 116   ;;  %s10068_s17 = smov 124  }
  0x44   : > { %s291_s21 = scalar_lea.vmem %s10118_s0, %s5460_s16  ;;  %s10066_s15 = smov 115  }
  0x45   : > { %v299_v1 = vld [vmem:[%s291_s21] sm:$0xff]  ;;  %v300_v2 = vld [vmem:[%s291_s21 + $0x8] sm:$0xff]  ;;  %s10064_s16 = smov 123   ;;  %s10056_s19 = smov 114  }
  0x46   : > { %v6367_v3 = vpack.c.bf16 %v300_v2, %v299_v1  ;;  %s10058_s20 = smov 122   ;;  %s10062_s21 = smov 113  }
  0x47   : > { %s10131_s3 = smov 120   ;;  %s10132_s0 = smov 119  }
  0x48   : > { %444 = vrot.lane.b32.xlu1 %v6367_v3, %s10084_s18  ;;  %359 = vrot.lane.b32.xlu0 %v6367_v3, %s10084_s18  ;;  %s10095_s10 = smov 1   ;;  %s10134_s12 = smov 127  }
  0x49   : > { %p10265_p9 = scmp.ne.s32.totalorder %s10109_s11, 0 }
  0x4c   : > { %365 = vrot.lane.b32.xlu1 %v6367_v3, %s10082_s13  ;;  %449 = vrot.lane.b32.xlu0 %v6367_v3, %s10082_s13 }
  0x50   : > { %451 = vrot.lane.b32.xlu1 %v6210_v0, %s10082_s13  ;;  %315 = vrot.lane.b32.xlu0 %v6210_v0, %s10093_s22 }
  0x54   : > { %317 = vrot.lane.b32.xlu1 %v6367_v3, %s10093_s22  ;;  %409 = vrot.lane.b32.xlu0 %v6367_v3, %s10093_s22 }
  0x58   : > { %411 = vrot.lane.b32.xlu1 %v6210_v0, %s10093_s22  ;;  %369 = vrot.lane.b32.xlu0 %v6210_v0, %s10080_s23 }
  0x5c   : > { %371 = vrot.lane.b32.xlu1 %v6367_v3, %s10080_s23  ;;  %454 = vrot.lane.b32.xlu0 %v6367_v3, %s10080_s23 }
  0x60   : > { %456 = vrot.lane.b32.xlu1 %v6210_v0, %s10080_s23  ;;  %321 = vrot.lane.b32.xlu0 %v6210_v0, %s10078_s29 }
  0x64   : > { %323 = vrot.lane.b32.xlu1 %v6367_v3, %s10078_s29  ;;  %414 = vrot.lane.b32.xlu0 %v6367_v3, %s10078_s29 }
  0x68   : > { %416 = vrot.lane.b32.xlu1 %v6210_v0, %s10078_s29  ;;  %375 = vrot.lane.b32.xlu0 %v6210_v0, %s10076_s8 }
  0x6c   : > { %377 = vrot.lane.b32.xlu1 %v6367_v3, %s10076_s8  ;;  %459 = vrot.lane.b32.xlu0 %v6367_v3, %s10076_s8 }
  0x70   : > { %461 = vrot.lane.b32.xlu1 %v6210_v0, %s10076_s8  ;;  %327 = vrot.lane.b32.xlu0 %v6210_v0, %s10074_s9 }
  0x74   : > { %329 = vrot.lane.b32.xlu1 %v6367_v3, %s10074_s9  ;;  %419 = vrot.lane.b32.xlu0 %v6367_v3, %s10074_s9 }
  0x78   : > { %421 = vrot.lane.b32.xlu1 %v6210_v0, %s10074_s9  ;;  %381 = vrot.lane.b32.xlu0 %v6210_v0, %s10070_s14 }
  0x7c   : > { %383 = vrot.lane.b32.xlu1 %v6367_v3, %s10070_s14  ;;  %464 = vrot.lane.b32.xlu0 %v6367_v3, %s10070_s14 }
  0x80   : > { %466 = vrot.lane.b32.xlu1 %v6210_v0, %s10070_s14  ;;  %333 = vrot.lane.b32.xlu0 %v6210_v0, %s10068_s17 }
  0x84   : > { %335 = vrot.lane.b32.xlu1 %v6367_v3, %s10068_s17  ;;  %424 = vrot.lane.b32.xlu0 %v6367_v3, %s10068_s17 }
  0x88   : > { %426 = vrot.lane.b32.xlu1 %v6210_v0, %s10068_s17  ;;  %387 = vrot.lane.b32.xlu0 %v6210_v0, %s10066_s15 }
  0x8c   : > { %389 = vrot.lane.b32.xlu1 %v6367_v3, %s10066_s15  ;;  %469 = vrot.lane.b32.xlu0 %v6367_v3, %s10066_s15 }
  0x90   : > { %471 = vrot.lane.b32.xlu1 %v6210_v0, %s10066_s15  ;;  %339 = vrot.lane.b32.xlu0 %v6210_v0, %s10064_s16  ;;  %s10119_s15 = smov 115  }
  0x94   : > { %341 = vrot.lane.b32.xlu1 %v6367_v3, %s10064_s16  ;;  %429 = vrot.lane.b32.xlu0 %v6367_v3, %s10064_s16 }
  0x98   : > { %431 = vrot.lane.b32.xlu1 %v6210_v0, %s10064_s16  ;;  %393 = vrot.lane.b32.xlu0 %v6210_v0, %s10056_s19  ;;  %s10120_s16 = smov 123  }
  0x9c   : > { %395 = vrot.lane.b32.xlu1 %v6367_v3, %s10056_s19  ;;  %474 = vrot.lane.b32.xlu0 %v6367_v3, %s10056_s19 }
  0xa0   : > { %476 = vrot.lane.b32.xlu1 %v6210_v0, %s10056_s19  ;;  %345 = vrot.lane.b32.xlu0 %v6210_v0, %s10058_s20  ;;  %s10060_s19 = smov 121  }
  0xa4   : > { %347 = vrot.lane.b32.xlu1 %v6367_v3, %s10058_s20  ;;  %434 = vrot.lane.b32.xlu0 %v6367_v3, %s10058_s20 }
  0xa8   : > { %436 = vrot.lane.b32.xlu1 %v6210_v0, %s10058_s20  ;;  %479 = vrot.lane.b32.xlu0 %v6367_v3, %s10062_s21  ;;  %s10072_s20 = smov 15  }
  0xac   : > { %481 = vrot.lane.b32.xlu1 %v6210_v0, %s10062_s21  ;;  %351 = vrot.lane.b32.xlu0 %v6210_v0, %s10060_s19 }
  0xb0   : > { %353 = vrot.lane.b32.xlu1 %v6367_v3, %s10060_s19  ;;  %439 = vrot.lane.b32.xlu0 %v6367_v3, %s10060_s19  ;;  %v358_v4 = vpop.permute.xlu0 %357  ;;  %v447_v5 = vpop.permute.xlu1 %446 }
  0xb4   : > { %441 = vrot.lane.b32.xlu1 %v6210_v0, %s10060_s19  ;;  %399 = vrot.lane.b32.xlu0 %v6367_v3, %s10062_s21  ;;  %v364_v6 = vpop.permute.xlu0 %363  ;;  %s10121_s19 = smov 114   ;;  %s10122_s21 = smov 122  }
  0xb8   : > { %637 = vrot.lane.b32.xlu1 %v6210_v0, %s10072_s20  ;;  %525 = vrot.lane.b32.xlu0 %v447_v5, %s10093_s22 }
  0xba   : > { %v445_v7 = vpop.permute.xlu1 %444  ;;  %v360_v8 = vpop.permute.xlu0 %359 }
  0xbb   : > { %v448_v9 = vsel %vm361_vm0, %v445_v7, %v447_v5  ;;  %v362_v12 = vsel %vm361_vm0, %v358_v4, %v360_v8 }
  0xbc   : > { %523 = vrot.lane.b32.xlu1 %v448_v9, %s10093_s22  ;;  %671 = vrot.lane.b32.xlu0 %v360_v8, %s10072_s20 }
  0xbe   : > { %v366_v10 = vpop.permute.xlu1 %365  ;;  %v450_v11 = vpop.permute.xlu0 %449 }
  0xbf   : > { %v368_v18 = vsel %vm367_vm1, %v364_v6, %v366_v10 }
  0xc0   : > { %669 = vrot.lane.b32.xlu1 %v362_v12, %s10072_s20  ;;  %639 = vrot.lane.b32.xlu0 %v6367_v3, %s10072_s20 }
  0xc2   : > { %v452_v13 = vpop.permute.xlu1 %451  ;;  %v316_v14 = vpop.permute.xlu0 %315 }
  0xc3   : > { %v453_v15 = vsel %vm367_vm1, %v450_v11, %v452_v13 }
  0xc4   : > { %529 = vrot.lane.b32.xlu0 %v452_v13, %s10093_s22  ;;  %527 = vrot.lane.b32.xlu1 %v453_v15, %s10093_s22 }
  0xc6   : > { %v318_v16 = vpop.permute.xlu1 %317  ;;  %v410_v17 = vpop.permute.xlu0 %409 }
  0xc7   : > { %v320_v24 = vsel %vm319_vm2, %v316_v14, %v318_v16 }
  0xc8   : > { %675 = vrot.lane.b32.xlu0 %v366_v10, %s10072_s20  ;;  %673 = vrot.lane.b32.xlu1 %v368_v18, %s10072_s20 }
  0xca   : > { %v412_v19 = vpop.permute.xlu1 %411  ;;  %v370_v20 = vpop.permute.xlu0 %369 }
  0xcb   : > { %v6498_v21 = vsel %vm319_vm2, %v410_v17, %v412_v19 }
  0xcc   : > { %497 = vrot.lane.b32.xlu0 %v412_v19, %s10093_s22  ;;  %495 = vrot.lane.b32.xlu1 %v6498_v21, %s10093_s22 }
  0xce   : > { %v372_v22 = vpop.permute.xlu1 %371  ;;  %v455_v23 = vpop.permute.xlu0 %454 }
  0xcf   : > { %v374_v30 = vsel %vm373_vm3, %v370_v20, %v372_v22 }
  0xd0   : > { %643 = vrot.lane.b32.xlu0 %v318_v16, %s10072_s20  ;;  %641 = vrot.lane.b32.xlu1 %v320_v24, %s10072_s20 }
  0xd2   : > { %v457_v25 = vpop.permute.xlu1 %456  ;;  %v322_v26 = vpop.permute.xlu0 %321 }
  0xd3   : > { %v458_v27 = vsel %vm373_vm3, %v455_v23, %v457_v25  ;;  %v6055_v23 = vld [vmem:[%s10046_s1 + $0xc] ss:$16 sps:$4 sm:$0xff]  }
  0xd4   : > { %533 = vrot.lane.b32.xlu0 %v457_v25, %s10093_s22  ;;  %531 = vrot.lane.b32.xlu1 %v458_v27, %s10093_s22  ;;  %v6058_v27 = vld [vmem:[%s10046_s1 + $0x4] ss:$16 sps:$4 sm:$0xff]  }
  0xd5   : > { %618 = vmatprep.mubr.bf16.mxu0 %v6055_v23  ;;  %763 = vmatprep.mubr.bf16.mxu1 %v6058_v27 }
  0xd6   : > { %v324_v28 = vpop.permute.xlu1 %323  ;;  %v415_v29 = vpop.permute.xlu0 %414 }
  0xd7   : > { %v326_v36 = vsel %vm325_vm4, %v322_v26, %v324_v28 }
  0xd8   : > { %679 = vrot.lane.b32.xlu0 %v372_v22, %s10072_s20  ;;  %677 = vrot.lane.b32.xlu1 %v374_v30, %s10072_s20 }
  0xda   : > { %v417_v31 = vpop.permute.xlu1 %416  ;;  %v376_v32 = vpop.permute.xlu0 %375 }
  0xdb   : > { %v418_v33 = vsel %vm325_vm4, %v415_v29, %v417_v31 }
  0xdc   : > { %501 = vrot.lane.b32.xlu0 %v417_v31, %s10093_s22  ;;  %499 = vrot.lane.b32.xlu1 %v418_v33, %s10093_s22  ;;  %v6227_v31 = vmov 0  }
  0xdd   : > { %6047 = vset.pattern.permute.xlu0 %v6227_v31  ;;  %6048 = vset.pattern.permute.xlu1 %v6227_v31 }
  0xde   : > { %v378_v34 = vpop.permute.xlu1 %377  ;;  %v460_v35 = vpop.permute.xlu0 %459 }
  0xdf   : > { %v380_v42 = vsel %vm379_vm5, %v376_v32, %v378_v34 }
  0xe0   : > { %647 = vrot.lane.b32.xlu0 %v324_v28, %s10072_s20  ;;  %645 = vrot.lane.b32.xlu1 %v326_v36, %s10072_s20 }
  0xe2   : > { %v462_v37 = vpop.permute.xlu1 %461  ;;  %v328_v38 = vpop.permute.xlu0 %327 }
  0xe3   : > { %v463_v39 = vsel %vm379_vm5, %v460_v35, %v462_v37 }
  0xe4   : > { %537 = vrot.lane.b32.xlu0 %v462_v37, %s10093_s22  ;;  %535 = vrot.lane.b32.xlu1 %v463_v39, %s10093_s22  ;;  %v772_v37 = vld [vmem:[%s10047_s2] sm:$0xff]  ;;  %v773_v39 = vld [vmem:[%s10047_s2 + $0x8] sm:$0xff] }
  0xe6   : > { %v330_v40 = vpop.permute.xlu1 %329  ;;  %v420_v41 = vpop.permute.xlu0 %419 }
  0xe7   : > { %v332_v48 = vsel %vm331_vm6, %v328_v38, %v330_v40 }
  0xe8   : > { %683 = vrot.lane.b32.xlu0 %v378_v34, %s10072_s20  ;;  %681 = vrot.lane.b32.xlu1 %v380_v42, %s10072_s20 }
  0xea   : > { %v422_v43 = vpop.permute.xlu1 %421  ;;  %v382_v44 = vpop.permute.xlu0 %381 }
  0xeb   : > { %v423_v45 = vsel %vm331_vm6, %v420_v41, %v422_v43 }
  0xec   : > { %505 = vrot.lane.b32.xlu0 %v422_v43, %s10093_s22  ;;  %503 = vrot.lane.b32.xlu1 %v423_v45, %s10093_s22 }
  0xee   : > { %v384_v46 = vpop.permute.xlu1 %383  ;;  %v465_v47 = vpop.permute.xlu0 %464 }
  0xef   : > { %v386_v54 = vsel %vm385_vm7, %v382_v44, %v384_v46 }
  0xf0   : > { %651 = vrot.lane.b32.xlu0 %v330_v40, %s10072_s20  ;;  %649 = vrot.lane.b32.xlu1 %v332_v48, %s10072_s20 }
  0xf2   : > { %v467_v49 = vpop.permute.xlu1 %466  ;;  %v334_v50 = vpop.permute.xlu0 %333 }
  0xf3   : > { %v468_v51 = vsel %vm385_vm7, %v465_v47, %v467_v49 }
  0xf4   : > { %541 = vrot.lane.b32.xlu0 %v467_v49, %s10093_s22  ;;  %539 = vrot.lane.b32.xlu1 %v468_v51, %s10093_s22 }
  0xf6   : > { %v336_v52 = vpop.permute.xlu1 %335  ;;  %v425_v53 = vpop.permute.xlu0 %424 }
  0xf7   : > { %v338_v60 = vsel %vm337_vm8, %v334_v50, %v336_v52 }
  0xf8   : > { %687 = vrot.lane.b32.xlu0 %v384_v46, %s10072_s20  ;;  %685 = vrot.lane.b32.xlu1 %v386_v54, %s10072_s20 }
  0xfa   : > { %v427_v55 = vpop.permute.xlu1 %426  ;;  %v388_v56 = vpop.permute.xlu0 %387 }
  0xfb   : > { %v428_v57 = vsel %vm337_vm8, %v425_v53, %v427_v55 }
  0xfc   : > { %509 = vrot.lane.b32.xlu0 %v427_v55, %s10093_s22  ;;  %507 = vrot.lane.b32.xlu1 %v428_v57, %s10093_s22 }
  0xfe   : > { %v390_v58 = vpop.permute.xlu1 %389  ;;  %v470_v59 = vpop.permute.xlu0 %469 }
  0xff   : > { %v392_v3 = vsel %vm391_vm9, %v388_v56, %v390_v58 }
 0x100   : > { %655 = vrot.lane.b32.xlu0 %v336_v52, %s10072_s20  ;;  %653 = vrot.lane.b32.xlu1 %v338_v60, %s10072_s20 }
 0x102   : > { %v472_v61 = vpop.permute.xlu1 %471  ;;  %v340_v62 = vpop.permute.xlu0 %339 }
 0x103   : > { %v473_v63 = vsel %vm391_vm9, %v470_v59, %v472_v61 }
 0x104   : > { %545 = vrot.lane.b32.xlu0 %v472_v61, %s10093_s22  ;;  %543 = vrot.lane.b32.xlu1 %v473_v63, %s10093_s22 }
 0x106   : > { %v342_v1 = vpop.permute.xlu1 %341  ;;  %v430_v2 = vpop.permute.xlu0 %429 }
 0x107   : > { %v344_v9 = vsel %vm343_vm10, %v340_v62, %v342_v1 }
 0x108   : > { %691 = vrot.lane.b32.xlu0 %v390_v58, %s10072_s20  ;;  %689 = vrot.lane.b32.xlu1 %v392_v3, %s10072_s20 }
 0x10a   : > { %v432_v4 = vpop.permute.xlu1 %431  ;;  %v394_v5 = vpop.permute.xlu0 %393 }
 0x10b   : > { %v433_v6 = vsel %vm343_vm10, %v430_v2, %v432_v4 }
 0x10c   : > { %513 = vrot.lane.b32.xlu0 %v432_v4, %s10093_s22  ;;  %511 = vrot.lane.b32.xlu1 %v433_v6, %s10093_s22 }
 0x10e   : > { %v396_v7 = vpop.permute.xlu1 %395  ;;  %v475_v8 = vpop.permute.xlu0 %474 }
 0x10f   : > { %v398_v15 = vsel %vm10102_vm11, %v394_v5, %v396_v7 }
 0x110   : > { %659 = vrot.lane.b32.xlu0 %v342_v1, %s10072_s20  ;;  %657 = vrot.lane.b32.xlu1 %v344_v9, %s10072_s20 }
 0x112   : > { %v477_v10 = vpop.permute.xlu1 %476  ;;  %v346_v11 = vpop.permute.xlu0 %345 }
 0x113   : > { %v478_v12 = vsel %vm10102_vm11, %v475_v8, %v477_v10 }
 0x114   : > { %549 = vrot.lane.b32.xlu0 %v477_v10, %s10093_s22  ;;  %547 = vrot.lane.b32.xlu1 %v478_v12, %s10093_s22 }
 0x116   : > { %v348_v13 = vpop.permute.xlu1 %347  ;;  %v435_v14 = vpop.permute.xlu0 %434 }
 0x117   : > { %v350_v22 = vsel %vm10101_vm12, %v346_v11, %v348_v13 }
 0x118   : > { %695 = vrot.lane.b32.xlu0 %v396_v7, %s10072_s20  ;;  %693 = vrot.lane.b32.xlu1 %v398_v15, %s10072_s20 }
 0x11a   : > { %v437_v16 = vpop.permute.xlu1 %436  ;;  %v480_v17 = vpop.permute.xlu0 %479 }
 0x11b   : > { %v438_v18 = vsel %vm10101_vm12, %v435_v14, %v437_v16 }
 0x11c   : > { %517 = vrot.lane.b32.xlu0 %v437_v16, %s10093_s22  ;;  %515 = vrot.lane.b32.xlu1 %v438_v18, %s10093_s22 }
 0x11e   : > { %v482_v19 = vpop.permute.xlu1 %481  ;;  %v352_v20 = vpop.permute.xlu0 %351 }
 0x11f   : > { %v484_v26 = vsel %vm10099_vm13, %v480_v17, %v482_v19 }
 0x120   : > { %663 = vrot.lane.b32.xlu0 %v348_v13, %s10072_s20  ;;  %661 = vrot.lane.b32.xlu1 %v350_v22, %s10072_s20 }
 0x122   : > { %v354_v24 = vpop.permute.xlu1 %353  ;;  %v440_v25 = vpop.permute.xlu0 %439 }
 0x123   : > { %v356_v34 = vsel %vm10098_vm14, %v352_v20, %v354_v24 }
 0x124   : > { %553 = vrot.lane.b32.xlu0 %v482_v19, %s10093_s22  ;;  %551 = vrot.lane.b32.xlu1 %v484_v26, %s10093_s22 }
 0x126   : > { %v442_v28 = vpop.permute.xlu1 %441  ;;  %v400_v29 = vpop.permute.xlu0 %399 }
 0x127   : > { %v443_v30 = vsel %vm10098_vm14, %v440_v25, %v442_v28 }
 0x128   : > { %521 = vrot.lane.b32.xlu0 %v442_v28, %s10093_s22  ;;  %519 = vrot.lane.b32.xlu1 %v443_v30, %s10093_s22 }
 0x12a   : > { %v638_v32 = vpop.permute.xlu1 %637  ;;  %v526_v33 = vpop.permute.xlu0 %525 }
 0x12c   : > { %667 = vrot.lane.b32.xlu0 %v354_v24, %s10072_s20  ;;  %665 = vrot.lane.b32.xlu1 %v356_v34, %s10072_s20 }
 0x12e   : > { %v524_v35 = vpop.permute.xlu1 %523  ;;  %v672_v36 = vpop.permute.xlu0 %671 }
 0x12f   : > { %v562_v38 = vsel %vm319_vm2, %v524_v35, %v526_v33 }
 0x130   : > { %697 = vrot.lane.b32.xlu1 %v400_v29, %s10072_s20  ;;  %5461 = vmatprep.subr.bf16.mxu0 %v562_v38 }
 0x131   : > { %5462 = vmatpush3.bf16.msra.mxu0 %v6498_v21  ;;  %776 = vperm.xlu0 %6047, %v772_v37  }
 0x132   : > { %v670_v40 = vpop.permute.xlu1 %669  ;;  %v640_v41 = vpop.permute.xlu0 %639 }
 0x133   : > { %v708_v42 = vsel %vm10090_vm15, %v670_v40, %v672_v36  ;;  %v700_v43 = vsel %vm10090_vm15, %v638_v32, %v640_v41 }
 0x134   : > { %5483 = vmatprep.subr.bf16.mxu1 %v708_v42  ;;  %781 = vperm.xlu1 %6048, %v773_v39  }
 0x135   : > { %5484 = vmatpush3.bf16.msra.mxu1 %v700_v43  ;;  %920 = vrot.lane.b32.xlu0 %v6210_v0, %s10084_s18 }
 0x136   : > { %v528_v44 = vpop.permute.xlu1 %527  ;;  %v530_v45 = vpop.permute.xlu0 %529 }
 0x137   : > { %v563_v21 = vsel %vm319_vm2, %v528_v44, %v530_v45 }
 0x138   : > { %5463 = vmatprep.subr.bf16.mxu0 %v563_v21  ;;  %838 = vrot.lane.b32.xlu1 %v6210_v0, %s10084_s18 }
 0x139   : > { %925 = vrot.lane.b32.xlu0 %v6210_v0, %s10082_s13 }
 0x13a   : > { %v674_v46 = vpop.permute.xlu1 %673  ;;  %v676_v47 = vpop.permute.xlu0 %675 }
 0x13b   : > { %v709_v48 = vsel %vm10090_vm15, %v674_v46, %v676_v47 }
 0x13c   : > { %5485 = vmatprep.subr.bf16.mxu1 %v709_v48  ;;  %843 = vrot.lane.b32.xlu1 %v6210_v0, %s10082_s13 }
 0x13d   : > { %885 = vrot.lane.b32.xlu0 %v6210_v0, %s10093_s22 }
 0x13e   : > { %v496_v49 = vpop.permute.xlu1 %495  ;;  %v498_v50 = vpop.permute.xlu0 %497 }
 0x13f   : > { %v555_v51 = vsel %vm319_vm2, %v496_v49, %v498_v50 }
 0x140   : > { %5464 = vmatpush3.bf16.msra.mxu0 %v555_v51  ;;  %803 = vrot.lane.b32.xlu1 %v6210_v0, %s10093_s22 }
 0x141   : > { %930 = vrot.lane.b32.xlu0 %v6210_v0, %s10080_s23 }
 0x142   : > { %v642_v52 = vpop.permute.xlu1 %641  ;;  %v644_v53 = vpop.permute.xlu0 %643 }
 0x143   : > { %v701_v54 = vsel %vm10090_vm15, %v642_v52, %v644_v53 }
 0x144   : > { %5486 = vmatpush3.bf16.msra.mxu1 %v701_v54  ;;  %848 = vrot.lane.b32.xlu1 %v6210_v0, %s10080_s23 }
 0x145   : > { %890 = vrot.lane.b32.xlu0 %v6210_v0, %s10078_s29 }
 0x146   : > { %v532_v55 = vpop.permute.xlu1 %531  ;;  %v534_v56 = vpop.permute.xlu0 %533 }
 0x147   : > { %v564_v57 = vsel %vm319_vm2, %v532_v55, %v534_v56 }
 0x148   : > { %5465 = vmatprep.subr.bf16.mxu0 %v564_v57  ;;  %808 = vrot.lane.b32.xlu1 %v6210_v0, %s10078_s29  ;;  %s10125_s29 = smov 126  }
 0x149   : > { %935 = vrot.lane.b32.xlu0 %v6210_v0, %s10076_s8 }
 0x14a   : > { %v678_v58 = vpop.permute.xlu1 %677  ;;  %v680_v59 = vpop.permute.xlu0 %679 }
 0x14b   : > { %v710_v60 = vsel %vm10090_vm15, %v678_v58, %v680_v59  ;;  %v6053_v59 = vld [vmem:[%s10046_s1 + $0x8] ss:$16 sps:$4 sm:$0xff]  }
 0x14c   : > { %5487 = vmatprep.subr.bf16.mxu1 %v710_v60  ;;  %853 = vrot.lane.b32.xlu1 %v6210_v0, %s10076_s8  ;;  %s10126_s8 = smov 117  }
 0x14d   : > { %895 = vrot.lane.b32.xlu0 %v6210_v0, %s10074_s9 }
 0x14e   : > { %v500_v61 = vpop.permute.xlu1 %499  ;;  %v502_v62 = vpop.permute.xlu0 %501 }
 0x14f   : > { %v556_v63 = vsel %vm319_vm2, %v500_v61, %v502_v62 }
 0x150   : > { %5466 = vmatpush3.bf16.msra.mxu0 %v556_v63  ;;  %813 = vrot.lane.b32.xlu1 %v6210_v0, %s10074_s9  ;;  %s10127_s9 = smov 125  }
 0x151   : > { %940 = vrot.lane.b32.xlu0 %v6210_v0, %s10070_s14 }
 0x152   : > { %v646_v1 = vpop.permute.xlu1 %645  ;;  %v648_v2 = vpop.permute.xlu0 %647 }
 0x153   : > { %v702_v3 = vsel %vm10090_vm15, %v646_v1, %v648_v2  ;;  %v6056_v1 = vld [vmem:[%s10046_s1] ss:$16 sps:$4 sm:$0xff]  }
 0x154   : > { %5488 = vmatpush3.bf16.msra.mxu1 %v702_v3  ;;  %858 = vrot.lane.b32.xlu1 %v6210_v0, %s10070_s14  ;;  %s10124_s14 = smov 121  }
 0x155   : > { %900 = vrot.lane.b32.xlu0 %v6210_v0, %s10068_s17 }
 0x156   : > { %v536_v4 = vpop.permute.xlu1 %535  ;;  %v538_v5 = vpop.permute.xlu0 %537 }
 0x157   : > { %v565_v6 = vsel %vm319_vm2, %v536_v4, %v538_v5 }
 0x158   : > { %5467 = vmatprep.subr.bf16.mxu0 %v565_v6  ;;  %818 = vrot.lane.b32.xlu1 %v6210_v0, %s10068_s17  ;;  %s10123_s17 = smov 113  }
 0x159   : > { %945 = vrot.lane.b32.xlu0 %v6210_v0, %s10119_s15 }
 0x15a   : > { %v682_v7 = vpop.permute.xlu1 %681  ;;  %v684_v8 = vpop.permute.xlu0 %683 }
 0x15b   : > { %v711_v9 = vsel %vm10090_vm15, %v682_v7, %v684_v8 }
 0x15c   : > { %5489 = vmatprep.subr.bf16.mxu1 %v711_v9  ;;  %863 = vrot.lane.b32.xlu1 %v6210_v0, %s10119_s15 }
 0x15d   : > { %905 = vrot.lane.b32.xlu0 %v6210_v0, %s10120_s16 }
 0x15e   : > { %v504_v10 = vpop.permute.xlu1 %503  ;;  %v506_v11 = vpop.permute.xlu0 %505 }
 0x15f   : > { %v557_v12 = vsel %vm319_vm2, %v504_v10, %v506_v11 }
 0x160   : > { %5468 = vmatpush3.bf16.msra.mxu0 %v557_v12  ;;  %823 = vrot.lane.b32.xlu1 %v6210_v0, %s10120_s16 }
 0x161   : > { %950 = vrot.lane.b32.xlu0 %v6210_v0, %s10121_s19 }
 0x162   : > { %v650_v13 = vpop.permute.xlu1 %649  ;;  %v652_v14 = vpop.permute.xlu0 %651 }
 0x163   : > { %v703_v15 = vsel %vm10090_vm15, %v650_v13, %v652_v14 }
 0x164   : > { %5490 = vmatpush3.bf16.msra.mxu1 %v703_v15  ;;  %868 = vrot.lane.b32.xlu1 %v6210_v0, %s10121_s19 }
 0x165   : > { %910 = vrot.lane.b32.xlu0 %v6210_v0, %s10122_s21 }
 0x166   : > { %v540_v16 = vpop.permute.xlu1 %539  ;;  %v542_v17 = vpop.permute.xlu0 %541 }
 0x167   : > { %v566_v18 = vsel %vm319_vm2, %v540_v16, %v542_v17 }
 0x168   : > { %5469 = vmatprep.subr.bf16.mxu0 %v566_v18  ;;  %828 = vrot.lane.b32.xlu1 %v6210_v0, %s10122_s21 }
 0x169   : > { %955 = vrot.lane.b32.xlu0 %v6210_v0, %s10123_s17 }
 0x16a   : > { %v686_v19 = vpop.permute.xlu1 %685  ;;  %v688_v20 = vpop.permute.xlu0 %687 }
 0x16b   : > { %v712_v22 = vsel %vm10090_vm15, %v686_v19, %v688_v20 }
 0x16c   : > { %5491 = vmatprep.subr.bf16.mxu1 %v712_v22  ;;  %833 = vrot.lane.b32.xlu1 %v6210_v0, %s10124_s14 }
 0x16d   : > { %915 = vrot.lane.b32.xlu0 %v6210_v0, %s10124_s14 }
 0x16e   : > { %v508_v23 = vpop.permute.xlu1 %507  ;;  %v510_v24 = vpop.permute.xlu0 %509 }
 0x16f   : > { %v558_v25 = vsel %vm319_vm2, %v508_v23, %v510_v24 }
 0x170   : > { %5470 = vmatpush3.bf16.msra.mxu0 %v558_v25 }
 0x171   : > { %1110 = vrot.lane.b32.xlu0 %v6210_v0, %s10072_s20  ;;  %s10128_s20 = smov 116  }
 0x172   : > { %v654_v26 = vpop.permute.xlu1 %653  ;;  %v656_v27 = vpop.permute.xlu0 %655 }
 0x173   : > { %v704_v28 = vsel %vm10090_vm15, %v654_v26, %v656_v27 }
 0x174   : > { %5492 = vmatpush3.bf16.msra.mxu1 %v704_v28 }
 0x176   : > { %v544_v29 = vpop.permute.xlu1 %543  ;;  %v546_v30 = vpop.permute.xlu0 %545 }
 0x177   : > { %v567_v32 = vsel %vm319_vm2, %v544_v29, %v546_v30 }
 0x178   : > { %5471 = vmatprep.subr.bf16.mxu0 %v567_v32 }
 0x17a   : > { %v690_v33 = vpop.permute.xlu1 %689  ;;  %v692_v34 = vpop.permute.xlu0 %691 }
 0x17b   : > { %v713_v35 = vsel %vm10090_vm15, %v690_v33, %v692_v34 }
 0x17c   : > { %5493 = vmatprep.subr.bf16.mxu1 %v713_v35 }
 0x17e   : > { %v512_v36 = vpop.permute.xlu1 %511  ;;  %v514_v37 = vpop.permute.xlu0 %513 }
 0x17f   : > { %v559_v38 = vsel %vm319_vm2, %v512_v36, %v514_v37 }
 0x180   : > { %5472 = vmatpush3.bf16.msra.mxu0 %v559_v38 }
 0x182   : > { %v658_v39 = vpop.permute.xlu1 %657  ;;  %v660_v40 = vpop.permute.xlu0 %659 }
 0x183   : > { %v705_v41 = vsel %vm10090_vm15, %v658_v39, %v660_v40 }
 0x184   : > { %5494 = vmatpush3.bf16.msra.mxu1 %v705_v41 }
 0x186   : > { %v548_v42 = vpop.permute.xlu1 %547  ;;  %v550_v43 = vpop.permute.xlu0 %549 }
 0x187   : > { %v568_v44 = vsel %vm319_vm2, %v548_v42, %v550_v43 }
 0x188   : > { %5473 = vmatprep.subr.bf16.mxu0 %v568_v44 }
 0x18a   : > { %v694_v45 = vpop.permute.xlu1 %693  ;;  %v696_v21 = vpop.permute.xlu0 %695 }
 0x18b   : > { %v714_v46 = vsel %vm10090_vm15, %v694_v45, %v696_v21 }
 0x18c   : > { %5495 = vmatprep.subr.bf16.mxu1 %v714_v46 }
 0x18e   : > { %v516_v47 = vpop.permute.xlu1 %515  ;;  %v518_v48 = vpop.permute.xlu0 %517 }
 0x18f   : > { %v560_v49 = vsel %vm319_vm2, %v516_v47, %v518_v48 }
 0x190   : > { %5474 = vmatpush3.bf16.msra.mxu0 %v560_v49 }
 0x192   : > { %v662_v50 = vpop.permute.xlu1 %661  ;;  %v664_v51 = vpop.permute.xlu0 %663 }
 0x193   : > { %v706_v52 = vsel %vm10090_vm15, %v662_v50, %v664_v51 }
 0x194   : > { %5496 = vmatpush3.bf16.msra.mxu1 %v706_v52 }
 0x196   : > { %v552_v53 = vpop.permute.xlu1 %551  ;;  %v554_v54 = vpop.permute.xlu0 %553 }
 0x197   : > { %v569_v55 = vsel %vm319_vm2, %v552_v53, %v554_v54 }
 0x198   : > { %5475 = vmatprep.subr.bf16.mxu0 %v569_v55 }
 0x19a   : > { %v520_v56 = vpop.permute.xlu1 %519  ;;  %v522_v57 = vpop.permute.xlu0 %521 }
 0x19b   : > { %v561_v58 = vsel %vm319_vm2, %v520_v56, %v522_v57 }
 0x19c   : > { %5476 = vmatpush3.bf16.msra.mxu0 %v561_v58 }
 0x19e   : > { %v666_v60 = vpop.permute.xlu1 %665  ;;  %v668_v61 = vpop.permute.xlu0 %667 }
 0x19f   : > { %619 = vmatmul.mubr.bf16.vlgmr.msra.gmra.mrb[0].mxu0 %v6053_v59  ;;  %v707_v63 = vsel %vm10090_vm15, %v666_v60, %v668_v61 }
 0x1a2   : > { %v698_v62 = vpop.permute.xlu1 %697 }
 0x1a3   : > { %5497 = vmatprep.subr.bf16.mxu1 %v698_v62 }
 0x1a4   : > { %5498 = vmatpush3.bf16.msra.mxu1 %v707_v63 }
 0x1a7   : > { %764 = vmatmul.mubr.bf16.vlgmr.msra.gmra.mrb[0].mxu1 %v6056_v1 }
 0x1b0   : > { %v777_v2 = vpop.permute.xlu0 %776 }
 0x1b3   : > { %v782_v18 = vpop.permute.xlu1 %781 }
 0x1b4   : > { %v6687_v3 = vpop.permute.xlu0 %920 }
 0x1b5   : > { %998 = vrot.lane.b32.xlu1 %v6687_v3, %s10093_s22 }
 0x1b7   : > { %v6747_v19 = vpop.permute.xlu1 %838 }
 0x1b8   : > { %v6691_v4 = vpop.permute.xlu0 %925 }
 0x1b9   : > { %1002 = vrot.lane.b32.xlu1 %v6691_v4, %s10093_s22 }
 0x1bb   : > { %v6749_v20 = vpop.permute.xlu1 %843 }
 0x1bc   : > { %v6695_v5 = vpop.permute.xlu0 %885 }
 0x1bd   : > { %970 = vrot.lane.b32.xlu1 %v6695_v5, %s10093_s22 }
 0x1bf   : > { %v6751_v22 = vpop.permute.xlu1 %803 }
 0x1c0   : > { %v6699_v6 = vpop.permute.xlu0 %930 }
 0x1c1   : > { %1006 = vrot.lane.b32.xlu1 %v6699_v6, %s10093_s22 }
 0x1c3   : > { %v6753_v23 = vpop.permute.xlu1 %848 }
 0x1c4   : > { %v6703_v7 = vpop.permute.xlu0 %890 }
 0x1c5   : > { %974 = vrot.lane.b32.xlu1 %v6703_v7, %s10093_s22 }
 0x1c7   : > { %v6755_v24 = vpop.permute.xlu1 %808 }
 0x1c8   : > { %v6707_v8 = vpop.permute.xlu0 %935 }
 0x1c9   : > { %1010 = vrot.lane.b32.xlu1 %v6707_v8, %s10093_s22 }
 0x1cb   : > { %v6757_v25 = vpop.permute.xlu1 %853 }
 0x1cc   : > { %v6711_v9 = vpop.permute.xlu0 %895 }
 0x1cd   : > { %978 = vrot.lane.b32.xlu1 %v6711_v9, %s10093_s22 }
 0x1cf   : > { %v6759_v26 = vpop.permute.xlu1 %813 }
 0x1d0   : > { %v6715_v10 = vpop.permute.xlu0 %940 }
 0x1d1   : > { %1014 = vrot.lane.b32.xlu1 %v6715_v10, %s10093_s22 }
 0x1d3   : > { %v6761_v34 = vpop.permute.xlu1 %858 }
 0x1d4   : > { %v6719_v11 = vpop.permute.xlu0 %900 }
 0x1d5   : > { %982 = vrot.lane.b32.xlu1 %v6719_v11, %s10093_s22 }
 0x1d7   : > { %v6763_v39 = vpop.permute.xlu1 %818 }
 0x1d8   : > { %v6723_v12 = vpop.permute.xlu0 %945 }
 0x1d9   : > { %1018 = vrot.lane.b32.xlu1 %v6723_v12, %s10093_s22 }
 0x1db   : > { %v6765_v21 = vpop.permute.xlu1 %863 }
 0x1dc   : > { %v6727_v13 = vpop.permute.xlu0 %905 }
 0x1dd   : > { %986 = vrot.lane.b32.xlu1 %v6727_v13, %s10093_s22 }
 0x1df   : > { %v6769_v49 = vpop.permute.xlu1 %823 }
 0x1e0   : > { %v6731_v14 = vpop.permute.xlu0 %950 }
 0x1e1   : > { %1022 = vrot.lane.b32.xlu1 %v6731_v14, %s10093_s22 }
 0x1e3   : > { %v6773_v50 = vpop.permute.xlu1 %868 }
 0x1e4   : > { %v6735_v15 = vpop.permute.xlu0 %910 }
 0x1e5   : > { %990 = vrot.lane.b32.xlu1 %v6735_v15, %s10093_s22 }
 0x1e7   : > { %v6779_v51 = vpop.permute.xlu1 %828 }
 0x1e8   : > { %v6739_v16 = vpop.permute.xlu0 %955 }
 0x1e9   : > { %1026 = vrot.lane.b32.xlu1 %v6739_v16, %s10093_s22 }
 0x1eb   : > { %v6783_v52 = vpop.permute.xlu1 %833 }
 0x1ec   : > { %v6743_v17 = vpop.permute.xlu0 %915 }
 0x1ed   : > { %994 = vrot.lane.b32.xlu1 %v6743_v17, %s10093_s22 }
 0x227   : > { %v6789_v53 = vpop.permute.xlu1 %998 }
 0x22b   : > { %v6793_v54 = vpop.permute.xlu1 %1002 }
 0x22f   : > { %v6799_v55 = vpop.permute.xlu1 %970 }
 0x233   : > { %v6803_v56 = vpop.permute.xlu1 %1006 }
 0x237   : > { %v6809_v57 = vpop.permute.xlu1 %974 }
 0x23b   : > { %v6813_v58 = vpop.permute.xlu1 %1010 }
 0x23f   : > { %v6817_v59 = vpop.permute.xlu1 %978 }
 0x243   : > { %v6820_v60 = vpop.permute.xlu1 %1014 }
 0x247   : > { %v6822_v61 = vpop.permute.xlu1 %982 }
 0x24b   : > { %v6824_v62 = vpop.permute.xlu1 %1018 }
 0x24f   : > { %v6826_v63 = vpop.permute.xlu1 %986 }
 0x253   : > { %v6828_v1 = vpop.permute.xlu1 %1022 }
 0x272   : > { %v5477_v27 = vpop.f32.mrb[0].mxu0 }
 0x273   : > { %v5478_v28 = vpop.f32.mrb[1].mxu0 }
 0x274   : > { %v5479_v29 = vadd.f32 %v5478_v28, %v5477_v27  ;;  %v5480_v30 = vpop.f32.mrb[2].mxu0  ;;  %v6836_v28 = vpop.permute.xlu0 %1110 }
 0x275   : > { %v5481_v32 = vpop.f32.mrb[3].mxu0 }
 0x276   : > { %v5482_v33 = vadd.f32 %v5481_v32, %v5480_v30 }
 0x27a   : > { %v5499_v35 = vpop.f32.mrb[0].mxu1 }
 0x27b   : > { %v5500_v36 = vpop.f32.mrb[1].mxu1 }
 0x27c   : > { %v5501_v37 = vadd.f32 %v5500_v36, %v5499_v35  ;;  %v5502_v38 = vpop.f32.mrb[2].mxu1 }
 0x27d   : > { %v5503_v40 = vpop.f32.mrb[3].mxu1 }
 0x27e   : > { %v766_v41 = vadd.f32 %v5501_v37, %v5479_v29  ;;  %v5504_v42 = vadd.f32 %v5503_v40, %v5502_v38 }
 0x280   : > { %v784_v43 = vadd.f32 %v777_v2, %v766_v41  ;;  %v769_v44 = vadd.f32 %v5504_v42, %v5482_v33  ;;  %v6830_v2 = vpop.permute.xlu1 %990 }
 0x282   : > { %v785_v45 = vadd.f32 %v782_v18, %v769_v44  ;;  %v786_v46 = vmax.f32 %v784_v43, 0.0 }
 0x284   : > { %v787_v47 = vmax.f32 %v785_v45, 0.0  ;;  %v6832_v18 = vpop.permute.xlu1 %1026 }
 0x286   : > { %v800_v48 = vpack.c.bf16 %v787_v47, %v786_v46 }
 0x288   : > { %840 = vrot.lane.b32.xlu0 %v800_v48, %s10084_s18  ;;  %918 = vrot.lane.b32.xlu1 %v800_v48, %s10084_s18  ;;  %v6834_v27 = vpop.permute.xlu1 %994  ;;  %s10133_s18 = smov 118  }
 0x28c   : > { %845 = vrot.lane.b32.xlu0 %v800_v48, %s10082_s13  ;;  %923 = vrot.lane.b32.xlu1 %v800_v48, %s10082_s13  ;;  %s10130_s13 = smov 15  }
 0x290   : > { %805 = vrot.lane.b32.xlu0 %v800_v48, %s10093_s22  ;;  %883 = vrot.lane.b32.xlu1 %v800_v48, %s10093_s22 }
 0x294   : > { %850 = vrot.lane.b32.xlu0 %v800_v48, %s10080_s23  ;;  %928 = vrot.lane.b32.xlu1 %v800_v48, %s10080_s23  ;;  %s10129_s23 = smov 124  }
 0x298   : > { %810 = vrot.lane.b32.xlu0 %v800_v48, %s10125_s29  ;;  %888 = vrot.lane.b32.xlu1 %v800_v48, %s10125_s29 }
 0x29c   : > { %855 = vrot.lane.b32.xlu0 %v800_v48, %s10126_s8  ;;  %933 = vrot.lane.b32.xlu1 %v800_v48, %s10126_s8 }
 0x2a0   : > { %815 = vrot.lane.b32.xlu0 %v800_v48, %s10127_s9  ;;  %893 = vrot.lane.b32.xlu1 %v800_v48, %s10127_s9 }
 0x2a4   : > { %860 = vrot.lane.b32.xlu0 %v800_v48, %s10128_s20  ;;  %938 = vrot.lane.b32.xlu1 %v800_v48, %s10128_s20 }
 0x2a8   : > { %820 = vrot.lane.b32.xlu0 %v800_v48, %s10129_s23  ;;  %898 = vrot.lane.b32.xlu1 %v800_v48, %s10129_s23 }
 0x2ac   : > { %865 = vrot.lane.b32.xlu0 %v800_v48, %s10119_s15  ;;  %943 = vrot.lane.b32.xlu1 %v800_v48, %s10119_s15 }
 0x2b0   : > { %825 = vrot.lane.b32.xlu0 %v800_v48, %s10120_s16  ;;  %903 = vrot.lane.b32.xlu1 %v800_v48, %s10120_s16 }
 0x2b4   : > { %870 = vrot.lane.b32.xlu0 %v800_v48, %s10121_s19  ;;  %948 = vrot.lane.b32.xlu1 %v800_v48, %s10121_s19 }
 0x2b8   : > { %830 = vrot.lane.b32.xlu0 %v800_v48, %s10122_s21  ;;  %908 = vrot.lane.b32.xlu1 %v800_v48, %s10122_s21 }
 0x2bc   : > { %835 = vrot.lane.b32.xlu0 %v800_v48, %s10124_s14  ;;  %953 = vrot.lane.b32.xlu1 %v800_v48, %s10123_s17 }
 0x2c0   : > { %913 = vrot.lane.b32.xlu1 %v800_v48, %s10124_s14 }
 0x2c4   : > { %873 = vrot.lane.b32.xlu1 %v800_v48, %s10123_s17 }
 0x2c8   : > { %1112 = vrot.lane.b32.xlu1 %v800_v48, %s10130_s13 }
 0x2fa   : > { %v919_v29 = vpop.permute.xlu1 %918  ;;  %v841_v30 = vpop.permute.xlu0 %840 }
 0x2fb   : > { %v922_v32 = vsel %vm361_vm0, %v919_v29, %v6687_v3  ;;  %1144 = vrot.lane.b32.xlu1 %v841_v30, %s10130_s13  ;;  %v842_v35 = vsel %vm361_vm0, %v6747_v19, %v841_v30 }
 0x2fc   : > { %996 = vrot.lane.b32.xlu0 %v922_v32, %s10093_s22 }
 0x2fe   : > { %v846_v33 = vpop.permute.xlu0 %845  ;;  %v924_v36 = vpop.permute.xlu1 %923 }
 0x2ff   : > { %1148 = vrot.lane.b32.xlu1 %v846_v33, %s10130_s13  ;;  %v927_v38 = vsel %vm367_vm1, %v924_v36, %v6691_v4  ;;  %v847_v40 = vsel %vm367_vm1, %v6749_v20, %v846_v33 }
 0x300   : > { %1142 = vrot.lane.b32.xlu0 %v842_v35, %s10130_s13 }
 0x302   : > { %v806_v37 = vpop.permute.xlu0 %805  ;;  %v884_v41 = vpop.permute.xlu1 %883 }
 0x303   : > { %1116 = vrot.lane.b32.xlu1 %v806_v37, %s10130_s13  ;;  %v6856_v42 = vsel %vm319_vm2, %v884_v41, %v6695_v5  ;;  %v807_v43 = vsel %vm319_vm2, %v6751_v22, %v806_v37 }
 0x304   : > { %1000 = vrot.lane.b32.xlu0 %v927_v38, %s10093_s22 }
 0x306   : > { %v851_v3 = vpop.permute.xlu0 %850  ;;  %v929_v20 = vpop.permute.xlu1 %928 }
 0x307   : > { %1152 = vrot.lane.b32.xlu1 %v851_v3, %s10130_s13  ;;  %v932_v45 = vsel %vm373_vm3, %v929_v20, %v6699_v6  ;;  %v852_v46 = vsel %vm373_vm3, %v6753_v23, %v851_v3 }
 0x308   : > { %1146 = vrot.lane.b32.xlu0 %v847_v40, %s10130_s13 }
 0x30a   : > { %v811_v19 = vpop.permute.xlu0 %810  ;;  %v889_v47 = vpop.permute.xlu1 %888 }
 0x30b   : > { %1120 = vrot.lane.b32.xlu1 %v811_v19, %s10130_s13  ;;  %v892_v48 = vsel %vm325_vm4, %v889_v47, %v6703_v7  ;;  %v812_v29 = vsel %vm325_vm4, %v6755_v24, %v811_v19 }
 0x30c   : > { %968 = vrot.lane.b32.xlu0 %v6856_v42, %s10093_s22 }
 0x30e   : > { %v856_v4 = vpop.permute.xlu0 %855  ;;  %v934_v30 = vpop.permute.xlu1 %933 }
 0x30f   : > { %1156 = vrot.lane.b32.xlu1 %v856_v4, %s10130_s13  ;;  %v937_v32 = vsel %vm379_vm5, %v934_v30, %v6707_v8  ;;  %v857_v33 = vsel %vm379_vm5, %v6757_v25, %v856_v4  ;;  %v5374_v25 = vld [vmem:[%s10047_s2 + $0x10] sm:$0xff] }
 0x310   : > { %1114 = vrot.lane.b32.xlu0 %v807_v43, %s10130_s13 }
 0x312   : > { %v816_v44 = vpop.permute.xlu0 %815  ;;  %v894_v35 = vpop.permute.xlu1 %893 }
 0x313   : > { %1124 = vrot.lane.b32.xlu1 %v816_v44, %s10130_s13  ;;  %v897_v36 = vsel %vm331_vm6, %v894_v35, %v6711_v9  ;;  %v817_v37 = vsel %vm331_vm6, %v6759_v26, %v816_v44 }
 0x314   : > { %1004 = vrot.lane.b32.xlu0 %v932_v45, %s10093_s22 }
 0x316   : > { %v861_v5 = vpop.permute.xlu0 %860  ;;  %v939_v38 = vpop.permute.xlu1 %938 }
 0x317   : > { %1160 = vrot.lane.b32.xlu1 %v861_v5, %s10130_s13  ;;  %v942_v9 = vsel %vm385_vm7, %v939_v38, %v6715_v10  ;;  %v862_v3 = vsel %vm385_vm7, %v6761_v34, %v861_v5 }
 0x318   : > { %1150 = vrot.lane.b32.xlu0 %v852_v46, %s10130_s13 }
 0x31a   : > { %v821_v22 = vpop.permute.xlu0 %820  ;;  %v899_v26 = vpop.permute.xlu1 %898 }
 0x31b   : > { %1128 = vrot.lane.b32.xlu1 %v821_v22, %s10130_s13  ;;  %v902_v40 = vsel %vm337_vm8, %v899_v26, %v6719_v11  ;;  %v822_v10 = vsel %vm337_vm8, %v6763_v39, %v821_v22 }
 0x31c   : > { %972 = vrot.lane.b32.xlu0 %v892_v48, %s10093_s22 }
 0x31e   : > { %v866_v6 = vpop.permute.xlu0 %865  ;;  %v944_v34 = vpop.permute.xlu1 %943 }
 0x31f   : > { %1164 = vrot.lane.b32.xlu1 %v866_v6, %s10130_s13  ;;  %v947_v41 = vsel %vm391_vm9, %v944_v34, %v6723_v12  ;;  %v867_v11 = vsel %vm391_vm9, %v6765_v21, %v866_v6 }
 0x320   : > { %1118 = vrot.lane.b32.xlu0 %v812_v29, %s10130_s13 }
 0x322   : > { %v826_v23 = vpop.permute.xlu0 %825  ;;  %v904_v39 = vpop.permute.xlu1 %903 }
 0x323   : > { %1132 = vrot.lane.b32.xlu1 %v826_v23, %s10130_s13  ;;  %v907_v19 = vsel %vm343_vm10, %v904_v39, %v6727_v13  ;;  %v827_v12 = vsel %vm343_vm10, %v6769_v49, %v826_v23 }
 0x324   : > { %1008 = vrot.lane.b32.xlu0 %v937_v32, %s10093_s22 }
 0x326   : > { %v871_v7 = vpop.permute.xlu0 %870  ;;  %v949_v21 = vpop.permute.xlu1 %948 }
 0x327   : > { %1168 = vrot.lane.b32.xlu1 %v871_v7, %s10130_s13  ;;  %v952_v4 = vsel %vm10102_vm11, %v949_v21, %v6731_v14  ;;  %v872_v43 = vsel %vm10102_vm11, %v6773_v50, %v871_v7  ;;  %v6061_v50 = vld [vmem:[%s10046_s1 + $0x2c] ss:$16 sps:$4 sm:$0xff]  }
 0x328   : > { %1154 = vrot.lane.b32.xlu0 %v857_v33, %s10130_s13  ;;  %1091 = vmatprep.mubr.bf16.mxu0 %v6061_v50 }
 0x32a   : > { %v831_v24 = vpop.permute.xlu0 %830  ;;  %v909_v13 = vpop.permute.xlu1 %908 }
 0x32b   : > { %1136 = vrot.lane.b32.xlu1 %v831_v24, %s10130_s13  ;;  %v912_v49 = vsel %vm10101_vm12, %v909_v13, %v6735_v15  ;;  %v832_v20 = vsel %vm10101_vm12, %v6779_v51, %v831_v24  ;;  %v6064_v51 = vld [vmem:[%s10046_s1 + $0x24] ss:$16 sps:$4 sm:$0xff]  }
 0x32c   : > { %976 = vrot.lane.b32.xlu0 %v897_v36, %s10093_s22  ;;  %1235 = vmatprep.mubr.bf16.mxu1 %v6064_v51 }
 0x32e   : > { %v836_v8 = vpop.permute.xlu0 %835  ;;  %v954_v14 = vpop.permute.xlu1 %953 }
 0x32f   : > { %1140 = vrot.lane.b32.xlu1 %v836_v8, %s10130_s13  ;;  %v957_v15 = vsel %vm10099_vm13, %v954_v14, %v6739_v16  ;;  %v837_v16 = vsel %vm10098_vm14, %v6783_v52, %v836_v8 }
 0x330   : > { %1122 = vrot.lane.b32.xlu0 %v817_v37, %s10130_s13 }
 0x332   : > { %v914_v44 = vpop.permute.xlu1 %913 }
 0x333   : > { %1249 = vperm.xlu1 %6048, %v5374_v25   ;;  %v917_v45 = vsel %vm10098_vm14, %v914_v44, %v6743_v17  ;;  %v5375_v17 = vld [vmem:[%s10047_s2 + $0x18] sm:$0xff] }
 0x334   : > { %1012 = vrot.lane.b32.xlu0 %v942_v9, %s10093_s22 }
 0x336   : > { %v874_v5 = vpop.permute.xlu1 %873 }
 0x337   : > { %1311 = vrot.lane.b32.xlu1 %v6210_v0, %s10131_s3 }
 0x338   : > { %1158 = vrot.lane.b32.xlu0 %v862_v3, %s10130_s13 }
 0x33a   : > { %v1113_v46 = vpop.permute.xlu1 %1112 }
 0x33b   : > { %1316 = vrot.lane.b32.xlu1 %v6210_v0, %s10132_s0  ;;  %v1172_v29 = vsel %vm10090_vm15, %v6836_v28, %v1113_v46 }
 0x33c   : > { %980 = vrot.lane.b32.xlu0 %v902_v40, %s10093_s22 }
 0x33f   : > { %1276 = vrot.lane.b32.xlu1 %v6210_v0, %s10093_s22 }
 0x340   : > { %1126 = vrot.lane.b32.xlu0 %v822_v10, %s10130_s13 }
 0x343   : > { %1321 = vrot.lane.b32.xlu1 %v6210_v0, %s10133_s18 }
 0x344   : > { %1016 = vrot.lane.b32.xlu0 %v947_v41, %s10093_s22 }
 0x347   : > { %1281 = vrot.lane.b32.xlu1 %v6210_v0, %s10125_s29 }
 0x348   : > { %1162 = vrot.lane.b32.xlu0 %v867_v11, %s10130_s13 }
 0x34b   : > { %1326 = vrot.lane.b32.xlu1 %v6210_v0, %s10126_s8 }
 0x34c   : > { %984 = vrot.lane.b32.xlu0 %v907_v19, %s10093_s22 }
 0x34f   : > { %1286 = vrot.lane.b32.xlu1 %v6210_v0, %s10127_s9 }
 0x350   : > { %1130 = vrot.lane.b32.xlu0 %v827_v12, %s10130_s13 }
 0x353   : > { %1331 = vrot.lane.b32.xlu1 %v6210_v0, %s10128_s20 }
 0x354   : > { %1020 = vrot.lane.b32.xlu0 %v952_v4, %s10093_s22 }
 0x357   : > { %1291 = vrot.lane.b32.xlu1 %v6210_v0, %s10129_s23 }
 0x358   : > { %1166 = vrot.lane.b32.xlu0 %v872_v43, %s10130_s13 }
 0x35b   : > { %1336 = vrot.lane.b32.xlu1 %v6210_v0, %s10119_s15 }
 0x35c   : > { %988 = vrot.lane.b32.xlu0 %v912_v49, %s10093_s22 }
 0x35f   : > { %1296 = vrot.lane.b32.xlu1 %v6210_v0, %s10120_s16 }
 0x360   : > { %1134 = vrot.lane.b32.xlu0 %v832_v20, %s10130_s13 }
 0x363   : > { %1341 = vrot.lane.b32.xlu1 %v6210_v0, %s10121_s19 }
 0x364   : > { %1024 = vrot.lane.b32.xlu0 %v957_v15, %s10093_s22 }
 0x367   : > { %1301 = vrot.lane.b32.xlu1 %v6210_v0, %s10122_s21 }
 0x368   : > { %992 = vrot.lane.b32.xlu0 %v917_v45, %s10093_s22 }
 0x36b   : > { %1306 = vrot.lane.b32.xlu1 %v6210_v0, %s10124_s14 }
 0x36c   : > { %1138 = vrot.lane.b32.xlu0 %v837_v16, %s10130_s13 }
 0x36d   : > { %v1145_v52 = vpop.permute.xlu1 %1144 }
 0x36e   : > { %v997_v47 = vpop.permute.xlu0 %996 }
 0x36f   : > { %v1035_v22 = vsel %vm319_vm2, %v997_v47, %v6789_v53 }
 0x370   : > { %1170 = vrot.lane.b32.xlu0 %v874_v5, %s10130_s13  ;;  %5505 = vmatprep.subr.bf16.mxu0 %v1035_v22 }
 0x371   : > { %5506 = vmatpush3.bf16.msra.mxu0 %v6856_v42  ;;  %v1149_v42 = vpop.permute.xlu1 %1148 }
 0x372   : > { %v1143_v48 = vpop.permute.xlu0 %1142 }
 0x373   : > { %v1180_v6 = vsel %vm10090_vm15, %v1143_v48, %v1145_v52 }
 0x374   : > { %1254 = vperm.xlu0 %6047, %v5375_v17   ;;  %5527 = vmatprep.subr.bf16.mxu1 %v1180_v6 }
 0x375   : > { %5528 = vmatpush3.bf16.msra.mxu1 %v1172_v29 }
 0x376   : > { %v1001_v53 = vpop.permute.xlu0 %1000 }
 0x377   : > { %v1036_v30 = vsel %vm319_vm2, %v1001_v53, %v6793_v54  ;;  %v1117_v54 = vpop.permute.xlu1 %1116 }
 0x378   : > { %5507 = vmatprep.subr.bf16.mxu0 %v1036_v30  ;;  %1393 = vrot.lane.b32.xlu0 %v6210_v0, %s10131_s3 }
 0x37a   : > { %v1147_v23 = vpop.permute.xlu0 %1146 }
 0x37b   : > { %v1181_v32 = vsel %vm10090_vm15, %v1147_v23, %v1149_v42 }
 0x37c   : > { %5529 = vmatprep.subr.bf16.mxu1 %v1181_v32  ;;  %1398 = vrot.lane.b32.xlu0 %v6210_v0, %s10132_s0 }
 0x37e   : > { %v969_v28 = vpop.permute.xlu0 %968 }
 0x37f   : > { %v1028_v7 = vsel %vm319_vm2, %v969_v28, %v6799_v55  ;;  %v1153_v55 = vpop.permute.xlu1 %1152  ;;  %v6059_v28 = vld [vmem:[%s10046_s1 + $0x28] ss:$16 sps:$4 sm:$0xff]  }
 0x380   : > { %5508 = vmatpush3.bf16.msra.mxu0 %v1028_v7  ;;  %1358 = vrot.lane.b32.xlu0 %v6210_v0, %s10093_s22 }
 0x382   : > { %v1115_v33 = vpop.permute.xlu0 %1114 }
 0x383   : > { %v1173_v35 = vsel %vm10090_vm15, %v1115_v33, %v1117_v54 }
 0x384   : > { %5530 = vmatpush3.bf16.msra.mxu1 %v1173_v35  ;;  %1403 = vrot.lane.b32.xlu0 %v6210_v0, %s10133_s18 }
 0x386   : > { %v1005_v24 = vpop.permute.xlu0 %1004 }
 0x387   : > { %v1037_v36 = vsel %vm319_vm2, %v1005_v24, %v6803_v56  ;;  %v1121_v56 = vpop.permute.xlu1 %1120 }
 0x388   : > { %5509 = vmatprep.subr.bf16.mxu0 %v1037_v36  ;;  %1363 = vrot.lane.b32.xlu0 %v6210_v0, %s10125_s29 }
 0x38a   : > { %v1151_v8 = vpop.permute.xlu0 %1150 }
 0x38b   : > { %v1182_v37 = vsel %vm10090_vm15, %v1151_v8, %v1153_v55 }
 0x38c   : > { %5531 = vmatprep.subr.bf16.mxu1 %v1182_v37  ;;  %1408 = vrot.lane.b32.xlu0 %v6210_v0, %s10126_s8 }
 0x38e   : > { %v973_v38 = vpop.permute.xlu0 %972 }
 0x38f   : > { %v1029_v25 = vsel %vm319_vm2, %v973_v38, %v6809_v57  ;;  %v1157_v57 = vpop.permute.xlu1 %1156 }
 0x390   : > { %5510 = vmatpush3.bf16.msra.mxu0 %v1029_v25  ;;  %1368 = vrot.lane.b32.xlu0 %v6210_v0, %s10127_s9 }
 0x392   : > { %v1119_v9 = vpop.permute.xlu0 %1118 }
 0x393   : > { %v1174_v3 = vsel %vm10090_vm15, %v1119_v9, %v1121_v56 }
 0x394   : > { %5532 = vmatpush3.bf16.msra.mxu1 %v1174_v3  ;;  %1413 = vrot.lane.b32.xlu0 %v6210_v0, %s10128_s20 }
 0x396   : > { %v1009_v26 = vpop.permute.xlu0 %1008 }
 0x397   : > { %v1038_v40 = vsel %vm319_vm2, %v1009_v26, %v6813_v58  ;;  %v1125_v58 = vpop.permute.xlu1 %1124 }
 0x398   : > { %5511 = vmatprep.subr.bf16.mxu0 %v1038_v40  ;;  %1373 = vrot.lane.b32.xlu0 %v6210_v0, %s10129_s23 }
 0x39a   : > { %v1155_v10 = vpop.permute.xlu0 %1154 }
 0x39b   : > { %v1183_v34 = vsel %vm10090_vm15, %v1155_v10, %v1157_v57 }
 0x39c   : > { %5533 = vmatprep.subr.bf16.mxu1 %v1183_v34  ;;  %1418 = vrot.lane.b32.xlu0 %v6210_v0, %s10119_s15 }
 0x39e   : > { %v977_v41 = vpop.permute.xlu0 %976 }
 0x39f   : > { %v1030_v11 = vsel %vm319_vm2, %v977_v41, %v6817_v59  ;;  %v1161_v59 = vpop.permute.xlu1 %1160 }
 0x3a0   : > { %5512 = vmatpush3.bf16.msra.mxu0 %v1030_v11  ;;  %1378 = vrot.lane.b32.xlu0 %v6210_v0, %s10120_s16 }
 0x3a2   : > { %v1123_v39 = vpop.permute.xlu0 %1122 }
 0x3a3   : > { %v1175_v19 = vsel %vm10090_vm15, %v1123_v39, %v1125_v58 }
 0x3a4   : > { %5534 = vmatpush3.bf16.msra.mxu1 %v1175_v19  ;;  %1423 = vrot.lane.b32.xlu0 %v6210_v0, %s10121_s19 }
 0x3a6   : > { %v1013_v12 = vpop.permute.xlu0 %1012 }
 0x3a7   : > { %v1039_v21 = vsel %vm319_vm2, %v1013_v12, %v6820_v60  ;;  %v1129_v60 = vpop.permute.xlu1 %1128 }
 0x3a8   : > { %5513 = vmatprep.subr.bf16.mxu0 %v1039_v21  ;;  %1383 = vrot.lane.b32.xlu0 %v6210_v0, %s10122_s21 }
 0x3aa   : > { %v1159_v4 = vpop.permute.xlu0 %1158 }
 0x3ab   : > { %v1184_v13 = vsel %vm10090_vm15, %v1159_v4, %v1161_v59  ;;  %v1165_v15 = vpop.permute.xlu1 %1164 }
 0x3ac   : > { %5535 = vmatprep.subr.bf16.mxu1 %v1184_v13  ;;  %1428 = vrot.lane.b32.xlu0 %v6210_v0, %s10123_s17 }
 0x3ae   : > { %v981_v43 = vpop.permute.xlu0 %980 }
 0x3af   : > { %v1031_v49 = vsel %vm319_vm2, %v981_v43, %v6822_v61  ;;  %v1133_v16 = vpop.permute.xlu1 %1132 }
 0x3b0   : > { %5514 = vmatpush3.bf16.msra.mxu0 %v1031_v49  ;;  %1388 = vrot.lane.b32.xlu0 %v6210_v0, %s10124_s14 }
 0x3b2   : > { %v1127_v14 = vpop.permute.xlu0 %1126 }
 0x3b3   : > { %v1176_v20 = vsel %vm10090_vm15, %v1127_v14, %v1129_v60  ;;  %v1169_v17 = vpop.permute.xlu1 %1168 }
 0x3b4   : > { %5536 = vmatpush3.bf16.msra.mxu1 %v1176_v20  ;;  %1583 = vrot.lane.b32.xlu0 %v6210_v0, %s10130_s13 }
 0x3b6   : > { %v1017_v50 = vpop.permute.xlu0 %1016 }
 0x3b7   : > { %v1040_v44 = vsel %vm319_vm2, %v1017_v50, %v6824_v62  ;;  %v1137_v29 = vpop.permute.xlu1 %1136 }
 0x3b8   : > { %5515 = vmatprep.subr.bf16.mxu0 %v1040_v44 }
 0x3ba   : > { %v1163_v51 = vpop.permute.xlu0 %1162 }
 0x3bb   : > { %v1185_v61 = vsel %vm10090_vm15, %v1163_v51, %v1165_v15  ;;  %v1141_v7 = vpop.permute.xlu1 %1140 }
 0x3bc   : > { %5537 = vmatprep.subr.bf16.mxu1 %v1185_v61 }
 0x3be   : > { %v985_v45 = vpop.permute.xlu0 %984 }
 0x3bf   : > { %v1032_v5 = vsel %vm319_vm2, %v985_v45, %v6826_v63  ;;  %v1250_v34 = vpop.permute.xlu1 %1249 }
 0x3c0   : > { %5516 = vmatpush3.bf16.msra.mxu0 %v1032_v5 }
 0x3c2   : > { %v1131_v46 = vpop.permute.xlu0 %1130 }
 0x3c3   : > { %v1177_v47 = vsel %vm10090_vm15, %v1131_v46, %v1133_v16  ;;  %v7128_v41 = vpop.permute.xlu1 %1311 }
 0x3c4   : > { %5538 = vmatpush3.bf16.msra.mxu1 %v1177_v47 }
 0x3c6   : > { %v1021_v22 = vpop.permute.xlu0 %1020 }
 0x3c7   : > { %v1041_v62 = vsel %vm319_vm2, %v1021_v22, %v6828_v1  ;;  %v7130_v11 = vpop.permute.xlu1 %1316 }
 0x3c8   : > { %5517 = vmatprep.subr.bf16.mxu0 %v1041_v62 }
 0x3ca   : > { %v1167_v52 = vpop.permute.xlu0 %1166 }
 0x3cb   : > { %v1186_v48 = vsel %vm10090_vm15, %v1167_v52, %v1169_v17  ;;  %v7132_v58 = vpop.permute.xlu1 %1276 }
 0x3cc   : > { %5539 = vmatprep.subr.bf16.mxu1 %v1186_v48 }
 0x3ce   : > { %v989_v6 = vpop.permute.xlu0 %988 }
 0x3cf   : > { %v1033_v63 = vsel %vm319_vm2, %v989_v6, %v6830_v2  ;;  %v7134_v39 = vpop.permute.xlu1 %1321 }
 0x3d0   : > { %5518 = vmatpush3.bf16.msra.mxu0 %v1033_v63 }
 0x3d2   : > { %v1135_v53 = vpop.permute.xlu0 %1134 }
 0x3d3   : > { %v1178_v30 = vsel %vm10090_vm15, %v1135_v53, %v1137_v29  ;;  %v7136_v19 = vpop.permute.xlu1 %1281 }
 0x3d4   : > { %5540 = vmatpush3.bf16.msra.mxu1 %v1178_v30 }
 0x3d6   : > { %v1025_v42 = vpop.permute.xlu0 %1024 }
 0x3d7   : > { %v1042_v1 = vsel %vm319_vm2, %v1025_v42, %v6832_v18  ;;  %v6062_v18 = vld [vmem:[%s10046_s1 + $0x20] ss:$16 sps:$4 sm:$0xff]   ;;  %v7138_v12 = vpop.permute.xlu1 %1326 }
 0x3d8   : > { %5519 = vmatprep.subr.bf16.mxu0 %v1042_v1 }
 0x3da   : > { %v993_v23 = vpop.permute.xlu0 %992 }
 0x3db   : > { %v1034_v32 = vsel %vm319_vm2, %v993_v23, %v6834_v27  ;;  %v7140_v21 = vpop.permute.xlu1 %1286 }
 0x3dc   : > { %5520 = vmatpush3.bf16.msra.mxu0 %v1034_v32 }
 0x3de   : > { %v1139_v2 = vpop.permute.xlu0 %1138 }
 0x3df   : > { %1092 = vmatmul.mubr.bf16.vlgmr.msra.gmra.mrb[4].mxu0 %v6059_v28  ;;  %v1179_v33 = vsel %vm10090_vm15, %v1139_v2, %v1141_v7  ;;  %v7142_v14 = vpop.permute.xlu1 %1331 }
 0x3e2   : > { %v1171_v54 = vpop.permute.xlu0 %1170 }
 0x3e3   : > { %5541 = vmatprep.subr.bf16.mxu1 %v1171_v54  ;;  %v7144_v51 = vpop.permute.xlu1 %1291 }
 0x3e4   : > { %5542 = vmatpush3.bf16.msra.mxu1 %v1179_v33 }
 0x3e7   : > { %1236 = vmatmul.mubr.bf16.vlgmr.msra.gmra.mrb[4].mxu1 %v6062_v18  ;;  %v7150_v22 = vpop.permute.xlu1 %1336 }
 0x3eb   : > { %v7160_v48 = vpop.permute.xlu1 %1296 }
 0x3ef   : > { %v7164_v6 = vpop.permute.xlu1 %1341 }
 0x3f3   : > { %v1255_v35 = vpop.permute.xlu0 %1254  ;;  %v7170_v63 = vpop.permute.xlu1 %1301 }
 0x3f7   : > { %v7068_v27 = vpop.permute.xlu0 %1393  ;;  %v7174_v29 = vpop.permute.xlu1 %1306 }
 0x3f8   : > { %1471 = vrot.lane.b32.xlu1 %v7068_v27, %s10093_s22 }
 0x3fb   : > { %v7072_v24 = vpop.permute.xlu0 %1398 }
 0x3fc   : > { %1475 = vrot.lane.b32.xlu1 %v7072_v24, %s10093_s22 }
 0x3ff   : > { %v7076_v36 = vpop.permute.xlu0 %1358 }
 0x400   : > { %1443 = vrot.lane.b32.xlu1 %v7076_v36, %s10093_s22 }
 0x403   : > { %v7080_v55 = vpop.permute.xlu0 %1403 }
 0x404   : > { %1479 = vrot.lane.b32.xlu1 %v7080_v55, %s10093_s22 }
 0x407   : > { %v7084_v8 = vpop.permute.xlu0 %1363 }
 0x408   : > { %1447 = vrot.lane.b32.xlu1 %v7084_v8, %s10093_s22 }
 0x40b   : > { %v7088_v37 = vpop.permute.xlu0 %1408 }
 0x40c   : > { %1483 = vrot.lane.b32.xlu1 %v7088_v37, %s10093_s22 }
 0x40f   : > { %v7092_v38 = vpop.permute.xlu0 %1368 }
 0x410   : > { %1451 = vrot.lane.b32.xlu1 %v7092_v38, %s10093_s22 }
 0x413   : > { %v7096_v25 = vpop.permute.xlu0 %1413 }
 0x414   : > { %1487 = vrot.lane.b32.xlu1 %v7096_v25, %s10093_s22 }
 0x417   : > { %v7100_v56 = vpop.permute.xlu0 %1373 }
 0x418   : > { %1455 = vrot.lane.b32.xlu1 %v7100_v56, %s10093_s22 }
 0x41b   : > { %v7104_v9 = vpop.permute.xlu0 %1418 }
 0x41c   : > { %1491 = vrot.lane.b32.xlu1 %v7104_v9, %s10093_s22 }
 0x41f   : > { %v7108_v3 = vpop.permute.xlu0 %1378 }
 0x420   : > { %1459 = vrot.lane.b32.xlu1 %v7108_v3, %s10093_s22 }
 0x423   : > { %v7112_v26 = vpop.permute.xlu0 %1423 }
 0x424   : > { %1495 = vrot.lane.b32.xlu1 %v7112_v26, %s10093_s22 }
 0x427   : > { %v7116_v40 = vpop.permute.xlu0 %1383 }
 0x428   : > { %1463 = vrot.lane.b32.xlu1 %v7116_v40, %s10093_s22 }
 0x42b   : > { %v7120_v57 = vpop.permute.xlu0 %1428 }
 0x42c   : > { %1499 = vrot.lane.b32.xlu1 %v7120_v57, %s10093_s22 }
 0x42f   : > { %v7124_v10 = vpop.permute.xlu0 %1388 }
 0x430   : > { %1467 = vrot.lane.b32.xlu1 %v7124_v10, %s10093_s22 }
 0x46a   : > { %v7180_v53 = vpop.permute.xlu1 %1471 }
 0x46e   : > { %v7184_v30 = vpop.permute.xlu1 %1475 }
 0x472   : > { %v7190_v42 = vpop.permute.xlu1 %1443 }
 0x476   : > { %v7194_v1 = vpop.permute.xlu1 %1479 }
 0x47a   : > { %v7200_v23 = vpop.permute.xlu1 %1447 }
 0x47e   : > { %v7204_v32 = vpop.permute.xlu1 %1483 }
 0x482   : > { %v7208_v28 = vpop.permute.xlu1 %1451 }
 0x486   : > { %v7211_v2 = vpop.permute.xlu1 %1487 }
 0x48a   : > { %v7213_v7 = vpop.permute.xlu1 %1455 }
 0x48e   : > { %v7215_v54 = vpop.permute.xlu1 %1491 }
 0x492   : > { %v7217_v33 = vpop.permute.xlu1 %1459 }
 0x496   : > { %v7219_v18 = vpop.permute.xlu1 %1495 }
 0x4b2   : > { %v5521_v59 = vpop.f32.mrb[4].mxu0 }
 0x4b3   : > { %v5522_v4 = vpop.f32.mrb[5].mxu0 }
 0x4b4   : > { %v5523_v13 = vadd.f32 %v5522_v4, %v5521_v59  ;;  %v5524_v43 = vpop.f32.mrb[6].mxu0  ;;  %v7225_v59 = vpop.permute.xlu0 %1583 }
 0x4b5   : > { %v5525_v49 = vpop.f32.mrb[7].mxu0 }
 0x4b6   : > { %v5526_v60 = vadd.f32 %v5525_v49, %v5524_v43 }
 0x4ba   : > { %v5543_v20 = vpop.f32.mrb[4].mxu1 }
 0x4bb   : > { %v5544_v50 = vpop.f32.mrb[5].mxu1 }
 0x4bc   : > { %v5545_v44 = vadd.f32 %v5544_v50, %v5543_v20  ;;  %v5546_v15 = vpop.f32.mrb[6].mxu1 }
 0x4bd   : > { %v5547_v61 = vpop.f32.mrb[7].mxu1 }
 0x4be   : > { %v1238_v45 = vadd.f32 %v5545_v44, %v5523_v13  ;;  %v5548_v5 = vadd.f32 %v5547_v61, %v5546_v15 }
 0x4c0   : > { %v7146_v16 = vadd.f32 %v1250_v34, %v1238_v45  ;;  %v1241_v46 = vadd.f32 %v5548_v5, %v5526_v60 }
 0x4c2   : > { %v7148_v47 = vadd.f32 %v1255_v35, %v1241_v46  ;;  %v1259_v62 = vmax.f32 %v7146_v16, 0.0  ;;  %v7221_v35 = vpop.permute.xlu1 %1463 }
 0x4c4   : > { %v1260_v17 = vmax.f32 %v7148_v47, 0.0 }
 0x4c6   : > { %v1273_v52 = vpack.c.bf16 %v1260_v17, %v1259_v62  ;;  %v7223_v34 = vpop.permute.xlu1 %1499 }
 0x4c8   : > { %1391 = vrot.lane.b32.xlu1 %v1273_v52, %s10131_s3  ;;  %1313 = vrot.lane.b32.xlu0 %v1273_v52, %s10131_s3 }
 0x4ca   : > { %v7227_v4 = vpop.permute.xlu1 %1467 }
 0x4cc   : > { %1396 = vrot.lane.b32.xlu1 %v1273_v52, %s10132_s0  ;;  %1318 = vrot.lane.b32.xlu0 %v1273_v52, %s10132_s0 }
 0x4d0   : > { %1356 = vrot.lane.b32.xlu1 %v1273_v52, %s10093_s22  ;;  %1278 = vrot.lane.b32.xlu0 %v1273_v52, %s10093_s22 }
 0x4d4   : > { %1401 = vrot.lane.b32.xlu1 %v1273_v52, %s10133_s18  ;;  %1323 = vrot.lane.b32.xlu0 %v1273_v52, %s10133_s18 }
 0x4d8   : > { %1361 = vrot.lane.b32.xlu1 %v1273_v52, %s10125_s29  ;;  %1283 = vrot.lane.b32.xlu0 %v1273_v52, %s10125_s29 }
 0x4dc   : > { %1406 = vrot.lane.b32.xlu1 %v1273_v52, %s10126_s8  ;;  %1328 = vrot.lane.b32.xlu0 %v1273_v52, %s10126_s8 }
 0x4e0   : > { %1366 = vrot.lane.b32.xlu1 %v1273_v52, %s10127_s9  ;;  %1288 = vrot.lane.b32.xlu0 %v1273_v52, %s10127_s9 }
 0x4e4   : > { %1411 = vrot.lane.b32.xlu1 %v1273_v52, %s10128_s20  ;;  %1333 = vrot.lane.b32.xlu0 %v1273_v52, %s10128_s20 }
 0x4e8   : > { %1371 = vrot.lane.b32.xlu1 %v1273_v52, %s10129_s23  ;;  %1293 = vrot.lane.b32.xlu0 %v1273_v52, %s10129_s23 }
 0x4ec   : > { %1416 = vrot.lane.b32.xlu1 %v1273_v52, %s10119_s15  ;;  %1338 = vrot.lane.b32.xlu0 %v1273_v52, %s10119_s15 }
 0x4f0   : > { %1376 = vrot.lane.b32.xlu1 %v1273_v52, %s10120_s16  ;;  %1298 = vrot.lane.b32.xlu0 %v1273_v52, %s10120_s16 }
 0x4f4   : > { %1421 = vrot.lane.b32.xlu1 %v1273_v52, %s10121_s19  ;;  %1343 = vrot.lane.b32.xlu0 %v1273_v52, %s10121_s19 }
 0x4f8   : > { %1381 = vrot.lane.b32.xlu1 %v1273_v52, %s10122_s21  ;;  %1303 = vrot.lane.b32.xlu0 %v1273_v52, %s10122_s21 }
 0x4fc   : > { %1426 = vrot.lane.b32.xlu1 %v1273_v52, %s10123_s17  ;;  %1308 = vrot.lane.b32.xlu0 %v1273_v52, %s10124_s14 }
 0x500   : > { %1386 = vrot.lane.b32.xlu1 %v1273_v52, %s10124_s14 }
 0x504   : > { %1346 = vrot.lane.b32.xlu1 %v1273_v52, %s10123_s17 }
 0x508   : > { %1585 = vrot.lane.b32.xlu1 %v1273_v52, %s10130_s13 }
 0x53a   : > { %v1314_v13 = vpop.permute.xlu0 %1313  ;;  %v1392_v43 = vpop.permute.xlu1 %1391 }
 0x53b   : > { %v1395_v49 = vsel %vm361_vm0, %v1392_v43, %v7068_v27  ;;  %1617 = vrot.lane.b32.xlu1 %v1314_v13, %s10130_s13  ;;  %v1315_v20 = vsel %vm361_vm0, %v7128_v41, %v1314_v13 }
 0x53c   : > { %1469 = vrot.lane.b32.xlu0 %v1395_v49, %s10093_s22 }
 0x53e   : > { %v1319_v60 = vpop.permute.xlu0 %1318  ;;  %v1397_v50 = vpop.permute.xlu1 %1396 }
 0x53f   : > { %1621 = vrot.lane.b32.xlu1 %v1319_v60, %s10130_s13  ;;  %v1400_v15 = vsel %vm367_vm1, %v1397_v50, %v7072_v24  ;;  %v1320_v61 = vsel %vm367_vm1, %v7130_v11, %v1319_v60 }
 0x540   : > { %1615 = vrot.lane.b32.xlu0 %v1315_v20, %s10130_s13 }
 0x542   : > { %v1279_v44 = vpop.permute.xlu0 %1278  ;;  %v1357_v45 = vpop.permute.xlu1 %1356 }
 0x543   : > { %1589 = vrot.lane.b32.xlu1 %v1279_v44, %s10130_s13  ;;  %v7247_v5 = vsel %vm319_vm2, %v1357_v45, %v7076_v36  ;;  %v1280_v46 = vsel %vm319_vm2, %v7132_v58, %v1279_v44 }
 0x544   : > { %1473 = vrot.lane.b32.xlu0 %v1400_v15, %s10093_s22 }
 0x546   : > { %v1324_v27 = vpop.permute.xlu0 %1323  ;;  %v1402_v11 = vpop.permute.xlu1 %1401 }
 0x547   : > { %1625 = vrot.lane.b32.xlu1 %v1324_v27, %s10130_s13  ;;  %v1405_v13 = vsel %vm373_vm3, %v1402_v11, %v7080_v55  ;;  %v1325_v43 = vsel %vm373_vm3, %v7134_v39, %v1324_v27 }
 0x548   : > { %1619 = vrot.lane.b32.xlu0 %v1320_v61, %s10130_s13 }
 0x54a   : > { %v1284_v41 = vpop.permute.xlu0 %1283  ;;  %v1362_v49 = vpop.permute.xlu1 %1361 }
 0x54b   : > { %1593 = vrot.lane.b32.xlu1 %v1284_v41, %s10130_s13  ;;  %v1365_v60 = vsel %vm325_vm4, %v1362_v49, %v7084_v8  ;;  %v1285_v20 = vsel %vm325_vm4, %v7136_v19, %v1284_v41 }
 0x54c   : > { %1441 = vrot.lane.b32.xlu0 %v7247_v5, %s10093_s22 }
 0x54e   : > { %v1329_v24 = vpop.permute.xlu0 %1328  ;;  %v1407_v50 = vpop.permute.xlu1 %1406 }
 0x54f   : > { %1629 = vrot.lane.b32.xlu1 %v1329_v24, %s10130_s13  ;;  %v1410_v44 = vsel %vm379_vm5, %v1407_v50, %v7088_v37  ;;  %v1330_v15 = vsel %vm379_vm5, %v7138_v12, %v1329_v24  ;;  %v5384_v12 = vld [vmem:[%s10047_s2 + $0x20] sm:$0xff] }
 0x550   : > { %1587 = vrot.lane.b32.xlu0 %v1280_v46, %s10130_s13 }
 0x552   : > { %v1289_v52 = vpop.permute.xlu0 %1288  ;;  %v1367_v27 = vpop.permute.xlu1 %1366 }
 0x553   : > { %1597 = vrot.lane.b32.xlu1 %v1289_v52, %s10130_s13  ;;  %v1370_v61 = vsel %vm331_vm6, %v1367_v27, %v7092_v38  ;;  %v1290_v45 = vsel %vm331_vm6, %v7140_v21, %v1289_v52 }
 0x554   : > { %1477 = vrot.lane.b32.xlu0 %v1405_v13, %s10093_s22 }
 0x556   : > { %v1334_v36 = vpop.permute.xlu0 %1333  ;;  %v1412_v41 = vpop.permute.xlu1 %1411 }
 0x557   : > { %1633 = vrot.lane.b32.xlu1 %v1334_v36, %s10130_s13  ;;  %v1415_v38 = vsel %vm385_vm7, %v1412_v41, %v7096_v25  ;;  %v1335_v24 = vsel %vm385_vm7, %v7142_v14, %v1334_v36 }
 0x558   : > { %1623 = vrot.lane.b32.xlu0 %v1325_v43, %s10130_s13 }
 0x55a   : > { %v1294_v58 = vpop.permute.xlu0 %1293  ;;  %v1372_v46 = vpop.permute.xlu1 %1371 }
 0x55b   : > { %1601 = vrot.lane.b32.xlu1 %v1294_v58, %s10130_s13  ;;  %v1375_v21 = vsel %vm337_vm8, %v1372_v46, %v7100_v56  ;;  %v1295_v11 = vsel %vm337_vm8, %v7144_v51, %v1294_v58 }
 0x55c   : > { %1445 = vrot.lane.b32.xlu0 %v1365_v60, %s10093_s22 }
 0x55e   : > { %v1339_v55 = vpop.permute.xlu0 %1338  ;;  %v1417_v52 = vpop.permute.xlu1 %1416 }
 0x55f   : > { %1637 = vrot.lane.b32.xlu1 %v1339_v55, %s10130_s13  ;;  %v1420_v25 = vsel %vm391_vm9, %v1417_v52, %v7104_v9  ;;  %v1340_v14 = vsel %vm391_vm9, %v7150_v22, %v1339_v55 }
 0x560   : > { %1591 = vrot.lane.b32.xlu0 %v1285_v20, %s10130_s13 }
 0x562   : > { %v1299_v39 = vpop.permute.xlu0 %1298  ;;  %v1377_v13 = vpop.permute.xlu1 %1376 }
 0x563   : > { %1605 = vrot.lane.b32.xlu1 %v1299_v39, %s10130_s13  ;;  %v1380_v56 = vsel %vm343_vm10, %v1377_v13, %v7108_v3  ;;  %v1300_v51 = vsel %vm343_vm10, %v7160_v48, %v1299_v39 }
 0x564   : > { %1481 = vrot.lane.b32.xlu0 %v1410_v44, %s10093_s22 }
 0x566   : > { %v1344_v8 = vpop.permute.xlu0 %1343  ;;  %v1422_v36 = vpop.permute.xlu1 %1421 }
 0x567   : > { %1641 = vrot.lane.b32.xlu1 %v1344_v8, %s10130_s13  ;;  %v1425_v9 = vsel %vm10102_vm11, %v1422_v36, %v7112_v26  ;;  %v1345_v43 = vsel %vm10102_vm11, %v7164_v6, %v1344_v8  ;;  %v6067_v26 = vld [vmem:[%s10046_s1 + $0x4c] ss:$16 sps:$4 sm:$0xff]  }
 0x568   : > { %1627 = vrot.lane.b32.xlu0 %v1330_v15, %s10130_s13  ;;  %1564 = vmatprep.mubr.bf16.mxu0 %v6067_v26 }
 0x56a   : > { %v1304_v19 = vpop.permute.xlu0 %1303  ;;  %v1382_v22 = vpop.permute.xlu1 %1381 }
 0x56b   : > { %1609 = vrot.lane.b32.xlu1 %v1304_v19, %s10130_s13  ;;  %v1385_v3 = vsel %vm10101_vm12, %v1382_v22, %v7116_v40  ;;  %v1305_v48 = vsel %vm10101_vm12, %v7170_v63, %v1304_v19  ;;  %v6070_v40 = vld [vmem:[%s10046_s1 + $0x44] ss:$16 sps:$4 sm:$0xff]  }
 0x56c   : > { %1449 = vrot.lane.b32.xlu0 %v1370_v61, %s10093_s22  ;;  %1708 = vmatprep.mubr.bf16.mxu1 %v6070_v40 }
 0x56e   : > { %v1309_v37 = vpop.permute.xlu0 %1308  ;;  %v1427_v49 = vpop.permute.xlu1 %1426 }
 0x56f   : > { %1613 = vrot.lane.b32.xlu1 %v1309_v37, %s10130_s13  ;;  %v1430_v6 = vsel %vm10099_vm13, %v1427_v49, %v7120_v57  ;;  %v1310_v55 = vsel %vm10098_vm14, %v7174_v29, %v1309_v37 }
 0x570   : > { %1595 = vrot.lane.b32.xlu0 %v1290_v45, %s10130_s13 }
 0x572   : > { %v1387_v58 = vpop.permute.xlu1 %1386 }
 0x573   : > { %1722 = vperm.xlu1 %6048, %v5384_v12   ;;  %v1390_v63 = vsel %vm10098_vm14, %v1387_v58, %v7124_v10  ;;  %v5385_v10 = vld [vmem:[%s10047_s2 + $0x28] sm:$0xff] }
 0x574   : > { %1485 = vrot.lane.b32.xlu0 %v1415_v38, %s10093_s22 }
 0x576   : > { %v1347_v60 = vpop.permute.xlu1 %1346 }
 0x578   : > { %1631 = vrot.lane.b32.xlu0 %v1335_v24, %s10130_s13 }
 0x57a   : > { %v1586_v57 = vpop.permute.xlu1 %1585 }
 0x57b   : > { %v1645_v8 = vsel %vm10090_vm15, %v7225_v59, %v1586_v57 }
 0x57c   : > { %1453 = vrot.lane.b32.xlu0 %v1375_v21, %s10093_s22 }
 0x580   : > { %1599 = vrot.lane.b32.xlu0 %v1295_v11, %s10130_s13 }
 0x584   : > { %1489 = vrot.lane.b32.xlu0 %v1420_v25, %s10093_s22 }
 0x588   : > { %1635 = vrot.lane.b32.xlu0 %v1340_v14, %s10130_s13 }
 0x58c   : > { %1457 = vrot.lane.b32.xlu0 %v1380_v56, %s10093_s22 }
 0x590   : > { %1603 = vrot.lane.b32.xlu0 %v1300_v51, %s10130_s13 }
 0x594   : > { %1493 = vrot.lane.b32.xlu0 %v1425_v9, %s10093_s22 }
 0x598   : > { %1639 = vrot.lane.b32.xlu0 %v1345_v43, %s10130_s13 }
 0x59c   : > { %1461 = vrot.lane.b32.xlu0 %v1385_v3, %s10093_s22 }
 0x5a0   : > { %1607 = vrot.lane.b32.xlu0 %v1305_v48, %s10130_s13 }
 0x5a4   : > { %1497 = vrot.lane.b32.xlu0 %v1430_v6, %s10093_s22 }
 0x5a8   : > { %1465 = vrot.lane.b32.xlu0 %v1390_v63, %s10093_s22 }
 0x5ac   : > { %1611 = vrot.lane.b32.xlu0 %v1310_v55, %s10130_s13 }
 0x5ad   : > { %v1618_v39 = vpop.permute.xlu1 %1617 }
 0x5ae   : > { %v1470_v20 = vpop.permute.xlu0 %1469 }
 0x5af   : > { %v1508_v50 = vsel %vm319_vm2, %v1470_v20, %v7180_v53 }
 0x5b0   : > { %5549 = vmatprep.subr.bf16.mxu0 %v1508_v50  ;;  %1643 = vrot.lane.b32.xlu0 %v1347_v60, %s10130_s13 }
 0x5b1   : > { %5550 = vmatpush3.bf16.msra.mxu0 %v7247_v5  ;;  %v1622_v5 = vpop.permute.xlu1 %1621 }
 0x5b2   : > { %v1616_v44 = vpop.permute.xlu0 %1615 }
 0x5b3   : > { %v1653_v29 = vsel %vm10090_vm15, %v1616_v44, %v1618_v39 }
 0x5b4   : > { %1727 = vperm.xlu0 %6047, %v5385_v10   ;;  %5571 = vmatprep.subr.bf16.mxu1 %v1653_v29 }
 0x5b5   : > { %5572 = vmatpush3.bf16.msra.mxu1 %v1645_v8  ;;  %v1590_v45 = vpop.permute.xlu1 %1589 }
 0x5b6   : > { %v1474_v53 = vpop.permute.xlu0 %1473 }
 0x5b7   : > { %v1509_v15 = vsel %vm319_vm2, %v1474_v53, %v7184_v30 }
 0x5b8   : > { %5551 = vmatprep.subr.bf16.mxu0 %v1509_v15 }
 0x5b9   : > { %v1626_v38 = vpop.permute.xlu1 %1625 }
 0x5ba   : > { %v1620_v27 = vpop.permute.xlu0 %1619 }
 0x5bb   : > { %v1654_v19 = vsel %vm10090_vm15, %v1620_v27, %v1622_v5 }
 0x5bc   : > { %5573 = vmatprep.subr.bf16.mxu1 %v1654_v19 }
 0x5bd   : > { %v1594_v11 = vpop.permute.xlu1 %1593 }
 0x5be   : > { %v1442_v61 = vpop.permute.xlu0 %1441 }
 0x5bf   : > { %v1501_v37 = vsel %vm319_vm2, %v1442_v61, %v7190_v42 }
 0x5c0   : > { %5552 = vmatpush3.bf16.msra.mxu0 %v1501_v37 }
 0x5c1   : > { %v1630_v13 = vpop.permute.xlu1 %1629 }
 0x5c2   : > { %v1588_v59 = vpop.permute.xlu0 %1587 }
 0x5c3   : > { %v1646_v41 = vsel %vm10090_vm15, %v1588_v59, %v1590_v45 }
 0x5c4   : > { %5574 = vmatpush3.bf16.msra.mxu1 %v1646_v41  ;;  %v6065_v41 = vld [vmem:[%s10046_s1 + $0x48] ss:$16 sps:$4 sm:$0xff]  }
 0x5c5   : > { %v1598_v9 = vpop.permute.xlu1 %1597 }
 0x5c6   : > { %v1478_v12 = vpop.permute.xlu0 %1477 }
 0x5c7   : > { %v1510_v30 = vsel %vm319_vm2, %v1478_v12, %v7194_v1 }
 0x5c8   : > { %5553 = vmatprep.subr.bf16.mxu0 %v1510_v30 }
 0x5c9   : > { %v1634_v49 = vpop.permute.xlu1 %1633 }
 0x5ca   : > { %v1624_v24 = vpop.permute.xlu0 %1623 }
 0x5cb   : > { %v1655_v46 = vsel %vm10090_vm15, %v1624_v24, %v1626_v38 }
 0x5cc   : > { %5575 = vmatprep.subr.bf16.mxu1 %v1655_v46 }
 0x5cd   : > { %v1602_v6 = vpop.permute.xlu1 %1601 }
 0x5ce   : > { %v1446_v21 = vpop.permute.xlu0 %1445 }
 0x5cf   : > { %v1502_v42 = vsel %vm319_vm2, %v1446_v21, %v7200_v23 }
 0x5d0   : > { %5554 = vmatpush3.bf16.msra.mxu0 %v1502_v42 }
 0x5d1   : > { %v1638_v55 = vpop.permute.xlu1 %1637 }
 0x5d2   : > { %v1592_v52 = vpop.permute.xlu0 %1591 }
 0x5d3   : > { %v1647_v25 = vsel %vm10090_vm15, %v1592_v52, %v1594_v11 }
 0x5d4   : > { %5576 = vmatpush3.bf16.msra.mxu1 %v1647_v25 }
 0x5d5   : > { %v1606_v10 = vpop.permute.xlu1 %1605 }
 0x5d6   : > { %v1482_v14 = vpop.permute.xlu0 %1481 }
 0x5d7   : > { %v1511_v1 = vsel %vm319_vm2, %v1482_v14, %v7204_v32 }
 0x5d8   : > { %5555 = vmatprep.subr.bf16.mxu0 %v1511_v1 }
 0x5d9   : > { %v1642_v8 = vpop.permute.xlu1 %1641 }
 0x5da   : > { %v1628_v56 = vpop.permute.xlu0 %1627 }
 0x5db   : > { %v1656_v51 = vsel %vm10090_vm15, %v1628_v56, %v1630_v13 }
 0x5dc   : > { %5577 = vmatprep.subr.bf16.mxu1 %v1656_v51 }
 0x5dd   : > { %v1610_v27 = vpop.permute.xlu1 %1609 }
 0x5de   : > { %v1450_v36 = vpop.permute.xlu0 %1449 }
 0x5df   : > { %v1503_v23 = vsel %vm319_vm2, %v1450_v36, %v7208_v28 }
 0x5e0   : > { %5556 = vmatpush3.bf16.msra.mxu0 %v1503_v23 }
 0x5e1   : > { %v1614_v12 = vpop.permute.xlu1 %1613 }
 0x5e2   : > { %v1596_v22 = vpop.permute.xlu0 %1595 }
 0x5e3   : > { %v1648_v43 = vsel %vm10090_vm15, %v1596_v22, %v1598_v9 }
 0x5e4   : > { %5578 = vmatpush3.bf16.msra.mxu1 %v1648_v43 }
 0x5e6   : > { %v1486_v3 = vpop.permute.xlu0 %1485 }
 0x5e7   : > { %v1512_v32 = vsel %vm319_vm2, %v1486_v3, %v7211_v2 }
 0x5e8   : > { %5557 = vmatprep.subr.bf16.mxu0 %v1512_v32 }
 0x5ea   : > { %v1632_v48 = vpop.permute.xlu0 %1631 }
 0x5eb   : > { %v1657_v26 = vsel %vm10090_vm15, %v1632_v48, %v1634_v49  ;;  %v6228_v48 = vmov 0.0  }
 0x5ec   : > { %5579 = vmatprep.subr.bf16.mxu1 %v1657_v26 }
 0x5ee   : > { %v1454_v58 = vpop.permute.xlu0 %1453 }
 0x5ef   : > { %v1504_v28 = vsel %vm319_vm2, %v1454_v58, %v7213_v7 }
 0x5f0   : > { %5558 = vmatpush3.bf16.msra.mxu0 %v1504_v28 }
 0x5f2   : > { %v1600_v40 = vpop.permute.xlu0 %1599  ;;  %v1723_v36 = vpop.permute.xlu1 %1722 }
 0x5f3   : > { %v1649_v63 = vsel %vm10090_vm15, %v1600_v40, %v1602_v6 }
 0x5f4   : > { %5580 = vmatpush3.bf16.msra.mxu1 %v1649_v63 }
 0x5f6   : > { %v1490_v60 = vpop.permute.xlu0 %1489 }
 0x5f7   : > { %v1513_v2 = vsel %vm319_vm2, %v1490_v60, %v7215_v54 }
 0x5f8   : > { %5559 = vmatprep.subr.bf16.mxu0 %v1513_v2 }
 0x5fa   : > { %v1636_v57 = vpop.permute.xlu0 %1635 }
 0x5fb   : > { %v1658_v20 = vsel %vm10090_vm15, %v1636_v57, %v1638_v55 }
 0x5fc   : > { %5581 = vmatprep.subr.bf16.mxu1 %v1658_v20 }
 0x5fe   : > { %v1458_v50 = vpop.permute.xlu0 %1457 }
 0x5ff   : > { %v1505_v7 = vsel %vm319_vm2, %v1458_v50, %v7217_v33 }
 0x600   : > { %5560 = vmatpush3.bf16.msra.mxu0 %v1505_v7 }
 0x602   : > { %v1604_v39 = vpop.permute.xlu0 %1603 }
 0x603   : > { %v1650_v44 = vsel %vm10090_vm15, %v1604_v39, %v1606_v10 }
 0x604   : > { %5582 = vmatpush3.bf16.msra.mxu1 %v1650_v44 }
 0x606   : > { %v1494_v29 = vpop.permute.xlu0 %1493 }
 0x607   : > { %v1514_v54 = vsel %vm319_vm2, %v1494_v29, %v7219_v18 }
 0x608   : > { %5561 = vmatprep.subr.bf16.mxu0 %v1514_v54  ;;  %v1785_v54 = vld [vmem:[%s10049_s4] sm:$0xff] }
 0x60a   : > { %v1640_v53 = vpop.permute.xlu0 %1639 }
 0x60b   : > { %v1659_v15 = vsel %vm10090_vm15, %v1640_v53, %v1642_v8 }
 0x60c   : > { %5583 = vmatprep.subr.bf16.mxu1 %v1659_v15 }
 0x60e   : > { %v1462_v5 = vpop.permute.xlu0 %1461 }
 0x60f   : > { %v1506_v33 = vsel %vm319_vm2, %v1462_v5, %v7221_v35  ;;  %v1786_v5 = vld [vmem:[%s10049_s4 + $0x8] sm:$0xff] }
 0x610   : > { %5562 = vmatpush3.bf16.msra.mxu0 %v1506_v33 }
 0x612   : > { %v1608_v19 = vpop.permute.xlu0 %1607 }
 0x613   : > { %v1651_v61 = vsel %vm10090_vm15, %v1608_v19, %v1610_v27 }
 0x614   : > { %5584 = vmatpush3.bf16.msra.mxu1 %v1651_v61 }
 0x616   : > { %v1498_v37 = vpop.permute.xlu0 %1497 }
 0x617   : > { %v1515_v18 = vsel %vm319_vm2, %v1498_v37, %v7223_v34  ;;  %v6068_v34 = vld [vmem:[%s10046_s1 + $0x40] ss:$16 sps:$4 sm:$0xff]  }
 0x618   : > { %5563 = vmatprep.subr.bf16.mxu0 %v1515_v18 }
 0x61a   : > { %v1466_v45 = vpop.permute.xlu0 %1465 }
 0x61b   : > { %v1507_v59 = vsel %vm319_vm2, %v1466_v45, %v7227_v4 }
 0x61c   : > { %5564 = vmatpush3.bf16.msra.mxu0 %v1507_v59 }
 0x61d   : > { %5893 = vmatprep.subr.bf16.mxu0 %v6228_v48 }
 0x61e   : > { %v1612_v35 = vpop.permute.xlu0 %1611 }
 0x61f   : > { %1565 = vmatmul.mubr.bf16.vlgmr.msra.gmra.mrb[8].mxu0 %v6065_v41  ;;  %v1652_v38 = vsel %vm10090_vm15, %v1612_v35, %v1614_v12  ;;  %vm10091_vm15 = vmmov 0  }
 0x620   : > { %5909 = vmatprep.mubr.msk.bf16.mxu0 %vm10091_vm15, %v6228_v48  ;;  %vm10097_vm15 = vcmask 7168  }
 0x622   : > { %v1644_v30 = vpop.permute.xlu0 %1643 }
 0x623   : > { %5585 = vmatprep.subr.bf16.mxu1 %v1644_v30 }
 0x624   : > { %5586 = vmatpush3.bf16.msra.mxu1 %v1652_v38 }
 0x627   : > { %1709 = vmatmul.mubr.bf16.vlgmr.msra.gmra.mrb[8].mxu1 %v6068_v34 }
 0x633   : > { %v1728_v22 = vpop.permute.xlu0 %1727 }
 0x6f2   : > { %v5565_v24 = vpop.f32.mrb[8].mxu0 }
 0x6f3   : > { %v5566_v4 = vpop.f32.mrb[9].mxu0 }
 0x6f4   : > { %v5567_v46 = vadd.f32 %v5566_v4, %v5565_v24  ;;  %v5568_v21 = vpop.f32.mrb[10].mxu0 }
 0x6f5   : > { %v5569_v42 = vpop.f32.mrb[11].mxu0 }
 0x6f6   : > { %v5570_v11 = vadd.f32 %v5569_v42, %v5568_v21 }
 0x6fa   : > { %v5587_v52 = vpop.f32.mrb[8].mxu1 }
 0x6fb   : > { %v5588_v25 = vpop.f32.mrb[9].mxu1 }
 0x6fc   : > { %v5589_v14 = vadd.f32 %v5588_v25, %v5587_v52  ;;  %v5590_v1 = vpop.f32.mrb[10].mxu1  ;;  %v6071_v25 = vld [vmem:[#allocation3] sm:$0xff]  }
 0x6fd   : > { %v5591_v13 = vpop.f32.mrb[11].mxu1 }
 0x6fe   : > { %v1711_v56 = vadd.f32 %v5589_v14, %v5567_v46  ;;  %v5592_v51 = vadd.f32 %v5591_v13, %v5590_v1 }
 0x700   : > { %v1730_v23 = vadd.f32 %v1723_v36, %v1711_v56  ;;  %v1714_v9 = vadd.f32 %v5592_v51, %v5570_v11 }
 0x702   : > { %v1731_v43 = vadd.f32 %v1728_v22, %v1714_v9  ;;  %v1732_v3 = vmax.f32 %v1730_v23, 0.0 }
 0x704   : > { %v1733_v32 = vmax.f32 %v1731_v43, 0.0 }
 0x706   : > { %v1741_v49 = vpack.c.bf16 %v1733_v32, %v1732_v3 }
 0x708   : > { %1753 = vrot.lane.b32.xlu0 %v1741_v49, %s10125_s29  ;;  %1749 = vrot.lane.b32.xlu1 %v1741_v49, %s10093_s22  ;;  %s10161_s22 = smov 1  }
 0x70c   : > { %1758 = vrot.lane.b32.xlu0 %v1741_v49, %s10127_s9  ;;  %1755 = vrot.lane.b32.xlu1 %v6210_v0, %s10125_s29 }
 0x710   : > { %1763 = vrot.lane.b32.xlu0 %v1741_v49, %s10129_s23  ;;  %1760 = vrot.lane.b32.xlu1 %v6210_v0, %s10127_s9 }
 0x714   : > { %1768 = vrot.lane.b32.xlu0 %v1741_v49, %s10120_s16  ;;  %1765 = vrot.lane.b32.xlu1 %v6210_v0, %s10129_s23 }
 0x718   : > { %1773 = vrot.lane.b32.xlu0 %v1741_v49, %s10122_s21  ;;  %1770 = vrot.lane.b32.xlu1 %v6210_v0, %s10120_s16 }
 0x71c   : > { %1778 = vrot.lane.b32.xlu0 %v1741_v49, %s10124_s14  ;;  %1775 = vrot.lane.b32.xlu1 %v6210_v0, %s10122_s21 }
 0x720   : > { %1780 = vrot.lane.b32.xlu1 %v6210_v0, %s10124_s14  ;;  %1804 = vrot.lane.b32.xlu0 %v6210_v0, %s10095_s10 }
 0x724   : > { %1806 = vrot.lane.b32.xlu1 %v1741_v49, %s10095_s10 }
 0x77a   : > { %v1754_v26 = vpop.permute.xlu0 %1753  ;;  %v1750_v58 = vpop.permute.xlu1 %1749 }
 0x77b   : > { %1810 = vrot.lane.b32.xlu1 %v1754_v26, %s10095_s10  ;;  %1808 = vrot.lane.b32.xlu0 %v1750_v58, %s10095_s10 }
 0x77e   : > { %v1759_v28 = vpop.permute.xlu0 %1758  ;;  %v1756_v6 = vpop.permute.xlu1 %1755 }
 0x77f   : > { %v1757_v40 = vsel %vm325_vm4, %v1754_v26, %v1756_v6  ;;  %1814 = vrot.lane.b32.xlu1 %v1759_v28, %s10095_s10 }
 0x780   : > { %1812 = vrot.lane.b32.xlu0 %v1757_v40, %s10095_s10 }
 0x782   : > { %v1764_v63 = vpop.permute.xlu0 %1763  ;;  %v1761_v60 = vpop.permute.xlu1 %1760 }
 0x783   : > { %v1762_v2 = vsel %vm331_vm6, %v1759_v28, %v1761_v60  ;;  %1818 = vrot.lane.b32.xlu1 %v1764_v63, %s10095_s10 }
 0x784   : > { %1816 = vrot.lane.b32.xlu0 %v1762_v2, %s10095_s10 }
 0x786   : > { %v1769_v55 = vpop.permute.xlu0 %1768  ;;  %v1766_v57 = vpop.permute.xlu1 %1765 }
 0x787   : > { %v1767_v20 = vsel %vm337_vm8, %v1764_v63, %v1766_v57  ;;  %1822 = vrot.lane.b32.xlu1 %v1769_v55, %s10095_s10 }
 0x788   : > { %1820 = vrot.lane.b32.xlu0 %v1767_v20, %s10095_s10 }
 0x78a   : > { %v1774_v50 = vpop.permute.xlu0 %1773  ;;  %v1771_v7 = vpop.permute.xlu1 %1770 }
 0x78b   : > { %v1772_v10 = vsel %vm343_vm10, %v1769_v55, %v1771_v7  ;;  %1826 = vrot.lane.b32.xlu1 %v1774_v50, %s10095_s10 }
 0x78c   : > { %1824 = vrot.lane.b32.xlu0 %v1772_v10, %s10095_s10 }
 0x78e   : > { %v1779_v39 = vpop.permute.xlu0 %1778  ;;  %v1776_v44 = vpop.permute.xlu1 %1775 }
 0x78f   : > { %v1777_v29 = vsel %vm10101_vm12, %v1774_v50, %v1776_v44  ;;  %1830 = vrot.lane.b32.xlu1 %v1779_v39, %s10095_s10 }
 0x790   : > { %1828 = vrot.lane.b32.xlu0 %v1777_v29, %s10095_s10 }
 0x792   : > { %v1781_v8 = vpop.permute.xlu1 %1780  ;;  %v1805_v15 = vpop.permute.xlu0 %1804 }
 0x793   : > { %v1782_v53 = vsel %vm10098_vm14, %v1779_v39, %v1781_v8  ;;  %1789 = vperm.xlu1 %6048, %v1785_v54  }
 0x794   : > { %1832 = vrot.lane.b32.xlu0 %v1782_v53, %s10095_s10 }
 0x796   : > { %v1807_v33 = vpop.permute.xlu1 %1806 }
 0x797   : > { %v1835_v27 = vsel %vm10097_vm15, %v1805_v15, %v1807_v33  ;;  %1945 = vrot.lane.b32.xlu1 %v6210_v0, %s10131_s3 }
 0x798   : > { %1794 = vperm.xlu0 %6047, %v1786_v5   ;;  %5894 = vmatpush3.bf16.msra.mxu0 %v1835_v27 }
 0x799   : > { %5895 = vmatprep.subr.bf16.mxu0 %v6228_v48 }
 0x79b   : > { %1950 = vrot.lane.b32.xlu1 %v6210_v0, %s10132_s0 }
 0x79c   : > { %2027 = vrot.lane.b32.xlu0 %v6210_v0, %s10131_s3 }
 0x79f   : > { %1910 = vrot.lane.b32.xlu1 %v6210_v0, %s10134_s12 }
 0x7a0   : > { %2032 = vrot.lane.b32.xlu0 %v6210_v0, %s10132_s0 }
 0x7a3   : > { %1955 = vrot.lane.b32.xlu1 %v6210_v0, %s10133_s18 }
 0x7a4   : > { %1992 = vrot.lane.b32.xlu0 %v6210_v0, %s10134_s12 }
 0x7a7   : > { %1915 = vrot.lane.b32.xlu1 %v6210_v0, %s10125_s29 }
 0x7a8   : > { %2037 = vrot.lane.b32.xlu0 %v6210_v0, %s10133_s18 }
 0x7ab   : > { %1960 = vrot.lane.b32.xlu1 %v6210_v0, %s10126_s8 }
 0x7ac   : > { %1997 = vrot.lane.b32.xlu0 %v6210_v0, %s10125_s29 }
 0x7af   : > { %1920 = vrot.lane.b32.xlu1 %v6210_v0, %s10127_s9 }
 0x7b0   : > { %2042 = vrot.lane.b32.xlu0 %v6210_v0, %s10126_s8 }
 0x7b3   : > { %1965 = vrot.lane.b32.xlu1 %v6210_v0, %s10128_s20 }
 0x7b4   : > { %2002 = vrot.lane.b32.xlu0 %v6210_v0, %s10127_s9 }
 0x7b7   : > { %1925 = vrot.lane.b32.xlu1 %v6210_v0, %s10129_s23 }
 0x7b8   : > { %2047 = vrot.lane.b32.xlu0 %v6210_v0, %s10128_s20 }
 0x7bb   : > { %1970 = vrot.lane.b32.xlu1 %v6210_v0, %s10119_s15 }
 0x7bc   : > { %2007 = vrot.lane.b32.xlu0 %v6210_v0, %s10129_s23 }
 0x7bf   : > { %1930 = vrot.lane.b32.xlu1 %v6210_v0, %s10120_s16 }
 0x7c0   : > { %2052 = vrot.lane.b32.xlu0 %v6210_v0, %s10119_s15 }
 0x7c3   : > { %1975 = vrot.lane.b32.xlu1 %v6210_v0, %s10121_s19 }
 0x7c4   : > { %2012 = vrot.lane.b32.xlu0 %v6210_v0, %s10120_s16 }
 0x7c7   : > { %1935 = vrot.lane.b32.xlu1 %v6210_v0, %s10122_s21 }
 0x7c8   : > { %2057 = vrot.lane.b32.xlu0 %v6210_v0, %s10121_s19 }
 0x7cb   : > { %1940 = vrot.lane.b32.xlu1 %v6210_v0, %s10124_s14 }
 0x7cc   : > { %2017 = vrot.lane.b32.xlu0 %v6210_v0, %s10122_s21 }
 0x7d0   : > { %2062 = vrot.lane.b32.xlu0 %v6210_v0, %s10123_s17 }
 0x7d4   : > { %2022 = vrot.lane.b32.xlu0 %v6210_v0, %s10124_s14 }
 0x7d8   : > { %2217 = vrot.lane.b32.xlu0 %v6210_v0, %s10130_s13 }
 0x7ed   : > { %v1809_v19 = vpop.permute.xlu0 %1808  ;;  %v1811_v61 = vpop.permute.xlu1 %1810 }
 0x7ee   : > { %5896 = vmatpush3.bf16.msra.mxu0 %v1809_v19 }
 0x7ef   : > { %5897 = vmatprep.subr.bf16.mxu0 %v6228_v48 }
 0x7f1   : > { %v1815_v37 = vpop.permute.xlu1 %1814 }
 0x7f2   : > { %v1813_v18 = vpop.permute.xlu0 %1812 }
 0x7f3   : > { %v1836_v45 = vsel %vm10097_vm15, %v1811_v61, %v1813_v18 }
 0x7f4   : > { %5898 = vmatpush3.bf16.msra.mxu0 %v1836_v45 }
 0x7f5   : > { %v1819_v59 = vpop.permute.xlu1 %1818  ;;  %5899 = vmatprep.subr.bf16.mxu0 %v6228_v48 }
 0x7f6   : > { %v1817_v41 = vpop.permute.xlu0 %1816 }
 0x7f7   : > { %v1837_v35 = vsel %vm10097_vm15, %v1815_v37, %v1817_v41 }
 0x7f8   : > { %5900 = vmatpush3.bf16.msra.mxu0 %v1837_v35 }
 0x7f9   : > { %5901 = vmatprep.subr.bf16.mxu0 %v6228_v48  ;;  %v1823_v12 = vpop.permute.xlu1 %1822 }
 0x7fa   : > { %v1821_v30 = vpop.permute.xlu0 %1820 }
 0x7fb   : > { %v1838_v38 = vsel %vm10097_vm15, %v1819_v59, %v1821_v30 }
 0x7fc   : > { %5902 = vmatpush3.bf16.msra.mxu0 %v1838_v38 }
 0x7fd   : > { %5903 = vmatprep.subr.bf16.mxu0 %v6228_v48  ;;  %v1827_v4 = vpop.permute.xlu1 %1826 }
 0x7fe   : > { %v1825_v34 = vpop.permute.xlu0 %1824 }
 0x7ff   : > { %v1839_v24 = vsel %vm10097_vm15, %v1823_v12, %v1825_v34 }
 0x800   : > { %5904 = vmatpush3.bf16.msra.mxu0 %v1839_v24 }
 0x801   : > { %5905 = vmatprep.subr.bf16.mxu0 %v6228_v48  ;;  %v1831_v42 = vpop.permute.xlu1 %1830 }
 0x802   : > { %v1829_v46 = vpop.permute.xlu0 %1828 }
 0x803   : > { %v1840_v21 = vsel %vm10097_vm15, %v1827_v4, %v1829_v46 }
 0x804   : > { %5906 = vmatpush3.bf16.msra.mxu0 %v1840_v21 }
 0x805   : > { %5907 = vmatprep.subr.bf16.mxu0 %v6228_v48 }
 0x806   : > { %v1833_v11 = vpop.permute.xlu0 %1832 }
 0x807   : > { %v1841_v52 = vsel %vm10097_vm15, %v1831_v42, %v1833_v11  ;;  %vm10135_vm15 = vcmask 121856  }
 0x808   : > { %5908 = vmatpush3.bf16.msra.mxu0 %v1841_v52 }
 0x80b   : > { %5910 = vmatmul.mubr.bf16.vlgmr.msra.gmra.mrb[12].mxu0 %v6071_v25 }
 0x812   : > { %v1790_v6 = vpop.permute.xlu1 %1789 }
 0x816   : > { %v7583_v40 = vpop.permute.xlu1 %1945 }
 0x817   : > { %v1795_v14 = vpop.permute.xlu0 %1794 }
 0x81a   : > { %v7585_v63 = vpop.permute.xlu1 %1950 }
 0x81b   : > { %v7523_v1 = vpop.permute.xlu0 %2027 }
 0x81c   : > { %2105 = vrot.lane.b32.xlu1 %v7523_v1, %s10134_s12 }
 0x81e   : > { %v7587_v60 = vpop.permute.xlu1 %1910 }
 0x81f   : > { %v7527_v13 = vpop.permute.xlu0 %2032 }
 0x820   : > { %2109 = vrot.lane.b32.xlu1 %v7527_v13, %s10134_s12 }
 0x822   : > { %v7589_v2 = vpop.permute.xlu1 %1955 }
 0x823   : > { %v7531_v56 = vpop.permute.xlu0 %1992 }
 0x824   : > { %2077 = vrot.lane.b32.xlu1 %v7531_v56, %s10134_s12 }
 0x826   : > { %v7591_v55 = vpop.permute.xlu1 %1915 }
 0x827   : > { %v7535_v51 = vpop.permute.xlu0 %2037 }
 0x828   : > { %2113 = vrot.lane.b32.xlu1 %v7535_v51, %s10134_s12 }
 0x82a   : > { %v7593_v57 = vpop.permute.xlu1 %1960 }
 0x82b   : > { %v7539_v36 = vpop.permute.xlu0 %1997 }
 0x82c   : > { %2081 = vrot.lane.b32.xlu1 %v7539_v36, %s10134_s12 }
 0x82e   : > { %v7595_v20 = vpop.permute.xlu1 %1920 }
 0x82f   : > { %v7543_v23 = vpop.permute.xlu0 %2042 }
 0x830   : > { %2117 = vrot.lane.b32.xlu1 %v7543_v23, %s10134_s12 }
 0x832   : > { %v7597_v50 = vpop.permute.xlu1 %1965 }
 0x833   : > { %v7547_v9 = vpop.permute.xlu0 %2002 }
 0x834   : > { %2085 = vrot.lane.b32.xlu1 %v7547_v9, %s10134_s12 }
 0x836   : > { %v7599_v7 = vpop.permute.xlu1 %1925 }
 0x837   : > { %v7551_v22 = vpop.permute.xlu0 %2047 }
 0x838   : > { %2121 = vrot.lane.b32.xlu1 %v7551_v22, %s10134_s12 }
 0x83a   : > { %v7601_v5 = vpop.permute.xlu1 %1970 }
 0x83b   : > { %v7555_v43 = vpop.permute.xlu0 %2007 }
 0x83c   : > { %2089 = vrot.lane.b32.xlu1 %v7555_v43, %s10134_s12 }
 0x83e   : > { %v7609_v61 = vpop.permute.xlu1 %1930 }
 0x83f   : > { %v7559_v3 = vpop.permute.xlu0 %2052 }
 0x840   : > { %2125 = vrot.lane.b32.xlu1 %v7559_v3, %s10134_s12 }
 0x842   : > { %v7613_v37 = vpop.permute.xlu1 %1975 }
 0x843   : > { %v7563_v32 = vpop.permute.xlu0 %2012 }
 0x844   : > { %2093 = vrot.lane.b32.xlu1 %v7563_v32, %s10134_s12 }
 0x846   : > { %v7619_v16 = vpop.permute.xlu1 %1935 }
 0x847   : > { %v7567_v49 = vpop.permute.xlu0 %2057 }
 0x848   : > { %2129 = vrot.lane.b32.xlu1 %v7567_v49, %s10134_s12 }
 0x84a   : > { %v7623_v47 = vpop.permute.xlu1 %1940 }
 0x84b   : > { %v7571_v26 = vpop.permute.xlu0 %2017 }
 0x84c   : > { %2097 = vrot.lane.b32.xlu1 %v7571_v26, %s10134_s12 }
 0x84f   : > { %v7575_v58 = vpop.permute.xlu0 %2062 }
 0x850   : > { %2133 = vrot.lane.b32.xlu1 %v7575_v58, %s10134_s12 }
 0x853   : > { %v7579_v28 = vpop.permute.xlu0 %2022 }
 0x854   : > { %2101 = vrot.lane.b32.xlu1 %v7579_v28, %s10134_s12 }
 0x857   : > { %v7674_v21 = vpop.permute.xlu0 %2217 }
 0x8de   : > { %v1884_v10 = vpop.f32.mrb[12].mxu0 }
 0x8df   : > { %v1885_v39 = vadd.f32 %v1884_v10, %v1790_v6  ;;  %v5911_v44 = vpop.f32.mrb[13].mxu0 }
 0x8e0   : > { %v1887_v29 = vpop.f32.mrb[14].mxu0 }
 0x8e1   : > { %v1891_v54 = vmax.f32 %v1885_v39, 0.0  ;;  %v1888_v8 = vadd.f32 %v1887_v29, %v1795_v14  ;;  %v5912_v53 = vpop.f32.mrb[15].mxu0 }
 0x8e3   : > { %v1892_v15 = vmax.f32 %v1888_v8, 0.0  ;;  %v1893_v33 = vadd.f32 %v1891_v54, %v1259_v62  ;;  %v7629_v62 = vpop.permute.xlu1 %2105 }
 0x8e5   : > { %v1894_v27 = vadd.f32 %v1892_v15, %v1260_v17 }
 0x8e7   : > { %v1907_v19 = vpack.c.bf16 %v1894_v27, %v1893_v33  ;;  %v7633_v17 = vpop.permute.xlu1 %2109 }
 0x8e9   : > { %2025 = vrot.lane.b32.xlu1 %v1907_v19, %s10131_s3  ;;  %1947 = vrot.lane.b32.xlu0 %v1907_v19, %s10131_s3 }
 0x8eb   : > { %v7639_v18 = vpop.permute.xlu1 %2077 }
 0x8ed   : > { %2030 = vrot.lane.b32.xlu1 %v1907_v19, %s10132_s0  ;;  %1952 = vrot.lane.b32.xlu0 %v1907_v19, %s10132_s0 }
 0x8ef   : > { %v7643_v45 = vpop.permute.xlu1 %2113 }
 0x8f1   : > { %1990 = vrot.lane.b32.xlu1 %v1907_v19, %s10134_s12  ;;  %1912 = vrot.lane.b32.xlu0 %v1907_v19, %s10134_s12 }
 0x8f3   : > { %v7649_v59 = vpop.permute.xlu1 %2081 }
 0x8f5   : > { %2035 = vrot.lane.b32.xlu1 %v1907_v19, %s10133_s18  ;;  %1957 = vrot.lane.b32.xlu0 %v1907_v19, %s10133_s18 }
 0x8f7   : > { %v7653_v41 = vpop.permute.xlu1 %2117 }
 0x8f9   : > { %1995 = vrot.lane.b32.xlu1 %v1907_v19, %s10125_s29  ;;  %1917 = vrot.lane.b32.xlu0 %v1907_v19, %s10125_s29 }
 0x8fb   : > { %v7657_v35 = vpop.permute.xlu1 %2085 }
 0x8fd   : > { %2040 = vrot.lane.b32.xlu1 %v1907_v19, %s10126_s8  ;;  %1962 = vrot.lane.b32.xlu0 %v1907_v19, %s10126_s8 }
 0x8ff   : > { %v7660_v12 = vpop.permute.xlu1 %2121 }
 0x901   : > { %2000 = vrot.lane.b32.xlu1 %v1907_v19, %s10127_s9  ;;  %1922 = vrot.lane.b32.xlu0 %v1907_v19, %s10127_s9 }
 0x903   : > { %v7662_v30 = vpop.permute.xlu1 %2089 }
 0x905   : > { %2045 = vrot.lane.b32.xlu1 %v1907_v19, %s10128_s20  ;;  %1967 = vrot.lane.b32.xlu0 %v1907_v19, %s10128_s20 }
 0x907   : > { %v7664_v38 = vpop.permute.xlu1 %2125 }
 0x909   : > { %2005 = vrot.lane.b32.xlu1 %v1907_v19, %s10129_s23  ;;  %1927 = vrot.lane.b32.xlu0 %v1907_v19, %s10129_s23 }
 0x90b   : > { %v7666_v34 = vpop.permute.xlu1 %2093 }
 0x90d   : > { %2050 = vrot.lane.b32.xlu1 %v1907_v19, %s10119_s15  ;;  %1972 = vrot.lane.b32.xlu0 %v1907_v19, %s10119_s15 }
 0x90f   : > { %v7668_v24 = vpop.permute.xlu1 %2129 }
 0x911   : > { %2010 = vrot.lane.b32.xlu1 %v1907_v19, %s10120_s16  ;;  %1932 = vrot.lane.b32.xlu0 %v1907_v19, %s10120_s16 }
 0x913   : > { %v7670_v4 = vpop.permute.xlu1 %2097 }
 0x915   : > { %2055 = vrot.lane.b32.xlu1 %v1907_v19, %s10121_s19  ;;  %1977 = vrot.lane.b32.xlu0 %v1907_v19, %s10121_s19 }
 0x917   : > { %v7672_v46 = vpop.permute.xlu1 %2133 }
 0x919   : > { %2015 = vrot.lane.b32.xlu1 %v1907_v19, %s10122_s21  ;;  %1937 = vrot.lane.b32.xlu0 %v1907_v19, %s10122_s21 }
 0x91b   : > { %v7676_v42 = vpop.permute.xlu1 %2101 }
 0x91d   : > { %2060 = vrot.lane.b32.xlu1 %v1907_v19, %s10123_s17  ;;  %1942 = vrot.lane.b32.xlu0 %v1907_v19, %s10124_s14 }
 0x921   : > { %2020 = vrot.lane.b32.xlu1 %v1907_v19, %s10124_s14 }
 0x925   : > { %1980 = vrot.lane.b32.xlu1 %v1907_v19, %s10123_s17 }
 0x929   : > { %2219 = vrot.lane.b32.xlu1 %v1907_v19, %s10130_s13 }
 0x95b   : > { %v1948_v11 = vpop.permute.xlu0 %1947  ;;  %v2026_v52 = vpop.permute.xlu1 %2025 }
 0x95c   : > { %v2029_v25 = vsel %vm361_vm0, %v2026_v52, %v7523_v1  ;;  %2251 = vrot.lane.b32.xlu1 %v1948_v11, %s10130_s13  ;;  %v1949_v6 = vsel %vm361_vm0, %v7583_v40, %v1948_v11 }
 0x95d   : > { %2103 = vrot.lane.b32.xlu0 %v2029_v25, %s10134_s12 }
 0x95f   : > { %v1953_v14 = vpop.permute.xlu0 %1952  ;;  %v2031_v10 = vpop.permute.xlu1 %2030 }
 0x960   : > { %2255 = vrot.lane.b32.xlu1 %v1953_v14, %s10130_s13  ;;  %v2034_v44 = vsel %vm367_vm1, %v2031_v10, %v7527_v13  ;;  %v1954_v29 = vsel %vm367_vm1, %v7585_v63, %v1953_v14 }
 0x961   : > { %2249 = vrot.lane.b32.xlu0 %v1949_v6, %s10130_s13 }
 0x963   : > { %v1913_v39 = vpop.permute.xlu0 %1912  ;;  %v1991_v54 = vpop.permute.xlu1 %1990 }
 0x964   : > { %2223 = vrot.lane.b32.xlu1 %v1913_v39, %s10130_s13  ;;  %v7696_v8 = vsel %vm319_vm2, %v1991_v54, %v7531_v56  ;;  %v1914_v53 = vsel %vm319_vm2, %v7587_v60, %v1913_v39 }
 0x965   : > { %2107 = vrot.lane.b32.xlu0 %v2034_v44, %s10134_s12 }
 0x967   : > { %v1958_v1 = vpop.permute.xlu0 %1957  ;;  %v2036_v63 = vpop.permute.xlu1 %2035 }
 0x968   : > { %2259 = vrot.lane.b32.xlu1 %v1958_v1, %s10130_s13  ;;  %v2039_v33 = vsel %vm373_vm3, %v2036_v63, %v7535_v51  ;;  %v1959_v27 = vsel %vm373_vm3, %v7589_v2, %v1958_v1 }
 0x969   : > { %2253 = vrot.lane.b32.xlu0 %v1954_v29, %s10130_s13 }
 0x96b   : > { %v1918_v40 = vpop.permute.xlu0 %1917  ;;  %v1996_v19 = vpop.permute.xlu1 %1995 }
 0x96c   : > { %2227 = vrot.lane.b32.xlu1 %v1918_v40, %s10130_s13  ;;  %v1999_v11 = vsel %vm325_vm4, %v1996_v19, %v7539_v36  ;;  %v1919_v52 = vsel %vm325_vm4, %v7591_v55, %v1918_v40 }
 0x96d   : > { %2075 = vrot.lane.b32.xlu0 %v7696_v8, %s10134_s12 }
 0x96f   : > { %v1963_v13 = vpop.permute.xlu0 %1962  ;;  %v2041_v25 = vpop.permute.xlu1 %2040 }
 0x970   : > { %2263 = vrot.lane.b32.xlu1 %v1963_v13, %s10130_s13  ;;  %v2044_v14 = vsel %vm379_vm5, %v2041_v25, %v7543_v23  ;;  %v1964_v6 = vsel %vm379_vm5, %v7593_v57, %v1963_v13  ;;  %v5395_v57 = vld [vmem:[%s10047_s2 + $0x30] sm:$0xff] }
 0x971   : > { %2221 = vrot.lane.b32.xlu0 %v1914_v53, %s10130_s13 }
 0x973   : > { %v1923_v15 = vpop.permute.xlu0 %1922  ;;  %v2001_v10 = vpop.permute.xlu1 %2000 }
 0x974   : > { %2231 = vrot.lane.b32.xlu1 %v1923_v15, %s10130_s13  ;;  %v2004_v39 = vsel %vm331_vm6, %v2001_v10, %v7547_v9  ;;  %v1924_v44 = vsel %vm331_vm6, %v7595_v20, %v1923_v15 }
 0x975   : > { %2111 = vrot.lane.b32.xlu0 %v2039_v33, %s10134_s12 }
 0x977   : > { %v1968_v56 = vpop.permute.xlu0 %1967  ;;  %v2046_v1 = vpop.permute.xlu1 %2045 }
 0x978   : > { %2267 = vrot.lane.b32.xlu1 %v1968_v56, %s10130_s13  ;;  %v2049_v9 = vsel %vm385_vm7, %v2046_v1, %v7551_v22  ;;  %v1969_v29 = vsel %vm385_vm7, %v7597_v50, %v1968_v56 }
 0x979   : > { %2257 = vrot.lane.b32.xlu0 %v1959_v27, %s10130_s13 }
 0x97b   : > { %v1928_v60 = vpop.permute.xlu0 %1927  ;;  %v2006_v20 = vpop.permute.xlu1 %2005 }
 0x97c   : > { %2235 = vrot.lane.b32.xlu1 %v1928_v60, %s10130_s13  ;;  %v2009_v54 = vsel %vm337_vm8, %v2006_v20, %v7555_v43  ;;  %v1929_v22 = vsel %vm337_vm8, %v7599_v7, %v1928_v60 }
 0x97d   : > { %2079 = vrot.lane.b32.xlu0 %v1999_v11, %s10134_s12 }
 0x97f   : > { %v1973_v51 = vpop.permute.xlu0 %1972  ;;  %v2051_v50 = vpop.permute.xlu1 %2050 }
 0x980   : > { %2271 = vrot.lane.b32.xlu1 %v1973_v51, %s10130_s13  ;;  %v2054_v40 = vsel %vm391_vm9, %v2051_v50, %v7559_v3  ;;  %v1974_v43 = vsel %vm391_vm9, %v7601_v5, %v1973_v51 }
 0x981   : > { %2225 = vrot.lane.b32.xlu0 %v1919_v52, %s10130_s13 }
 0x983   : > { %v1933_v2 = vpop.permute.xlu0 %1932  ;;  %v2011_v7 = vpop.permute.xlu1 %2010 }
 0x984   : > { %2239 = vrot.lane.b32.xlu1 %v1933_v2, %s10130_s13  ;;  %v2014_v13 = vsel %vm343_vm10, %v2011_v7, %v7563_v32  ;;  %v1934_v3 = vsel %vm343_vm10, %v7609_v61, %v1933_v2 }
 0x985   : > { %2115 = vrot.lane.b32.xlu0 %v2044_v14, %s10134_s12 }
 0x987   : > { %v1978_v36 = vpop.permute.xlu0 %1977  ;;  %v2056_v5 = vpop.permute.xlu1 %2055 }
 0x988   : > { %2275 = vrot.lane.b32.xlu1 %v1978_v36, %s10130_s13  ;;  %v2059_v53 = vsel %vm10102_vm11, %v2056_v5, %v7567_v49  ;;  %v1979_v63 = vsel %vm10102_vm11, %v7613_v37, %v1978_v36  ;;  %v6074_v37 = vld [vmem:[%s10046_s1 + $0x6c] ss:$16 sps:$4 sm:$0xff]  }
 0x989   : > { %2261 = vrot.lane.b32.xlu0 %v1964_v6, %s10130_s13  ;;  %2198 = vmatprep.mubr.bf16.mxu1 %v6074_v37 }
 0x98b   : > { %v1938_v55 = vpop.permute.xlu0 %1937  ;;  %v2016_v32 = vpop.permute.xlu1 %2015 }
 0x98c   : > { %2243 = vrot.lane.b32.xlu1 %v1938_v55, %s10130_s13  ;;  %v2019_v61 = vsel %vm10101_vm12, %v2016_v32, %v7571_v26  ;;  %v1939_v15 = vsel %vm10101_vm12, %v7619_v16, %v1938_v55  ;;  %v6077_v16 = vld [vmem:[%s10046_s1 + $0x64] ss:$16 sps:$4 sm:$0xff]  }
 0x98d   : > { %2083 = vrot.lane.b32.xlu0 %v2004_v39, %s10134_s12  ;;  %2342 = vmatprep.mubr.bf16.mxu0 %v6077_v16 }
 0x98f   : > { %v1943_v23 = vpop.permute.xlu0 %1942  ;;  %v2061_v49 = vpop.permute.xlu1 %2060 }
 0x990   : > { %2247 = vrot.lane.b32.xlu1 %v1943_v23, %s10130_s13  ;;  %v2064_v26 = vsel %vm10099_vm13, %v2061_v49, %v7575_v58  ;;  %v1944_v58 = vsel %vm10098_vm14, %v7623_v47, %v1943_v23 }
 0x991   : > { %2229 = vrot.lane.b32.xlu0 %v1924_v44, %s10130_s13 }
 0x993   : > { %v2021_v33 = vpop.permute.xlu1 %2020 }
 0x994   : > { %2356 = vperm.xlu1 %6048, %v5395_v57   ;;  %v2024_v56 = vsel %vm10098_vm14, %v2021_v33, %v7579_v28  ;;  %v5396_v28 = vld [vmem:[%s10047_s2 + $0x38] sm:$0xff]  ;;  %vm10136_vm14 = vmmov %vm10135_vm15 }
 0x995   : > { %2119 = vrot.lane.b32.xlu0 %v2049_v9, %s10134_s12  ;;  %vm10137_vm13 = vmmov %vm10136_vm14 }
 0x997   : > { %v1981_v27 = vpop.permute.xlu1 %1980 }
 0x998   : > { %2418 = vrot.lane.b32.xlu1 %v6210_v0, %s10131_s3 }
 0x999   : > { %2265 = vrot.lane.b32.xlu0 %v1969_v29, %s10130_s13 }
 0x99b   : > { %v2220_v19 = vpop.permute.xlu1 %2219 }
 0x99c   : > { %2423 = vrot.lane.b32.xlu1 %v6210_v0, %s10132_s0  ;;  %v2279_v25 = vsel %vm10136_vm14, %v7674_v21, %v2220_v19  ;;  %vm10138_vm14 = vmmov %vm10137_vm13 }
 0x99d   : > { %2087 = vrot.lane.b32.xlu0 %v2009_v54, %s10134_s12 }
 0x9a0   : > { %2383 = vrot.lane.b32.xlu1 %v6210_v0, %s10134_s12 }
 0x9a1   : > { %2233 = vrot.lane.b32.xlu0 %v1929_v22, %s10130_s13 }
 0x9a4   : > { %2428 = vrot.lane.b32.xlu1 %v6210_v0, %s10133_s18 }
 0x9a5   : > { %2123 = vrot.lane.b32.xlu0 %v2054_v40, %s10134_s12 }
 0x9a8   : > { %2388 = vrot.lane.b32.xlu1 %v6210_v0, %s10125_s29 }
 0x9a9   : > { %2269 = vrot.lane.b32.xlu0 %v1974_v43, %s10130_s13 }
 0x9ac   : > { %2433 = vrot.lane.b32.xlu1 %v6210_v0, %s10126_s8 }
 0x9ad   : > { %2091 = vrot.lane.b32.xlu0 %v2014_v13, %s10134_s12 }
 0x9b0   : > { %2393 = vrot.lane.b32.xlu1 %v6210_v0, %s10127_s9 }
 0x9b1   : > { %2237 = vrot.lane.b32.xlu0 %v1934_v3, %s10130_s13 }
 0x9b4   : > { %2438 = vrot.lane.b32.xlu1 %v6210_v0, %s10128_s20 }
 0x9b5   : > { %2127 = vrot.lane.b32.xlu0 %v2059_v53, %s10134_s12 }
 0x9b8   : > { %2398 = vrot.lane.b32.xlu1 %v6210_v0, %s10129_s23 }
 0x9b9   : > { %2273 = vrot.lane.b32.xlu0 %v1979_v63, %s10130_s13 }
 0x9bc   : > { %2443 = vrot.lane.b32.xlu1 %v6210_v0, %s10119_s15 }
 0x9bd   : > { %2095 = vrot.lane.b32.xlu0 %v2019_v61, %s10134_s12 }
 0x9c0   : > { %2403 = vrot.lane.b32.xlu1 %v6210_v0, %s10120_s16 }
 0x9c1   : > { %2241 = vrot.lane.b32.xlu0 %v1939_v15, %s10130_s13 }
 0x9c4   : > { %2448 = vrot.lane.b32.xlu1 %v6210_v0, %s10121_s19 }
 0x9c5   : > { %2131 = vrot.lane.b32.xlu0 %v2064_v26, %s10134_s12 }
 0x9c8   : > { %2408 = vrot.lane.b32.xlu1 %v6210_v0, %s10122_s21 }
 0x9c9   : > { %2099 = vrot.lane.b32.xlu0 %v2024_v56, %s10134_s12 }
 0x9cc   : > { %2413 = vrot.lane.b32.xlu1 %v6210_v0, %s10124_s14 }
 0x9cd   : > { %2245 = vrot.lane.b32.xlu0 %v1944_v58, %s10130_s13 }
 0x9ce   : > { %v2252_v47 = vpop.permute.xlu1 %2251 }
 0x9cf   : > { %v2104_v60 = vpop.permute.xlu0 %2103 }
 0x9d0   : > { %v2142_v11 = vsel %vm319_vm2, %v2104_v60, %v7629_v62 }
 0x9d1   : > { %5602 = vmatprep.subr.bf16.mxu1 %v2142_v11  ;;  %2277 = vrot.lane.b32.xlu0 %v1981_v27, %s10130_s13 }
 0x9d2   : > { %5603 = vmatpush3.bf16.msra.mxu1 %v7696_v8  ;;  %v2256_v8 = vpop.permute.xlu1 %2255 }
 0x9d3   : > { %v2250_v51 = vpop.permute.xlu0 %2249 }
 0x9d4   : > { %v2287_v52 = vsel %vm10135_vm15, %v2250_v51, %v2252_v47  ;;  %vm10139_vm15 = vmmov %vm10137_vm13 }
 0x9d5   : > { %2361 = vperm.xlu0 %6047, %v5396_v28   ;;  %5624 = vmatprep.subr.bf16.mxu0 %v2287_v52 }
 0x9d6   : > { %5625 = vmatpush3.bf16.msra.mxu0 %v2279_v25 }
 0x9d7   : > { %v2108_v62 = vpop.permute.xlu0 %2107 }
 0x9d8   : > { %v2143_v2 = vsel %vm319_vm2, %v2108_v62, %v7633_v17  ;;  %v2224_v17 = vpop.permute.xlu1 %2223 }
 0x9d9   : > { %5604 = vmatprep.subr.bf16.mxu1 %v2143_v2  ;;  %2500 = vrot.lane.b32.xlu0 %v6210_v0, %s10131_s3 }
 0x9db   : > { %v2254_v14 = vpop.permute.xlu0 %2253 }
 0x9dc   : > { %v2288_v36 = vsel %vm10137_vm13, %v2254_v14, %v2256_v8 }
 0x9dd   : > { %5626 = vmatprep.subr.bf16.mxu0 %v2288_v36  ;;  %2505 = vrot.lane.b32.xlu0 %v6210_v0, %s10132_s0 }
 0x9df   : > { %v2076_v21 = vpop.permute.xlu0 %2075 }
 0x9e0   : > { %v2135_v6 = vsel %vm319_vm2, %v2076_v21, %v7639_v18  ;;  %v2260_v18 = vpop.permute.xlu1 %2259 }
 0x9e1   : > { %5605 = vmatpush3.bf16.msra.mxu1 %v2135_v6  ;;  %2465 = vrot.lane.b32.xlu0 %v6210_v0, %s10134_s12  ;;  %v6072_v6 = vld [vmem:[%s10046_s1 + $0x68] ss:$16 sps:$4 sm:$0xff]  }
 0x9e3   : > { %v2222_v10 = vpop.permute.xlu0 %2221 }
 0x9e4   : > { %v2280_v55 = vsel %vm10138_vm14, %v2222_v10, %v2224_v17  ;;  %vm10140_vm14 = vmmov %vm10137_vm13 }
 0x9e5   : > { %5627 = vmatpush3.bf16.msra.mxu0 %v2280_v55  ;;  %2510 = vrot.lane.b32.xlu0 %v6210_v0, %s10133_s18 }
 0x9e7   : > { %v2112_v39 = vpop.permute.xlu0 %2111 }
 0x9e8   : > { %v2144_v23 = vsel %vm319_vm2, %v2112_v39, %v7643_v45  ;;  %v2228_v45 = vpop.permute.xlu1 %2227 }
 0x9e9   : > { %5606 = vmatprep.subr.bf16.mxu1 %v2144_v23  ;;  %2470 = vrot.lane.b32.xlu0 %v6210_v0, %s10125_s29 }
 0x9eb   : > { %v2258_v44 = vpop.permute.xlu0 %2257 }
 0x9ec   : > { %v2289_v1 = vsel %vm10137_vm13, %v2258_v44, %v2260_v18 }
 0x9ed   : > { %5628 = vmatprep.subr.bf16.mxu0 %v2289_v1  ;;  %2515 = vrot.lane.b32.xlu0 %v6210_v0, %s10126_s8 }
 0x9ef   : > { %v2080_v57 = vpop.permute.xlu0 %2079 }
 0x9f0   : > { %v2136_v9 = vsel %vm319_vm2, %v2080_v57, %v7649_v59  ;;  %v2264_v59 = vpop.permute.xlu1 %2263 }
 0x9f1   : > { %5607 = vmatpush3.bf16.msra.mxu1 %v2136_v9  ;;  %2475 = vrot.lane.b32.xlu0 %v6210_v0, %s10127_s9 }
 0x9f3   : > { %v2226_v29 = vpop.permute.xlu0 %2225 }
 0x9f4   : > { %v2281_v20 = vsel %vm10139_vm15, %v2226_v29, %v2228_v45  ;;  %vm10141_vm15 = vmmov %vm10137_vm13 }
 0x9f5   : > { %5629 = vmatpush3.bf16.msra.mxu0 %v2281_v20  ;;  %2520 = vrot.lane.b32.xlu0 %v6210_v0, %s10128_s20 }
 0x9f7   : > { %v2116_v54 = vpop.permute.xlu0 %2115 }
 0x9f8   : > { %v2145_v22 = vsel %vm319_vm2, %v2116_v54, %v7653_v41  ;;  %v2232_v41 = vpop.permute.xlu1 %2231 }
 0x9f9   : > { %5608 = vmatprep.subr.bf16.mxu1 %v2145_v22  ;;  %2480 = vrot.lane.b32.xlu0 %v6210_v0, %s10129_s23 }
 0x9fb   : > { %v2262_v50 = vpop.permute.xlu0 %2261 }
 0x9fc   : > { %v2290_v40 = vsel %vm10140_vm14, %v2262_v50, %v2264_v59  ;;  %vm10142_vm14 = vmmov %vm10137_vm13 }
 0x9fd   : > { %5630 = vmatprep.subr.bf16.mxu0 %v2290_v40  ;;  %2525 = vrot.lane.b32.xlu0 %v6210_v0, %s10119_s15 }
 0x9ff   : > { %v2084_v43 = vpop.permute.xlu0 %2083 }
 0xa00   : > { %v2137_v7 = vsel %vm319_vm2, %v2084_v43, %v7657_v35  ;;  %v2268_v35 = vpop.permute.xlu1 %2267 }
 0xa01   : > { %5609 = vmatpush3.bf16.msra.mxu1 %v2137_v7  ;;  %2485 = vrot.lane.b32.xlu0 %v6210_v0, %s10120_s16 }
 0xa03   : > { %v2230_v13 = vpop.permute.xlu0 %2229 }
 0xa04   : > { %v2282_v3 = vsel %vm10137_vm13, %v2230_v13, %v2232_v41 }
 0xa05   : > { %5631 = vmatpush3.bf16.msra.mxu0 %v2282_v3  ;;  %2530 = vrot.lane.b32.xlu0 %v6210_v0, %s10121_s19 }
 0xa07   : > { %v2120_v5 = vpop.permute.xlu0 %2119 }
 0xa08   : > { %v2146_v53 = vsel %vm319_vm2, %v2120_v5, %v7660_v12  ;;  %v2236_v12 = vpop.permute.xlu1 %2235 }
 0xa09   : > { %5610 = vmatprep.subr.bf16.mxu1 %v2146_v53  ;;  %2490 = vrot.lane.b32.xlu0 %v6210_v0, %s10122_s21 }
 0xa0b   : > { %v2266_v32 = vpop.permute.xlu0 %2265 }
 0xa0c   : > { %v2291_v63 = vsel %vm10141_vm15, %v2266_v32, %v2268_v35  ;;  %v2272_v16 = vpop.permute.xlu1 %2271  ;;  %vm10143_vm15 = vmmov %vm10137_vm13 }
 0xa0d   : > { %5632 = vmatprep.subr.bf16.mxu0 %v2291_v63  ;;  %2535 = vrot.lane.b32.xlu0 %v6210_v0, %s10123_s17 }
 0xa0f   : > { %v2088_v61 = vpop.permute.xlu0 %2087 }
 0xa10   : > { %v2138_v49 = vsel %vm319_vm2, %v2088_v61, %v7662_v30  ;;  %v2240_v19 = vpop.permute.xlu1 %2239 }
 0xa11   : > { %5611 = vmatpush3.bf16.msra.mxu1 %v2138_v49  ;;  %2495 = vrot.lane.b32.xlu0 %v6210_v0, %s10124_s14 }
 0xa13   : > { %v2234_v15 = vpop.permute.xlu0 %2233 }
 0xa14   : > { %v2283_v37 = vsel %vm10142_vm14, %v2234_v15, %v2236_v12  ;;  %v2276_v47 = vpop.permute.xlu1 %2275  ;;  %vm10144_vm14 = vmmov %vm10137_vm13 }
 0xa15   : > { %5633 = vmatpush3.bf16.msra.mxu0 %v2283_v37  ;;  %2690 = vrot.lane.b32.xlu0 %v6210_v0, %s10130_s13 }
 0xa17   : > { %v2124_v33 = vpop.permute.xlu0 %2123 }
 0xa18   : > { %v2147_v26 = vsel %vm319_vm2, %v2124_v33, %v7664_v38  ;;  %v2244_v62 = vpop.permute.xlu1 %2243 }
 0xa19   : > { %5612 = vmatprep.subr.bf16.mxu1 %v2147_v26 }
 0xa1b   : > { %v2270_v56 = vpop.permute.xlu0 %2269 }
 0xa1c   : > { %v2292_v30 = vsel %vm10137_vm13, %v2270_v56, %v2272_v16  ;;  %v2248_v17 = vpop.permute.xlu1 %2247 }
 0xa1d   : > { %5634 = vmatprep.subr.bf16.mxu0 %v2292_v30 }
 0xa1f   : > { %v2092_v27 = vpop.permute.xlu0 %2091 }
 0xa20   : > { %v2139_v58 = vsel %vm319_vm2, %v2092_v27, %v7666_v34  ;;  %v2357_v43 = vpop.permute.xlu1 %2356 }
 0xa21   : > { %5613 = vmatpush3.bf16.msra.mxu1 %v2139_v58 }
 0xa23   : > { %v2238_v60 = vpop.permute.xlu0 %2237 }
 0xa24   : > { %v2284_v11 = vsel %vm10143_vm15, %v2238_v60, %v2240_v19  ;;  %vm10145_vm15 = vmmov %vm10137_vm13  ;;  %v7968_v7 = vpop.permute.xlu1 %2418 }
 0xa25   : > { %5635 = vmatpush3.bf16.msra.mxu0 %v2284_v11 }
 0xa27   : > { %v2128_v28 = vpop.permute.xlu0 %2127 }
 0xa28   : > { %v2148_v38 = vsel %vm319_vm2, %v2128_v28, %v7668_v24  ;;  %v7970_v41 = vpop.permute.xlu1 %2423 }
 0xa29   : > { %5614 = vmatprep.subr.bf16.mxu1 %v2148_v38 }
 0xa2b   : > { %v2274_v51 = vpop.permute.xlu0 %2273 }
 0xa2c   : > { %v2293_v52 = vsel %vm10144_vm14, %v2274_v51, %v2276_v47  ;;  %v7972_v13 = vpop.permute.xlu1 %2383  ;;  %vm10146_vm14 = vcmask 924672  }
 0xa2d   : > { %5636 = vmatprep.subr.bf16.mxu0 %v2293_v52 }
 0xa2f   : > { %v2096_v25 = vpop.permute.xlu0 %2095 }
 0xa30   : > { %v2140_v34 = vsel %vm319_vm2, %v2096_v25, %v7670_v4  ;;  %v7974_v3 = vpop.permute.xlu1 %2428 }
 0xa31   : > { %5615 = vmatpush3.bf16.msra.mxu1 %v2140_v34 }
 0xa33   : > { %v2242_v2 = vpop.permute.xlu0 %2241 }
 0xa34   : > { %v2285_v8 = vsel %vm10137_vm13, %v2242_v2, %v2244_v62  ;;  %v7976_v5 = vpop.permute.xlu1 %2388  ;;  %vm10147_vm13 = vcmask 990208  }
 0xa35   : > { %5637 = vmatpush3.bf16.msra.mxu0 %v2285_v8 }
 0xa37   : > { %v2132_v14 = vpop.permute.xlu0 %2131 }
 0xa38   : > { %v2149_v24 = vsel %vm319_vm2, %v2132_v14, %v7672_v46  ;;  %v6075_v46 = vld [vmem:[%s10046_s1 + $0x60] ss:$16 sps:$4 sm:$0xff]   ;;  %v7978_v53 = vpop.permute.xlu1 %2433 }
 0xa39   : > { %5616 = vmatprep.subr.bf16.mxu1 %v2149_v24 }
 0xa3b   : > { %v2100_v36 = vpop.permute.xlu0 %2099 }
 0xa3c   : > { %v2141_v21 = vsel %vm319_vm2, %v2100_v36, %v7676_v42  ;;  %v7980_v35 = vpop.permute.xlu1 %2393 }
 0xa3d   : > { %5617 = vmatpush3.bf16.msra.mxu1 %v2141_v21 }
 0xa3f   : > { %v2246_v4 = vpop.permute.xlu0 %2245 }
 0xa40   : > { %2199 = vmatmul.mubr.bf16.vlgmr.msra.gmra.mrb[12].mxu1 %v6072_v6  ;;  %v2286_v55 = vsel %vm10145_vm15, %v2246_v4, %v2248_v17  ;;  %v7982_v37 = vpop.permute.xlu1 %2438  ;;  %vm10148_vm15 = vmmov %vm10147_vm13 }
 0xa43   : > { %v2278_v10 = vpop.permute.xlu0 %2277 }
 0xa44   : > { %5638 = vmatprep.subr.bf16.mxu0 %v2278_v10  ;;  %v7984_v30 = vpop.permute.xlu1 %2398 }
 0xa45   : > { %5639 = vmatpush3.bf16.msra.mxu0 %v2286_v55 }
 0xa48   : > { %2343 = vmatmul.mubr.bf16.vlgmr.msra.gmra.mrb[16].mxu0 %v6075_v46  ;;  %v7990_v38 = vpop.permute.xlu1 %2443 }
 0xa4c   : > { %v8000_v25 = vpop.permute.xlu1 %2403 }
 0xa50   : > { %v8004_v34 = vpop.permute.xlu1 %2448 }
 0xa54   : > { %v2362_v39 = vpop.permute.xlu0 %2361  ;;  %v8010_v62 = vpop.permute.xlu1 %2408 }
 0xa58   : > { %v7908_v42 = vpop.permute.xlu0 %2500  ;;  %v8014_v2 = vpop.permute.xlu1 %2413 }
 0xa59   : > { %2578 = vrot.lane.b32.xlu1 %v7908_v42, %s10134_s12 }
 0xa5c   : > { %v7912_v23 = vpop.permute.xlu0 %2505 }
 0xa5d   : > { %2582 = vrot.lane.b32.xlu1 %v7912_v23, %s10134_s12 }
 0xa60   : > { %v7916_v18 = vpop.permute.xlu0 %2465 }
 0xa61   : > { %2550 = vrot.lane.b32.xlu1 %v7916_v18, %s10134_s12 }
 0xa64   : > { %v7920_v44 = vpop.permute.xlu0 %2510 }
 0xa65   : > { %2586 = vrot.lane.b32.xlu1 %v7920_v44, %s10134_s12 }
 0xa68   : > { %v7924_v1 = vpop.permute.xlu0 %2470 }
 0xa69   : > { %2554 = vrot.lane.b32.xlu1 %v7924_v1, %s10134_s12 }
 0xa6c   : > { %v7928_v57 = vpop.permute.xlu0 %2515 }
 0xa6d   : > { %2590 = vrot.lane.b32.xlu1 %v7928_v57, %s10134_s12 }
 0xa70   : > { %v7932_v9 = vpop.permute.xlu0 %2475 }
 0xa71   : > { %2558 = vrot.lane.b32.xlu1 %v7932_v9, %s10134_s12 }
 0xa74   : > { %v7936_v45 = vpop.permute.xlu0 %2520 }
 0xa75   : > { %2594 = vrot.lane.b32.xlu1 %v7936_v45, %s10134_s12 }
 0xa78   : > { %v7940_v29 = vpop.permute.xlu0 %2480 }
 0xa79   : > { %2562 = vrot.lane.b32.xlu1 %v7940_v29, %s10134_s12 }
 0xa7c   : > { %v7944_v20 = vpop.permute.xlu0 %2525 }
 0xa7d   : > { %2598 = vrot.lane.b32.xlu1 %v7944_v20, %s10134_s12 }
 0xa80   : > { %v7948_v54 = vpop.permute.xlu0 %2485 }
 0xa81   : > { %2566 = vrot.lane.b32.xlu1 %v7948_v54, %s10134_s12 }
 0xa84   : > { %v7952_v22 = vpop.permute.xlu0 %2530 }
 0xa85   : > { %2602 = vrot.lane.b32.xlu1 %v7952_v22, %s10134_s12 }
 0xa88   : > { %v7956_v59 = vpop.permute.xlu0 %2490 }
 0xa89   : > { %2570 = vrot.lane.b32.xlu1 %v7956_v59, %s10134_s12 }
 0xa8c   : > { %v7960_v50 = vpop.permute.xlu0 %2535 }
 0xa8d   : > { %2606 = vrot.lane.b32.xlu1 %v7960_v50, %s10134_s12 }
 0xa90   : > { %v7964_v40 = vpop.permute.xlu0 %2495 }
 0xa91   : > { %2574 = vrot.lane.b32.xlu1 %v7964_v40, %s10134_s12 }
 0xacb   : > { %v8020_v8 = vpop.permute.xlu1 %2578 }
 0xacf   : > { %v8024_v14 = vpop.permute.xlu1 %2582 }
 0xad3   : > { %v8030_v24 = vpop.permute.xlu1 %2550 }
 0xad7   : > { %v8034_v36 = vpop.permute.xlu1 %2586 }
 0xadb   : > { %v8040_v21 = vpop.permute.xlu1 %2554 }
 0xadf   : > { %v8044_v6 = vpop.permute.xlu1 %2590 }
 0xae3   : > { %v8048_v4 = vpop.permute.xlu1 %2558 }
 0xae7   : > { %v8051_v17 = vpop.permute.xlu1 %2594 }
 0xaeb   : > { %v8053_v10 = vpop.permute.xlu1 %2562 }
 0xaef   : > { %v8055_v55 = vpop.permute.xlu1 %2598 }
 0xaf3   : > { %v8057_v46 = vpop.permute.xlu1 %2566 }
 0xb13   : > { %v5618_v32 = vpop.f32.mrb[12].mxu1 }
 0xb14   : > { %v5619_v63 = vpop.f32.mrb[13].mxu1 }
 0xb15   : > { %v5620_v61 = vadd.f32 %v5619_v63, %v5618_v32  ;;  %v5621_v49 = vpop.f32.mrb[14].mxu1  ;;  %v8065_v63 = vpop.permute.xlu0 %2690 }
 0xb16   : > { %v5622_v12 = vpop.f32.mrb[15].mxu1 }
 0xb17   : > { %v5623_v15 = vadd.f32 %v5622_v12, %v5621_v49 }
 0xb1b   : > { %v5640_v33 = vpop.f32.mrb[16].mxu0 }
 0xb1c   : > { %v5641_v26 = vpop.f32.mrb[17].mxu0 }
 0xb1d   : > { %v5642_v16 = vadd.f32 %v5641_v26, %v5640_v33  ;;  %v5643_v56 = vpop.f32.mrb[18].mxu0 }
 0xb1e   : > { %v5644_v27 = vpop.f32.mrb[19].mxu0 }
 0xb1f   : > { %v2345_v58 = vadd.f32 %v5642_v16, %v5620_v61  ;;  %v5645_v19 = vadd.f32 %v5644_v27, %v5643_v56 }
 0xb21   : > { %v7986_v60 = vadd.f32 %v2357_v43, %v2345_v58  ;;  %v2348_v11 = vadd.f32 %v5645_v19, %v5623_v15 }
 0xb23   : > { %v7988_v28 = vadd.f32 %v2362_v39, %v2348_v11  ;;  %v2366_v47 = vmax.f32 %v7986_v60, 0.0  ;;  %v8059_v39 = vpop.permute.xlu1 %2602 }
 0xb25   : > { %v2367_v51 = vmax.f32 %v7988_v28, 0.0 }
 0xb27   : > { %v2380_v52 = vpack.c.bf16 %v2367_v51, %v2366_v47  ;;  %v8061_v43 = vpop.permute.xlu1 %2570 }
 0xb29   : > { %2498 = vrot.lane.b32.xlu1 %v2380_v52, %s10131_s3  ;;  %2420 = vrot.lane.b32.xlu0 %v2380_v52, %s10131_s3 }
 0xb2b   : > { %v8063_v32 = vpop.permute.xlu1 %2606 }
 0xb2d   : > { %2503 = vrot.lane.b32.xlu1 %v2380_v52, %s10132_s0  ;;  %2425 = vrot.lane.b32.xlu0 %v2380_v52, %s10132_s0 }
 0xb2f   : > { %v8067_v61 = vpop.permute.xlu1 %2574 }
 0xb31   : > { %2463 = vrot.lane.b32.xlu1 %v2380_v52, %s10134_s12  ;;  %2385 = vrot.lane.b32.xlu0 %v2380_v52, %s10134_s12 }
 0xb35   : > { %2508 = vrot.lane.b32.xlu1 %v2380_v52, %s10133_s18  ;;  %2430 = vrot.lane.b32.xlu0 %v2380_v52, %s10133_s18 }
 0xb39   : > { %2468 = vrot.lane.b32.xlu1 %v2380_v52, %s10125_s29  ;;  %2390 = vrot.lane.b32.xlu0 %v2380_v52, %s10125_s29 }
 0xb3d   : > { %2513 = vrot.lane.b32.xlu1 %v2380_v52, %s10126_s8  ;;  %2435 = vrot.lane.b32.xlu0 %v2380_v52, %s10126_s8 }
 0xb41   : > { %2473 = vrot.lane.b32.xlu1 %v2380_v52, %s10127_s9  ;;  %2395 = vrot.lane.b32.xlu0 %v2380_v52, %s10127_s9 }
 0xb45   : > { %2518 = vrot.lane.b32.xlu1 %v2380_v52, %s10128_s20  ;;  %2440 = vrot.lane.b32.xlu0 %v2380_v52, %s10128_s20 }
 0xb49   : > { %2478 = vrot.lane.b32.xlu1 %v2380_v52, %s10129_s23  ;;  %2400 = vrot.lane.b32.xlu0 %v2380_v52, %s10129_s23 }
 0xb4d   : > { %2523 = vrot.lane.b32.xlu1 %v2380_v52, %s10119_s15  ;;  %2445 = vrot.lane.b32.xlu0 %v2380_v52, %s10119_s15 }
 0xb51   : > { %2483 = vrot.lane.b32.xlu1 %v2380_v52, %s10120_s16  ;;  %2405 = vrot.lane.b32.xlu0 %v2380_v52, %s10120_s16 }
 0xb55   : > { %2528 = vrot.lane.b32.xlu1 %v2380_v52, %s10121_s19  ;;  %2450 = vrot.lane.b32.xlu0 %v2380_v52, %s10121_s19 }
 0xb59   : > { %2488 = vrot.lane.b32.xlu1 %v2380_v52, %s10122_s21  ;;  %2410 = vrot.lane.b32.xlu0 %v2380_v52, %s10122_s21 }
 0xb5d   : > { %2533 = vrot.lane.b32.xlu1 %v2380_v52, %s10123_s17  ;;  %2415 = vrot.lane.b32.xlu0 %v2380_v52, %s10124_s14 }
 0xb61   : > { %2493 = vrot.lane.b32.xlu1 %v2380_v52, %s10124_s14 }
 0xb65   : > { %2453 = vrot.lane.b32.xlu1 %v2380_v52, %s10123_s17 }
 0xb69   : > { %2692 = vrot.lane.b32.xlu1 %v2380_v52, %s10130_s13 }
 0xb9b   : > { %v2421_v49 = vpop.permute.xlu0 %2420  ;;  %v2499_v12 = vpop.permute.xlu1 %2498 }
 0xb9c   : > { %v2502_v15 = vsel %vm361_vm0, %v2499_v12, %v7908_v42  ;;  %2724 = vrot.lane.b32.xlu1 %v2421_v49, %s10130_s13  ;;  %v2422_v26 = vsel %vm361_vm0, %v7968_v7, %v2421_v49 }
 0xb9d   : > { %2576 = vrot.lane.b32.xlu0 %v2502_v15, %s10134_s12 }
 0xb9f   : > { %v2426_v33 = vpop.permute.xlu0 %2425  ;;  %v2504_v16 = vpop.permute.xlu1 %2503 }
 0xba0   : > { %2728 = vrot.lane.b32.xlu1 %v2426_v33, %s10130_s13  ;;  %v2507_v27 = vsel %vm367_vm1, %v2504_v16, %v7912_v23  ;;  %v2427_v58 = vsel %vm367_vm1, %v7970_v41, %v2426_v33 }
 0xba1   : > { %2722 = vrot.lane.b32.xlu0 %v2422_v26, %s10130_s13 }
 0xba3   : > { %v2386_v56 = vpop.permute.xlu0 %2385  ;;  %v2464_v19 = vpop.permute.xlu1 %2463 }
 0xba4   : > { %2696 = vrot.lane.b32.xlu1 %v2386_v56, %s10130_s13  ;;  %v8087_v11 = vsel %vm319_vm2, %v2464_v19, %v7916_v18  ;;  %v2387_v52 = vsel %vm319_vm2, %v7972_v13, %v2386_v56 }
 0xba5   : > { %2580 = vrot.lane.b32.xlu0 %v2507_v27, %s10134_s12 }
 0xba7   : > { %v2431_v42 = vpop.permute.xlu0 %2430  ;;  %v2509_v41 = vpop.permute.xlu1 %2508 }
 0xba8   : > { %2732 = vrot.lane.b32.xlu1 %v2431_v42, %s10130_s13  ;;  %v2512_v12 = vsel %vm373_vm3, %v2509_v41, %v7920_v44  ;;  %v2432_v15 = vsel %vm373_vm3, %v7974_v3, %v2431_v42 }
 0xba9   : > { %2726 = vrot.lane.b32.xlu0 %v2427_v58, %s10130_s13 }
 0xbab   : > { %v2391_v7 = vpop.permute.xlu0 %2390  ;;  %v2469_v33 = vpop.permute.xlu1 %2468 }
 0xbac   : > { %2700 = vrot.lane.b32.xlu1 %v2391_v7, %s10130_s13  ;;  %v2472_v26 = vsel %vm325_vm4, %v2469_v33, %v7924_v1  ;;  %v2392_v16 = vsel %vm325_vm4, %v7976_v5, %v2391_v7 }
 0xbad   : > { %2548 = vrot.lane.b32.xlu0 %v8087_v11, %s10134_s12 }
 0xbaf   : > { %v2436_v23 = vpop.permute.xlu0 %2435  ;;  %v2514_v56 = vpop.permute.xlu1 %2513 }
 0xbb0   : > { %2736 = vrot.lane.b32.xlu1 %v2436_v23, %s10130_s13  ;;  %v2517_v27 = vsel %vm379_vm5, %v2514_v56, %v7928_v57  ;;  %v2437_v42 = vsel %vm379_vm5, %v7978_v53, %v2436_v23  ;;  %v5405_v53 = vld [vmem:[%s10047_s2 + $0x40] sm:$0xff] }
 0xbb1   : > { %2694 = vrot.lane.b32.xlu0 %v2387_v52, %s10130_s13 }
 0xbb3   : > { %v2396_v49 = vpop.permute.xlu0 %2395  ;;  %v2474_v58 = vpop.permute.xlu1 %2473 }
 0xbb4   : > { %2704 = vrot.lane.b32.xlu1 %v2396_v49, %s10130_s13  ;;  %v2477_v19 = vsel %vm331_vm6, %v2474_v58, %v7932_v9  ;;  %v2397_v7 = vsel %vm331_vm6, %v7980_v35, %v2396_v49 }
 0xbb5   : > { %2584 = vrot.lane.b32.xlu0 %v2512_v12, %s10134_s12 }
 0xbb7   : > { %v2441_v18 = vpop.permute.xlu0 %2440  ;;  %v2519_v52 = vpop.permute.xlu1 %2518 }
 0xbb8   : > { %2740 = vrot.lane.b32.xlu1 %v2441_v18, %s10130_s13  ;;  %v2522_v9 = vsel %vm385_vm7, %v2519_v52, %v7936_v45  ;;  %v2442_v23 = vsel %vm385_vm7, %v7982_v37, %v2441_v18 }
 0xbb9   : > { %2730 = vrot.lane.b32.xlu0 %v2432_v15, %s10130_s13 }
 0xbbb   : > { %v2401_v13 = vpop.permute.xlu0 %2400  ;;  %v2479_v41 = vpop.permute.xlu1 %2478 }
 0xbbc   : > { %2708 = vrot.lane.b32.xlu1 %v2401_v13, %s10130_s13  ;;  %v2482_v35 = vsel %vm337_vm8, %v2479_v41, %v7940_v29  ;;  %v2402_v49 = vsel %vm337_vm8, %v7984_v30, %v2401_v13 }
 0xbbd   : > { %2552 = vrot.lane.b32.xlu0 %v2472_v26, %s10134_s12 }
 0xbbf   : > { %v2446_v44 = vpop.permute.xlu0 %2445  ;;  %v2524_v12 = vpop.permute.xlu1 %2523 }
 0xbc0   : > { %2744 = vrot.lane.b32.xlu1 %v2446_v44, %s10130_s13  ;;  %v2527_v45 = vsel %vm391_vm9, %v2524_v12, %v7944_v20  ;;  %v2447_v37 = vsel %vm391_vm9, %v7990_v38, %v2446_v44 }
 0xbc1   : > { %2698 = vrot.lane.b32.xlu0 %v2392_v16, %s10130_s13 }
 0xbc3   : > { %v2406_v3 = vpop.permute.xlu0 %2405  ;;  %v2484_v18 = vpop.permute.xlu1 %2483 }
 0xbc4   : > { %2712 = vrot.lane.b32.xlu1 %v2406_v3, %s10130_s13  ;;  %v2487_v29 = vsel %vm343_vm10, %v2484_v18, %v7948_v54  ;;  %v2407_v30 = vsel %vm343_vm10, %v8000_v25, %v2406_v3 }
 0xbc5   : > { %2588 = vrot.lane.b32.xlu0 %v2517_v27, %s10134_s12 }
 0xbc7   : > { %v2451_v1 = vpop.permute.xlu0 %2450  ;;  %v2529_v15 = vpop.permute.xlu1 %2528 }
 0xbc8   : > { %2748 = vrot.lane.b32.xlu1 %v2451_v1, %s10130_s13  ;;  %v2532_v20 = vsel %vm10102_vm11, %v2529_v15, %v7952_v22  ;;  %v2452_v33 = vsel %vm10102_vm11, %v8004_v34, %v2451_v1  ;;  %v6080_v22 = vld [vmem:[%s10046_s1 + $0x8c] ss:$16 sps:$4 sm:$0xff]  }
 0xbc9   : > { %2734 = vrot.lane.b32.xlu0 %v2437_v42, %s10130_s13  ;;  %2671 = vmatprep.mubr.bf16.mxu1 %v6080_v22 }
 0xbcb   : > { %v2411_v5 = vpop.permute.xlu0 %2410  ;;  %v2489_v38 = vpop.permute.xlu1 %2488 }
 0xbcc   : > { %2716 = vrot.lane.b32.xlu1 %v2411_v5, %s10130_s13  ;;  %v2492_v54 = vsel %vm10101_vm12, %v2489_v38, %v7956_v59  ;;  %v2412_v25 = vsel %vm10101_vm12, %v8010_v62, %v2411_v5  ;;  %v6083_v59 = vld [vmem:[%s10046_s1 + $0x84] ss:$16 sps:$4 sm:$0xff]  }
 0xbcd   : > { %2556 = vrot.lane.b32.xlu0 %v2477_v19, %s10134_s12  ;;  %2815 = vmatprep.mubr.bf16.mxu0 %v6083_v59 }
 0xbcf   : > { %v2416_v57 = vpop.permute.xlu0 %2415  ;;  %v2534_v13 = vpop.permute.xlu1 %2533 }
 0xbd0   : > { %2720 = vrot.lane.b32.xlu1 %v2416_v57, %s10130_s13  ;;  %v2537_v34 = vsel %vm10146_vm14, %v2534_v13, %v7960_v50  ;;  %v2417_v16 = vsel %vm10148_vm15, %v8014_v2, %v2416_v57  ;;  %vm10149_vm14 = vcmask 121856  }
 0xbd1   : > { %2702 = vrot.lane.b32.xlu0 %v2397_v7, %s10130_s13 }
 0xbd3   : > { %v2494_v26 = vpop.permute.xlu1 %2493 }
 0xbd4   : > { %2829 = vperm.xlu1 %6048, %v5405_v53   ;;  %v2497_v62 = vsel %vm10147_vm13, %v2494_v26, %v7964_v40  ;;  %v5406_v40 = vld [vmem:[%s10047_s2 + $0x48] sm:$0xff]  ;;  %vm10150_vm13 = vmmov %vm10149_vm14 }
 0xbd5   : > { %2592 = vrot.lane.b32.xlu0 %v2522_v9, %s10134_s12  ;;  %vm10151_vm15 = vmmov %vm10150_vm13 }
 0xbd7   : > { %v2454_v44 = vpop.permute.xlu1 %2453 }
 0xbd9   : > { %2738 = vrot.lane.b32.xlu0 %v2442_v23, %s10130_s13 }
 0xbdb   : > { %v2693_v50 = vpop.permute.xlu1 %2692 }
 0xbdc   : > { %v2752_v42 = vsel %vm10150_vm13, %v8065_v63, %v2693_v50 }
 0xbdd   : > { %2560 = vrot.lane.b32.xlu0 %v2482_v35, %s10134_s12 }
 0xbe1   : > { %2706 = vrot.lane.b32.xlu0 %v2402_v49, %s10130_s13 }
 0xbe5   : > { %2596 = vrot.lane.b32.xlu0 %v2527_v45, %s10134_s12 }
 0xbe9   : > { %2742 = vrot.lane.b32.xlu0 %v2447_v37, %s10130_s13 }
 0xbed   : > { %2564 = vrot.lane.b32.xlu0 %v2487_v29, %s10134_s12 }
 0xbf1   : > { %2710 = vrot.lane.b32.xlu0 %v2407_v30, %s10130_s13 }
 0xbf5   : > { %2600 = vrot.lane.b32.xlu0 %v2532_v20, %s10134_s12 }
 0xbf9   : > { %2746 = vrot.lane.b32.xlu0 %v2452_v33, %s10130_s13 }
 0xbfd   : > { %2568 = vrot.lane.b32.xlu0 %v2492_v54, %s10134_s12 }
 0xc01   : > { %2714 = vrot.lane.b32.xlu0 %v2412_v25, %s10130_s13 }
 0xc05   : > { %2604 = vrot.lane.b32.xlu0 %v2537_v34, %s10134_s12 }
 0xc09   : > { %2572 = vrot.lane.b32.xlu0 %v2497_v62, %s10134_s12 }
 0xc0d   : > { %2718 = vrot.lane.b32.xlu0 %v2417_v16, %s10130_s13 }
 0xc0e   : > { %v2725_v27 = vpop.permute.xlu1 %2724 }
 0xc0f   : > { %v2577_v56 = vpop.permute.xlu0 %2576 }
 0xc10   : > { %v2615_v3 = vsel %vm319_vm2, %v2577_v56, %v8020_v8 }
 0xc11   : > { %5646 = vmatprep.subr.bf16.mxu1 %v2615_v3  ;;  %2750 = vrot.lane.b32.xlu0 %v2454_v44, %s10130_s13 }
 0xc12   : > { %5647 = vmatpush3.bf16.msra.mxu1 %v8087_v11  ;;  %v2729_v11 = vpop.permute.xlu1 %2728 }
 0xc13   : > { %v2723_v1 = vpop.permute.xlu0 %2722 }
 0xc14   : > { %v2760_v2 = vsel %vm10149_vm14, %v2723_v1, %v2725_v27  ;;  %vm10152_vm14 = vmmov %vm10150_vm13 }
 0xc15   : > { %2834 = vperm.xlu0 %6047, %v5406_v40   ;;  %5668 = vmatprep.subr.bf16.mxu0 %v2760_v2 }
 0xc16   : > { %5669 = vmatpush3.bf16.msra.mxu0 %v2752_v42  ;;  %v2697_v52 = vpop.permute.xlu1 %2696 }
 0xc17   : > { %v2581_v8 = vpop.permute.xlu0 %2580 }
 0xc18   : > { %v2616_v58 = vsel %vm319_vm2, %v2581_v8, %v8024_v14 }
 0xc19   : > { %5648 = vmatprep.subr.bf16.mxu1 %v2616_v58 }
 0xc1a   : > { %v2733_v23 = vpop.permute.xlu1 %2732 }
 0xc1b   : > { %v2727_v5 = vpop.permute.xlu0 %2726 }
 0xc1c   : > { %v2761_v19 = vsel %vm10151_vm15, %v2727_v5, %v2729_v11  ;;  %vm10153_vm15 = vmmov %vm10150_vm13 }
 0xc1d   : > { %5670 = vmatprep.subr.bf16.mxu0 %v2761_v19 }
 0xc1e   : > { %v2701_v12 = vpop.permute.xlu1 %2700 }
 0xc1f   : > { %v2549_v57 = vpop.permute.xlu0 %2548 }
 0xc20   : > { %v2608_v7 = vsel %vm319_vm2, %v2549_v57, %v8030_v24 }
 0xc21   : > { %5649 = vmatpush3.bf16.msra.mxu1 %v2608_v7 }
 0xc22   : > { %v2737_v29 = vpop.permute.xlu1 %2736 }
 0xc23   : > { %v2695_v63 = vpop.permute.xlu0 %2694 }
 0xc24   : > { %v2753_v53 = vsel %vm10152_vm14, %v2695_v63, %v2697_v52  ;;  %vm10154_vm14 = vmmov %vm10150_vm13 }
 0xc25   : > { %5671 = vmatpush3.bf16.msra.mxu0 %v2753_v53 }
 0xc26   : > { %v2705_v38 = vpop.permute.xlu1 %2704 }
 0xc27   : > { %v2585_v9 = vpop.permute.xlu0 %2584 }
 0xc28   : > { %v2617_v14 = vsel %vm319_vm2, %v2585_v9, %v8034_v36  ;;  %v6078_v9 = vld [vmem:[%s10046_s1 + $0x88] ss:$16 sps:$4 sm:$0xff]  }
 0xc29   : > { %5650 = vmatprep.subr.bf16.mxu1 %v2617_v14 }
 0xc2a   : > { %v2741_v25 = vpop.permute.xlu1 %2740 }
 0xc2b   : > { %v2731_v41 = vpop.permute.xlu0 %2730 }
 0xc2c   : > { %v2762_v35 = vsel %vm10150_vm13, %v2731_v41, %v2733_v23 }
 0xc2d   : > { %5672 = vmatprep.subr.bf16.mxu0 %v2762_v35 }
 0xc2e   : > { %v2709_v59 = vpop.permute.xlu1 %2708 }
 0xc2f   : > { %v2553_v49 = vpop.permute.xlu0 %2552 }
 0xc30   : > { %v2609_v24 = vsel %vm319_vm2, %v2553_v49, %v8040_v21 }
 0xc31   : > { %5651 = vmatpush3.bf16.msra.mxu1 %v2609_v24 }
 0xc32   : > { %v2745_v50 = vpop.permute.xlu1 %2744 }
 0xc33   : > { %v2699_v45 = vpop.permute.xlu0 %2698 }
 0xc34   : > { %v2754_v37 = vsel %vm10153_vm15, %v2699_v45, %v2701_v12  ;;  %vm10155_vm15 = vmmov %vm10150_vm13 }
 0xc35   : > { %5673 = vmatpush3.bf16.msra.mxu0 %v2754_v37 }
 0xc36   : > { %v2713_v27 = vpop.permute.xlu1 %2712 }
 0xc37   : > { %v2589_v18 = vpop.permute.xlu0 %2588 }
 0xc38   : > { %v2618_v36 = vsel %vm319_vm2, %v2589_v18, %v8044_v6 }
 0xc39   : > { %5652 = vmatprep.subr.bf16.mxu1 %v2618_v36 }
 0xc3a   : > { %v2749_v8 = vpop.permute.xlu1 %2748 }
 0xc3b   : > { %v2735_v30 = vpop.permute.xlu0 %2734 }
 0xc3c   : > { %v2763_v15 = vsel %vm10154_vm14, %v2735_v30, %v2737_v29  ;;  %vm10156_vm14 = vmmov %vm10150_vm13 }
 0xc3d   : > { %5674 = vmatprep.subr.bf16.mxu0 %v2763_v15 }
 0xc3e   : > { %v2717_v19 = vpop.permute.xlu1 %2716 }
 0xc3f   : > { %v2557_v20 = vpop.permute.xlu0 %2556 }
 0xc40   : > { %v2610_v21 = vsel %vm319_vm2, %v2557_v20, %v8048_v4 }
 0xc41   : > { %5653 = vmatpush3.bf16.msra.mxu1 %v2610_v21 }
 0xc42   : > { %v2721_v14 = vpop.permute.xlu1 %2720 }
 0xc43   : > { %v2703_v33 = vpop.permute.xlu0 %2702 }
 0xc44   : > { %v2755_v54 = vsel %vm10150_vm13, %v2703_v33, %v2705_v38 }
 0xc45   : > { %5675 = vmatpush3.bf16.msra.mxu0 %v2755_v54 }
 0xc47   : > { %v2593_v13 = vpop.permute.xlu0 %2592 }
 0xc48   : > { %v2619_v6 = vsel %vm319_vm2, %v2593_v13, %v8051_v17 }
 0xc49   : > { %5654 = vmatprep.subr.bf16.mxu1 %v2619_v6 }
 0xc4b   : > { %v2739_v22 = vpop.permute.xlu0 %2738 }
 0xc4c   : > { %v2764_v26 = vsel %vm10155_vm15, %v2739_v22, %v2741_v25  ;;  %vm10157_vm15 = vmmov %vm10150_vm13 }
 0xc4d   : > { %5676 = vmatprep.subr.bf16.mxu0 %v2764_v26 }
 0xc4f   : > { %v2561_v34 = vpop.permute.xlu0 %2560 }
 0xc50   : > { %v2611_v4 = vsel %vm319_vm2, %v2561_v34, %v8053_v10 }
 0xc51   : > { %5655 = vmatpush3.bf16.msra.mxu1 %v2611_v4 }
 0xc53   : > { %v2707_v62 = vpop.permute.xlu0 %2706  ;;  %v2830_v21 = vpop.permute.xlu1 %2829 }
 0xc54   : > { %v2756_v44 = vsel %vm10156_vm14, %v2707_v62, %v2709_v59  ;;  %vm10158_vm14 = vmmov %vm10150_vm13 }
 0xc55   : > { %5677 = vmatpush3.bf16.msra.mxu0 %v2756_v44 }
 0xc57   : > { %v2597_v16 = vpop.permute.xlu0 %2596 }
 0xc58   : > { %v2620_v17 = vsel %vm319_vm2, %v2597_v16, %v8055_v55 }
 0xc59   : > { %5656 = vmatprep.subr.bf16.mxu1 %v2620_v17 }
 0xc5b   : > { %v2743_v56 = vpop.permute.xlu0 %2742 }
 0xc5c   : > { %v2765_v3 = vsel %vm10150_vm13, %v2743_v56, %v2745_v50 }
 0xc5d   : > { %5678 = vmatprep.subr.bf16.mxu0 %v2765_v3 }
 0xc5f   : > { %v2565_v40 = vpop.permute.xlu0 %2564 }
 0xc60   : > { %v2612_v10 = vsel %vm319_vm2, %v2565_v40, %v8057_v46 }
 0xc61   : > { %5657 = vmatpush3.bf16.msra.mxu1 %v2612_v10 }
 0xc63   : > { %v2711_v1 = vpop.permute.xlu0 %2710 }
 0xc64   : > { %v2757_v2 = vsel %vm10157_vm15, %v2711_v1, %v2713_v27  ;;  %vm10159_vm15 = vmmov 0  }
 0xc65   : > { %5679 = vmatpush3.bf16.msra.mxu0 %v2757_v2 }
 0xc67   : > { %v2601_v42 = vpop.permute.xlu0 %2600 }
 0xc68   : > { %v2621_v55 = vsel %vm319_vm2, %v2601_v42, %v8059_v39 }
 0xc69   : > { %5658 = vmatprep.subr.bf16.mxu1 %v2621_v55  ;;  %v5407_v55 = vld [vmem:[%s10049_s4 + $0x10] sm:$0xff] }
 0xc6b   : > { %v2747_v58 = vpop.permute.xlu0 %2746 }
 0xc6c   : > { %v2766_v11 = vsel %vm10158_vm14, %v2747_v58, %v2749_v8  ;;  %vm10160_vm14 = vmmov %vm10150_vm13 }
 0xc6d   : > { %5680 = vmatprep.subr.bf16.mxu0 %v2766_v11 }
 0xc6f   : > { %v2569_v5 = vpop.permute.xlu0 %2568 }
 0xc70   : > { %v2613_v46 = vsel %vm319_vm2, %v2569_v5, %v8061_v43  ;;  %v5408_v5 = vld [vmem:[%s10049_s4 + $0x18] sm:$0xff] }
 0xc71   : > { %5659 = vmatpush3.bf16.msra.mxu1 %v2613_v46 }
 0xc73   : > { %v2715_v57 = vpop.permute.xlu0 %2714 }
 0xc74   : > { %v2758_v7 = vsel %vm10150_vm13, %v2715_v57, %v2717_v19  ;;  %vm10162_vm13 = vcmask 990208  }
 0xc75   : > { %5681 = vmatpush3.bf16.msra.mxu0 %v2758_v7 }
 0xc77   : > { %v2605_v52 = vpop.permute.xlu0 %2604 }
 0xc78   : > { %v2622_v39 = vsel %vm319_vm2, %v2605_v52, %v8063_v32 }
 0xc79   : > { %5660 = vmatprep.subr.bf16.mxu1 %v2622_v39 }
 0xc7b   : > { %v2573_v63 = vpop.permute.xlu0 %2572 }
 0xc7c   : > { %v2614_v53 = vsel %vm319_vm2, %v2573_v63, %v8067_v61  ;;  %v6081_v61 = vld [vmem:[%s10046_s1 + $0x80] ss:$16 sps:$4 sm:$0xff]  }
 0xc7d   : > { %5661 = vmatpush3.bf16.msra.mxu1 %v2614_v53 }
 0xc7e   : > { %5913 = vmatprep.subr.bf16.mxu1 %v6228_v48 }
 0xc7f   : > { %v2719_v43 = vpop.permute.xlu0 %2718 }
 0xc80   : > { %2672 = vmatmul.mubr.bf16.vlgmr.msra.gmra.mrb[16].mxu1 %v6078_v9  ;;  %v2759_v32 = vsel %vm10160_vm14, %v2719_v43, %v2721_v14  ;;  %vm10163_vm14 = vcmask 7168  }
 0xc81   : > { %5929 = vmatprep.mubr.msk.bf16.mxu1 %vm10159_vm15, %v6228_v48 }
 0xc83   : > { %v2751_v23 = vpop.permute.xlu0 %2750 }
 0xc84   : > { %5682 = vmatprep.subr.bf16.mxu0 %v2751_v23 }
 0xc85   : > { %5683 = vmatpush3.bf16.msra.mxu0 %v2759_v32 }
 0xc88   : > { %2816 = vmatmul.mubr.bf16.vlgmr.msra.gmra.mrb[20].mxu0 %v6081_v61 }
 0xc94   : > { %v2835_v54 = vpop.permute.xlu0 %2834 }
 0xd53   : > { %v5662_v41 = vpop.f32.mrb[16].mxu1 }
 0xd54   : > { %v5663_v35 = vpop.f32.mrb[17].mxu1 }
 0xd55   : > { %v5664_v49 = vadd.f32 %v5663_v35, %v5662_v41  ;;  %v5665_v24 = vpop.f32.mrb[18].mxu1 }
 0xd56   : > { %v5666_v12 = vpop.f32.mrb[19].mxu1 }
 0xd57   : > { %v5667_v45 = vadd.f32 %v5666_v12, %v5665_v24 }
 0xd5b   : > { %v5684_v37 = vpop.f32.mrb[20].mxu0 }
 0xd5c   : > { %v5685_v18 = vpop.f32.mrb[21].mxu0 }
 0xd5d   : > { %v5686_v36 = vadd.f32 %v5685_v18, %v5684_v37  ;;  %v5687_v29 = vpop.f32.mrb[22].mxu0  ;;  %v6084_v18 = vld [vmem:[#allocation3 + $0x8] sm:$0xff]  }
 0xd5e   : > { %v5688_v30 = vpop.f32.mrb[23].mxu0 }
 0xd5f   : > { %v2818_v15 = vadd.f32 %v5686_v36, %v5664_v49  ;;  %v5689_v20 = vadd.f32 %v5688_v30, %v5687_v29 }
 0xd61   : > { %v2837_v38 = vadd.f32 %v2830_v21, %v2818_v15  ;;  %v2821_v33 = vadd.f32 %v5689_v20, %v5667_v45 }
 0xd63   : > { %v2838_v13 = vadd.f32 %v2835_v54, %v2821_v33  ;;  %v2839_v6 = vmax.f32 %v2837_v38, 0.0 }
 0xd65   : > { %v2840_v25 = vmax.f32 %v2838_v13, 0.0 }
 0xd67   : > { %v2848_v22 = vpack.c.bf16 %v2840_v25, %v2839_v6 }
 0xd69   : > { %2860 = vrot.lane.b32.xlu0 %v2848_v22, %s10125_s29  ;;  %2856 = vrot.lane.b32.xlu1 %v2848_v22, %s10134_s12 }
 0xd6d   : > { %2865 = vrot.lane.b32.xlu0 %v2848_v22, %s10127_s9  ;;  %2862 = vrot.lane.b32.xlu1 %v6210_v0, %s10125_s29 }
 0xd71   : > { %2870 = vrot.lane.b32.xlu0 %v2848_v22, %s10129_s23  ;;  %2867 = vrot.lane.b32.xlu1 %v6210_v0, %s10127_s9 }
 0xd75   : > { %2875 = vrot.lane.b32.xlu0 %v2848_v22, %s10120_s16  ;;  %2872 = vrot.lane.b32.xlu1 %v6210_v0, %s10129_s23 }
 0xd79   : > { %2880 = vrot.lane.b32.xlu0 %v2848_v22, %s10122_s21  ;;  %2877 = vrot.lane.b32.xlu1 %v6210_v0, %s10120_s16 }
 0xd7d   : > { %2885 = vrot.lane.b32.xlu0 %v2848_v22, %s10124_s14  ;;  %2882 = vrot.lane.b32.xlu1 %v6210_v0, %s10122_s21 }
 0xd81   : > { %2887 = vrot.lane.b32.xlu1 %v6210_v0, %s10124_s14  ;;  %2913 = vrot.lane.b32.xlu0 %v6210_v0, %s10161_s22 }
 0xd85   : > { %2915 = vrot.lane.b32.xlu1 %v2848_v22, %s10161_s22 }
 0xddb   : > { %v2861_v26 = vpop.permute.xlu0 %2860  ;;  %v2857_v34 = vpop.permute.xlu1 %2856 }
 0xddc   : > { %2919 = vrot.lane.b32.xlu1 %v2861_v26, %s10161_s22  ;;  %2917 = vrot.lane.b32.xlu0 %v2857_v34, %s10161_s22 }
 0xddf   : > { %v2866_v4 = vpop.permute.xlu0 %2865  ;;  %v2863_v59 = vpop.permute.xlu1 %2862 }
 0xde0   : > { %v2864_v62 = vsel %vm325_vm4, %v2861_v26, %v2863_v59  ;;  %2923 = vrot.lane.b32.xlu1 %v2866_v4, %s10161_s22 }
 0xde1   : > { %2921 = vrot.lane.b32.xlu0 %v2864_v62, %s10161_s22 }
 0xde3   : > { %v2871_v44 = vpop.permute.xlu0 %2870  ;;  %v2868_v16 = vpop.permute.xlu1 %2867 }
 0xde4   : > { %v2869_v17 = vsel %vm331_vm6, %v2866_v4, %v2868_v16  ;;  %2927 = vrot.lane.b32.xlu1 %v2871_v44, %s10161_s22 }
 0xde5   : > { %2925 = vrot.lane.b32.xlu0 %v2869_v17, %s10161_s22 }
 0xde7   : > { %v2876_v50 = vpop.permute.xlu0 %2875  ;;  %v2873_v56 = vpop.permute.xlu1 %2872 }
 0xde8   : > { %v2874_v3 = vsel %vm337_vm8, %v2871_v44, %v2873_v56  ;;  %2931 = vrot.lane.b32.xlu1 %v2876_v50, %s10161_s22 }
 0xde9   : > { %2929 = vrot.lane.b32.xlu0 %v2874_v3, %s10161_s22 }
 0xdeb   : > { %v2881_v40 = vpop.permute.xlu0 %2880  ;;  %v2878_v10 = vpop.permute.xlu1 %2877 }
 0xdec   : > { %v2879_v27 = vsel %vm343_vm10, %v2876_v50, %v2878_v10  ;;  %2935 = vrot.lane.b32.xlu1 %v2881_v40, %s10161_s22 }
 0xded   : > { %2933 = vrot.lane.b32.xlu0 %v2879_v27, %s10161_s22 }
 0xdef   : > { %v2886_v1 = vpop.permute.xlu0 %2885  ;;  %v2883_v2 = vpop.permute.xlu1 %2882 }
 0xdf0   : > { %v2884_v42 = vsel %vm10101_vm12, %v2881_v40, %v2883_v2  ;;  %2939 = vrot.lane.b32.xlu1 %v2886_v1, %s10161_s22 }
 0xdf1   : > { %2937 = vrot.lane.b32.xlu0 %v2884_v42, %s10161_s22 }
 0xdf3   : > { %v2888_v8 = vpop.permute.xlu1 %2887  ;;  %v2914_v11 = vpop.permute.xlu0 %2913 }
 0xdf4   : > { %v2889_v58 = vsel %vm10162_vm13, %v2886_v1, %v2888_v8  ;;  %2898 = vperm.xlu1 %6048, %v5407_v55   ;;  %vm10164_vm13 = vmmov %vm10163_vm14 }
 0xdf5   : > { %2941 = vrot.lane.b32.xlu0 %v2889_v58, %s10161_s22  ;;  %vm10166_vm12 = vmmov %vm10164_vm13 }
 0xdf6   : > { %vm10167_vm11 = vmmov %vm10166_vm12 }
 0xdf7   : > { %v2916_v46 = vpop.permute.xlu1 %2915 }
 0xdf8   : > { %v2943_v19 = vsel %vm10163_vm14, %v2914_v11, %v2916_v46  ;;  %3053 = vrot.lane.b32.xlu1 %v6210_v0, %s10131_s3  ;;  %vm10165_vm14 = vmmov %vm10164_vm13 }
 0xdf9   : > { %2903 = vperm.xlu0 %6047, %v5408_v5   ;;  %5914 = vmatpush3.bf16.msra.mxu1 %v2943_v19 }
 0xdfa   : > { %5915 = vmatprep.subr.bf16.mxu1 %v6228_v48 }
 0xdfc   : > { %3058 = vrot.lane.b32.xlu1 %v6210_v0, %s10132_s0 }
 0xdfd   : > { %3135 = vrot.lane.b32.xlu0 %v6210_v0, %s10131_s3 }
 0xe00   : > { %3018 = vrot.lane.b32.xlu1 %v6210_v0, %s10134_s12 }
 0xe01   : > { %3140 = vrot.lane.b32.xlu0 %v6210_v0, %s10132_s0 }
 0xe04   : > { %3063 = vrot.lane.b32.xlu1 %v6210_v0, %s10133_s18 }
 0xe05   : > { %3100 = vrot.lane.b32.xlu0 %v6210_v0, %s10134_s12 }
 0xe08   : > { %3023 = vrot.lane.b32.xlu1 %v6210_v0, %s10125_s29 }
 0xe09   : > { %3145 = vrot.lane.b32.xlu0 %v6210_v0, %s10133_s18 }
 0xe0c   : > { %3068 = vrot.lane.b32.xlu1 %v6210_v0, %s10126_s8 }
 0xe0d   : > { %3105 = vrot.lane.b32.xlu0 %v6210_v0, %s10125_s29 }
 0xe10   : > { %3028 = vrot.lane.b32.xlu1 %v6210_v0, %s10127_s9 }
 0xe11   : > { %3150 = vrot.lane.b32.xlu0 %v6210_v0, %s10126_s8 }
 0xe14   : > { %3073 = vrot.lane.b32.xlu1 %v6210_v0, %s10128_s20 }
 0xe15   : > { %3110 = vrot.lane.b32.xlu0 %v6210_v0, %s10127_s9 }
 0xe18   : > { %3033 = vrot.lane.b32.xlu1 %v6210_v0, %s10129_s23 }
 0xe19   : > { %3155 = vrot.lane.b32.xlu0 %v6210_v0, %s10128_s20 }
 0xe1c   : > { %3078 = vrot.lane.b32.xlu1 %v6210_v0, %s10119_s15 }
 0xe1d   : > { %3115 = vrot.lane.b32.xlu0 %v6210_v0, %s10129_s23 }
 0xe20   : > { %3038 = vrot.lane.b32.xlu1 %v6210_v0, %s10120_s16 }
 0xe21   : > { %3160 = vrot.lane.b32.xlu0 %v6210_v0, %s10119_s15 }
 0xe24   : > { %3083 = vrot.lane.b32.xlu1 %v6210_v0, %s10121_s19 }
 0xe25   : > { %3120 = vrot.lane.b32.xlu0 %v6210_v0, %s10120_s16 }
 0xe28   : > { %3043 = vrot.lane.b32.xlu1 %v6210_v0, %s10122_s21 }
 0xe29   : > { %3165 = vrot.lane.b32.xlu0 %v6210_v0, %s10121_s19 }
 0xe2c   : > { %3048 = vrot.lane.b32.xlu1 %v6210_v0, %s10124_s14 }
 0xe2d   : > { %3125 = vrot.lane.b32.xlu0 %v6210_v0, %s10122_s21 }
 0xe31   : > { %3170 = vrot.lane.b32.xlu0 %v6210_v0, %s10123_s17 }
 0xe35   : > { %3130 = vrot.lane.b32.xlu0 %v6210_v0, %s10124_s14 }
 0xe39   : > { %3325 = vrot.lane.b32.xlu0 %v6210_v0, %s10130_s13 }
 0xe4e   : > { %v2918_v57 = vpop.permute.xlu0 %2917  ;;  %v2920_v7 = vpop.permute.xlu1 %2919 }
 0xe4f   : > { %5916 = vmatpush3.bf16.msra.mxu1 %v2918_v57 }
 0xe50   : > { %5917 = vmatprep.subr.bf16.mxu1 %v6228_v48 }
 0xe52   : > { %v2924_v52 = vpop.permute.xlu1 %2923 }
 0xe53   : > { %v2922_v39 = vpop.permute.xlu0 %2921 }
 0xe54   : > { %v2944_v63 = vsel %vm10164_vm13, %v2920_v7, %v2922_v39  ;;  %vm10168_vm13 = vmmov %vm10167_vm11 }
 0xe55   : > { %5918 = vmatpush3.bf16.msra.mxu1 %v2944_v63 }
 0xe56   : > { %v2928_v53 = vpop.permute.xlu1 %2927  ;;  %5919 = vmatprep.subr.bf16.mxu1 %v6228_v48 }
 0xe57   : > { %v2926_v9 = vpop.permute.xlu0 %2925 }
 0xe58   : > { %v2945_v43 = vsel %vm10165_vm14, %v2924_v52, %v2926_v9  ;;  %vm10169_vm14 = vmmov %vm10167_vm11 }
 0xe59   : > { %5920 = vmatpush3.bf16.msra.mxu1 %v2945_v43 }
 0xe5a   : > { %5921 = vmatprep.subr.bf16.mxu1 %v6228_v48  ;;  %v2932_v14 = vpop.permute.xlu1 %2931 }
 0xe5b   : > { %v2930_v23 = vpop.permute.xlu0 %2929 }
 0xe5c   : > { %v2946_v32 = vsel %vm10166_vm12, %v2928_v53, %v2930_v23 }
 0xe5d   : > { %5922 = vmatpush3.bf16.msra.mxu1 %v2946_v32 }
 0xe5e   : > { %5923 = vmatprep.subr.bf16.mxu1 %v6228_v48  ;;  %v2936_v35 = vpop.permute.xlu1 %2935 }
 0xe5f   : > { %v2934_v61 = vpop.permute.xlu0 %2933 }
 0xe60   : > { %v2947_v41 = vsel %vm10167_vm11, %v2932_v14, %v2934_v61  ;;  %vm10170_vm11 = vcmask 932864  }
 0xe61   : > { %5924 = vmatpush3.bf16.msra.mxu1 %v2947_v41  ;;  %vm10171_vm12 = vmmov %vm10170_vm11 }
 0xe62   : > { %5925 = vmatprep.subr.bf16.mxu1 %v6228_v48  ;;  %v2940_v12 = vpop.permute.xlu1 %2939 }
 0xe63   : > { %v2938_v49 = vpop.permute.xlu0 %2937 }
 0xe64   : > { %v2948_v24 = vsel %vm10168_vm13, %v2936_v35, %v2938_v49  ;;  %vm10172_vm13 = vcmask 998400  }
 0xe65   : > { %5926 = vmatpush3.bf16.msra.mxu1 %v2948_v24 }
 0xe66   : > { %5927 = vmatprep.subr.bf16.mxu1 %v6228_v48 }
 0xe67   : > { %v2942_v45 = vpop.permute.xlu0 %2941 }
 0xe68   : > { %v2949_v37 = vsel %vm10169_vm14, %v2940_v12, %v2942_v45  ;;  %vm10173_vm14 = vmmov %vm10172_vm13 }
 0xe69   : > { %5928 = vmatpush3.bf16.msra.mxu1 %v2949_v37 }
 0xe6c   : > { %5930 = vmatmul.mubr.bf16.vlgmr.msra.gmra.mrb[20].mxu1 %v6084_v18 }
 0xe73   : > { %v2899_v59 = vpop.permute.xlu1 %2898 }
 0xe77   : > { %v8423_v62 = vpop.permute.xlu1 %3053 }
 0xe78   : > { %v2904_v36 = vpop.permute.xlu0 %2903 }
 0xe7b   : > { %v8425_v44 = vpop.permute.xlu1 %3058 }
 0xe7c   : > { %v8363_v29 = vpop.permute.xlu0 %3135 }
 0xe7d   : > { %3213 = vrot.lane.b32.xlu1 %v8363_v29, %s10134_s12 }
 0xe7f   : > { %v8427_v16 = vpop.permute.xlu1 %3018 }
 0xe80   : > { %v8367_v30 = vpop.permute.xlu0 %3140 }
 0xe81   : > { %3217 = vrot.lane.b32.xlu1 %v8367_v30, %s10134_s12 }
 0xe83   : > { %v8429_v17 = vpop.permute.xlu1 %3063 }
 0xe84   : > { %v8371_v15 = vpop.permute.xlu0 %3100 }
 0xe85   : > { %3185 = vrot.lane.b32.xlu1 %v8371_v15, %s10134_s12 }
 0xe87   : > { %v8431_v50 = vpop.permute.xlu1 %3023 }
 0xe88   : > { %v8375_v20 = vpop.permute.xlu0 %3145 }
 0xe89   : > { %3221 = vrot.lane.b32.xlu1 %v8375_v20, %s10134_s12 }
 0xe8b   : > { %v8433_v56 = vpop.permute.xlu1 %3068 }
 0xe8c   : > { %v8379_v21 = vpop.permute.xlu0 %3105 }
 0xe8d   : > { %3189 = vrot.lane.b32.xlu1 %v8379_v21, %s10134_s12 }
 0xe8f   : > { %v8435_v3 = vpop.permute.xlu1 %3028 }
 0xe90   : > { %v8383_v38 = vpop.permute.xlu0 %3150 }
 0xe91   : > { %3225 = vrot.lane.b32.xlu1 %v8383_v38, %s10134_s12 }
 0xe93   : > { %v8437_v40 = vpop.permute.xlu1 %3073 }
 0xe94   : > { %v8387_v33 = vpop.permute.xlu0 %3110 }
 0xe95   : > { %3193 = vrot.lane.b32.xlu1 %v8387_v33, %s10134_s12 }
 0xe97   : > { %v8439_v10 = vpop.permute.xlu1 %3033 }
 0xe98   : > { %v8391_v54 = vpop.permute.xlu0 %3155 }
 0xe99   : > { %3229 = vrot.lane.b32.xlu1 %v8391_v54, %s10134_s12 }
 0xe9b   : > { %v8441_v5 = vpop.permute.xlu1 %3078 }
 0xe9c   : > { %v8395_v13 = vpop.permute.xlu0 %3115 }
 0xe9d   : > { %3197 = vrot.lane.b32.xlu1 %v8395_v13, %s10134_s12 }
 0xe9f   : > { %v8449_v7 = vpop.permute.xlu1 %3038 }
 0xea0   : > { %v8399_v6 = vpop.permute.xlu0 %3160 }
 0xea1   : > { %3233 = vrot.lane.b32.xlu1 %v8399_v6, %s10134_s12 }
 0xea3   : > { %v8453_v52 = vpop.permute.xlu1 %3083 }
 0xea4   : > { %v8403_v25 = vpop.permute.xlu0 %3120 }
 0xea5   : > { %3201 = vrot.lane.b32.xlu1 %v8403_v25, %s10134_s12 }
 0xea7   : > { %v8459_v60 = vpop.permute.xlu1 %3043 }
 0xea8   : > { %v8407_v22 = vpop.permute.xlu0 %3165 }
 0xea9   : > { %3237 = vrot.lane.b32.xlu1 %v8407_v22, %s10134_s12 }
 0xeab   : > { %v8463_v28 = vpop.permute.xlu1 %3048 }
 0xeac   : > { %v8411_v26 = vpop.permute.xlu0 %3125 }
 0xead   : > { %3205 = vrot.lane.b32.xlu1 %v8411_v26, %s10134_s12 }
 0xeb0   : > { %v8415_v34 = vpop.permute.xlu0 %3170 }
 0xeb1   : > { %3241 = vrot.lane.b32.xlu1 %v8415_v34, %s10134_s12 }
 0xeb4   : > { %v8419_v4 = vpop.permute.xlu0 %3130 }
 0xeb5   : > { %3209 = vrot.lane.b32.xlu1 %v8419_v4, %s10134_s12 }
 0xeb8   : > { %v8514_v24 = vpop.permute.xlu0 %3325 }
 0xf3f   : > { %v2992_v27 = vpop.f32.mrb[20].mxu1 }
 0xf40   : > { %v2993_v1 = vadd.f32 %v2992_v27, %v2899_v59  ;;  %v5931_v2 = vpop.f32.mrb[21].mxu1 }
 0xf41   : > { %v2995_v42 = vpop.f32.mrb[22].mxu1 }
 0xf42   : > { %v2999_v55 = vmax.f32 %v2993_v1, 0.0  ;;  %v2996_v8 = vadd.f32 %v2995_v42, %v2904_v36  ;;  %v5932_v58 = vpop.f32.mrb[23].mxu1 }
 0xf44   : > { %v3000_v11 = vmax.f32 %v2996_v8, 0.0  ;;  %v3001_v46 = vadd.f32 %v2999_v55, %v2366_v47  ;;  %v8469_v47 = vpop.permute.xlu1 %3213 }
 0xf46   : > { %v3002_v19 = vadd.f32 %v3000_v11, %v2367_v51 }
 0xf48   : > { %v3015_v57 = vpack.c.bf16 %v3002_v19, %v3001_v46  ;;  %v8473_v51 = vpop.permute.xlu1 %3217 }
 0xf4a   : > { %3133 = vrot.lane.b32.xlu1 %v3015_v57, %s10131_s3  ;;  %3055 = vrot.lane.b32.xlu0 %v3015_v57, %s10131_s3 }
 0xf4c   : > { %v8479_v39 = vpop.permute.xlu1 %3185 }
 0xf4e   : > { %3138 = vrot.lane.b32.xlu1 %v3015_v57, %s10132_s0  ;;  %3060 = vrot.lane.b32.xlu0 %v3015_v57, %s10132_s0 }
 0xf50   : > { %v8483_v63 = vpop.permute.xlu1 %3221 }
 0xf52   : > { %3098 = vrot.lane.b32.xlu1 %v3015_v57, %s10134_s12  ;;  %3020 = vrot.lane.b32.xlu0 %v3015_v57, %s10134_s12 }
 0xf54   : > { %v8489_v53 = vpop.permute.xlu1 %3189 }
 0xf56   : > { %3143 = vrot.lane.b32.xlu1 %v3015_v57, %s10133_s18  ;;  %3065 = vrot.lane.b32.xlu0 %v3015_v57, %s10133_s18 }
 0xf58   : > { %v8493_v9 = vpop.permute.xlu1 %3225 }
 0xf5a   : > { %3103 = vrot.lane.b32.xlu1 %v3015_v57, %s10125_s29  ;;  %3025 = vrot.lane.b32.xlu0 %v3015_v57, %s10125_s29 }
 0xf5c   : > { %v8497_v43 = vpop.permute.xlu1 %3193 }
 0xf5e   : > { %3148 = vrot.lane.b32.xlu1 %v3015_v57, %s10126_s8  ;;  %3070 = vrot.lane.b32.xlu0 %v3015_v57, %s10126_s8 }
 0xf60   : > { %v8500_v14 = vpop.permute.xlu1 %3229 }
 0xf62   : > { %3108 = vrot.lane.b32.xlu1 %v3015_v57, %s10127_s9  ;;  %3030 = vrot.lane.b32.xlu0 %v3015_v57, %s10127_s9 }
 0xf64   : > { %v8502_v23 = vpop.permute.xlu1 %3197 }
 0xf66   : > { %3153 = vrot.lane.b32.xlu1 %v3015_v57, %s10128_s20  ;;  %3075 = vrot.lane.b32.xlu0 %v3015_v57, %s10128_s20 }
 0xf68   : > { %v8504_v32 = vpop.permute.xlu1 %3233 }
 0xf6a   : > { %3113 = vrot.lane.b32.xlu1 %v3015_v57, %s10129_s23  ;;  %3035 = vrot.lane.b32.xlu0 %v3015_v57, %s10129_s23 }
 0xf6c   : > { %v8506_v61 = vpop.permute.xlu1 %3201 }
 0xf6e   : > { %3158 = vrot.lane.b32.xlu1 %v3015_v57, %s10119_s15  ;;  %3080 = vrot.lane.b32.xlu0 %v3015_v57, %s10119_s15 }
 0xf70   : > { %v8508_v41 = vpop.permute.xlu1 %3237 }
 0xf72   : > { %3118 = vrot.lane.b32.xlu1 %v3015_v57, %s10120_s16  ;;  %3040 = vrot.lane.b32.xlu0 %v3015_v57, %s10120_s16 }
 0xf74   : > { %v8510_v35 = vpop.permute.xlu1 %3205 }
 0xf76   : > { %3163 = vrot.lane.b32.xlu1 %v3015_v57, %s10121_s19  ;;  %3085 = vrot.lane.b32.xlu0 %v3015_v57, %s10121_s19 }
 0xf78   : > { %v8512_v49 = vpop.permute.xlu1 %3241 }
 0xf7a   : > { %3123 = vrot.lane.b32.xlu1 %v3015_v57, %s10122_s21  ;;  %3045 = vrot.lane.b32.xlu0 %v3015_v57, %s10122_s21 }
 0xf7c   : > { %v8516_v12 = vpop.permute.xlu1 %3209 }
 0xf7e   : > { %3168 = vrot.lane.b32.xlu1 %v3015_v57, %s10123_s17  ;;  %3050 = vrot.lane.b32.xlu0 %v3015_v57, %s10124_s14 }
 0xf82   : > { %3128 = vrot.lane.b32.xlu1 %v3015_v57, %s10124_s14 }
 0xf86   : > { %3088 = vrot.lane.b32.xlu1 %v3015_v57, %s10123_s17 }
 0xf8a   : > { %3327 = vrot.lane.b32.xlu1 %v3015_v57, %s10130_s13 }
 0xfbc   : > { %v3056_v45 = vpop.permute.xlu0 %3055  ;;  %v3134_v37 = vpop.permute.xlu1 %3133 }
 0xfbd   : > { %v3137_v18 = vsel %vm361_vm0, %v3134_v37, %v8363_v29  ;;  %3359 = vrot.lane.b32.xlu1 %v3056_v45, %s10130_s13  ;;  %v3057_v59 = vsel %vm361_vm0, %v8423_v62, %v3056_v45 }
 0xfbe   : > { %3211 = vrot.lane.b32.xlu0 %v3137_v18, %s10134_s12 }
 0xfc0   : > { %v3061_v36 = vpop.permute.xlu0 %3060  ;;  %v3139_v27 = vpop.permute.xlu1 %3138 }
 0xfc1   : > { %3363 = vrot.lane.b32.xlu1 %v3061_v36, %s10130_s13  ;;  %v3142_v2 = vsel %vm367_vm1, %v3139_v27, %v8367_v30  ;;  %v3062_v42 = vsel %vm367_vm1, %v8425_v44, %v3061_v36 }
 0xfc2   : > { %3357 = vrot.lane.b32.xlu0 %v3057_v59, %s10130_s13 }
 0xfc4   : > { %v3021_v1 = vpop.permute.xlu0 %3020  ;;  %v3099_v55 = vpop.permute.xlu1 %3098 }
 0xfc5   : > { %3331 = vrot.lane.b32.xlu1 %v3021_v1, %s10130_s13  ;;  %v8536_v8 = vsel %vm319_vm2, %v3099_v55, %v8371_v15  ;;  %v3022_v58 = vsel %vm319_vm2, %v8427_v16, %v3021_v1 }
 0xfc6   : > { %3215 = vrot.lane.b32.xlu0 %v3142_v2, %s10134_s12 }
 0xfc8   : > { %v3066_v29 = vpop.permute.xlu0 %3065  ;;  %v3144_v44 = vpop.permute.xlu1 %3143 }
 0xfc9   : > { %3367 = vrot.lane.b32.xlu1 %v3066_v29, %s10130_s13  ;;  %v3147_v46 = vsel %vm373_vm3, %v3144_v44, %v8375_v20  ;;  %v3067_v19 = vsel %vm373_vm3, %v8429_v17, %v3066_v29 }
 0xfca   : > { %3361 = vrot.lane.b32.xlu0 %v3062_v42, %s10130_s13 }
 0xfcc   : > { %v3026_v62 = vpop.permute.xlu0 %3025  ;;  %v3104_v57 = vpop.permute.xlu1 %3103 }
 0xfcd   : > { %3335 = vrot.lane.b32.xlu1 %v3026_v62, %s10130_s13  ;;  %v3107_v45 = vsel %vm325_vm4, %v3104_v57, %v8379_v21  ;;  %v3027_v37 = vsel %vm325_vm4, %v8431_v50, %v3026_v62 }
 0xfce   : > { %3183 = vrot.lane.b32.xlu0 %v8536_v8, %s10134_s12 }
 0xfd0   : > { %v3071_v30 = vpop.permute.xlu0 %3070  ;;  %v3149_v18 = vpop.permute.xlu1 %3148 }
 0xfd1   : > { %3371 = vrot.lane.b32.xlu1 %v3071_v30, %s10130_s13  ;;  %v3152_v36 = vsel %vm379_vm5, %v3149_v18, %v8383_v38  ;;  %v3072_v59 = vsel %vm379_vm5, %v8433_v56, %v3071_v30  ;;  %v5418_v56 = vld [vmem:[%s10047_s2 + $0x50] sm:$0xff] }
 0xfd2   : > { %3329 = vrot.lane.b32.xlu0 %v3022_v58, %s10130_s13 }
 0xfd4   : > { %v3031_v11 = vpop.permute.xlu0 %3030  ;;  %v3109_v27 = vpop.permute.xlu1 %3108 }
 0xfd5   : > { %3339 = vrot.lane.b32.xlu1 %v3031_v11, %s10130_s13  ;;  %v3112_v1 = vsel %vm331_vm6, %v3109_v27, %v8387_v33  ;;  %v3032_v2 = vsel %vm331_vm6, %v8435_v3, %v3031_v11 }
 0xfd6   : > { %3219 = vrot.lane.b32.xlu0 %v3147_v46, %s10134_s12 }
 0xfd8   : > { %v3076_v15 = vpop.permute.xlu0 %3075  ;;  %v3154_v29 = vpop.permute.xlu1 %3153 }
 0xfd9   : > { %3375 = vrot.lane.b32.xlu1 %v3076_v15, %s10130_s13  ;;  %v3157_v33 = vsel %vm385_vm7, %v3154_v29, %v8391_v54  ;;  %v3077_v42 = vsel %vm385_vm7, %v8437_v40, %v3076_v15 }
 0xfda   : > { %3365 = vrot.lane.b32.xlu0 %v3067_v19, %s10130_s13 }
 0xfdc   : > { %v3036_v16 = vpop.permute.xlu0 %3035  ;;  %v3114_v3 = vpop.permute.xlu1 %3113 }
 0xfdd   : > { %3343 = vrot.lane.b32.xlu1 %v3036_v16, %s10130_s13  ;;  %v3117_v55 = vsel %vm337_vm8, %v3114_v3, %v8395_v13  ;;  %v3037_v54 = vsel %vm337_vm8, %v8439_v10, %v3036_v16 }
 0xfde   : > { %3187 = vrot.lane.b32.xlu0 %v3107_v45, %s10134_s12 }
 0xfe0   : > { %v3081_v20 = vpop.permute.xlu0 %3080  ;;  %v3159_v40 = vpop.permute.xlu1 %3158 }
 0xfe1   : > { %3379 = vrot.lane.b32.xlu1 %v3081_v20, %s10130_s13  ;;  %v3162_v62 = vsel %vm391_vm9, %v3159_v40, %v8399_v6  ;;  %v3082_v13 = vsel %vm391_vm9, %v8441_v5, %v3081_v20 }
 0xfe2   : > { %3333 = vrot.lane.b32.xlu0 %v3027_v37, %s10130_s13 }
 0xfe4   : > { %v3041_v17 = vpop.permute.xlu0 %3040  ;;  %v3119_v10 = vpop.permute.xlu1 %3118 }
 0xfe5   : > { %3347 = vrot.lane.b32.xlu1 %v3041_v17, %s10130_s13  ;;  %v3122_v30 = vsel %vm343_vm10, %v3119_v10, %v8403_v25  ;;  %v3042_v6 = vsel %vm343_vm10, %v8449_v7, %v3041_v17 }
 0xfe6   : > { %3223 = vrot.lane.b32.xlu0 %v3152_v36, %s10134_s12 }
 0xfe8   : > { %v3086_v21 = vpop.permute.xlu0 %3085  ;;  %v3164_v5 = vpop.permute.xlu1 %3163 }
 0xfe9   : > { %3383 = vrot.lane.b32.xlu1 %v3086_v21, %s10130_s13  ;;  %v3167_v58 = vsel %vm10170_vm11, %v3164_v5, %v8407_v22  ;;  %v3087_v44 = vsel %vm10171_vm12, %v8453_v52, %v3086_v21  ;;  %v6087_v52 = vld [vmem:[%s10046_s1 + $0xac] ss:$16 sps:$4 sm:$0xff]   ;;  %vm10174_vm11 = vcmask 924672   ;;  %vm10175_vm12 = vcmask 990208  }
 0xfea   : > { %3369 = vrot.lane.b32.xlu0 %v3072_v59, %s10130_s13  ;;  %3306 = vmatprep.mubr.bf16.mxu0 %v6087_v52 }
 0xfec   : > { %v3046_v50 = vpop.permute.xlu0 %3045  ;;  %v3124_v25 = vpop.permute.xlu1 %3123 }
 0xfed   : > { %3351 = vrot.lane.b32.xlu1 %v3046_v50, %s10130_s13  ;;  %v3127_v7 = vsel %vm10172_vm13, %v3124_v25, %v8411_v26  ;;  %v3047_v11 = vsel %vm10173_vm14, %v8459_v60, %v3046_v50  ;;  %v6090_v60 = vld [vmem:[%s10046_s1 + $0xa4] ss:$16 sps:$4 sm:$0xff]   ;;  %vm10176_vm13 = vmmov %vm10175_vm12  ;;  %vm10177_vm14 = vcmask 121856  }
 0xfee   : > { %3191 = vrot.lane.b32.xlu0 %v3112_v1, %s10134_s12  ;;  %3450 = vmatprep.mubr.bf16.mxu1 %v6090_v60 }
 0xff0   : > { %v3051_v38 = vpop.permute.xlu0 %3050  ;;  %v3169_v22 = vpop.permute.xlu1 %3168 }
 0xff1   : > { %3355 = vrot.lane.b32.xlu1 %v3051_v38, %s10130_s13  ;;  %v3172_v26 = vsel %vm10174_vm11, %v3169_v22, %v8415_v34  ;;  %v3052_v34 = vsel %vm10176_vm13, %v8463_v28, %v3051_v38  ;;  %vm10178_vm11 = vmmov %vm10177_vm14 }
 0xff2   : > { %3337 = vrot.lane.b32.xlu0 %v3032_v2, %s10130_s13  ;;  %vm10180_vm13 = vmmov %vm10178_vm11 }
 0xff4   : > { %v3129_v46 = vpop.permute.xlu1 %3128 }
 0xff5   : > { %3464 = vperm.xlu1 %6048, %v5418_v56   ;;  %v3132_v15 = vsel %vm10175_vm12, %v3129_v46, %v8419_v4  ;;  %v5419_v4 = vld [vmem:[%s10047_s2 + $0x58] sm:$0xff]  ;;  %vm10179_vm12 = vmmov %vm10178_vm11 }
 0xff6   : > { %3227 = vrot.lane.b32.xlu0 %v3157_v33, %s10134_s12 }
 0xff8   : > { %v3089_v19 = vpop.permute.xlu1 %3088 }
 0xff9   : > { %3526 = vrot.lane.b32.xlu1 %v6210_v0, %s10131_s3 }
 0xffa   : > { %3373 = vrot.lane.b32.xlu0 %v3077_v42, %s10130_s13 }
 0xffc   : > { %v3328_v57 = vpop.permute.xlu1 %3327 }
 0xffd   : > { %3531 = vrot.lane.b32.xlu1 %v6210_v0, %s10132_s0  ;;  %v3387_v18 = vsel %vm10178_vm11, %v8514_v24, %v3328_v57 }
 0xffe   : > { %3195 = vrot.lane.b32.xlu0 %v3117_v55, %s10134_s12 }
0x1001   : > { %3491 = vrot.lane.b32.xlu1 %v6210_v0, %s10134_s12 }
0x1002   : > { %3341 = vrot.lane.b32.xlu0 %v3037_v54, %s10130_s13 }
0x1005   : > { %3536 = vrot.lane.b32.xlu1 %v6210_v0, %s10133_s18 }
0x1006   : > { %3231 = vrot.lane.b32.xlu0 %v3162_v62, %s10134_s12 }
0x1009   : > { %3496 = vrot.lane.b32.xlu1 %v6210_v0, %s10125_s29 }
0x100a   : > { %3377 = vrot.lane.b32.xlu0 %v3082_v13, %s10130_s13 }
0x100d   : > { %3541 = vrot.lane.b32.xlu1 %v6210_v0, %s10126_s8 }
0x100e   : > { %3199 = vrot.lane.b32.xlu0 %v3122_v30, %s10134_s12 }
0x1011   : > { %3501 = vrot.lane.b32.xlu1 %v6210_v0, %s10127_s9 }
0x1012   : > { %3345 = vrot.lane.b32.xlu0 %v3042_v6, %s10130_s13 }
0x1015   : > { %3546 = vrot.lane.b32.xlu1 %v6210_v0, %s10128_s20 }
0x1016   : > { %3235 = vrot.lane.b32.xlu0 %v3167_v58, %s10134_s12 }
0x1019   : > { %3506 = vrot.lane.b32.xlu1 %v6210_v0, %s10129_s23 }
0x101a   : > { %3381 = vrot.lane.b32.xlu0 %v3087_v44, %s10130_s13 }
0x101d   : > { %3551 = vrot.lane.b32.xlu1 %v6210_v0, %s10119_s15 }
0x101e   : > { %3203 = vrot.lane.b32.xlu0 %v3127_v7, %s10134_s12 }
0x1021   : > { %3511 = vrot.lane.b32.xlu1 %v6210_v0, %s10120_s16 }
0x1022   : > { %3349 = vrot.lane.b32.xlu0 %v3047_v11, %s10130_s13 }
0x1025   : > { %3556 = vrot.lane.b32.xlu1 %v6210_v0, %s10121_s19 }
0x1026   : > { %3239 = vrot.lane.b32.xlu0 %v3172_v26, %s10134_s12 }
0x1029   : > { %3516 = vrot.lane.b32.xlu1 %v6210_v0, %s10122_s21 }
0x102a   : > { %3207 = vrot.lane.b32.xlu0 %v3132_v15, %s10134_s12 }
0x102d   : > { %3521 = vrot.lane.b32.xlu1 %v6210_v0, %s10124_s14 }
0x102e   : > { %3353 = vrot.lane.b32.xlu0 %v3052_v34, %s10130_s13 }
0x102f   : > { %v3360_v28 = vpop.permute.xlu1 %3359 }
0x1030   : > { %v3212_v16 = vpop.permute.xlu0 %3211 }
0x1031   : > { %v3250_v45 = vsel %vm319_vm2, %v3212_v16, %v8469_v47 }
0x1032   : > { %5699 = vmatprep.subr.bf16.mxu0 %v3250_v45  ;;  %3385 = vrot.lane.b32.xlu0 %v3089_v19, %s10130_s13 }
0x1033   : > { %5700 = vmatpush3.bf16.msra.mxu0 %v8536_v8  ;;  %v3364_v8 = vpop.permute.xlu1 %3363 }
0x1034   : > { %v3358_v20 = vpop.permute.xlu0 %3357 }
0x1035   : > { %v3395_v37 = vsel %vm10177_vm14, %v3358_v20, %v3360_v28  ;;  %vm10181_vm14 = vmmov %vm10178_vm11 }
0x1036   : > { %3469 = vperm.xlu0 %6047, %v5419_v4   ;;  %5721 = vmatprep.subr.bf16.mxu1 %v3395_v37 }
0x1037   : > { %5722 = vmatpush3.bf16.msra.mxu1 %v3387_v18 }
0x1038   : > { %v3216_v47 = vpop.permute.xlu0 %3215 }
0x1039   : > { %v3251_v17 = vsel %vm319_vm2, %v3216_v47, %v8473_v51  ;;  %v3332_v51 = vpop.permute.xlu1 %3331 }
0x103a   : > { %5701 = vmatprep.subr.bf16.mxu0 %v3251_v17  ;;  %3608 = vrot.lane.b32.xlu0 %v6210_v0, %s10131_s3 }
0x103c   : > { %v3362_v36 = vpop.permute.xlu0 %3361 }
0x103d   : > { %v3396_v21 = vsel %vm10179_vm12, %v3362_v36, %v3364_v8  ;;  %vm10182_vm12 = vmmov %vm10178_vm11 }
0x103e   : > { %5723 = vmatprep.subr.bf16.mxu1 %v3396_v21  ;;  %3613 = vrot.lane.b32.xlu0 %v6210_v0, %s10132_s0 }
0x1040   : > { %v3184_v24 = vpop.permute.xlu0 %3183 }
0x1041   : > { %v3243_v59 = vsel %vm319_vm2, %v3184_v24, %v8479_v39  ;;  %v3368_v39 = vpop.permute.xlu1 %3367 }
0x1042   : > { %5702 = vmatpush3.bf16.msra.mxu0 %v3243_v59  ;;  %3573 = vrot.lane.b32.xlu0 %v6210_v0, %s10134_s12  ;;  %v6085_v59 = vld [vmem:[%s10046_s1 + $0xa8] ss:$16 sps:$4 sm:$0xff]  }
0x1044   : > { %v3330_v27 = vpop.permute.xlu0 %3329 }
0x1045   : > { %v3388_v50 = vsel %vm10180_vm13, %v3330_v27, %v3332_v51  ;;  %vm10183_vm13 = vmmov %vm10178_vm11 }
0x1046   : > { %5724 = vmatpush3.bf16.msra.mxu1 %v3388_v50  ;;  %3618 = vrot.lane.b32.xlu0 %v6210_v0, %s10133_s18 }
0x1048   : > { %v3220_v1 = vpop.permute.xlu0 %3219 }
0x1049   : > { %v3252_v38 = vsel %vm319_vm2, %v3220_v1, %v8483_v63  ;;  %v3336_v63 = vpop.permute.xlu1 %3335 }
0x104a   : > { %5703 = vmatprep.subr.bf16.mxu0 %v3252_v38  ;;  %3578 = vrot.lane.b32.xlu0 %v6210_v0, %s10125_s29 }
0x104c   : > { %v3366_v2 = vpop.permute.xlu0 %3365 }
0x104d   : > { %v3397_v29 = vsel %vm10181_vm14, %v3366_v2, %v3368_v39  ;;  %vm10184_vm14 = vmmov %vm10178_vm11 }
0x104e   : > { %5725 = vmatprep.subr.bf16.mxu1 %v3397_v29  ;;  %3623 = vrot.lane.b32.xlu0 %v6210_v0, %s10126_s8 }
0x1050   : > { %v3188_v56 = vpop.permute.xlu0 %3187 }
0x1051   : > { %v3244_v33 = vsel %vm319_vm2, %v3188_v56, %v8489_v53  ;;  %v3372_v53 = vpop.permute.xlu1 %3371 }
0x1052   : > { %5704 = vmatpush3.bf16.msra.mxu0 %v3244_v33  ;;  %3583 = vrot.lane.b32.xlu0 %v6210_v0, %s10127_s9 }
0x1054   : > { %v3334_v42 = vpop.permute.xlu0 %3333 }
0x1055   : > { %v3389_v3 = vsel %vm10178_vm11, %v3334_v42, %v3336_v63 }
0x1056   : > { %5726 = vmatpush3.bf16.msra.mxu1 %v3389_v3  ;;  %3628 = vrot.lane.b32.xlu0 %v6210_v0, %s10128_s20 }
0x1058   : > { %v3224_v55 = vpop.permute.xlu0 %3223 }
0x1059   : > { %v3253_v54 = vsel %vm319_vm2, %v3224_v55, %v8493_v9  ;;  %v3340_v9 = vpop.permute.xlu1 %3339 }
0x105a   : > { %5705 = vmatprep.subr.bf16.mxu0 %v3253_v54  ;;  %3588 = vrot.lane.b32.xlu0 %v6210_v0, %s10129_s23 }
0x105c   : > { %v3370_v40 = vpop.permute.xlu0 %3369 }
0x105d   : > { %v3398_v62 = vsel %vm10182_vm12, %v3370_v40, %v3372_v53  ;;  %vm10185_vm12 = vmmov %vm10178_vm11 }
0x105e   : > { %5727 = vmatprep.subr.bf16.mxu1 %v3398_v62  ;;  %3633 = vrot.lane.b32.xlu0 %v6210_v0, %s10119_s15 }
0x1060   : > { %v3192_v13 = vpop.permute.xlu0 %3191 }
0x1061   : > { %v3245_v10 = vsel %vm319_vm2, %v3192_v13, %v8497_v43  ;;  %v3376_v43 = vpop.permute.xlu1 %3375 }
0x1062   : > { %5706 = vmatpush3.bf16.msra.mxu0 %v3245_v10  ;;  %3593 = vrot.lane.b32.xlu0 %v6210_v0, %s10120_s16 }
0x1064   : > { %v3338_v30 = vpop.permute.xlu0 %3337 }
0x1065   : > { %v3390_v6 = vsel %vm10183_vm13, %v3338_v30, %v3340_v9  ;;  %vm10186_vm13 = vmmov %vm10178_vm11 }
0x1066   : > { %5728 = vmatpush3.bf16.msra.mxu1 %v3390_v6  ;;  %3638 = vrot.lane.b32.xlu0 %v6210_v0, %s10121_s19 }
0x1068   : > { %v3228_v5 = vpop.permute.xlu0 %3227 }
0x1069   : > { %v3254_v58 = vsel %vm319_vm2, %v3228_v5, %v8500_v14  ;;  %v3344_v14 = vpop.permute.xlu1 %3343 }
0x106a   : > { %5707 = vmatprep.subr.bf16.mxu0 %v3254_v58  ;;  %3598 = vrot.lane.b32.xlu0 %v6210_v0, %s10122_s21 }
0x106c   : > { %v3374_v25 = vpop.permute.xlu0 %3373 }
0x106d   : > { %v3399_v44 = vsel %vm10184_vm14, %v3374_v25, %v3376_v43  ;;  %v3380_v60 = vpop.permute.xlu1 %3379  ;;  %vm10187_vm14 = vmmov %vm10178_vm11 }
0x106e   : > { %5729 = vmatprep.subr.bf16.mxu1 %v3399_v44  ;;  %3643 = vrot.lane.b32.xlu0 %v6210_v0, %s10123_s17 }
0x1070   : > { %v3196_v7 = vpop.permute.xlu0 %3195 }
0x1071   : > { %v3246_v22 = vsel %vm319_vm2, %v3196_v7, %v8502_v23  ;;  %v3348_v57 = vpop.permute.xlu1 %3347 }
0x1072   : > { %5708 = vmatpush3.bf16.msra.mxu0 %v3246_v22  ;;  %3603 = vrot.lane.b32.xlu0 %v6210_v0, %s10124_s14 }
0x1074   : > { %v3342_v11 = vpop.permute.xlu0 %3341 }
0x1075   : > { %v3391_v52 = vsel %vm10178_vm11, %v3342_v11, %v3344_v14  ;;  %v3384_v28 = vpop.permute.xlu1 %3383 }
0x1076   : > { %5730 = vmatpush3.bf16.msra.mxu1 %v3391_v52  ;;  %3798 = vrot.lane.b32.xlu0 %v6210_v0, %s10130_s13 }
0x1078   : > { %v3232_v46 = vpop.permute.xlu0 %3231 }
0x1079   : > { %v3255_v26 = vsel %vm319_vm2, %v3232_v46, %v8504_v32  ;;  %v3352_v47 = vpop.permute.xlu1 %3351 }
0x107a   : > { %5709 = vmatprep.subr.bf16.mxu0 %v3255_v26 }
0x107c   : > { %v3378_v15 = vpop.permute.xlu0 %3377 }
0x107d   : > { %v3400_v23 = vsel %vm10185_vm12, %v3378_v15, %v3380_v60  ;;  %v3356_v51 = vpop.permute.xlu1 %3355  ;;  %vm10188_vm12 = vmmov %vm10178_vm11 }
0x107e   : > { %5731 = vmatprep.subr.bf16.mxu1 %v3400_v23 }
0x1080   : > { %v3200_v19 = vpop.permute.xlu0 %3199 }
0x1081   : > { %v3247_v34 = vsel %vm319_vm2, %v3200_v19, %v8506_v61  ;;  %v3465_v13 = vpop.permute.xlu1 %3464 }
0x1082   : > { %5710 = vmatpush3.bf16.msra.mxu0 %v3247_v34 }
0x1084   : > { %v3346_v16 = vpop.permute.xlu0 %3345 }
0x1085   : > { %v3392_v45 = vsel %vm10186_vm13, %v3346_v16, %v3348_v57  ;;  %v8808_v10 = vpop.permute.xlu1 %3526  ;;  %vm10189_vm13 = vcmask 932864  }
0x1086   : > { %5732 = vmatpush3.bf16.msra.mxu1 %v3392_v45 }
0x1088   : > { %v3236_v4 = vpop.permute.xlu0 %3235 }
0x1089   : > { %v3256_v32 = vsel %vm319_vm2, %v3236_v4, %v8508_v41  ;;  %v8810_v9 = vpop.permute.xlu1 %3531 }
0x108a   : > { %5711 = vmatprep.subr.bf16.mxu0 %v3256_v32 }
0x108c   : > { %v3382_v20 = vpop.permute.xlu0 %3381 }
0x108d   : > { %v3401_v37 = vsel %vm10187_vm14, %v3382_v20, %v3384_v28  ;;  %v8812_v30 = vpop.permute.xlu1 %3491  ;;  %vm10190_vm14 = vmmov %vm10189_vm13 }
0x108e   : > { %5733 = vmatprep.subr.bf16.mxu1 %v3401_v37 }
0x1090   : > { %v3204_v18 = vpop.permute.xlu0 %3203 }
0x1091   : > { %v3248_v61 = vsel %vm319_vm2, %v3204_v18, %v8510_v35  ;;  %v8814_v6 = vpop.permute.xlu1 %3536 }
0x1092   : > { %5712 = vmatpush3.bf16.msra.mxu0 %v3248_v61 }
0x1094   : > { %v3350_v17 = vpop.permute.xlu0 %3349 }
0x1095   : > { %v3393_v8 = vsel %vm10178_vm11, %v3350_v17, %v3352_v47  ;;  %v8816_v5 = vpop.permute.xlu1 %3496  ;;  %vm10191_vm11 = vcmask 998400  }
0x1096   : > { %5734 = vmatpush3.bf16.msra.mxu1 %v3393_v8 }
0x1098   : > { %v3240_v36 = vpop.permute.xlu0 %3239 }
0x1099   : > { %v3257_v41 = vsel %vm319_vm2, %v3240_v36, %v8512_v49  ;;  %v6088_v49 = vld [vmem:[%s10046_s1 + $0xa0] ss:$16 sps:$4 sm:$0xff]   ;;  %v8818_v58 = vpop.permute.xlu1 %3541 }
0x109a   : > { %5713 = vmatprep.subr.bf16.mxu0 %v3257_v41 }
0x109c   : > { %v3208_v21 = vpop.permute.xlu0 %3207 }
0x109d   : > { %v3249_v24 = vsel %vm319_vm2, %v3208_v21, %v8516_v12  ;;  %v8820_v43 = vpop.permute.xlu1 %3501 }
0x109e   : > { %5714 = vmatpush3.bf16.msra.mxu0 %v3249_v24 }
0x10a0   : > { %v3354_v35 = vpop.permute.xlu0 %3353 }
0x10a1   : > { %3307 = vmatmul.mubr.bf16.vlgmr.msra.gmra.mrb[24].mxu0 %v6085_v59  ;;  %v3394_v50 = vsel %vm10188_vm12, %v3354_v35, %v3356_v51  ;;  %v8822_v52 = vpop.permute.xlu1 %3546  ;;  %vm10192_vm12 = vmmov %vm10191_vm11 }
0x10a4   : > { %v3386_v27 = vpop.permute.xlu0 %3385 }
0x10a5   : > { %5735 = vmatprep.subr.bf16.mxu1 %v3386_v27  ;;  %v8824_v23 = vpop.permute.xlu1 %3506 }
0x10a6   : > { %5736 = vmatpush3.bf16.msra.mxu1 %v3394_v50 }
0x10a9   : > { %3451 = vmatmul.mubr.bf16.vlgmr.msra.gmra.mrb[24].mxu1 %v6088_v49  ;;  %v8830_v32 = vpop.permute.xlu1 %3551 }
0x10ad   : > { %v8840_v18 = vpop.permute.xlu1 %3511 }
0x10b1   : > { %v8844_v61 = vpop.permute.xlu1 %3556 }
0x10b5   : > { %v3470_v1 = vpop.permute.xlu0 %3469  ;;  %v8850_v47 = vpop.permute.xlu1 %3516 }
0x10b9   : > { %v8748_v12 = vpop.permute.xlu0 %3608  ;;  %v8854_v17 = vpop.permute.xlu1 %3521 }
0x10ba   : > { %3686 = vrot.lane.b32.xlu1 %v8748_v12, %s10134_s12 }
0x10bd   : > { %v8752_v38 = vpop.permute.xlu0 %3613 }
0x10be   : > { %3690 = vrot.lane.b32.xlu1 %v8752_v38, %s10134_s12 }
0x10c1   : > { %v8756_v39 = vpop.permute.xlu0 %3573 }
0x10c2   : > { %3658 = vrot.lane.b32.xlu1 %v8756_v39, %s10134_s12 }
0x10c5   : > { %v8760_v2 = vpop.permute.xlu0 %3618 }
0x10c6   : > { %3694 = vrot.lane.b32.xlu1 %v8760_v2, %s10134_s12 }
0x10c9   : > { %v8764_v29 = vpop.permute.xlu0 %3578 }
0x10ca   : > { %3662 = vrot.lane.b32.xlu1 %v8764_v29, %s10134_s12 }
0x10cd   : > { %v8768_v56 = vpop.permute.xlu0 %3623 }
0x10ce   : > { %3698 = vrot.lane.b32.xlu1 %v8768_v56, %s10134_s12 }
0x10d1   : > { %v8772_v33 = vpop.permute.xlu0 %3583 }
0x10d2   : > { %3666 = vrot.lane.b32.xlu1 %v8772_v33, %s10134_s12 }
0x10d5   : > { %v8776_v63 = vpop.permute.xlu0 %3628 }
0x10d6   : > { %3702 = vrot.lane.b32.xlu1 %v8776_v63, %s10134_s12 }
0x10d9   : > { %v8780_v42 = vpop.permute.xlu0 %3588 }
0x10da   : > { %3670 = vrot.lane.b32.xlu1 %v8780_v42, %s10134_s12 }
0x10dd   : > { %v8784_v3 = vpop.permute.xlu0 %3633 }
0x10de   : > { %3706 = vrot.lane.b32.xlu1 %v8784_v3, %s10134_s12 }
0x10e1   : > { %v8788_v55 = vpop.permute.xlu0 %3593 }
0x10e2   : > { %3674 = vrot.lane.b32.xlu1 %v8788_v55, %s10134_s12 }
0x10e5   : > { %v8792_v54 = vpop.permute.xlu0 %3638 }
0x10e6   : > { %3710 = vrot.lane.b32.xlu1 %v8792_v54, %s10134_s12 }
0x10e9   : > { %v8796_v53 = vpop.permute.xlu0 %3598 }
0x10ea   : > { %3678 = vrot.lane.b32.xlu1 %v8796_v53, %s10134_s12 }
0x10ed   : > { %v8800_v40 = vpop.permute.xlu0 %3643 }
0x10ee   : > { %3714 = vrot.lane.b32.xlu1 %v8800_v40, %s10134_s12 }
0x10f1   : > { %v8804_v62 = vpop.permute.xlu0 %3603 }
0x10f2   : > { %3682 = vrot.lane.b32.xlu1 %v8804_v62, %s10134_s12 }
0x112c   : > { %v8860_v8 = vpop.permute.xlu1 %3686 }
0x1130   : > { %v8864_v36 = vpop.permute.xlu1 %3690 }
0x1134   : > { %v8870_v41 = vpop.permute.xlu1 %3658 }
0x1138   : > { %v8874_v21 = vpop.permute.xlu1 %3694 }
0x113c   : > { %v8880_v24 = vpop.permute.xlu1 %3662 }
0x1140   : > { %v8884_v59 = vpop.permute.xlu1 %3698 }
0x1144   : > { %v8888_v35 = vpop.permute.xlu1 %3666 }
0x1148   : > { %v8891_v51 = vpop.permute.xlu1 %3702 }
0x114c   : > { %v8893_v27 = vpop.permute.xlu1 %3670 }
0x1150   : > { %v8895_v50 = vpop.permute.xlu1 %3706 }
0x1154   : > { %v8897_v49 = vpop.permute.xlu1 %3674 }
0x1174   : > { %v5715_v25 = vpop.f32.mrb[24].mxu0 }
0x1175   : > { %v5716_v44 = vpop.f32.mrb[25].mxu0 }
0x1176   : > { %v5717_v7 = vadd.f32 %v5716_v44, %v5715_v25  ;;  %v5718_v22 = vpop.f32.mrb[26].mxu0  ;;  %v8905_v44 = vpop.permute.xlu0 %3798 }
0x1177   : > { %v5719_v14 = vpop.f32.mrb[27].mxu0 }
0x1178   : > { %v5720_v11 = vadd.f32 %v5719_v14, %v5718_v22 }
0x117c   : > { %v5737_v46 = vpop.f32.mrb[24].mxu1 }
0x117d   : > { %v5738_v26 = vpop.f32.mrb[25].mxu1 }
0x117e   : > { %v5739_v60 = vadd.f32 %v5738_v26, %v5737_v46  ;;  %v5740_v15 = vpop.f32.mrb[26].mxu1 }
0x117f   : > { %v5741_v19 = vpop.f32.mrb[27].mxu1 }
0x1180   : > { %v3453_v34 = vadd.f32 %v5739_v60, %v5717_v7  ;;  %v5742_v57 = vadd.f32 %v5741_v19, %v5740_v15 }
0x1182   : > { %v8826_v16 = vadd.f32 %v3465_v13, %v3453_v34  ;;  %v3456_v45 = vadd.f32 %v5742_v57, %v5720_v11 }
0x1184   : > { %v8828_v4 = vadd.f32 %v3470_v1, %v3456_v45  ;;  %v3474_v28 = vmax.f32 %v8826_v16, 0.0  ;;  %v8899_v1 = vpop.permute.xlu1 %3710 }
0x1186   : > { %v3475_v20 = vmax.f32 %v8828_v4, 0.0 }
0x1188   : > { %v3488_v37 = vpack.c.bf16 %v3475_v20, %v3474_v28  ;;  %v8901_v13 = vpop.permute.xlu1 %3678 }
0x118a   : > { %3606 = vrot.lane.b32.xlu1 %v3488_v37, %s10131_s3  ;;  %3528 = vrot.lane.b32.xlu0 %v3488_v37, %s10131_s3 }
0x118c   : > { %v8903_v25 = vpop.permute.xlu1 %3714 }
0x118e   : > { %3611 = vrot.lane.b32.xlu1 %v3488_v37, %s10132_s0  ;;  %3533 = vrot.lane.b32.xlu0 %v3488_v37, %s10132_s0 }
0x1190   : > { %v8907_v7 = vpop.permute.xlu1 %3682 }
0x1192   : > { %3571 = vrot.lane.b32.xlu1 %v3488_v37, %s10134_s12  ;;  %3493 = vrot.lane.b32.xlu0 %v3488_v37, %s10134_s12 }
0x1196   : > { %3616 = vrot.lane.b32.xlu1 %v3488_v37, %s10133_s18  ;;  %3538 = vrot.lane.b32.xlu0 %v3488_v37, %s10133_s18 }
0x119a   : > { %3576 = vrot.lane.b32.xlu1 %v3488_v37, %s10125_s29  ;;  %3498 = vrot.lane.b32.xlu0 %v3488_v37, %s10125_s29 }
0x119e   : > { %3621 = vrot.lane.b32.xlu1 %v3488_v37, %s10126_s8  ;;  %3543 = vrot.lane.b32.xlu0 %v3488_v37, %s10126_s8 }
0x11a2   : > { %3581 = vrot.lane.b32.xlu1 %v3488_v37, %s10127_s9  ;;  %3503 = vrot.lane.b32.xlu0 %v3488_v37, %s10127_s9 }
0x11a6   : > { %3626 = vrot.lane.b32.xlu1 %v3488_v37, %s10128_s20  ;;  %3548 = vrot.lane.b32.xlu0 %v3488_v37, %s10128_s20 }
0x11aa   : > { %3586 = vrot.lane.b32.xlu1 %v3488_v37, %s10129_s23  ;;  %3508 = vrot.lane.b32.xlu0 %v3488_v37, %s10129_s23 }
0x11ae   : > { %3631 = vrot.lane.b32.xlu1 %v3488_v37, %s10119_s15  ;;  %3553 = vrot.lane.b32.xlu0 %v3488_v37, %s10119_s15 }
0x11b2   : > { %3591 = vrot.lane.b32.xlu1 %v3488_v37, %s10120_s16  ;;  %3513 = vrot.lane.b32.xlu0 %v3488_v37, %s10120_s16 }
0x11b6   : > { %3636 = vrot.lane.b32.xlu1 %v3488_v37, %s10121_s19  ;;  %3558 = vrot.lane.b32.xlu0 %v3488_v37, %s10121_s19 }
0x11ba   : > { %3596 = vrot.lane.b32.xlu1 %v3488_v37, %s10122_s21  ;;  %3518 = vrot.lane.b32.xlu0 %v3488_v37, %s10122_s21 }
0x11be   : > { %3641 = vrot.lane.b32.xlu1 %v3488_v37, %s10123_s17  ;;  %3523 = vrot.lane.b32.xlu0 %v3488_v37, %s10124_s14 }
0x11c2   : > { %3601 = vrot.lane.b32.xlu1 %v3488_v37, %s10124_s14 }
0x11c6   : > { %3561 = vrot.lane.b32.xlu1 %v3488_v37, %s10123_s17 }
0x11ca   : > { %3800 = vrot.lane.b32.xlu1 %v3488_v37, %s10130_s13 }
0x11fc   : > { %v3529_v22 = vpop.permute.xlu0 %3528  ;;  %v3607_v14 = vpop.permute.xlu1 %3606 }
0x11fd   : > { %v3610_v11 = vsel %vm361_vm0, %v3607_v14, %v8748_v12  ;;  %3832 = vrot.lane.b32.xlu1 %v3529_v22, %s10130_s13  ;;  %v3530_v26 = vsel %vm361_vm0, %v8808_v10, %v3529_v22 }
0x11fe   : > { %3684 = vrot.lane.b32.xlu0 %v3610_v11, %s10134_s12 }
0x1200   : > { %v3534_v46 = vpop.permute.xlu0 %3533  ;;  %v3612_v60 = vpop.permute.xlu1 %3611 }
0x1201   : > { %3836 = vrot.lane.b32.xlu1 %v3534_v46, %s10130_s13  ;;  %v3615_v19 = vsel %vm367_vm1, %v3612_v60, %v8752_v38  ;;  %v3535_v34 = vsel %vm367_vm1, %v8810_v9, %v3534_v46 }
0x1202   : > { %3830 = vrot.lane.b32.xlu0 %v3530_v26, %s10130_s13 }
0x1204   : > { %v3494_v15 = vpop.permute.xlu0 %3493  ;;  %v3572_v57 = vpop.permute.xlu1 %3571 }
0x1205   : > { %3804 = vrot.lane.b32.xlu1 %v3494_v15, %s10130_s13  ;;  %v8927_v45 = vsel %vm319_vm2, %v3572_v57, %v8756_v39  ;;  %v3495_v37 = vsel %vm319_vm2, %v8812_v30, %v3494_v15 }
0x1206   : > { %3688 = vrot.lane.b32.xlu0 %v3615_v19, %s10134_s12 }
0x1208   : > { %v3539_v12 = vpop.permute.xlu0 %3538  ;;  %v3617_v9 = vpop.permute.xlu1 %3616 }
0x1209   : > { %3840 = vrot.lane.b32.xlu1 %v3539_v12, %s10130_s13  ;;  %v3620_v14 = vsel %vm373_vm3, %v3617_v9, %v8760_v2  ;;  %v3540_v11 = vsel %vm373_vm3, %v8814_v6, %v3539_v12 }
0x120a   : > { %3834 = vrot.lane.b32.xlu0 %v3535_v34, %s10130_s13 }
0x120c   : > { %v3499_v10 = vpop.permute.xlu0 %3498  ;;  %v3577_v46 = vpop.permute.xlu1 %3576 }
0x120d   : > { %3808 = vrot.lane.b32.xlu1 %v3499_v10, %s10130_s13  ;;  %v3580_v26 = vsel %vm325_vm4, %v3577_v46, %v8764_v29  ;;  %v3500_v60 = vsel %vm325_vm4, %v8816_v5, %v3499_v10 }
0x120e   : > { %3656 = vrot.lane.b32.xlu0 %v8927_v45, %s10134_s12 }
0x1210   : > { %v3544_v38 = vpop.permute.xlu0 %3543  ;;  %v3622_v15 = vpop.permute.xlu1 %3621 }
0x1211   : > { %3844 = vrot.lane.b32.xlu1 %v3544_v38, %s10130_s13  ;;  %v3625_v19 = vsel %vm379_vm5, %v3622_v15, %v8768_v56  ;;  %v3545_v12 = vsel %vm379_vm5, %v8818_v58, %v3544_v38  ;;  %v5428_v58 = vld [vmem:[%s10047_s2 + $0x60] sm:$0xff] }
0x1212   : > { %3802 = vrot.lane.b32.xlu0 %v3495_v37, %s10130_s13 }
0x1214   : > { %v3504_v22 = vpop.permute.xlu0 %3503  ;;  %v3582_v34 = vpop.permute.xlu1 %3581 }
0x1215   : > { %3812 = vrot.lane.b32.xlu1 %v3504_v22, %s10130_s13  ;;  %v3585_v57 = vsel %vm331_vm6, %v3582_v34, %v8772_v33  ;;  %v3505_v10 = vsel %vm331_vm6, %v8820_v43, %v3504_v22 }
0x1216   : > { %3692 = vrot.lane.b32.xlu0 %v3620_v14, %s10134_s12 }
0x1218   : > { %v3549_v39 = vpop.permute.xlu0 %3548  ;;  %v3627_v37 = vpop.permute.xlu1 %3626 }
0x1219   : > { %3848 = vrot.lane.b32.xlu1 %v3549_v39, %s10130_s13  ;;  %v3630_v33 = vsel %vm385_vm7, %v3627_v37, %v8776_v63  ;;  %v3550_v38 = vsel %vm385_vm7, %v8822_v52, %v3549_v39 }
0x121a   : > { %3838 = vrot.lane.b32.xlu0 %v3540_v11, %s10130_s13 }
0x121c   : > { %v3509_v30 = vpop.permute.xlu0 %3508  ;;  %v3587_v9 = vpop.permute.xlu1 %3586 }
0x121d   : > { %3816 = vrot.lane.b32.xlu1 %v3509_v30, %s10130_s13  ;;  %v3590_v43 = vsel %vm337_vm8, %v3587_v9, %v8780_v42  ;;  %v3510_v22 = vsel %vm337_vm8, %v8824_v23, %v3509_v30 }
0x121e   : > { %3660 = vrot.lane.b32.xlu0 %v3580_v26, %s10134_s12 }
0x1220   : > { %v3554_v2 = vpop.permute.xlu0 %3553  ;;  %v3632_v14 = vpop.permute.xlu1 %3631 }
0x1221   : > { %3852 = vrot.lane.b32.xlu1 %v3554_v2, %s10130_s13  ;;  %v3635_v63 = vsel %vm391_vm9, %v3632_v14, %v8784_v3  ;;  %v3555_v52 = vsel %vm391_vm9, %v8830_v32, %v3554_v2 }
0x1222   : > { %3806 = vrot.lane.b32.xlu0 %v3500_v60, %s10130_s13 }
0x1224   : > { %v3514_v6 = vpop.permute.xlu0 %3513  ;;  %v3592_v39 = vpop.permute.xlu1 %3591 }
0x1225   : > { %3820 = vrot.lane.b32.xlu1 %v3514_v6, %s10130_s13  ;;  %v3595_v42 = vsel %vm343_vm10, %v3592_v39, %v8788_v55  ;;  %v3515_v23 = vsel %vm343_vm10, %v8840_v18, %v3514_v6 }
0x1226   : > { %3696 = vrot.lane.b32.xlu0 %v3625_v19, %s10134_s12 }
0x1228   : > { %v3559_v29 = vpop.permute.xlu0 %3558  ;;  %v3637_v11 = vpop.permute.xlu1 %3636 }
0x1229   : > { %3856 = vrot.lane.b32.xlu1 %v3559_v29, %s10130_s13  ;;  %v3640_v3 = vsel %vm10189_vm13, %v3637_v11, %v8792_v54  ;;  %v3560_v46 = vsel %vm10190_vm14, %v8844_v61, %v3559_v29  ;;  %v6093_v54 = vld [vmem:[%s10046_s1 + $0xcc] ss:$16 sps:$4 sm:$0xff]   ;;  %vm10193_vm13 = vcmask 924672   ;;  %vm10194_vm14 = vcmask 990208  }
0x122a   : > { %3842 = vrot.lane.b32.xlu0 %v3545_v12, %s10130_s13  ;;  %3779 = vmatprep.mubr.bf16.mxu0 %v6093_v54 }
0x122c   : > { %v3519_v5 = vpop.permute.xlu0 %3518  ;;  %v3597_v32 = vpop.permute.xlu1 %3596 }
0x122d   : > { %3824 = vrot.lane.b32.xlu1 %v3519_v5, %s10130_s13  ;;  %v3600_v55 = vsel %vm10191_vm11, %v3597_v32, %v8796_v53  ;;  %v3520_v18 = vsel %vm10192_vm12, %v8850_v47, %v3519_v5  ;;  %v6096_v53 = vld [vmem:[%s10046_s1 + $0xc4] ss:$16 sps:$4 sm:$0xff]   ;;  %vm10195_vm11 = vmmov %vm10194_vm14  ;;  %vm10196_vm12 = vcmask 121856  }
0x122e   : > { %3664 = vrot.lane.b32.xlu0 %v3585_v57, %s10134_s12  ;;  %3923 = vmatprep.mubr.bf16.mxu1 %v6096_v53 }
0x1230   : > { %v3524_v56 = vpop.permute.xlu0 %3523  ;;  %v3642_v30 = vpop.permute.xlu1 %3641 }
0x1231   : > { %3828 = vrot.lane.b32.xlu1 %v3524_v56, %s10130_s13  ;;  %v3645_v61 = vsel %vm10193_vm13, %v3642_v30, %v8800_v40  ;;  %v3525_v60 = vsel %vm10195_vm11, %v8854_v17, %v3524_v56  ;;  %vm10197_vm13 = vmmov %vm10196_vm12 }
0x1232   : > { %3810 = vrot.lane.b32.xlu0 %v3505_v10, %s10130_s13  ;;  %vm10199_vm11 = vmmov %vm10196_vm12 }
0x1234   : > { %v3602_v26 = vpop.permute.xlu1 %3601 }
0x1235   : > { %3937 = vperm.xlu1 %6048, %v5428_v58   ;;  %v3605_v47 = vsel %vm10194_vm14, %v3602_v26, %v8804_v62  ;;  %v5429_v62 = vld [vmem:[%s10047_s2 + $0x68] sm:$0xff]  ;;  %vm10198_vm14 = vmmov %vm10196_vm12 }
0x1236   : > { %3700 = vrot.lane.b32.xlu0 %v3630_v33, %s10134_s12 }
0x1238   : > { %v3562_v2 = vpop.permute.xlu1 %3561 }
0x123a   : > { %3846 = vrot.lane.b32.xlu0 %v3550_v38, %s10130_s13 }
0x123c   : > { %v3801_v40 = vpop.permute.xlu1 %3800 }
0x123d   : > { %v3860_v12 = vsel %vm10197_vm13, %v8905_v44, %v3801_v40  ;;  %vm10201_vm13 = vmmov %vm10199_vm11 }
0x123e   : > { %3668 = vrot.lane.b32.xlu0 %v3590_v43, %s10134_s12 }
0x1242   : > { %3814 = vrot.lane.b32.xlu0 %v3510_v22, %s10130_s13 }
0x1246   : > { %3704 = vrot.lane.b32.xlu0 %v3635_v63, %s10134_s12 }
0x124a   : > { %3850 = vrot.lane.b32.xlu0 %v3555_v52, %s10130_s13 }
0x124e   : > { %3672 = vrot.lane.b32.xlu0 %v3595_v42, %s10134_s12 }
0x1252   : > { %3818 = vrot.lane.b32.xlu0 %v3515_v23, %s10130_s13 }
0x1256   : > { %3708 = vrot.lane.b32.xlu0 %v3640_v3, %s10134_s12 }
0x125a   : > { %3854 = vrot.lane.b32.xlu0 %v3560_v46, %s10130_s13 }
0x125e   : > { %3676 = vrot.lane.b32.xlu0 %v3600_v55, %s10134_s12 }
0x1262   : > { %3822 = vrot.lane.b32.xlu0 %v3520_v18, %s10130_s13 }
0x1266   : > { %3712 = vrot.lane.b32.xlu0 %v3645_v61, %s10134_s12 }
0x126a   : > { %3680 = vrot.lane.b32.xlu0 %v3605_v47, %s10134_s12 }
0x126e   : > { %3826 = vrot.lane.b32.xlu0 %v3525_v60, %s10130_s13 }
0x126f   : > { %v3833_v19 = vpop.permute.xlu1 %3832 }
0x1270   : > { %v3685_v15 = vpop.permute.xlu0 %3684 }
0x1271   : > { %v3723_v6 = vsel %vm319_vm2, %v3685_v15, %v8860_v8 }
0x1272   : > { %5743 = vmatprep.subr.bf16.mxu0 %v3723_v6  ;;  %3858 = vrot.lane.b32.xlu0 %v3562_v2, %s10130_s13 }
0x1273   : > { %5744 = vmatpush3.bf16.msra.mxu0 %v8927_v45  ;;  %v3837_v45 = vpop.permute.xlu1 %3836 }
0x1274   : > { %v3831_v29 = vpop.permute.xlu0 %3830 }
0x1275   : > { %v3868_v17 = vsel %vm10196_vm12, %v3831_v29, %v3833_v19  ;;  %vm10200_vm12 = vmmov %vm10199_vm11 }
0x1276   : > { %3942 = vperm.xlu0 %6047, %v5429_v62   ;;  %5765 = vmatprep.subr.bf16.mxu1 %v3868_v17 }
0x1277   : > { %5766 = vmatpush3.bf16.msra.mxu1 %v3860_v12  ;;  %v3805_v37 = vpop.permute.xlu1 %3804 }
0x1278   : > { %v3689_v8 = vpop.permute.xlu0 %3688 }
0x1279   : > { %v3724_v34 = vsel %vm319_vm2, %v3689_v8, %v8864_v36 }
0x127a   : > { %5745 = vmatprep.subr.bf16.mxu0 %v3724_v34 }
0x127b   : > { %v3841_v38 = vpop.permute.xlu1 %3840 }
0x127c   : > { %v3835_v5 = vpop.permute.xlu0 %3834 }
0x127d   : > { %v3869_v57 = vsel %vm10198_vm14, %v3835_v5, %v3837_v45  ;;  %vm10202_vm14 = vmmov %vm10199_vm11 }
0x127e   : > { %5767 = vmatprep.subr.bf16.mxu1 %v3869_v57 }
0x127f   : > { %v3809_v14 = vpop.permute.xlu1 %3808 }
0x1280   : > { %v3657_v56 = vpop.permute.xlu0 %3656 }
0x1281   : > { %v3716_v10 = vsel %vm319_vm2, %v3657_v56, %v8870_v41 }
0x1282   : > { %5746 = vmatpush3.bf16.msra.mxu0 %v3716_v10 }
0x1283   : > { %v3845_v42 = vpop.permute.xlu1 %3844 }
0x1284   : > { %v3803_v44 = vpop.permute.xlu0 %3802 }
0x1285   : > { %v3861_v58 = vsel %vm10199_vm11, %v3803_v44, %v3805_v37 }
0x1286   : > { %5768 = vmatpush3.bf16.msra.mxu1 %v3861_v58 }
0x1287   : > { %v3813_v32 = vpop.permute.xlu1 %3812 }
0x1288   : > { %v3693_v33 = vpop.permute.xlu0 %3692 }
0x1289   : > { %v3725_v36 = vsel %vm319_vm2, %v3693_v33, %v8874_v21  ;;  %v6091_v33 = vld [vmem:[%s10046_s1 + $0xc8] ss:$16 sps:$4 sm:$0xff]  }
0x128a   : > { %5747 = vmatprep.subr.bf16.mxu0 %v3725_v36 }
0x128b   : > { %v3849_v18 = vpop.permute.xlu1 %3848 }
0x128c   : > { %v3839_v9 = vpop.permute.xlu0 %3838 }
0x128d   : > { %v3870_v43 = vsel %vm10200_vm12, %v3839_v9, %v3841_v38  ;;  %vm10203_vm12 = vmmov %vm10199_vm11 }
0x128e   : > { %5769 = vmatprep.subr.bf16.mxu1 %v3870_v43 }
0x128f   : > { %v3817_v53 = vpop.permute.xlu1 %3816 }
0x1290   : > { %v3661_v22 = vpop.permute.xlu0 %3660 }
0x1291   : > { %v3717_v41 = vsel %vm319_vm2, %v3661_v22, %v8880_v24 }
0x1292   : > { %5748 = vmatpush3.bf16.msra.mxu0 %v3717_v41 }
0x1293   : > { %v3853_v40 = vpop.permute.xlu1 %3852 }
0x1294   : > { %v3807_v63 = vpop.permute.xlu0 %3806 }
0x1295   : > { %v3862_v52 = vsel %vm10201_vm13, %v3807_v63, %v3809_v14  ;;  %vm10204_vm13 = vmmov %vm10199_vm11 }
0x1296   : > { %5770 = vmatpush3.bf16.msra.mxu1 %v3862_v52 }
0x1297   : > { %v3821_v19 = vpop.permute.xlu1 %3820 }
0x1298   : > { %v3697_v39 = vpop.permute.xlu0 %3696 }
0x1299   : > { %v3726_v21 = vsel %vm319_vm2, %v3697_v39, %v8884_v59 }
0x129a   : > { %5749 = vmatprep.subr.bf16.mxu0 %v3726_v21 }
0x129b   : > { %v3857_v8 = vpop.permute.xlu1 %3856 }
0x129c   : > { %v3843_v23 = vpop.permute.xlu0 %3842 }
0x129d   : > { %v3871_v11 = vsel %vm10202_vm14, %v3843_v23, %v3845_v42  ;;  %vm10205_vm14 = vmmov %vm10199_vm11 }
0x129e   : > { %5771 = vmatprep.subr.bf16.mxu1 %v3871_v11 }
0x129f   : > { %v3825_v57 = vpop.permute.xlu1 %3824 }
0x12a0   : > { %v3665_v3 = vpop.permute.xlu0 %3664 }
0x12a1   : > { %v3718_v24 = vsel %vm319_vm2, %v3665_v3, %v8888_v35 }
0x12a2   : > { %5750 = vmatpush3.bf16.msra.mxu0 %v3718_v24 }
0x12a3   : > { %v3829_v36 = vpop.permute.xlu1 %3828 }
0x12a4   : > { %v3811_v46 = vpop.permute.xlu0 %3810 }
0x12a5   : > { %v3863_v55 = vsel %vm10199_vm11, %v3811_v46, %v3813_v32 }
0x12a6   : > { %5772 = vmatpush3.bf16.msra.mxu1 %v3863_v55 }
0x12a8   : > { %v3701_v30 = vpop.permute.xlu0 %3700 }
0x12a9   : > { %v3727_v59 = vsel %vm319_vm2, %v3701_v30, %v8891_v51 }
0x12aa   : > { %5751 = vmatprep.subr.bf16.mxu0 %v3727_v59 }
0x12ac   : > { %v3847_v54 = vpop.permute.xlu0 %3846 }
0x12ad   : > { %v3872_v26 = vsel %vm10203_vm12, %v3847_v54, %v3849_v18  ;;  %vm10206_vm12 = vmmov %vm10199_vm11 }
0x12ae   : > { %5773 = vmatprep.subr.bf16.mxu1 %v3872_v26 }
0x12b0   : > { %v3669_v61 = vpop.permute.xlu0 %3668 }
0x12b1   : > { %v3719_v35 = vsel %vm319_vm2, %v3669_v61, %v8893_v27 }
0x12b2   : > { %5752 = vmatpush3.bf16.msra.mxu0 %v3719_v35 }
0x12b4   : > { %v3815_v47 = vpop.permute.xlu0 %3814  ;;  %v3938_v24 = vpop.permute.xlu1 %3937 }
0x12b5   : > { %v3864_v2 = vsel %vm10204_vm13, %v3815_v47, %v3817_v53  ;;  %vm10207_vm13 = vmmov %vm10199_vm11 }
0x12b6   : > { %5774 = vmatpush3.bf16.msra.mxu1 %v3864_v2 }
0x12b8   : > { %v3705_v60 = vpop.permute.xlu0 %3704 }
0x12b9   : > { %v3728_v51 = vsel %vm319_vm2, %v3705_v60, %v8895_v50 }
0x12ba   : > { %5753 = vmatprep.subr.bf16.mxu0 %v3728_v51 }
0x12bc   : > { %v3851_v15 = vpop.permute.xlu0 %3850 }
0x12bd   : > { %v3873_v6 = vsel %vm10205_vm14, %v3851_v15, %v3853_v40  ;;  %vm10208_vm14 = vmmov %vm10199_vm11 }
0x12be   : > { %5775 = vmatprep.subr.bf16.mxu1 %v3873_v6 }
0x12c0   : > { %v3673_v62 = vpop.permute.xlu0 %3672 }
0x12c1   : > { %v3720_v27 = vsel %vm319_vm2, %v3673_v62, %v8897_v49 }
0x12c2   : > { %5754 = vmatpush3.bf16.msra.mxu0 %v3720_v27 }
0x12c4   : > { %v3819_v29 = vpop.permute.xlu0 %3818 }
0x12c5   : > { %v3865_v17 = vsel %vm10199_vm11, %v3819_v29, %v3821_v19  ;;  %vm10209_vm11 = vcmask 998400  }
0x12c6   : > { %5776 = vmatpush3.bf16.msra.mxu1 %v3865_v17 }
0x12c8   : > { %v3709_v12 = vpop.permute.xlu0 %3708 }
0x12c9   : > { %v3729_v50 = vsel %vm319_vm2, %v3709_v12, %v8899_v1 }
0x12ca   : > { %5755 = vmatprep.subr.bf16.mxu0 %v3729_v50  ;;  %v5430_v50 = vld [vmem:[%s10049_s4 + $0x20] sm:$0xff] }
0x12cc   : > { %v3855_v34 = vpop.permute.xlu0 %3854 }
0x12cd   : > { %v3874_v45 = vsel %vm10206_vm12, %v3855_v34, %v3857_v8  ;;  %vm10210_vm12 = vcmask 990208  }
0x12ce   : > { %5777 = vmatprep.subr.bf16.mxu1 %v3874_v45 }
0x12d0   : > { %v3677_v5 = vpop.permute.xlu0 %3676 }
0x12d1   : > { %v3721_v49 = vsel %vm319_vm2, %v3677_v5, %v8901_v13  ;;  %v5431_v5 = vld [vmem:[%s10049_s4 + $0x28] sm:$0xff] }
0x12d2   : > { %5756 = vmatpush3.bf16.msra.mxu0 %v3721_v49 }
0x12d4   : > { %v3823_v56 = vpop.permute.xlu0 %3822 }
0x12d5   : > { %v3866_v10 = vsel %vm10207_vm13, %v3823_v56, %v3825_v57  ;;  %vm10211_vm13 = vcmask 7168  }
0x12d6   : > { %5778 = vmatpush3.bf16.msra.mxu1 %v3866_v10 }
0x12d8   : > { %v3713_v37 = vpop.permute.xlu0 %3712 }
0x12d9   : > { %v3730_v1 = vsel %vm319_vm2, %v3713_v37, %v8903_v25 }
0x12da   : > { %5757 = vmatprep.subr.bf16.mxu0 %v3730_v1 }
0x12dc   : > { %v3681_v44 = vpop.permute.xlu0 %3680 }
0x12dd   : > { %v3722_v58 = vsel %vm319_vm2, %v3681_v44, %v8907_v7  ;;  %v6094_v7 = vld [vmem:[%s10046_s1 + $0xc0] ss:$16 sps:$4 sm:$0xff]  }
0x12de   : > { %5758 = vmatpush3.bf16.msra.mxu0 %v3722_v58 }
0x12df   : > { %5933 = vmatprep.subr.bf16.mxu0 %v6228_v48 }
0x12e0   : > { %v3827_v13 = vpop.permute.xlu0 %3826 }
0x12e1   : > { %3780 = vmatmul.mubr.bf16.vlgmr.msra.gmra.mrb[28].mxu0 %v6091_v33  ;;  %v3867_v25 = vsel %vm10208_vm14, %v3827_v13, %v3829_v36  ;;  %vm10212_vm14 = vmmov %vm10211_vm13 }
0x12e2   : > { %5949 = vmatprep.mubr.msk.bf16.mxu0 %vm10159_vm15, %v6228_v48 }
0x12e4   : > { %v3859_v38 = vpop.permute.xlu0 %3858 }
0x12e5   : > { %5779 = vmatprep.subr.bf16.mxu1 %v3859_v38 }
0x12e6   : > { %5780 = vmatpush3.bf16.msra.mxu1 %v3867_v25 }
0x12e9   : > { %3924 = vmatmul.mubr.bf16.vlgmr.msra.gmra.mrb[28].mxu1 %v6094_v7 }
0x12f5   : > { %v3943_v55 = vpop.permute.xlu0 %3942 }
0x13b4   : > { %v5759_v9 = vpop.f32.mrb[28].mxu0 }
0x13b5   : > { %v5760_v43 = vpop.f32.mrb[29].mxu0 }
0x13b6   : > { %v5761_v22 = vadd.f32 %v5760_v43, %v5759_v9  ;;  %v5762_v41 = vpop.f32.mrb[30].mxu0 }
0x13b7   : > { %v5763_v14 = vpop.f32.mrb[31].mxu0 }
0x13b8   : > { %v5764_v63 = vadd.f32 %v5763_v14, %v5762_v41 }
0x13bc   : > { %v5781_v52 = vpop.f32.mrb[28].mxu1 }
0x13bd   : > { %v5782_v39 = vpop.f32.mrb[29].mxu1 }
0x13be   : > { %v5783_v21 = vadd.f32 %v5782_v39, %v5781_v52  ;;  %v5784_v42 = vpop.f32.mrb[30].mxu1  ;;  %v6097_v39 = vld [vmem:[#allocation3 + $0x10] sm:$0xff]  }
0x13bf   : > { %v5785_v23 = vpop.f32.mrb[31].mxu1 }
0x13c0   : > { %v3926_v11 = vadd.f32 %v5783_v21, %v5761_v22  ;;  %v5786_v3 = vadd.f32 %v5785_v23, %v5784_v42 }
0x13c2   : > { %v3945_v32 = vadd.f32 %v3938_v24, %v3926_v11  ;;  %v3929_v46 = vadd.f32 %v5786_v3, %v5764_v63 }
0x13c4   : > { %v3946_v30 = vadd.f32 %v3943_v55, %v3929_v46  ;;  %v3947_v59 = vmax.f32 %v3945_v32, 0.0 }
0x13c6   : > { %v3948_v18 = vmax.f32 %v3946_v30, 0.0 }
0x13c8   : > { %v3956_v54 = vpack.c.bf16 %v3948_v18, %v3947_v59 }
0x13ca   : > { %3968 = vrot.lane.b32.xlu0 %v3956_v54, %s10125_s29  ;;  %3964 = vrot.lane.b32.xlu1 %v3956_v54, %s10134_s12 }
0x13ce   : > { %3973 = vrot.lane.b32.xlu0 %v3956_v54, %s10127_s9  ;;  %3970 = vrot.lane.b32.xlu1 %v6210_v0, %s10125_s29 }
0x13d2   : > { %3978 = vrot.lane.b32.xlu0 %v3956_v54, %s10129_s23  ;;  %3975 = vrot.lane.b32.xlu1 %v6210_v0, %s10127_s9 }
0x13d6   : > { %3983 = vrot.lane.b32.xlu0 %v3956_v54, %s10120_s16  ;;  %3980 = vrot.lane.b32.xlu1 %v6210_v0, %s10129_s23 }
0x13da   : > { %3988 = vrot.lane.b32.xlu0 %v3956_v54, %s10122_s21  ;;  %3985 = vrot.lane.b32.xlu1 %v6210_v0, %s10120_s16 }
0x13de   : > { %3993 = vrot.lane.b32.xlu0 %v3956_v54, %s10124_s14  ;;  %3990 = vrot.lane.b32.xlu1 %v6210_v0, %s10122_s21 }
0x13e2   : > { %3995 = vrot.lane.b32.xlu1 %v6210_v0, %s10124_s14  ;;  %4021 = vrot.lane.b32.xlu0 %v6210_v0, %s10161_s22 }
0x13e6   : > { %4023 = vrot.lane.b32.xlu1 %v3956_v54, %s10161_s22 }
0x143c   : > { %v3969_v26 = vpop.permute.xlu0 %3968  ;;  %v3965_v61 = vpop.permute.xlu1 %3964 }
0x143d   : > { %4027 = vrot.lane.b32.xlu1 %v3969_v26, %s10161_s22  ;;  %4025 = vrot.lane.b32.xlu0 %v3965_v61, %s10161_s22 }
0x1440   : > { %v3974_v35 = vpop.permute.xlu0 %3973  ;;  %v3971_v53 = vpop.permute.xlu1 %3970 }
0x1441   : > { %v3972_v47 = vsel %vm325_vm4, %v3969_v26, %v3971_v53  ;;  %4031 = vrot.lane.b32.xlu1 %v3974_v35, %s10161_s22 }
0x1442   : > { %4029 = vrot.lane.b32.xlu0 %v3972_v47, %s10161_s22 }
0x1444   : > { %v3979_v2 = vpop.permute.xlu0 %3978  ;;  %v3976_v60 = vpop.permute.xlu1 %3975 }
0x1445   : > { %v3977_v51 = vsel %vm331_vm6, %v3974_v35, %v3976_v60  ;;  %4035 = vrot.lane.b32.xlu1 %v3979_v2, %s10161_s22 }
0x1446   : > { %4033 = vrot.lane.b32.xlu0 %v3977_v51, %s10161_s22 }
0x1448   : > { %v3984_v40 = vpop.permute.xlu0 %3983  ;;  %v3981_v15 = vpop.permute.xlu1 %3980 }
0x1449   : > { %v3982_v6 = vsel %vm337_vm8, %v3979_v2, %v3981_v15  ;;  %4039 = vrot.lane.b32.xlu1 %v3984_v40, %s10161_s22 }
0x144a   : > { %4037 = vrot.lane.b32.xlu0 %v3982_v6, %s10161_s22 }
0x144c   : > { %v3989_v62 = vpop.permute.xlu0 %3988  ;;  %v3986_v27 = vpop.permute.xlu1 %3985 }
0x144d   : > { %v3987_v19 = vsel %vm343_vm10, %v3984_v40, %v3986_v27  ;;  %4043 = vrot.lane.b32.xlu1 %v3989_v62, %s10161_s22 }
0x144e   : > { %4041 = vrot.lane.b32.xlu0 %v3987_v19, %s10161_s22 }
0x1450   : > { %v3994_v29 = vpop.permute.xlu0 %3993  ;;  %v3991_v17 = vpop.permute.xlu1 %3990 }
0x1451   : > { %v3992_v12 = vsel %vm10209_vm11, %v3989_v62, %v3991_v17  ;;  %4047 = vrot.lane.b32.xlu1 %v3994_v29, %s10161_s22  ;;  %vm10213_vm11 = vmmov %vm10211_vm13 }
0x1452   : > { %4045 = vrot.lane.b32.xlu0 %v3992_v12, %s10161_s22 }
0x1454   : > { %v3996_v8 = vpop.permute.xlu1 %3995  ;;  %v4022_v45 = vpop.permute.xlu0 %4021 }
0x1455   : > { %v3997_v34 = vsel %vm10210_vm12, %v3994_v29, %v3996_v8  ;;  %4006 = vperm.xlu1 %6048, %v5430_v50   ;;  %vm10214_vm12 = vmmov %vm10213_vm11 }
0x1456   : > { %4049 = vrot.lane.b32.xlu0 %v3997_v34, %s10161_s22 }
0x1458   : > { %v4024_v49 = vpop.permute.xlu1 %4023 }
0x1459   : > { %v4051_v57 = vsel %vm10211_vm13, %v4022_v45, %v4024_v49  ;;  %4161 = vrot.lane.b32.xlu1 %v6210_v0, %s10131_s3  ;;  %vm10215_vm13 = vmmov %vm10213_vm11 }
0x145a   : > { %4011 = vperm.xlu0 %6047, %v5431_v5   ;;  %5934 = vmatpush3.bf16.msra.mxu0 %v4051_v57 }
0x145b   : > { %5935 = vmatprep.subr.bf16.mxu0 %v6228_v48 }
0x145d   : > { %4166 = vrot.lane.b32.xlu1 %v6210_v0, %s10132_s0 }
0x145e   : > { %4243 = vrot.lane.b32.xlu0 %v6210_v0, %s10131_s3 }
0x1461   : > { %4126 = vrot.lane.b32.xlu1 %v6210_v0, %s10134_s12 }
0x1462   : > { %4248 = vrot.lane.b32.xlu0 %v6210_v0, %s10132_s0 }
0x1465   : > { %4171 = vrot.lane.b32.xlu1 %v6210_v0, %s10133_s18 }
0x1466   : > { %4208 = vrot.lane.b32.xlu0 %v6210_v0, %s10134_s12 }
0x1469   : > { %4131 = vrot.lane.b32.xlu1 %v6210_v0, %s10125_s29 }
0x146a   : > { %4253 = vrot.lane.b32.xlu0 %v6210_v0, %s10133_s18 }
0x146d   : > { %4176 = vrot.lane.b32.xlu1 %v6210_v0, %s10126_s8 }
0x146e   : > { %4213 = vrot.lane.b32.xlu0 %v6210_v0, %s10125_s29 }
0x1471   : > { %4136 = vrot.lane.b32.xlu1 %v6210_v0, %s10127_s9 }
0x1472   : > { %4258 = vrot.lane.b32.xlu0 %v6210_v0, %s10126_s8 }
0x1475   : > { %4181 = vrot.lane.b32.xlu1 %v6210_v0, %s10128_s20 }
0x1476   : > { %4218 = vrot.lane.b32.xlu0 %v6210_v0, %s10127_s9 }
0x1479   : > { %4141 = vrot.lane.b32.xlu1 %v6210_v0, %s10129_s23 }
0x147a   : > { %4263 = vrot.lane.b32.xlu0 %v6210_v0, %s10128_s20 }
0x147d   : > { %4186 = vrot.lane.b32.xlu1 %v6210_v0, %s10119_s15 }
0x147e   : > { %4223 = vrot.lane.b32.xlu0 %v6210_v0, %s10129_s23 }
0x1481   : > { %4146 = vrot.lane.b32.xlu1 %v6210_v0, %s10120_s16 }
0x1482   : > { %4268 = vrot.lane.b32.xlu0 %v6210_v0, %s10119_s15 }
0x1485   : > { %4191 = vrot.lane.b32.xlu1 %v6210_v0, %s10121_s19 }
0x1486   : > { %4228 = vrot.lane.b32.xlu0 %v6210_v0, %s10120_s16 }
0x1489   : > { %4151 = vrot.lane.b32.xlu1 %v6210_v0, %s10122_s21 }
0x148a   : > { %4273 = vrot.lane.b32.xlu0 %v6210_v0, %s10121_s19 }
0x148d   : > { %4156 = vrot.lane.b32.xlu1 %v6210_v0, %s10124_s14 }
0x148e   : > { %4233 = vrot.lane.b32.xlu0 %v6210_v0, %s10122_s21 }
0x1492   : > { %4278 = vrot.lane.b32.xlu0 %v6210_v0, %s10123_s17 }
0x1496   : > { %4238 = vrot.lane.b32.xlu0 %v6210_v0, %s10124_s14 }
0x149a   : > { %4433 = vrot.lane.b32.xlu0 %v6210_v0, %s10130_s13 }
0x14af   : > { %v4026_v56 = vpop.permute.xlu0 %4025  ;;  %v4028_v10 = vpop.permute.xlu1 %4027 }
0x14b0   : > { %5936 = vmatpush3.bf16.msra.mxu0 %v4026_v56 }
0x14b1   : > { %5937 = vmatprep.subr.bf16.mxu0 %v6228_v48 }
0x14b3   : > { %v4032_v37 = vpop.permute.xlu1 %4031 }
0x14b4   : > { %v4030_v1 = vpop.permute.xlu0 %4029 }
0x14b5   : > { %v4052_v44 = vsel %vm10212_vm14, %v4028_v10, %v4030_v1  ;;  %vm10216_vm14 = vmmov %vm10213_vm11 }
0x14b6   : > { %5938 = vmatpush3.bf16.msra.mxu0 %v4052_v44 }
0x14b7   : > { %v4036_v58 = vpop.permute.xlu1 %4035  ;;  %5939 = vmatprep.subr.bf16.mxu0 %v6228_v48 }
0x14b8   : > { %v4034_v33 = vpop.permute.xlu0 %4033 }
0x14b9   : > { %v4053_v13 = vsel %vm10213_vm11, %v4032_v37, %v4034_v33 }
0x14ba   : > { %5940 = vmatpush3.bf16.msra.mxu0 %v4053_v13 }
0x14bb   : > { %5941 = vmatprep.subr.bf16.mxu0 %v6228_v48  ;;  %v4040_v36 = vpop.permute.xlu1 %4039 }
0x14bc   : > { %v4038_v38 = vpop.permute.xlu0 %4037 }
0x14bd   : > { %v4054_v25 = vsel %vm10214_vm12, %v4036_v58, %v4038_v38  ;;  %vm10217_vm12 = vcmask 932864  }
0x14be   : > { %5942 = vmatpush3.bf16.msra.mxu0 %v4054_v25 }
0x14bf   : > { %5943 = vmatprep.subr.bf16.mxu0 %v6228_v48  ;;  %v4044_v43 = vpop.permute.xlu1 %4043 }
0x14c0   : > { %v4042_v7 = vpop.permute.xlu0 %4041 }
0x14c1   : > { %v4055_v9 = vsel %vm10215_vm13, %v4040_v36, %v4042_v7  ;;  %vm10218_vm13 = vmmov %vm10217_vm12 }
0x14c2   : > { %5944 = vmatpush3.bf16.msra.mxu0 %v4055_v9 }
0x14c3   : > { %5945 = vmatprep.subr.bf16.mxu0 %v6228_v48  ;;  %v4048_v14 = vpop.permute.xlu1 %4047 }
0x14c4   : > { %v4046_v22 = vpop.permute.xlu0 %4045 }
0x14c5   : > { %v4056_v41 = vsel %vm10216_vm14, %v4044_v43, %v4046_v22  ;;  %vm10219_vm14 = vcmask 998400  }
0x14c6   : > { %5946 = vmatpush3.bf16.msra.mxu0 %v4056_v41 }
0x14c7   : > { %5947 = vmatprep.subr.bf16.mxu0 %v6228_v48 }
0x14c8   : > { %v4050_v63 = vpop.permute.xlu0 %4049 }
0x14c9   : > { %v4057_v52 = vsel %vm10213_vm11, %v4048_v14, %v4050_v63  ;;  %vm10220_vm11 = vmmov %vm10219_vm14 }
0x14ca   : > { %5948 = vmatpush3.bf16.msra.mxu0 %v4057_v52 }
0x14cd   : > { %5950 = vmatmul.mubr.bf16.vlgmr.msra.gmra.mrb[32].mxu0 %v6097_v39 }
0x14d4   : > { %v4007_v53 = vpop.permute.xlu1 %4006 }
0x14d8   : > { %v9263_v47 = vpop.permute.xlu1 %4161 }
0x14d9   : > { %v4012_v21 = vpop.permute.xlu0 %4011 }
0x14dc   : > { %v9265_v2 = vpop.permute.xlu1 %4166 }
0x14dd   : > { %v9203_v42 = vpop.permute.xlu0 %4243 }
0x14de   : > { %4321 = vrot.lane.b32.xlu1 %v9203_v42, %s10134_s12 }
0x14e0   : > { %v9267_v60 = vpop.permute.xlu1 %4126 }
0x14e1   : > { %v9207_v23 = vpop.permute.xlu0 %4248 }
0x14e2   : > { %4325 = vrot.lane.b32.xlu1 %v9207_v23, %s10134_s12 }
0x14e4   : > { %v9269_v51 = vpop.permute.xlu1 %4171 }
0x14e5   : > { %v9211_v11 = vpop.permute.xlu0 %4208 }
0x14e6   : > { %4293 = vrot.lane.b32.xlu1 %v9211_v11, %s10134_s12 }
0x14e8   : > { %v9271_v40 = vpop.permute.xlu1 %4131 }
0x14e9   : > { %v9215_v3 = vpop.permute.xlu0 %4253 }
0x14ea   : > { %4329 = vrot.lane.b32.xlu1 %v9215_v3, %s10134_s12 }
0x14ec   : > { %v9273_v15 = vpop.permute.xlu1 %4176 }
0x14ed   : > { %v9219_v24 = vpop.permute.xlu0 %4213 }
0x14ee   : > { %4297 = vrot.lane.b32.xlu1 %v9219_v24, %s10134_s12 }
0x14f0   : > { %v9275_v6 = vpop.permute.xlu1 %4136 }
0x14f1   : > { %v9223_v32 = vpop.permute.xlu0 %4258 }
0x14f2   : > { %4333 = vrot.lane.b32.xlu1 %v9223_v32, %s10134_s12 }
0x14f4   : > { %v9277_v62 = vpop.permute.xlu1 %4181 }
0x14f5   : > { %v9227_v46 = vpop.permute.xlu0 %4218 }
0x14f6   : > { %4301 = vrot.lane.b32.xlu1 %v9227_v46, %s10134_s12 }
0x14f8   : > { %v9279_v27 = vpop.permute.xlu1 %4141 }
0x14f9   : > { %v9231_v55 = vpop.permute.xlu0 %4263 }
0x14fa   : > { %4337 = vrot.lane.b32.xlu1 %v9231_v55, %s10134_s12 }
0x14fc   : > { %v9281_v5 = vpop.permute.xlu1 %4186 }
0x14fd   : > { %v9235_v30 = vpop.permute.xlu0 %4223 }
0x14fe   : > { %4305 = vrot.lane.b32.xlu1 %v9235_v30, %s10134_s12 }
0x1500   : > { %v9289_v10 = vpop.permute.xlu1 %4146 }
0x1501   : > { %v9239_v59 = vpop.permute.xlu0 %4268 }
0x1502   : > { %4341 = vrot.lane.b32.xlu1 %v9239_v59, %s10134_s12 }
0x1504   : > { %v9293_v37 = vpop.permute.xlu1 %4191 }
0x1505   : > { %v9243_v18 = vpop.permute.xlu0 %4228 }
0x1506   : > { %4309 = vrot.lane.b32.xlu1 %v9243_v18, %s10134_s12 }
0x1508   : > { %v9299_v16 = vpop.permute.xlu1 %4151 }
0x1509   : > { %v9247_v54 = vpop.permute.xlu0 %4273 }
0x150a   : > { %4345 = vrot.lane.b32.xlu1 %v9247_v54, %s10134_s12 }
0x150c   : > { %v9303_v4 = vpop.permute.xlu1 %4156 }
0x150d   : > { %v9251_v26 = vpop.permute.xlu0 %4233 }
0x150e   : > { %4313 = vrot.lane.b32.xlu1 %v9251_v26, %s10134_s12 }
0x1511   : > { %v9255_v61 = vpop.permute.xlu0 %4278 }
0x1512   : > { %4349 = vrot.lane.b32.xlu1 %v9255_v61, %s10134_s12 }
0x1515   : > { %v9259_v35 = vpop.permute.xlu0 %4238 }
0x1516   : > { %4317 = vrot.lane.b32.xlu1 %v9259_v35, %s10134_s12 }
0x1519   : > { %v9354_v41 = vpop.permute.xlu0 %4433 }
0x15a0   : > { %v4100_v19 = vpop.f32.mrb[32].mxu0 }
0x15a1   : > { %v4101_v29 = vadd.f32 %v4100_v19, %v4007_v53  ;;  %v5951_v17 = vpop.f32.mrb[33].mxu0 }
0x15a2   : > { %v4103_v12 = vpop.f32.mrb[34].mxu0 }
0x15a3   : > { %v4107_v50 = vmax.f32 %v4101_v29, 0.0  ;;  %v4104_v8 = vadd.f32 %v4103_v12, %v4012_v21  ;;  %v5952_v34 = vpop.f32.mrb[35].mxu0 }
0x15a5   : > { %v4108_v45 = vmax.f32 %v4104_v8, 0.0  ;;  %v4109_v49 = vadd.f32 %v4107_v50, %v3474_v28  ;;  %v9309_v28 = vpop.permute.xlu1 %4321 }
0x15a7   : > { %v4110_v57 = vadd.f32 %v4108_v45, %v3475_v20 }
0x15a9   : > { %v4123_v56 = vpack.c.bf16 %v4110_v57, %v4109_v49  ;;  %v9313_v20 = vpop.permute.xlu1 %4325 }
0x15ab   : > { %4241 = vrot.lane.b32.xlu1 %v4123_v56, %s10131_s3  ;;  %4163 = vrot.lane.b32.xlu0 %v4123_v56, %s10131_s3 }
0x15ad   : > { %v9319_v1 = vpop.permute.xlu1 %4293 }
0x15af   : > { %4246 = vrot.lane.b32.xlu1 %v4123_v56, %s10132_s0  ;;  %4168 = vrot.lane.b32.xlu0 %v4123_v56, %s10132_s0 }
0x15b1   : > { %v9323_v44 = vpop.permute.xlu1 %4329 }
0x15b3   : > { %4206 = vrot.lane.b32.xlu1 %v4123_v56, %s10134_s12  ;;  %4128 = vrot.lane.b32.xlu0 %v4123_v56, %s10134_s12 }
0x15b5   : > { %v9329_v58 = vpop.permute.xlu1 %4297 }
0x15b7   : > { %4251 = vrot.lane.b32.xlu1 %v4123_v56, %s10133_s18  ;;  %4173 = vrot.lane.b32.xlu0 %v4123_v56, %s10133_s18 }
0x15b9   : > { %v9333_v33 = vpop.permute.xlu1 %4333 }
0x15bb   : > { %4211 = vrot.lane.b32.xlu1 %v4123_v56, %s10125_s29  ;;  %4133 = vrot.lane.b32.xlu0 %v4123_v56, %s10125_s29 }
0x15bd   : > { %v9337_v13 = vpop.permute.xlu1 %4301 }
0x15bf   : > { %4256 = vrot.lane.b32.xlu1 %v4123_v56, %s10126_s8  ;;  %4178 = vrot.lane.b32.xlu0 %v4123_v56, %s10126_s8 }
0x15c1   : > { %v9340_v36 = vpop.permute.xlu1 %4337 }
0x15c3   : > { %4216 = vrot.lane.b32.xlu1 %v4123_v56, %s10127_s9  ;;  %4138 = vrot.lane.b32.xlu0 %v4123_v56, %s10127_s9 }
0x15c5   : > { %v9342_v38 = vpop.permute.xlu1 %4305 }
0x15c7   : > { %4261 = vrot.lane.b32.xlu1 %v4123_v56, %s10128_s20  ;;  %4183 = vrot.lane.b32.xlu0 %v4123_v56, %s10128_s20 }
0x15c9   : > { %v9344_v25 = vpop.permute.xlu1 %4341 }
0x15cb   : > { %4221 = vrot.lane.b32.xlu1 %v4123_v56, %s10129_s23  ;;  %4143 = vrot.lane.b32.xlu0 %v4123_v56, %s10129_s23 }
0x15cd   : > { %v9346_v7 = vpop.permute.xlu1 %4309 }
0x15cf   : > { %4266 = vrot.lane.b32.xlu1 %v4123_v56, %s10119_s15  ;;  %4188 = vrot.lane.b32.xlu0 %v4123_v56, %s10119_s15 }
0x15d1   : > { %v9348_v9 = vpop.permute.xlu1 %4345 }
0x15d3   : > { %4226 = vrot.lane.b32.xlu1 %v4123_v56, %s10120_s16  ;;  %4148 = vrot.lane.b32.xlu0 %v4123_v56, %s10120_s16 }
0x15d5   : > { %v9350_v43 = vpop.permute.xlu1 %4313 }
0x15d7   : > { %4271 = vrot.lane.b32.xlu1 %v4123_v56, %s10121_s19  ;;  %4193 = vrot.lane.b32.xlu0 %v4123_v56, %s10121_s19 }
0x15d9   : > { %v9352_v22 = vpop.permute.xlu1 %4349 }
0x15db   : > { %4231 = vrot.lane.b32.xlu1 %v4123_v56, %s10122_s21  ;;  %4153 = vrot.lane.b32.xlu0 %v4123_v56, %s10122_s21 }
0x15dd   : > { %v9356_v14 = vpop.permute.xlu1 %4317 }
0x15df   : > { %4276 = vrot.lane.b32.xlu1 %v4123_v56, %s10123_s17  ;;  %4158 = vrot.lane.b32.xlu0 %v4123_v56, %s10124_s14 }
0x15e3   : > { %4236 = vrot.lane.b32.xlu1 %v4123_v56, %s10124_s14 }
0x15e7   : > { %4196 = vrot.lane.b32.xlu1 %v4123_v56, %s10123_s17 }
0x15eb   : > { %4435 = vrot.lane.b32.xlu1 %v4123_v56, %s10130_s13 }
0x161d   : > { %v4164_v63 = vpop.permute.xlu0 %4163  ;;  %v4242_v52 = vpop.permute.xlu1 %4241 }
0x161e   : > { %v4245_v39 = vsel %vm361_vm0, %v4242_v52, %v9203_v42  ;;  %4467 = vrot.lane.b32.xlu1 %v4164_v63, %s10130_s13  ;;  %v4165_v53 = vsel %vm361_vm0, %v9263_v47, %v4164_v63 }
0x161f   : > { %4319 = vrot.lane.b32.xlu0 %v4245_v39, %s10134_s12 }
0x1621   : > { %v4169_v21 = vpop.permute.xlu0 %4168  ;;  %v4247_v19 = vpop.permute.xlu1 %4246 }
0x1622   : > { %4471 = vrot.lane.b32.xlu1 %v4169_v21, %s10130_s13  ;;  %v4250_v17 = vsel %vm367_vm1, %v4247_v19, %v9207_v23  ;;  %v4170_v12 = vsel %vm367_vm1, %v9265_v2, %v4169_v21 }
0x1623   : > { %4465 = vrot.lane.b32.xlu0 %v4165_v53, %s10130_s13 }
0x1625   : > { %v4129_v29 = vpop.permute.xlu0 %4128  ;;  %v4207_v50 = vpop.permute.xlu1 %4206 }
0x1626   : > { %4439 = vrot.lane.b32.xlu1 %v4129_v29, %s10130_s13  ;;  %v9376_v8 = vsel %vm319_vm2, %v4207_v50, %v9211_v11  ;;  %v4130_v34 = vsel %vm319_vm2, %v9267_v60, %v4129_v29 }
0x1627   : > { %4323 = vrot.lane.b32.xlu0 %v4250_v17, %s10134_s12 }
0x1629   : > { %v4174_v42 = vpop.permute.xlu0 %4173  ;;  %v4252_v2 = vpop.permute.xlu1 %4251 }
0x162a   : > { %4475 = vrot.lane.b32.xlu1 %v4174_v42, %s10130_s13  ;;  %v4255_v49 = vsel %vm373_vm3, %v4252_v2, %v9215_v3  ;;  %v4175_v57 = vsel %vm373_vm3, %v9269_v51, %v4174_v42 }
0x162b   : > { %4469 = vrot.lane.b32.xlu0 %v4170_v12, %s10130_s13 }
0x162d   : > { %v4134_v47 = vpop.permute.xlu0 %4133  ;;  %v4212_v56 = vpop.permute.xlu1 %4211 }
0x162e   : > { %4443 = vrot.lane.b32.xlu1 %v4134_v47, %s10130_s13  ;;  %v4215_v63 = vsel %vm325_vm4, %v4212_v56, %v9219_v24  ;;  %v4135_v52 = vsel %vm325_vm4, %v9271_v40, %v4134_v47 }
0x162f   : > { %4291 = vrot.lane.b32.xlu0 %v9376_v8, %s10134_s12 }
0x1631   : > { %v4179_v23 = vpop.permute.xlu0 %4178  ;;  %v4257_v39 = vpop.permute.xlu1 %4256 }
0x1632   : > { %4479 = vrot.lane.b32.xlu1 %v4179_v23, %s10130_s13  ;;  %v4260_v21 = vsel %vm379_vm5, %v4257_v39, %v9223_v32  ;;  %v4180_v53 = vsel %vm379_vm5, %v9273_v15, %v4179_v23  ;;  %v5441_v15 = vld [vmem:[%s10047_s2 + $0x70] sm:$0xff] }
0x1633   : > { %4437 = vrot.lane.b32.xlu0 %v4130_v34, %s10130_s13 }
0x1635   : > { %v4139_v45 = vpop.permute.xlu0 %4138  ;;  %v4217_v19 = vpop.permute.xlu1 %4216 }
0x1636   : > { %4447 = vrot.lane.b32.xlu1 %v4139_v45, %s10130_s13  ;;  %v4220_v29 = vsel %vm331_vm6, %v4217_v19, %v9227_v46  ;;  %v4140_v17 = vsel %vm331_vm6, %v9275_v6, %v4139_v45 }
0x1637   : > { %4327 = vrot.lane.b32.xlu0 %v4255_v49, %s10134_s12 }
0x1639   : > { %v4184_v11 = vpop.permute.xlu0 %4183  ;;  %v4262_v42 = vpop.permute.xlu1 %4261 }
0x163a   : > { %4483 = vrot.lane.b32.xlu1 %v4184_v11, %s10130_s13  ;;  %v4265_v46 = vsel %vm385_vm7, %v4262_v42, %v9231_v55  ;;  %v4185_v12 = vsel %vm385_vm7, %v9277_v62, %v4184_v11 }
0x163b   : > { %4473 = vrot.lane.b32.xlu0 %v4175_v57, %s10130_s13 }
0x163d   : > { %v4144_v60 = vpop.permute.xlu0 %4143  ;;  %v4222_v6 = vpop.permute.xlu1 %4221 }
0x163e   : > { %4451 = vrot.lane.b32.xlu1 %v4144_v60, %s10130_s13  ;;  %v4225_v50 = vsel %vm337_vm8, %v4222_v6, %v9235_v30  ;;  %v4145_v55 = vsel %vm337_vm8, %v9279_v27, %v4144_v60 }
0x163f   : > { %4295 = vrot.lane.b32.xlu0 %v4215_v63, %s10134_s12 }
0x1641   : > { %v4189_v3 = vpop.permute.xlu0 %4188  ;;  %v4267_v62 = vpop.permute.xlu1 %4266 }
0x1642   : > { %4487 = vrot.lane.b32.xlu1 %v4189_v3, %s10130_s13  ;;  %v4270_v47 = vsel %vm391_vm9, %v4267_v62, %v9239_v59  ;;  %v4190_v30 = vsel %vm391_vm9, %v9281_v5, %v4189_v3 }
0x1643   : > { %4441 = vrot.lane.b32.xlu0 %v4135_v52, %s10130_s13 }
0x1645   : > { %v4149_v51 = vpop.permute.xlu0 %4148  ;;  %v4227_v27 = vpop.permute.xlu1 %4226 }
0x1646   : > { %4455 = vrot.lane.b32.xlu1 %v4149_v51, %s10130_s13  ;;  %v4230_v23 = vsel %vm343_vm10, %v4227_v27, %v9243_v18  ;;  %v4150_v59 = vsel %vm343_vm10, %v9289_v10, %v4149_v51 }
0x1647   : > { %4331 = vrot.lane.b32.xlu0 %v4260_v21, %s10134_s12 }
0x1649   : > { %v4194_v24 = vpop.permute.xlu0 %4193  ;;  %v4272_v5 = vpop.permute.xlu1 %4271 }
0x164a   : > { %4491 = vrot.lane.b32.xlu1 %v4194_v24, %s10130_s13  ;;  %v4275_v34 = vsel %vm10217_vm12, %v4272_v5, %v9247_v54  ;;  %v4195_v2 = vsel %vm10218_vm13, %v9293_v37, %v4194_v24  ;;  %v6100_v37 = vld [vmem:[%s10046_s1 + $0xec] ss:$16 sps:$4 sm:$0xff]   ;;  %vm10221_vm12 = vcmask 924672   ;;  %vm10222_vm13 = vcmask 990208  }
0x164b   : > { %4477 = vrot.lane.b32.xlu0 %v4180_v53, %s10130_s13  ;;  %4414 = vmatprep.mubr.bf16.mxu1 %v6100_v37 }
0x164d   : > { %v4154_v40 = vpop.permute.xlu0 %4153  ;;  %v4232_v18 = vpop.permute.xlu1 %4231 }
0x164e   : > { %4459 = vrot.lane.b32.xlu1 %v4154_v40, %s10130_s13  ;;  %v4235_v10 = vsel %vm10219_vm14, %v4232_v18, %v9251_v26  ;;  %v4155_v45 = vsel %vm10220_vm11, %v9299_v16, %v4154_v40  ;;  %v6103_v16 = vld [vmem:[%s10046_s1 + $0xe4] ss:$16 sps:$4 sm:$0xff]   ;;  %vm10223_vm14 = vmmov %vm10222_vm13  ;;  %vm10224_vm11 = vcmask 121856  }
0x164f   : > { %4299 = vrot.lane.b32.xlu0 %v4220_v29, %s10134_s12  ;;  %4558 = vmatprep.mubr.bf16.mxu0 %v6103_v16 }
0x1651   : > { %v4159_v32 = vpop.permute.xlu0 %4158  ;;  %v4277_v54 = vpop.permute.xlu1 %4276 }
0x1652   : > { %4463 = vrot.lane.b32.xlu1 %v4159_v32, %s10130_s13  ;;  %v4280_v26 = vsel %vm10221_vm12, %v4277_v54, %v9255_v61  ;;  %v4160_v61 = vsel %vm10223_vm14, %v9303_v4, %v4159_v32  ;;  %vm10225_vm12 = vmmov %vm10224_vm11 }
0x1653   : > { %4445 = vrot.lane.b32.xlu0 %v4140_v17, %s10130_s13  ;;  %vm10227_vm14 = vmmov %vm10224_vm11 }
0x1655   : > { %v4237_v49 = vpop.permute.xlu1 %4236 }
0x1656   : > { %4572 = vperm.xlu1 %6048, %v5441_v15   ;;  %v4240_v11 = vsel %vm10222_vm13, %v4237_v49, %v9259_v35  ;;  %v5442_v35 = vld [vmem:[%s10047_s2 + $0x78] sm:$0xff]  ;;  %vm10226_vm13 = vmmov %vm10224_vm11 }
0x1657   : > { %4335 = vrot.lane.b32.xlu0 %v4265_v46, %s10134_s12 }
0x1659   : > { %v4197_v57 = vpop.permute.xlu1 %4196 }
0x165a   : > { %4634 = vrot.lane.b32.xlu1 %v6210_v0, %s10131_s3 }
0x165b   : > { %4481 = vrot.lane.b32.xlu0 %v4185_v12, %s10130_s13 }
0x165d   : > { %v4436_v56 = vpop.permute.xlu1 %4435 }
0x165e   : > { %4639 = vrot.lane.b32.xlu1 %v6210_v0, %s10132_s0  ;;  %v4495_v39 = vsel %vm10225_vm12, %v9354_v41, %v4436_v56  ;;  %vm10228_vm12 = vmmov %vm10224_vm11 }
0x165f   : > { %4303 = vrot.lane.b32.xlu0 %v4225_v50, %s10134_s12 }
0x1662   : > { %4599 = vrot.lane.b32.xlu1 %v6210_v0, %s10134_s12 }
0x1663   : > { %4449 = vrot.lane.b32.xlu0 %v4145_v55, %s10130_s13 }
0x1666   : > { %4644 = vrot.lane.b32.xlu1 %v6210_v0, %s10133_s18 }
0x1667   : > { %4339 = vrot.lane.b32.xlu0 %v4270_v47, %s10134_s12 }
0x166a   : > { %4604 = vrot.lane.b32.xlu1 %v6210_v0, %s10125_s29 }
0x166b   : > { %4485 = vrot.lane.b32.xlu0 %v4190_v30, %s10130_s13 }
0x166e   : > { %4649 = vrot.lane.b32.xlu1 %v6210_v0, %s10126_s8 }
0x166f   : > { %4307 = vrot.lane.b32.xlu0 %v4230_v23, %s10134_s12 }
0x1672   : > { %4609 = vrot.lane.b32.xlu1 %v6210_v0, %s10127_s9 }
0x1673   : > { %4453 = vrot.lane.b32.xlu0 %v4150_v59, %s10130_s13 }
0x1676   : > { %4654 = vrot.lane.b32.xlu1 %v6210_v0, %s10128_s20 }
0x1677   : > { %4343 = vrot.lane.b32.xlu0 %v4275_v34, %s10134_s12 }
0x167a   : > { %4614 = vrot.lane.b32.xlu1 %v6210_v0, %s10129_s23 }
0x167b   : > { %4489 = vrot.lane.b32.xlu0 %v4195_v2, %s10130_s13 }
0x167e   : > { %4659 = vrot.lane.b32.xlu1 %v6210_v0, %s10119_s15 }
0x167f   : > { %4311 = vrot.lane.b32.xlu0 %v4235_v10, %s10134_s12 }
0x1682   : > { %4619 = vrot.lane.b32.xlu1 %v6210_v0, %s10120_s16 }
0x1683   : > { %4457 = vrot.lane.b32.xlu0 %v4155_v45, %s10130_s13 }
0x1686   : > { %4664 = vrot.lane.b32.xlu1 %v6210_v0, %s10121_s19 }
0x1687   : > { %4347 = vrot.lane.b32.xlu0 %v4280_v26, %s10134_s12 }
0x168a   : > { %4624 = vrot.lane.b32.xlu1 %v6210_v0, %s10122_s21 }
0x168b   : > { %4315 = vrot.lane.b32.xlu0 %v4240_v11, %s10134_s12 }
0x168e   : > { %4629 = vrot.lane.b32.xlu1 %v6210_v0, %s10124_s14 }
0x168f   : > { %4461 = vrot.lane.b32.xlu0 %v4160_v61, %s10130_s13 }
0x1690   : > { %v4468_v4 = vpop.permute.xlu1 %4467 }
0x1691   : > { %v4320_v60 = vpop.permute.xlu0 %4319 }
0x1692   : > { %v4358_v63 = vsel %vm319_vm2, %v4320_v60, %v9309_v28 }
0x1693   : > { %5796 = vmatprep.subr.bf16.mxu1 %v4358_v63  ;;  %4493 = vrot.lane.b32.xlu0 %v4197_v57, %s10130_s13 }
0x1694   : > { %5797 = vmatpush3.bf16.msra.mxu1 %v9376_v8  ;;  %v4472_v8 = vpop.permute.xlu1 %4471 }
0x1695   : > { %v4466_v3 = vpop.permute.xlu0 %4465 }
0x1696   : > { %v4503_v52 = vsel %vm10224_vm11, %v4466_v3, %v4468_v4 }
0x1697   : > { %4577 = vperm.xlu0 %6047, %v5442_v35   ;;  %5818 = vmatprep.subr.bf16.mxu0 %v4503_v52 }
0x1698   : > { %5819 = vmatpush3.bf16.msra.mxu0 %v4495_v39 }
0x1699   : > { %v4324_v28 = vpop.permute.xlu0 %4323 }
0x169a   : > { %v4359_v51 = vsel %vm319_vm2, %v4324_v28, %v9313_v20  ;;  %v4440_v20 = vpop.permute.xlu1 %4439 }
0x169b   : > { %5798 = vmatprep.subr.bf16.mxu1 %v4359_v51  ;;  %4716 = vrot.lane.b32.xlu0 %v6210_v0, %s10131_s3 }
0x169d   : > { %v4470_v21 = vpop.permute.xlu0 %4469 }
0x169e   : > { %v4504_v24 = vsel %vm10226_vm13, %v4470_v21, %v4472_v8  ;;  %vm10229_vm13 = vmmov %vm10224_vm11 }
0x169f   : > { %5820 = vmatprep.subr.bf16.mxu0 %v4504_v24  ;;  %4721 = vrot.lane.b32.xlu0 %v6210_v0, %s10132_s0 }
0x16a1   : > { %v4292_v41 = vpop.permute.xlu0 %4291 }
0x16a2   : > { %v4351_v53 = vsel %vm319_vm2, %v4292_v41, %v9319_v1  ;;  %v4476_v1 = vpop.permute.xlu1 %4475 }
0x16a3   : > { %5799 = vmatpush3.bf16.msra.mxu1 %v4351_v53  ;;  %4681 = vrot.lane.b32.xlu0 %v6210_v0, %s10134_s12  ;;  %v6098_v53 = vld [vmem:[%s10046_s1 + $0xe8] ss:$16 sps:$4 sm:$0xff]  }
0x16a5   : > { %v4438_v19 = vpop.permute.xlu0 %4437 }
0x16a6   : > { %v4496_v40 = vsel %vm10227_vm14, %v4438_v19, %v4440_v20  ;;  %vm10230_vm14 = vmmov %vm10224_vm11 }
0x16a7   : > { %5821 = vmatpush3.bf16.msra.mxu0 %v4496_v40  ;;  %4726 = vrot.lane.b32.xlu0 %v6210_v0, %s10133_s18 }
0x16a9   : > { %v4328_v29 = vpop.permute.xlu0 %4327 }
0x16aa   : > { %v4360_v32 = vsel %vm319_vm2, %v4328_v29, %v9323_v44  ;;  %v4444_v44 = vpop.permute.xlu1 %4443 }
0x16ab   : > { %5800 = vmatprep.subr.bf16.mxu1 %v4360_v32  ;;  %4686 = vrot.lane.b32.xlu0 %v6210_v0, %s10125_s29 }
0x16ad   : > { %v4474_v17 = vpop.permute.xlu0 %4473 }
0x16ae   : > { %v4505_v42 = vsel %vm10224_vm11, %v4474_v17, %v4476_v1 }
0x16af   : > { %5822 = vmatprep.subr.bf16.mxu0 %v4505_v42  ;;  %4731 = vrot.lane.b32.xlu0 %v6210_v0, %s10126_s8 }
0x16b1   : > { %v4296_v15 = vpop.permute.xlu0 %4295 }
0x16b2   : > { %v4352_v46 = vsel %vm319_vm2, %v4296_v15, %v9329_v58  ;;  %v4480_v58 = vpop.permute.xlu1 %4479 }
0x16b3   : > { %5801 = vmatpush3.bf16.msra.mxu1 %v4352_v46  ;;  %4691 = vrot.lane.b32.xlu0 %v6210_v0, %s10127_s9 }
0x16b5   : > { %v4442_v12 = vpop.permute.xlu0 %4441 }
0x16b6   : > { %v4497_v6 = vsel %vm10228_vm12, %v4442_v12, %v4444_v44  ;;  %vm10231_vm12 = vmmov %vm10224_vm11 }
0x16b7   : > { %5823 = vmatpush3.bf16.msra.mxu0 %v4497_v6  ;;  %4736 = vrot.lane.b32.xlu0 %v6210_v0, %s10128_s20 }
0x16b9   : > { %v4332_v50 = vpop.permute.xlu0 %4331 }
0x16ba   : > { %v4361_v55 = vsel %vm319_vm2, %v4332_v50, %v9333_v33  ;;  %v4448_v33 = vpop.permute.xlu1 %4447 }
0x16bb   : > { %5802 = vmatprep.subr.bf16.mxu1 %v4361_v55  ;;  %4696 = vrot.lane.b32.xlu0 %v6210_v0, %s10129_s23 }
0x16bd   : > { %v4478_v62 = vpop.permute.xlu0 %4477 }
0x16be   : > { %v4506_v47 = vsel %vm10229_vm13, %v4478_v62, %v4480_v58  ;;  %vm10232_vm13 = vmmov %vm10224_vm11 }
0x16bf   : > { %5824 = vmatprep.subr.bf16.mxu0 %v4506_v47  ;;  %4741 = vrot.lane.b32.xlu0 %v6210_v0, %s10119_s15 }
0x16c1   : > { %v4300_v30 = vpop.permute.xlu0 %4299 }
0x16c2   : > { %v4353_v27 = vsel %vm319_vm2, %v4300_v30, %v9337_v13  ;;  %v4484_v13 = vpop.permute.xlu1 %4483 }
0x16c3   : > { %5803 = vmatpush3.bf16.msra.mxu1 %v4353_v27  ;;  %4701 = vrot.lane.b32.xlu0 %v6210_v0, %s10120_s16 }
0x16c5   : > { %v4446_v23 = vpop.permute.xlu0 %4445 }
0x16c6   : > { %v4498_v59 = vsel %vm10230_vm14, %v4446_v23, %v4448_v33  ;;  %vm10233_vm14 = vmmov %vm10224_vm11 }
0x16c7   : > { %5825 = vmatpush3.bf16.msra.mxu0 %v4498_v59  ;;  %4746 = vrot.lane.b32.xlu0 %v6210_v0, %s10121_s19 }
0x16c9   : > { %v4336_v5 = vpop.permute.xlu0 %4335 }
0x16ca   : > { %v4362_v34 = vsel %vm319_vm2, %v4336_v5, %v9340_v36  ;;  %v4452_v36 = vpop.permute.xlu1 %4451 }
0x16cb   : > { %5804 = vmatprep.subr.bf16.mxu1 %v4362_v34  ;;  %4706 = vrot.lane.b32.xlu0 %v6210_v0, %s10122_s21 }
0x16cd   : > { %v4482_v18 = vpop.permute.xlu0 %4481 }
0x16ce   : > { %v4507_v2 = vsel %vm10224_vm11, %v4482_v18, %v4484_v13  ;;  %v4488_v16 = vpop.permute.xlu1 %4487 }
0x16cf   : > { %5826 = vmatprep.subr.bf16.mxu0 %v4507_v2  ;;  %4751 = vrot.lane.b32.xlu0 %v6210_v0, %s10123_s17 }
0x16d1   : > { %v4304_v10 = vpop.permute.xlu0 %4303 }
0x16d2   : > { %v4354_v54 = vsel %vm319_vm2, %v4304_v10, %v9342_v38  ;;  %v4456_v56 = vpop.permute.xlu1 %4455 }
0x16d3   : > { %5805 = vmatpush3.bf16.msra.mxu1 %v4354_v54  ;;  %4711 = vrot.lane.b32.xlu0 %v6210_v0, %s10124_s14 }
0x16d5   : > { %v4450_v45 = vpop.permute.xlu0 %4449 }
0x16d6   : > { %v4499_v37 = vsel %vm10231_vm12, %v4450_v45, %v4452_v36  ;;  %v4492_v4 = vpop.permute.xlu1 %4491  ;;  %vm10234_vm12 = vmmov %vm10224_vm11 }
0x16d7   : > { %5827 = vmatpush3.bf16.msra.mxu0 %v4499_v37  ;;  %4906 = vrot.lane.b32.xlu0 %v6210_v0, %s10130_s13 }
0x16d9   : > { %v4340_v49 = vpop.permute.xlu0 %4339 }
0x16da   : > { %v4363_v26 = vsel %vm319_vm2, %v4340_v49, %v9344_v25  ;;  %v4460_v28 = vpop.permute.xlu1 %4459 }
0x16db   : > { %5806 = vmatprep.subr.bf16.mxu1 %v4363_v26 }
0x16dd   : > { %v4486_v11 = vpop.permute.xlu0 %4485 }
0x16de   : > { %v4508_v38 = vsel %vm10232_vm13, %v4486_v11, %v4488_v16  ;;  %v4464_v20 = vpop.permute.xlu1 %4463  ;;  %vm10235_vm13 = vmmov %vm10224_vm11 }
0x16df   : > { %5828 = vmatprep.subr.bf16.mxu0 %v4508_v38 }
0x16e1   : > { %v4308_v57 = vpop.permute.xlu0 %4307 }
0x16e2   : > { %v4355_v61 = vsel %vm319_vm2, %v4308_v57, %v9346_v7  ;;  %v4573_v30 = vpop.permute.xlu1 %4572 }
0x16e3   : > { %5807 = vmatpush3.bf16.msra.mxu1 %v4355_v61 }
0x16e5   : > { %v4454_v60 = vpop.permute.xlu0 %4453 }
0x16e6   : > { %v4500_v63 = vsel %vm10233_vm14, %v4454_v60, %v4456_v56  ;;  %v9648_v27 = vpop.permute.xlu1 %4634 }
0x16e7   : > { %5829 = vmatpush3.bf16.msra.mxu0 %v4500_v63 }
0x16e9   : > { %v4344_v35 = vpop.permute.xlu0 %4343 }
0x16ea   : > { %v4364_v25 = vsel %vm319_vm2, %v4344_v35, %v9348_v9  ;;  %v9650_v33 = vpop.permute.xlu1 %4639 }
0x16eb   : > { %5808 = vmatprep.subr.bf16.mxu1 %v4364_v25 }
0x16ed   : > { %v4490_v3 = vpop.permute.xlu0 %4489 }
0x16ee   : > { %v4509_v52 = vsel %vm10224_vm11, %v4490_v3, %v4492_v4  ;;  %v9652_v23 = vpop.permute.xlu1 %4599 }
0x16ef   : > { %5830 = vmatprep.subr.bf16.mxu0 %v4509_v52 }
0x16f1   : > { %v4312_v39 = vpop.permute.xlu0 %4311 }
0x16f2   : > { %v4356_v7 = vsel %vm319_vm2, %v4312_v39, %v9350_v43  ;;  %v9654_v59 = vpop.permute.xlu1 %4644 }
0x16f3   : > { %5809 = vmatpush3.bf16.msra.mxu1 %v4356_v7 }
0x16f5   : > { %v4458_v51 = vpop.permute.xlu0 %4457 }
0x16f6   : > { %v4501_v8 = vsel %vm10234_vm12, %v4458_v51, %v4460_v28  ;;  %v9656_v5 = vpop.permute.xlu1 %4604  ;;  %vm10243_vm12 = vmmov %vm10224_vm11 }
0x16f7   : > { %5831 = vmatpush3.bf16.msra.mxu0 %v4501_v8 }
0x16f9   : > { %v4348_v21 = vpop.permute.xlu0 %4347 }
0x16fa   : > { %v4365_v9 = vsel %vm319_vm2, %v4348_v21, %v9352_v22  ;;  %v6101_v22 = vld [vmem:[%s10046_s1 + $0xe0] ss:$16 sps:$4 sm:$0xff]   ;;  %v9658_v34 = vpop.permute.xlu1 %4649 }
0x16fb   : > { %5810 = vmatprep.subr.bf16.mxu1 %v4365_v9 }
0x16fd   : > { %v4316_v24 = vpop.permute.xlu0 %4315 }
0x16fe   : > { %v4357_v41 = vsel %vm319_vm2, %v4316_v24, %v9356_v14  ;;  %v9660_v13 = vpop.permute.xlu1 %4609 }
0x16ff   : > { %5811 = vmatpush3.bf16.msra.mxu1 %v4357_v41 }
0x1701   : > { %v4462_v43 = vpop.permute.xlu0 %4461 }
0x1702   : > { %4415 = vmatmul.mubr.bf16.vlgmr.msra.gmra.mrb[32].mxu1 %v6098_v53  ;;  %v4502_v40 = vsel %vm10235_vm13, %v4462_v43, %v4464_v20  ;;  %v9662_v37 = vpop.permute.xlu1 %4654  ;;  %vm10244_vm13 = vmmov %vm10224_vm11 }
0x1705   : > { %v4494_v19 = vpop.permute.xlu0 %4493 }
0x1706   : > { %5832 = vmatprep.subr.bf16.mxu0 %v4494_v19  ;;  %v9664_v38 = vpop.permute.xlu1 %4614 }
0x1707   : > { %5833 = vmatpush3.bf16.msra.mxu0 %v4502_v40 }
0x170a   : > { %4559 = vmatmul.mubr.bf16.vlgmr.msra.gmra.mrb[36].mxu0 %v6101_v22  ;;  %v9670_v25 = vpop.permute.xlu1 %4659 }
0x170e   : > { %v9680_v39 = vpop.permute.xlu1 %4619 }
0x1712   : > { %v9684_v7 = vpop.permute.xlu1 %4664 }
0x1716   : > { %v4578_v29 = vpop.permute.xlu0 %4577  ;;  %v9690_v28 = vpop.permute.xlu1 %4624 }
0x171a   : > { %v9588_v14 = vpop.permute.xlu0 %4716  ;;  %v9694_v51 = vpop.permute.xlu1 %4629 }
0x171b   : > { %4794 = vrot.lane.b32.xlu1 %v9588_v14, %s10134_s12 }
0x171e   : > { %v9592_v32 = vpop.permute.xlu0 %4721 }
0x171f   : > { %4798 = vrot.lane.b32.xlu1 %v9592_v32, %s10134_s12 }
0x1722   : > { %v9596_v1 = vpop.permute.xlu0 %4681 }
0x1723   : > { %4766 = vrot.lane.b32.xlu1 %v9596_v1, %s10134_s12 }
0x1726   : > { %v9600_v17 = vpop.permute.xlu0 %4726 }
0x1727   : > { %4802 = vrot.lane.b32.xlu1 %v9600_v17, %s10134_s12 }
0x172a   : > { %v9604_v42 = vpop.permute.xlu0 %4686 }
0x172b   : > { %4770 = vrot.lane.b32.xlu1 %v9604_v42, %s10134_s12 }
0x172e   : > { %v9608_v15 = vpop.permute.xlu0 %4731 }
0x172f   : > { %4806 = vrot.lane.b32.xlu1 %v9608_v15, %s10134_s12 }
0x1732   : > { %v9612_v46 = vpop.permute.xlu0 %4691 }
0x1733   : > { %4774 = vrot.lane.b32.xlu1 %v9612_v46, %s10134_s12 }
0x1736   : > { %v9616_v44 = vpop.permute.xlu0 %4736 }
0x1737   : > { %4810 = vrot.lane.b32.xlu1 %v9616_v44, %s10134_s12 }
0x173a   : > { %v9620_v12 = vpop.permute.xlu0 %4696 }
0x173b   : > { %4778 = vrot.lane.b32.xlu1 %v9620_v12, %s10134_s12 }
0x173e   : > { %v9624_v6 = vpop.permute.xlu0 %4741 }
0x173f   : > { %4814 = vrot.lane.b32.xlu1 %v9624_v6, %s10134_s12 }
0x1742   : > { %v9628_v50 = vpop.permute.xlu0 %4701 }
0x1743   : > { %4782 = vrot.lane.b32.xlu1 %v9628_v50, %s10134_s12 }
0x1746   : > { %v9632_v55 = vpop.permute.xlu0 %4746 }
0x1747   : > { %4818 = vrot.lane.b32.xlu1 %v9632_v55, %s10134_s12 }
0x174a   : > { %v9636_v58 = vpop.permute.xlu0 %4706 }
0x174b   : > { %4786 = vrot.lane.b32.xlu1 %v9636_v58, %s10134_s12 }
0x174e   : > { %v9640_v62 = vpop.permute.xlu0 %4751 }
0x174f   : > { %4822 = vrot.lane.b32.xlu1 %v9640_v62, %s10134_s12 }
0x1752   : > { %v9644_v47 = vpop.permute.xlu0 %4711 }
0x1753   : > { %4790 = vrot.lane.b32.xlu1 %v9644_v47, %s10134_s12 }
0x178d   : > { %v9700_v8 = vpop.permute.xlu1 %4794 }
0x1791   : > { %v9704_v21 = vpop.permute.xlu1 %4798 }
0x1795   : > { %v9710_v9 = vpop.permute.xlu1 %4766 }
0x1799   : > { %v9714_v24 = vpop.permute.xlu1 %4802 }
0x179d   : > { %v9720_v41 = vpop.permute.xlu1 %4770 }
0x17a1   : > { %v9724_v53 = vpop.permute.xlu1 %4806 }
0x17a5   : > { %v9728_v43 = vpop.permute.xlu1 %4774 }
0x17a9   : > { %v9731_v20 = vpop.permute.xlu1 %4810 }
0x17ad   : > { %v9733_v19 = vpop.permute.xlu1 %4778 }
0x17b1   : > { %v9735_v40 = vpop.permute.xlu1 %4814 }
0x17b5   : > { %v9737_v22 = vpop.permute.xlu1 %4782 }
0x17d5   : > { %v5812_v18 = vpop.f32.mrb[32].mxu1 }
0x17d6   : > { %v5813_v2 = vpop.f32.mrb[33].mxu1 }
0x17d7   : > { %v5814_v10 = vadd.f32 %v5813_v2, %v5812_v18  ;;  %v5815_v54 = vpop.f32.mrb[34].mxu1  ;;  %v9745_v2 = vpop.permute.xlu0 %4906 }
0x17d8   : > { %v5816_v36 = vpop.f32.mrb[35].mxu1 }
0x17d9   : > { %v5817_v45 = vadd.f32 %v5816_v36, %v5815_v54 }
0x17dd   : > { %v5834_v49 = vpop.f32.mrb[36].mxu0 }
0x17de   : > { %v5835_v26 = vpop.f32.mrb[37].mxu0 }
0x17df   : > { %v5836_v16 = vadd.f32 %v5835_v26, %v5834_v49  ;;  %v5837_v11 = vpop.f32.mrb[38].mxu0 }
0x17e0   : > { %v5838_v57 = vpop.f32.mrb[39].mxu0 }
0x17e1   : > { %v4561_v61 = vadd.f32 %v5836_v16, %v5814_v10  ;;  %v5839_v56 = vadd.f32 %v5838_v57, %v5837_v11 }
0x17e3   : > { %v9666_v60 = vadd.f32 %v4573_v30, %v4561_v61  ;;  %v4564_v63 = vadd.f32 %v5839_v56, %v5817_v45 }
0x17e5   : > { %v9668_v35 = vadd.f32 %v4578_v29, %v4564_v63  ;;  %v4582_v4 = vmax.f32 %v9666_v60, 0.0  ;;  %v9739_v29 = vpop.permute.xlu1 %4818 }
0x17e7   : > { %v4583_v3 = vmax.f32 %v9668_v35, 0.0 }
0x17e9   : > { %v4596_v52 = vpack.c.bf16 %v4583_v3, %v4582_v4  ;;  %v9741_v30 = vpop.permute.xlu1 %4786 }
0x17eb   : > { %4714 = vrot.lane.b32.xlu1 %v4596_v52, %s10131_s3  ;;  %4636 = vrot.lane.b32.xlu0 %v4596_v52, %s10131_s3 }
0x17ed   : > { %v9743_v18 = vpop.permute.xlu1 %4822 }
0x17ef   : > { %4719 = vrot.lane.b32.xlu1 %v4596_v52, %s10132_s0  ;;  %4641 = vrot.lane.b32.xlu0 %v4596_v52, %s10132_s0 }
0x17f1   : > { %v9747_v10 = vpop.permute.xlu1 %4790 }
0x17f3   : > { %4679 = vrot.lane.b32.xlu1 %v4596_v52, %s10134_s12  ;;  %4601 = vrot.lane.b32.xlu0 %v4596_v52, %s10134_s12 }
0x17f7   : > { %4724 = vrot.lane.b32.xlu1 %v4596_v52, %s10133_s18  ;;  %4646 = vrot.lane.b32.xlu0 %v4596_v52, %s10133_s18 }
0x17fb   : > { %4684 = vrot.lane.b32.xlu1 %v4596_v52, %s10125_s29  ;;  %4606 = vrot.lane.b32.xlu0 %v4596_v52, %s10125_s29 }
0x17ff   : > { %4729 = vrot.lane.b32.xlu1 %v4596_v52, %s10126_s8  ;;  %4651 = vrot.lane.b32.xlu0 %v4596_v52, %s10126_s8 }
0x1803   : > { %4689 = vrot.lane.b32.xlu1 %v4596_v52, %s10127_s9  ;;  %4611 = vrot.lane.b32.xlu0 %v4596_v52, %s10127_s9 }
0x1807   : > { %4734 = vrot.lane.b32.xlu1 %v4596_v52, %s10128_s20  ;;  %4656 = vrot.lane.b32.xlu0 %v4596_v52, %s10128_s20 }
0x180b   : > { %4694 = vrot.lane.b32.xlu1 %v4596_v52, %s10129_s23  ;;  %4616 = vrot.lane.b32.xlu0 %v4596_v52, %s10129_s23 }
0x180f   : > { %4739 = vrot.lane.b32.xlu1 %v4596_v52, %s10119_s15  ;;  %4661 = vrot.lane.b32.xlu0 %v4596_v52, %s10119_s15 }
0x1813   : > { %4699 = vrot.lane.b32.xlu1 %v4596_v52, %s10120_s16  ;;  %4621 = vrot.lane.b32.xlu0 %v4596_v52, %s10120_s16 }
0x1817   : > { %4744 = vrot.lane.b32.xlu1 %v4596_v52, %s10121_s19  ;;  %4666 = vrot.lane.b32.xlu0 %v4596_v52, %s10121_s19  ;;  %s5457_s19 = sshll.u32 %s6294_s28, 5  ;;  %s6232_s28 = smov [#allocation6]  }
0x1818   : > { %s6143_s10 = sshll.u32 %s6232_s28, 4  ;;  %s6144_s10 = int_to_ptr.vmem [resolvable:$false] %s6143_s10 }
0x181b   : > { %4704 = vrot.lane.b32.xlu1 %v4596_v52, %s10122_s21  ;;  %4626 = vrot.lane.b32.xlu0 %v4596_v52, %s10122_s21 }
0x181f   : > { %4749 = vrot.lane.b32.xlu1 %v4596_v52, %s10123_s17  ;;  %4631 = vrot.lane.b32.xlu0 %v4596_v52, %s10124_s14 }
0x1823   : > { %4709 = vrot.lane.b32.xlu1 %v4596_v52, %s10124_s14 }
0x1827   : > { %4669 = vrot.lane.b32.xlu1 %v4596_v52, %s10123_s17  ;;  %s284_s17 = sand.u32 1, %s6197_s25  }
0x1828   : > { %s5359_s15 = sshll.u32 %s284_s17, 1  ;;  %s5269_s24 = scalar_lea.sflag [#allocation5], %s284_s17 }
0x1829   : > { %s286_s8 = scalar_lea.vmem [#allocation6], %s5359_s15 }
0x182a   : > { %s5282_s20 = sshll.u32 %s286_s8, 4  ;;  %s10005_s20 = int_to_ptr.vmem [resolvable:$true] %s5282_s20 }
0x182b   : > { %4908 = vrot.lane.b32.xlu1 %v4596_v52, %s10130_s13  ;;  %s6139_s26 = scalar_lea.vmem %s10005_s20, 32  ;;  %p6146_p2 = scmp.lt.s32.totalorder %s10005_s20, %s6144_s10 }
0x182c   : > { %p6140_p6 = scmp.ne.s32.totalorder %s10005_s20, %s6139_s26 }
0x182e   : > { %p6141_p10 = pnand %p6140_p6, %p10265_p9 }
0x1830   : > { %p6142_p12 = pneg %p6141_p10 }
0x185d   : > { %v4637_v54 = vpop.permute.xlu0 %4636  ;;  %v4715_v36 = vpop.permute.xlu1 %4714 }
0x185e   : > { %v4718_v45 = vsel %vm361_vm0, %v4715_v36, %v9588_v14  ;;  %4940 = vrot.lane.b32.xlu1 %v4637_v54, %s10130_s13  ;;  %v4638_v26 = vsel %vm361_vm0, %v9648_v27, %v4637_v54  ;;  %vm10236_vm0 = vcmask 932864  }
0x185f   : > { %4792 = vrot.lane.b32.xlu0 %v4718_v45, %s10134_s12 }
0x1861   : > { %v4642_v49 = vpop.permute.xlu0 %4641  ;;  %v4720_v16 = vpop.permute.xlu1 %4719 }
0x1862   : > { %4944 = vrot.lane.b32.xlu1 %v4642_v49, %s10130_s13  ;;  %v4723_v57 = vsel %vm367_vm1, %v4720_v16, %v9592_v32  ;;  %v4643_v61 = vsel %vm367_vm1, %v9650_v33, %v4642_v49  ;;  %vm10237_vm1 = vmmov %vm10236_vm0 }
0x1863   : > { %4938 = vrot.lane.b32.xlu0 %v4638_v26, %s10130_s13 }
0x1865   : > { %v4602_v11 = vpop.permute.xlu0 %4601  ;;  %v4680_v56 = vpop.permute.xlu1 %4679 }
0x1866   : > { %4912 = vrot.lane.b32.xlu1 %v4602_v11, %s10130_s13  ;;  %v9767_v63 = vsel %vm319_vm2, %v4680_v56, %v9596_v1  ;;  %v4603_v52 = vsel %vm319_vm2, %v9652_v23, %v4602_v11 }
0x1867   : > { %4796 = vrot.lane.b32.xlu0 %v4723_v57, %s10134_s12 }
0x1869   : > { %v4647_v14 = vpop.permute.xlu0 %4646  ;;  %v4725_v33 = vpop.permute.xlu1 %4724 }
0x186a   : > { %4948 = vrot.lane.b32.xlu1 %v4647_v14, %s10130_s13  ;;  %v4728_v36 = vsel %vm373_vm3, %v4725_v33, %v9600_v17  ;;  %v4648_v45 = vsel %vm373_vm3, %v9654_v59, %v4647_v14  ;;  %vm10238_vm3 = vcmask 998400  }
0x186b   : > { %4942 = vrot.lane.b32.xlu0 %v4643_v61, %s10130_s13 }
0x186d   : > { %v4607_v27 = vpop.permute.xlu0 %4606  ;;  %v4685_v49 = vpop.permute.xlu1 %4684 }
0x186e   : > { %4916 = vrot.lane.b32.xlu1 %v4607_v27, %s10130_s13  ;;  %v4688_v26 = vsel %vm325_vm4, %v4685_v49, %v9604_v42  ;;  %v4608_v16 = vsel %vm325_vm4, %v9656_v5, %v4607_v27 }
0x186f   : > { %4764 = vrot.lane.b32.xlu0 %v9767_v63, %s10134_s12 }
0x1871   : > { %v4652_v32 = vpop.permute.xlu0 %4651  ;;  %v4730_v11 = vpop.permute.xlu1 %4729 }
0x1872   : > { %4952 = vrot.lane.b32.xlu1 %v4652_v32, %s10130_s13  ;;  %v4733_v57 = vsel %vm379_vm5, %v4730_v11, %v9608_v15  ;;  %v4653_v14 = vsel %vm379_vm5, %v9658_v34, %v4652_v32  ;;  %v5451_v34 = vld [vmem:[%s10047_s2 + $0x80] sm:$0xff]  ;;  %vm10239_vm5 = vmmov %vm10238_vm3 }
0x1873   : > { %4910 = vrot.lane.b32.xlu0 %v4603_v52, %s10130_s13 }
0x1875   : > { %v4612_v54 = vpop.permute.xlu0 %4611  ;;  %v4690_v61 = vpop.permute.xlu1 %4689 }
0x1876   : > { %4920 = vrot.lane.b32.xlu1 %v4612_v54, %s10130_s13  ;;  %v4693_v56 = vsel %vm331_vm6, %v4690_v61, %v9612_v46  ;;  %v4613_v27 = vsel %vm331_vm6, %v9660_v13, %v4612_v54 }
0x1877   : > { %4800 = vrot.lane.b32.xlu0 %v4728_v36, %s10134_s12 }
0x1879   : > { %v4657_v1 = vpop.permute.xlu0 %4656  ;;  %v4735_v52 = vpop.permute.xlu1 %4734 }
0x187a   : > { %4956 = vrot.lane.b32.xlu1 %v4657_v1, %s10130_s13  ;;  %v4738_v46 = vsel %vm385_vm7, %v4735_v52, %v9616_v44  ;;  %v4658_v32 = vsel %vm385_vm7, %v9662_v37, %v4657_v1  ;;  %vm10240_vm7 = vcmask 924672  }
0x187b   : > { %4946 = vrot.lane.b32.xlu0 %v4648_v45, %s10130_s13 }
0x187d   : > { %v4617_v23 = vpop.permute.xlu0 %4616  ;;  %v4695_v33 = vpop.permute.xlu1 %4694 }
0x187e   : > { %4924 = vrot.lane.b32.xlu1 %v4617_v23, %s10130_s13  ;;  %v4698_v13 = vsel %vm337_vm8, %v4695_v33, %v9620_v12  ;;  %v4618_v54 = vsel %vm337_vm8, %v9664_v38, %v4617_v23 }
0x187f   : > { %4768 = vrot.lane.b32.xlu0 %v4688_v26, %s10134_s12 }
0x1881   : > { %v4662_v17 = vpop.permute.xlu0 %4661  ;;  %v4740_v36 = vpop.permute.xlu1 %4739 }
0x1882   : > { %4960 = vrot.lane.b32.xlu1 %v4662_v17, %s10130_s13  ;;  %v4743_v44 = vsel %vm391_vm9, %v4740_v36, %v9624_v6  ;;  %v4663_v37 = vsel %vm391_vm9, %v9670_v25, %v4662_v17  ;;  %vm10241_vm9 = vcmask 990208  }
0x1883   : > { %4914 = vrot.lane.b32.xlu0 %v4608_v16, %s10130_s13  ;;  %vm10242_vm14 = vmmov %vm10241_vm9 }
0x1885   : > { %v4622_v59 = vpop.permute.xlu0 %4621  ;;  %v4700_v1 = vpop.permute.xlu1 %4699 }
0x1886   : > { %4928 = vrot.lane.b32.xlu1 %v4622_v59, %s10130_s13  ;;  %v4703_v12 = vsel %vm343_vm10, %v4700_v1, %v9628_v50  ;;  %v4623_v38 = vsel %vm343_vm10, %v9680_v39, %v4622_v59 }
0x1887   : > { %4804 = vrot.lane.b32.xlu0 %v4733_v57, %s10134_s12 }
0x1889   : > { %v4667_v42 = vpop.permute.xlu0 %4666  ;;  %v4745_v45 = vpop.permute.xlu1 %4744 }
0x188a   : > { %4964 = vrot.lane.b32.xlu1 %v4667_v42, %s10130_s13  ;;  %v4748_v6 = vsel %vm10236_vm0, %v4745_v45, %v9632_v55  ;;  %v4668_v49 = vsel %vm10237_vm1, %v9684_v7, %v4667_v42  ;;  %v6106_v55 = vld [vmem:[%s10046_s1 + $0x10c] ss:$16 sps:$4 sm:$0xff]   ;;  %vm10245_vm0 = vmmov %vm10224_vm11 }
0x188b   : > { %4950 = vrot.lane.b32.xlu0 %v4653_v14, %s10130_s13  ;;  %4887 = vmatprep.mubr.bf16.mxu1 %v6106_v55  ;;  %vm10246_vm1 = vmmov %vm10245_vm0 }
0x188d   : > { %v4627_v5 = vpop.permute.xlu0 %4626  ;;  %v4705_v25 = vpop.permute.xlu1 %4704 }
0x188e   : > { %4932 = vrot.lane.b32.xlu1 %v4627_v5, %s10130_s13  ;;  %v4708_v50 = vsel %vm10238_vm3, %v4705_v25, %v9636_v58  ;;  %v4628_v39 = vsel %vm10239_vm5, %v9690_v28, %v4627_v5  ;;  %v6109_v58 = vld [vmem:[%s10046_s1 + $0x104] ss:$16 sps:$4 sm:$0xff]   ;;  %vm10247_vm3 = vmmov %vm10245_vm0 }
0x188f   : > { %4772 = vrot.lane.b32.xlu0 %v4693_v56, %s10134_s12  ;;  %5031 = vmatprep.mubr.bf16.mxu0 %v6109_v58  ;;  %vm10248_vm5 = vmmov %vm10245_vm0 }
0x1891   : > { %v4632_v15 = vpop.permute.xlu0 %4631  ;;  %v4750_v23 = vpop.permute.xlu1 %4749 }
0x1892   : > { %4936 = vrot.lane.b32.xlu1 %v4632_v15, %s10130_s13  ;;  %v4753_v7 = vsel %vm10240_vm7, %v4750_v23, %v9640_v62  ;;  %v4633_v16 = vsel %vm10242_vm14, %v9694_v51, %v4632_v15  ;;  %vm10249_vm7 = vmmov %vm10245_vm0 }
0x1893   : > { %4918 = vrot.lane.b32.xlu0 %v4613_v27, %s10130_s13  ;;  %vm10251_vm14 = vmmov %vm10245_vm0 }
0x1895   : > { %v4710_v26 = vpop.permute.xlu1 %4709 }
0x1896   : > { %5045 = vperm.xlu1 %6048, %v5451_v34   ;;  %v4713_v28 = vsel %vm10241_vm9, %v4710_v26, %v9644_v47  ;;  %v5452_v47 = vld [vmem:[%s10047_s2 + $0x88] sm:$0xff]  ;;  %vm10250_vm9 = vmmov %vm10245_vm0 }
0x1897   : > { %4808 = vrot.lane.b32.xlu0 %v4738_v46, %s10134_s12 }
0x1899   : > { %v4670_v17 = vpop.permute.xlu1 %4669 }
0x189b   : > { %4954 = vrot.lane.b32.xlu0 %v4658_v32, %s10130_s13 }
0x189d   : > { %v4909_v62 = vpop.permute.xlu1 %4908 }
0x189e   : > { %v4968_v14 = vsel %vm10243_vm12, %v9745_v2, %v4909_v62  ;;  %vm10253_vm12 = vmmov %vm10245_vm0 }
0x189f   : > { %4776 = vrot.lane.b32.xlu0 %v4698_v13, %s10134_s12 }
0x18a3   : > { %4922 = vrot.lane.b32.xlu0 %v4618_v54, %s10130_s13 }
0x18a7   : > { %4812 = vrot.lane.b32.xlu0 %v4743_v44, %s10134_s12 }
0x18ab   : > { %4958 = vrot.lane.b32.xlu0 %v4663_v37, %s10130_s13 }
0x18af   : > { %4780 = vrot.lane.b32.xlu0 %v4703_v12, %s10134_s12 }
0x18b3   : > { %4926 = vrot.lane.b32.xlu0 %v4623_v38, %s10130_s13 }
0x18b7   : > { %4816 = vrot.lane.b32.xlu0 %v4748_v6, %s10134_s12 }
0x18bb   : > { %4962 = vrot.lane.b32.xlu0 %v4668_v49, %s10130_s13 }
0x18bf   : > { %4784 = vrot.lane.b32.xlu0 %v4708_v50, %s10134_s12 }
0x18c3   : > { %4930 = vrot.lane.b32.xlu0 %v4628_v39, %s10130_s13 }
0x18c7   : > { %4820 = vrot.lane.b32.xlu0 %v4753_v7, %s10134_s12 }
0x18cb   : > { %4788 = vrot.lane.b32.xlu0 %v4713_v28, %s10134_s12 }
0x18cf   : > { %4934 = vrot.lane.b32.xlu0 %v4633_v16, %s10130_s13 }
0x18d0   : > { %v4941_v57 = vpop.permute.xlu1 %4940 }
0x18d1   : > { %v4793_v11 = vpop.permute.xlu0 %4792 }
0x18d2   : > { %v4831_v59 = vsel %vm319_vm2, %v4793_v11, %v9700_v8 }
0x18d3   : > { %5840 = vmatprep.subr.bf16.mxu1 %v4831_v59  ;;  %4966 = vrot.lane.b32.xlu0 %v4670_v17, %s10130_s13  ;;  %s10003_s13 = scalar_lea.hbm %s10052_s7, %s5457_s19 }
0x18d4   : > { %5841 = vmatpush3.bf16.msra.mxu1 %v9767_v63  ;;  %v4945_v63 = vpop.permute.xlu1 %4944 }
0x18d5   : > { %v4939_v42 = vpop.permute.xlu0 %4938 }
0x18d6   : > { %v4976_v51 = vsel %vm10224_vm11, %v4939_v42, %v4941_v57  ;;  %vm10252_vm11 = vmmov %vm10245_vm0 }
0x18d7   : > { %5050 = vperm.xlu0 %6047, %v5452_v47   ;;  %5862 = vmatprep.subr.bf16.mxu0 %v4976_v51 }
0x18d8   : > { %5863 = vmatpush3.bf16.msra.mxu0 %v4968_v14  ;;  %v4913_v52 = vpop.permute.xlu1 %4912 }
0x18d9   : > { %v4797_v8 = vpop.permute.xlu0 %4796 }
0x18da   : > { %v4832_v61 = vsel %vm319_vm2, %v4797_v8, %v9704_v21 }
0x18db   : > { %5842 = vmatprep.subr.bf16.mxu1 %v4832_v61 }
0x18dc   : > { %v4949_v32 = vpop.permute.xlu1 %4948 }
0x18dd   : > { %v4943_v5 = vpop.permute.xlu0 %4942 }
0x18de   : > { %v4977_v56 = vsel %vm10244_vm13, %v4943_v5, %v4945_v63  ;;  %vm10254_vm13 = vmmov %vm10245_vm0 }
0x18df   : > { %5864 = vmatprep.subr.bf16.mxu0 %v4977_v56 }
0x18e0   : > { %v4917_v36 = vpop.permute.xlu1 %4916 }
0x18e1   : > { %v4765_v15 = vpop.permute.xlu0 %4764 }
0x18e2   : > { %v4824_v27 = vsel %vm319_vm2, %v4765_v15, %v9710_v9 }
0x18e3   : > { %5843 = vmatpush3.bf16.msra.mxu1 %v4824_v27 }
0x18e4   : > { %v4953_v12 = vpop.permute.xlu1 %4952 }
0x18e5   : > { %v4911_v2 = vpop.permute.xlu0 %4910 }
0x18e6   : > { %v4969_v34 = vsel %vm10245_vm0, %v4911_v2, %v4913_v52 }
0x18e7   : > { %5865 = vmatpush3.bf16.msra.mxu0 %v4969_v34 }
0x18e8   : > { %v4921_v25 = vpop.permute.xlu1 %4920 }
0x18e9   : > { %v4801_v46 = vpop.permute.xlu0 %4800 }
0x18ea   : > { %v4833_v21 = vsel %vm319_vm2, %v4801_v46, %v9714_v24  ;;  %v6104_v46 = vld [vmem:[%s10046_s1 + $0x108] ss:$16 sps:$4 sm:$0xff]  }
0x18eb   : > { %5844 = vmatprep.subr.bf16.mxu1 %v4833_v21 }
0x18ec   : > { %v4957_v39 = vpop.permute.xlu1 %4956 }
0x18ed   : > { %v4947_v33 = vpop.permute.xlu0 %4946 }
0x18ee   : > { %v4978_v13 = vsel %vm10246_vm1, %v4947_v33, %v4949_v32  ;;  %vm10255_vm1 = vmmov %vm10245_vm0 }
0x18ef   : > { %5866 = vmatprep.subr.bf16.mxu0 %v4978_v13 }
0x18f0   : > { %v4925_v58 = vpop.permute.xlu1 %4924 }
0x18f1   : > { %v4769_v54 = vpop.permute.xlu0 %4768 }
0x18f2   : > { %v4825_v9 = vsel %vm319_vm2, %v4769_v54, %v9720_v41 }
0x18f3   : > { %5845 = vmatpush3.bf16.msra.mxu1 %v4825_v9 }
0x18f4   : > { %v4961_v62 = vpop.permute.xlu1 %4960 }
0x18f5   : > { %v4915_v44 = vpop.permute.xlu0 %4914 }
0x18f6   : > { %v4970_v37 = vsel %vm10247_vm3, %v4915_v44, %v4917_v36 }
0x18f7   : > { %5867 = vmatpush3.bf16.msra.mxu0 %v4970_v37 }
0x18f8   : > { %v4929_v57 = vpop.permute.xlu1 %4928 }
0x18f9   : > { %v4805_v1 = vpop.permute.xlu0 %4804 }
0x18fa   : > { %v4834_v24 = vsel %vm319_vm2, %v4805_v1, %v9724_v53 }
0x18fb   : > { %5846 = vmatprep.subr.bf16.mxu1 %v4834_v24 }
0x18fc   : > { %v4965_v8 = vpop.permute.xlu1 %4964 }
0x18fd   : > { %v4951_v38 = vpop.permute.xlu0 %4950 }
0x18fe   : > { %v4979_v45 = vsel %vm10248_vm5, %v4951_v38, %v4953_v12 }
0x18ff   : > { %5868 = vmatprep.subr.bf16.mxu0 %v4979_v45 }
0x1900   : > { %v4933_v56 = vpop.permute.xlu1 %4932 }
0x1901   : > { %v4773_v6 = vpop.permute.xlu0 %4772 }
0x1902   : > { %v4826_v41 = vsel %vm319_vm2, %v4773_v6, %v9728_v43 }
0x1903   : > { %5847 = vmatpush3.bf16.msra.mxu1 %v4826_v41 }
0x1904   : > { %v4937_v21 = vpop.permute.xlu1 %4936 }
0x1905   : > { %v4919_v49 = vpop.permute.xlu0 %4918 }
0x1906   : > { %v4971_v50 = vsel %vm10249_vm7, %v4919_v49, %v4921_v25 }
0x1907   : > { %5869 = vmatpush3.bf16.msra.mxu0 %v4971_v50 }
0x1909   : > { %v4809_v23 = vpop.permute.xlu0 %4808 }
0x190a   : > { %v4835_v53 = vsel %vm319_vm2, %v4809_v23, %v9731_v20 }
0x190b   : > { %5848 = vmatprep.subr.bf16.mxu1 %v4835_v53 }
0x190d   : > { %v4955_v55 = vpop.permute.xlu0 %4954 }
0x190e   : > { %v4980_v26 = vsel %vm10250_vm9, %v4955_v55, %v4957_v39  ;;  %vm5257_vm9 = vcmask 1040384  }
0x190f   : > { %5870 = vmatprep.subr.bf16.mxu0 %v4980_v26 }
0x1911   : > { %v4777_v7 = vpop.permute.xlu0 %4776 }
0x1912   : > { %v4827_v43 = vsel %vm319_vm2, %v4777_v7, %v9733_v19 }
0x1913   : > { %5849 = vmatpush3.bf16.msra.mxu1 %v4827_v43 }
0x1915   : > { %v4923_v28 = vpop.permute.xlu0 %4922  ;;  %v5046_v41 = vpop.permute.xlu1 %5045 }
0x1916   : > { %v4972_v17 = vsel %vm10251_vm14, %v4923_v28, %v4925_v58 }
0x1917   : > { %5871 = vmatpush3.bf16.msra.mxu0 %v4972_v17 }
0x1919   : > { %v4813_v16 = vpop.permute.xlu0 %4812 }
0x191a   : > { %v4836_v20 = vsel %vm319_vm2, %v4813_v16, %v9735_v40 }
0x191b   : > { %5850 = vmatprep.subr.bf16.mxu1 %v4836_v20 }
0x191d   : > { %v4959_v11 = vpop.permute.xlu0 %4958 }
0x191e   : > { %v4981_v59 = vsel %vm10252_vm11, %v4959_v11, %v4961_v62 }
0x191f   : > { %5872 = vmatprep.subr.bf16.mxu0 %v4981_v59 }
0x1921   : > { %v4781_v47 = vpop.permute.xlu0 %4780 }
0x1922   : > { %v4828_v19 = vsel %vm319_vm2, %v4781_v47, %v9737_v22 }
0x1923   : > { %5851 = vmatpush3.bf16.msra.mxu1 %v4828_v19 }
0x1925   : > { %v4927_v42 = vpop.permute.xlu0 %4926 }
0x1926   : > { %v4973_v51 = vsel %vm10253_vm12, %v4927_v42, %v4929_v57 }
0x1927   : > { %5873 = vmatpush3.bf16.msra.mxu0 %v4973_v51 }
0x1929   : > { %v4817_v14 = vpop.permute.xlu0 %4816 }
0x192a   : > { %v4837_v40 = vsel %vm319_vm2, %v4817_v14, %v9739_v29  ;;  %v5453_v14 = vld [vmem:[%s10049_s4 + $0x30] sm:$0xff] }
0x192b   : > { %5852 = vmatprep.subr.bf16.mxu1 %v4837_v40 }
0x192d   : > { %v4963_v61 = vpop.permute.xlu0 %4962 }
0x192e   : > { %v4982_v63 = vsel %vm10254_vm13, %v4963_v61, %v4965_v8 }
0x192f   : > { %5874 = vmatprep.subr.bf16.mxu0 %v4982_v63  ;;  %v5219_v63 = vld [vmem:[%s10050_s5] sm:$0xff] }
0x1931   : > { %v4785_v5 = vpop.permute.xlu0 %4784 }
0x1932   : > { %v4829_v22 = vsel %vm319_vm2, %v4785_v5, %v9741_v30  ;;  %v5454_v5 = vld [vmem:[%s10049_s4 + $0x38] sm:$0xff] }
0x1933   : > { %5853 = vmatpush3.bf16.msra.mxu1 %v4829_v22 }
0x1935   : > { %v4931_v15 = vpop.permute.xlu0 %4930 }
0x1936   : > { %v4974_v27 = vsel %vm10245_vm0, %v4931_v15, %v4933_v56  ;;  %v5220_v15 = vld [vmem:[%s10050_s5 + $0x8] sm:$0xff] }
0x1937   : > { %5875 = vmatpush3.bf16.msra.mxu0 %v4974_v27  ;;  %v6231_v27 = vmov 1  }
0x1939   : > { %v4821_v52 = vpop.permute.xlu0 %4820 }
0x193a   : > { %v4838_v29 = vsel %vm319_vm2, %v4821_v52, %v9743_v18  ;;  %v5259_v52 = vld [vmem:[%s10051_s6] sm:$0x3] }
0x193b   : > { %5854 = vmatprep.subr.bf16.mxu1 %v4838_v29 }
0x193d   : > { %v4789_v2 = vpop.permute.xlu0 %4788 }
0x193e   : > { %v4830_v34 = vsel %vm319_vm2, %v4789_v2, %v9747_v10  ;;  %v6107_v10 = vld [vmem:[%s10046_s1 + $0x100] ss:$16 sps:$4 sm:$0xff]   ;;  %vm10256_vm2 = vcmask 998400  }
0x193f   : > { %5855 = vmatpush3.bf16.msra.mxu1 %v4830_v34 }
0x1940   : > { %5953 = vmatprep.subr.bf16.mxu1 %v6228_v48 }
0x1941   : > { %v4935_v30 = vpop.permute.xlu0 %4934 }
0x1942   : > { %4888 = vmatmul.mubr.bf16.vlgmr.msra.gmra.mrb[36].mxu1 %v6104_v46  ;;  %v4975_v18 = vsel %vm10255_vm1, %v4935_v30, %v4937_v21 }
0x1943   : > { %5969 = vmatprep.mubr.msk.bf16.mxu1 %vm10159_vm15, %v6228_v48 }
0x1945   : > { %v4967_v32 = vpop.permute.xlu0 %4966 }
0x1946   : > { %5876 = vmatprep.subr.bf16.mxu0 %v4967_v32 }
0x1947   : > { %5877 = vmatpush3.bf16.msra.mxu0 %v4975_v18 }
0x194a   : > { %5032 = vmatmul.mubr.bf16.vlgmr.msra.gmra.mrb[40].mxu0 %v6107_v10 }
0x1956   : > { %v5051_v50 = vpop.permute.xlu0 %5050 }
0x1a15   : > { %v5856_v33 = vpop.f32.mrb[36].mxu1 }
0x1a16   : > { %v5857_v13 = vpop.f32.mrb[37].mxu1 }
0x1a17   : > { %v5858_v54 = vadd.f32 %v5857_v13, %v5856_v33  ;;  %v5859_v9 = vpop.f32.mrb[38].mxu1 }
0x1a18   : > { %v5860_v36 = vpop.f32.mrb[39].mxu1 }
0x1a19   : > { %v5861_v44 = vadd.f32 %v5860_v36, %v5859_v9 }
0x1a1d   : > { %v5878_v37 = vpop.f32.mrb[40].mxu0 }
0x1a1e   : > { %v5879_v1 = vpop.f32.mrb[41].mxu0 }
0x1a1f   : > { %v5880_v24 = vadd.f32 %v5879_v1, %v5878_v37  ;;  %v5881_v12 = vpop.f32.mrb[42].mxu0 }
0x1a20   : > { %v5882_v38 = vpop.f32.mrb[43].mxu0 }
0x1a21   : > { %v5034_v45 = vadd.f32 %v5880_v24, %v5858_v54  ;;  %v5883_v6 = vadd.f32 %v5882_v38, %v5881_v12  ;;  %v6110_v12 = vld [vmem:[#allocation3 + $0x18] sm:$0xff]  }
0x1a23   : > { %v5053_v25 = vadd.f32 %v5046_v41, %v5034_v45  ;;  %v5037_v49 = vadd.f32 %v5883_v6, %v5861_v44 }
0x1a25   : > { %v5054_v23 = vadd.f32 %v5051_v50, %v5037_v49  ;;  %v5055_v53 = vmax.f32 %v5053_v25, 0.0 }
0x1a27   : > { %v5056_v39 = vmax.f32 %v5054_v23, 0.0 }
0x1a29   : > { %v5064_v55 = vpack.c.bf16 %v5056_v39, %v5055_v53 }
0x1a2b   : > { %5076 = vrot.lane.b32.xlu0 %v5064_v55, %s10125_s29  ;;  %5072 = vrot.lane.b32.xlu1 %v5064_v55, %s10134_s12 }
0x1a2f   : > { %5081 = vrot.lane.b32.xlu0 %v5064_v55, %s10127_s9  ;;  %5078 = vrot.lane.b32.xlu1 %v6210_v0, %s10125_s29 }
0x1a33   : > { %5086 = vrot.lane.b32.xlu0 %v5064_v55, %s10129_s23  ;;  %5083 = vrot.lane.b32.xlu1 %v6210_v0, %s10127_s9 }
0x1a37   : > { %5091 = vrot.lane.b32.xlu0 %v5064_v55, %s10120_s16  ;;  %5088 = vrot.lane.b32.xlu1 %v6210_v0, %s10129_s23  ;;  %s6145_s23 = scalar_lea.vmem %s6144_s10, 64 }
0x1a38   : > { %p6147_p3 = scmp.lt.s32.totalorder %s6145_s23, %s6139_s26 }
0x1a3a   : > { %p6148_p4 = por %p6147_p3, %p6146_p2 }
0x1a3b   : > { %5096 = vrot.lane.b32.xlu0 %v5064_v55, %s10122_s21  ;;  %5093 = vrot.lane.b32.xlu1 %v6210_v0, %s10120_s16 }
0x1a3c   : > { %p6149_p7 = pnand %p6148_p4, %p6142_p12 }
0x1a3f   : > { %5101 = vrot.lane.b32.xlu0 %v5064_v55, %s10124_s14  ;;  %5098 = vrot.lane.b32.xlu1 %v6210_v0, %s10122_s21 }
0x1a43   : > { %5103 = vrot.lane.b32.xlu1 %v6210_v0, %s10124_s14  ;;  %5129 = vrot.lane.b32.xlu0 %v6210_v0, %s10161_s22 }
0x1a47   : > { %5131 = vrot.lane.b32.xlu1 %v5064_v55, %s10161_s22 }
0x1a9d   : > { %v5077_v26 = vpop.permute.xlu0 %5076  ;;  %v5073_v7 = vpop.permute.xlu1 %5072 }
0x1a9e   : > { %5135 = vrot.lane.b32.xlu1 %v5077_v26, %s10161_s22  ;;  %5133 = vrot.lane.b32.xlu0 %v5073_v7, %s10161_s22 }
0x1aa1   : > { %v5082_v43 = vpop.permute.xlu0 %5081  ;;  %v5079_v58 = vpop.permute.xlu1 %5078 }
0x1aa2   : > { %v5080_v28 = vsel %vm325_vm4, %v5077_v26, %v5079_v58  ;;  %5139 = vrot.lane.b32.xlu1 %v5082_v43, %s10161_s22  ;;  %vm10257_vm4 = vcmask 990208  }
0x1aa3   : > { %5137 = vrot.lane.b32.xlu0 %v5080_v28, %s10161_s22 }
0x1aa5   : > { %v5087_v17 = vpop.permute.xlu0 %5086  ;;  %v5084_v16 = vpop.permute.xlu1 %5083 }
0x1aa6   : > { %v5085_v0 = vsel %vm331_vm6, %v5082_v43, %v5084_v16  ;;  %5143 = vrot.lane.b32.xlu1 %v5087_v17, %s10161_s22  ;;  %vm10258_vm6 = vcmask 7168  }
0x1aa7   : > { %5141 = vrot.lane.b32.xlu0 %v5085_v0, %s10161_s22  ;;  %vm10261_vm15 = vmmov %vm10258_vm6 }
0x1aa8   : > { %vm10262_vm3 = vmmov %vm10258_vm6 }
0x1aa9   : > { %v5092_v20 = vpop.permute.xlu0 %5091  ;;  %v5089_v62 = vpop.permute.xlu1 %5088  ;;  %vm10263_vm5 = vmmov %vm10262_vm3 }
0x1aaa   : > { %v5090_v11 = vsel %vm337_vm8, %v5087_v17, %v5089_v62  ;;  %5147 = vrot.lane.b32.xlu1 %v5092_v20, %s10161_s22  ;;  %vm10259_vm8 = vmmov %vm10258_vm6 }
0x1aab   : > { %5145 = vrot.lane.b32.xlu0 %v5090_v11, %s10161_s22  ;;  %vm10264_vm7 = vmmov %vm10262_vm3 }
0x1aad   : > { %v5097_v59 = vpop.permute.xlu0 %5096  ;;  %v5094_v47 = vpop.permute.xlu1 %5093 }
0x1aae   : > { %v5095_v19 = vsel %vm343_vm10, %v5092_v20, %v5094_v47  ;;  %5151 = vrot.lane.b32.xlu1 %v5097_v59, %s10161_s22  ;;  %vm10260_vm10 = vmmov %vm10258_vm6 }
0x1aaf   : > { %5149 = vrot.lane.b32.xlu0 %v5095_v19, %s10161_s22 }
0x1ab1   : > { %v5102_v57 = vpop.permute.xlu0 %5101  ;;  %v5099_v42 = vpop.permute.xlu1 %5098 }
0x1ab2   : > { %v5100_v51 = vsel %vm10256_vm2, %v5097_v59, %v5099_v42  ;;  %5155 = vrot.lane.b32.xlu1 %v5102_v57, %s10161_s22 }
0x1ab3   : > { %5153 = vrot.lane.b32.xlu0 %v5100_v51, %s10161_s22 }
0x1ab5   : > { %v5104_v40 = vpop.permute.xlu1 %5103  ;;  %v5130_v61 = vpop.permute.xlu0 %5129 }
0x1ab6   : > { %v5105_v8 = vsel %vm10257_vm4, %v5102_v57, %v5104_v40  ;;  %5114 = vperm.xlu1 %6048, %v5453_v14  }
0x1ab7   : > { %5157 = vrot.lane.b32.xlu0 %v5105_v8, %s10161_s22 }
0x1ab9   : > { %v5132_v22 = vpop.permute.xlu1 %5131 }
0x1aba   : > { %v5159_v56 = vsel %vm10258_vm6, %v5130_v61, %v5132_v22  ;;  %5223 = vperm.xlu1 %6048, %v5219_v63  }
0x1abb   : > { %5119 = vperm.xlu0 %6047, %v5454_v5   ;;  %5954 = vmatpush3.bf16.msra.mxu1 %v5159_v56 }
0x1abc   : > { %5955 = vmatprep.subr.bf16.mxu1 %v6228_v48 }
0x1abe   : > { %6049 = vset.pattern.permute.xlu1 %v6231_v27 }
0x1abf   : > { %5228 = vperm.xlu0 %6047, %v5220_v15   ;;  %5241 = vperm.xlu1 %6049, %v5219_v63  }
0x1ac3   : > { %6050 = vset.pattern.permute.xlu0 %v6231_v27  ;;  %6051 = vset.pattern.permute.xlu1 %v6227_v31 }
0x1ac4   : > { %5245 = vperm.xlu0 %6050, %v5220_v15   ;;  %5262 = vperm.xlu1 %6051, %v5259_v52  }
0x1ac8   : > { %6052 = vset.pattern.permute.xlu0 %v6227_v31 }
0x1b10   : > { %v5134_v29 = vpop.permute.xlu0 %5133  ;;  %v5136_v2 = vpop.permute.xlu1 %5135 }
0x1b11   : > { %5956 = vmatpush3.bf16.msra.mxu1 %v5134_v29 }
0x1b12   : > { %5957 = vmatprep.subr.bf16.mxu1 %v6228_v48 }
0x1b14   : > { %v5140_v34 = vpop.permute.xlu1 %5139 }
0x1b15   : > { %v5138_v46 = vpop.permute.xlu0 %5137 }
0x1b16   : > { %v5160_v30 = vsel %vm10259_vm8, %v5136_v2, %v5138_v46 }
0x1b17   : > { %5958 = vmatpush3.bf16.msra.mxu1 %v5160_v30 }
0x1b18   : > { %v5144_v21 = vpop.permute.xlu1 %5143  ;;  %5959 = vmatprep.subr.bf16.mxu1 %v6228_v48 }
0x1b19   : > { %v5142_v32 = vpop.permute.xlu0 %5141 }
0x1b1a   : > { %v5161_v18 = vsel %vm10260_vm10, %v5140_v34, %v5142_v32 }
0x1b1b   : > { %5960 = vmatpush3.bf16.msra.mxu1 %v5161_v18 }
0x1b1c   : > { %5961 = vmatprep.subr.bf16.mxu1 %v6228_v48  ;;  %v5148_v31 = vpop.permute.xlu1 %5147 }
0x1b1d   : > { %v5146_v10 = vpop.permute.xlu0 %5145 }
0x1b1e   : > { %v5162_v33 = vsel %vm10261_vm15, %v5144_v21, %v5146_v10 }
0x1b1f   : > { %5962 = vmatpush3.bf16.msra.mxu1 %v5162_v33 }
0x1b20   : > { %5963 = vmatprep.subr.bf16.mxu1 %v6228_v48  ;;  %v5152_v9 = vpop.permute.xlu1 %5151 }
0x1b21   : > { %v5150_v13 = vpop.permute.xlu0 %5149 }
0x1b22   : > { %v5163_v54 = vsel %vm10262_vm3, %v5148_v31, %v5150_v13 }
0x1b23   : > { %5964 = vmatpush3.bf16.msra.mxu1 %v5163_v54 }
0x1b24   : > { %5965 = vmatprep.subr.bf16.mxu1 %v6228_v48  ;;  %v5156_v37 = vpop.permute.xlu1 %5155 }
0x1b25   : > { %v5154_v36 = vpop.permute.xlu0 %5153 }
0x1b26   : > { %v5164_v44 = vsel %vm10263_vm5, %v5152_v9, %v5154_v36 }
0x1b27   : > { %5966 = vmatpush3.bf16.msra.mxu1 %v5164_v44 }
0x1b28   : > { %5967 = vmatprep.subr.bf16.mxu1 %v6228_v48 }
0x1b29   : > { %v5158_v1 = vpop.permute.xlu0 %5157 }
0x1b2a   : > { %v5165_v24 = vsel %vm10264_vm7, %v5156_v37, %v5158_v1 }
0x1b2b   : > { %5968 = vmatpush3.bf16.msra.mxu1 %v5165_v24 }
0x1b2e   : > { %5970 = vmatmul.mubr.bf16.vlgmr.msra.gmra.mrb[40].mxu1 %v6110_v12 }
0x1b35   : > { %v5115_v38 = vpop.permute.xlu1 %5114 }
0x1b39   : > { %v5224_v41 = vpop.permute.xlu1 %5223 }
0x1b3a   : > { %v5120_v45 = vpop.permute.xlu0 %5119 }
0x1b3e   : > { %v5229_v50 = vpop.permute.xlu0 %5228  ;;  %v5242_v7 = vpop.permute.xlu1 %5241 }
0x1b43   : > { %v5246_v43 = vpop.permute.xlu0 %5245  ;;  %v5263_v40 = vpop.permute.xlu1 %5262 }
0x1c01   : > { %v5208_v6 = vpop.f32.mrb[40].mxu1 }
0x1c02   : > { %v5209_v25 = vadd.f32 %v5208_v6, %v5115_v38  ;;  %v5971_v49 = vpop.f32.mrb[41].mxu1 }
0x1c03   : > { %v5211_v23 = vpop.f32.mrb[42].mxu1 }
0x1c04   : > { %v5215_v53 = vmax.f32 %v5209_v25, 0.0  ;;  %v5212_v39 = vadd.f32 %v5211_v23, %v5120_v45  ;;  %v5972_v55 = vpop.f32.mrb[43].mxu1 }
0x1c06   : > { %v5216_v48 = vmax.f32 %v5212_v39, 0.0  ;;  %v5217_v26 = vadd.f32 %v5215_v53, %v4582_v4 }
0x1c08   : > { %v5218_v58 = vadd.f32 %v5216_v48, %v4583_v3  ;;  %v5231_v28 = vmul.f32 %v5224_v41, %v5217_v26  ;;  %v5248_v17 = vmul.f32 %v5242_v7, %v5217_v26 }
0x1c0a   : > { %v5232_v16 = vmul.f32 %v5229_v50, %v5218_v58  ;;  %v5249_v0 = vmul.f32 %v5246_v43, %v5218_v58 }
0x1c0c   : > { %v5233_v20 = vadd.f32 %v5232_v16, %v5231_v28  ;;  %v5250_v62 = vadd.f32 %v5249_v0, %v5248_v17 }
0x1c0e   : > { %v5234_v11 = vrot.slane %v5233_v20, 4  ;;  %v5251_v59 = vrot.slane %v5250_v62, 4 }
0x1c10   : > { %v5235_v47 = vadd.f32 %v5234_v11, %v5233_v20  ;;  %v5252_v19 = vadd.f32 %v5251_v59, %v5250_v62 }
0x1c12   : > { %v5253_v57 = vrot.slane %v5252_v19, 2  ;;  %v5236_v60 = vrot.slane %v5235_v47, 2 }
0x1c14   : > { %v5254_v4 = vadd.f32 %v5253_v57, %v5252_v19  ;;  %v5237_v42 = vadd.f32 %v5236_v60, %v5235_v47 }
0x1c16   : > { %v5238_v51 = vrot.slane %v5237_v42, 1  ;;  %v5255_v35 = vrot.slane %v5254_v4, 1 }
0x1c18   : > { %v5239_v3 = vadd.f32 %v5238_v51, %v5237_v42  ;;  %v5256_v14 = vadd.f32 %v5255_v35, %v5254_v4 }
0x1c1a   : > { %v5258_v8 = vsel %vm5257_vm9, %v5239_v3, %v5256_v14 }
0x1c1b   : > { %v5265_v61 = vadd.f32 %v5263_v40, %v5258_v8 }
0x1c1d   : > { %v5266_v63 = vmax.f32 %v5265_v61, 0.0 }
0x1c1f   : > { %5267 = vst [vmem:[%s286_s8] sm:$0x3] %v5266_v63 }
0x1c20   : > { %6152 = shalt.err (!%p6149_p7)
}
0x1c21   : > { %s6153_s14 = scalar_lea.hbm %s10003_s13, 32  ;;  %s6157_s29 = scalar_lea.hbm %s10052_s7, 64 }
0x1c22   : > { %p6154_p8 = scmp.ne.s32.totalorder %s10003_s13, %s6153_s14  ;;  %p6158_p1 = scmp.lt.u32.totalorder %s10003_s13, %s10052_s7 }
0x1c23   : > { %p6159_p0 = scmp.lt.u32.totalorder %s6157_s29, %s6153_s14  ;;  %p6161_p6 = scmp.lt.u32.totalorder %s6153_s14, %s10003_s13 }
0x1c24   : > { %p6155_p11 = pnand %p6154_p8, %p10265_p9 }
0x1c25   : > { %p6160_p5 = por %p6159_p0, %p6158_p1 }
0x1c26   : > { %p6156_p13 = pneg %p6155_p11 }
0x1c27   : > { %p6162_p10 = por %p6161_p6, %p6160_p5 }
0x1c29   : > { %p6163_p12 = pnand %p6162_p10, %p6156_p13 }
0x1c2b   : > { %6166 = shalt.err (!%p6163_p12)
}
0x1c2c   : > { %5977 = dma.vmem_to_hbm [thread:$0]  (%p10265_p9), %s10005_s20, 32, %s10003_s13, %s5269_s24  }
0x1c2d PF: > { %s10266_s30 = sld [smem:[#allocation9_spill]]  ;;  %s10267_s22 = sld [smem:[#allocation13_spill]] }
0x1c2e   : > { %p5989_p2 = scmp.ge.s32.totalorder %s6205_s27, 2 }
0x1c33   : > { %s5294_s3 = sand.u32 1, %s10266_s30   ;;  %p10268_p3 = scmp.ne.s32.totalorder %s10267_s22, 0 }
0x1c34   : > { %s5295_s17 = scalar_lea.sflag [#allocation5], %s5294_s3 }
0x1c35   : > { %p5984_p4 = pnand %p5989_p2, %p10268_p3 }
0x1c37   : > { %6188 = dma.done.wait (!%p5984_p4), %s5295_s17, 32  }
0x1c38   : > { %6190 = vsyncadd (!%p5984_p4), %s5295_s17, 4294967264  ;;  %s10269_s27 = sld [smem:[#allocation11_spill]]  ;;  %s10270_s15 = sld [smem:[#allocation10_spill]] }
0x1c39   : > { %s10271_s26 = sld [smem:[#allocation12_spill]]  ;;  %s10272_s24 = smov %s6197_s25 }
0x1c3e   : > { %p18_p7 = scmp.ge.s32.totalorder %s10269_s27, 4   ;;  %s10273_s25 = smov %s10270_s15 }
0x1c40   :  { %20 = sbr.rel (!%p18_p7) target bundleno = 7 (0x7), region = 110 }
0x1c47   :  { %5300 = vsyncpa [#allocation4], 1 }
0x1c48   :  { %5302 = vsyncpa [#allocation4 + $0x1], 1 }
0x1c49   :  { %5303 = vsyncpa [#allocation5], 1 }
0x1c4a   :  { %5305 = vsyncpa [#allocation5 + $0x1], 1 }

</bundles_post_ra>
